<compile_context>
chip_gen: v7x
topology: tpu7x:2x2x1
jax: 0.10.0
libtpu: 0.0.40
codegen_flags: <defaults>
</compile_context>

<pallas_src>
import functools
import jax
import jax.numpy as jnp
from jax.experimental import pallas as pl
from jax.experimental.pallas import tpu as pltpu

MAX_LEN = 40
N_FEAT = 30
EMBED_DIM = 16
FM_K = 50
DNN_UNITS = (56, 128, 50)
W_MIX = 0.5            # self.w
# gamma (=0.5) is unused in forward()

ALL_DIM = FM_K + EMBED_DIM          # 66 (logical fc1 input width)
FRONT_OUT = 128                     # lane-dense width of the fused branch output
OUT_DIM = 3953
OUT_PAD = 4096                      # fc3 output padded to a lane-aligned width


def _round_up(x, m):
    return (x + m - 1) // m * m


# ----------------------------------------------------------------------------
# Kernel 1: fused "front" = self-attention + FM bi-interaction + deep MLP
#           -> lane-dense (tb, 128) all_feat block  [wd in cols 0..49, attn in 50..65]
# ----------------------------------------------------------------------------
def _front_kernel(seq_ref, mask_ref, aw_ref, feat_ref,
                  w1_ref, b1_ref, w2_ref, b2_ref, w3_ref, b3_ref, v_ref,
                  o_ref, *, dim, w_mix):
    # ---- self-attention branch (values = raw embeddings), mean-pooled ----
    x = seq_ref[...]                                      # (tb, L, D)
    W = aw_ref[...]                                       # (D, D)
    q = jnp.maximum(
        jnp.einsum("bld,de->ble", x, W, preferred_element_type=jnp.float32), 0.0)
    scores = jnp.einsum("bld,bmd->blm", q, q,
                        preferred_element_type=jnp.float32) / jnp.sqrt(jnp.float32(dim))
    mask = mask_ref[...]                                  # (tb, 1, L), 1.0 where id != 0
    scores = jnp.where(mask == 0.0, jnp.float32(-1e9), scores)
    m = jnp.max(scores, axis=-1, keepdims=True)
    e = jnp.exp(scores - m)
    p = e / jnp.sum(e, axis=-1, keepdims=True)
    short = jnp.mean(
        jnp.einsum("blm,bmd->bld", p, x, preferred_element_type=jnp.float32),
        axis=1)                                           # (tb, D)

    # ---- wide (FM) + deep (MLP); w3/b3/fm_v are lane-padded to 128 cols ----
    f = feat_ref[...]                                     # (tb, 30)
    h = jnp.maximum(jnp.dot(f, w1_ref[...], preferred_element_type=jnp.float32)
                    + b1_ref[...], 0.0)
    h = jnp.maximum(jnp.dot(h, w2_ref[...], preferred_element_type=jnp.float32)
                    + b2_ref[...], 0.0)
    deep = jnp.maximum(jnp.dot(h, w3_ref[...], preferred_element_type=jnp.float32)
                       + b3_ref[...], 0.0)                # (tb, 128), cols >=50 are 0
    V = v_ref[...]                                        # (30, 128), cols >=50 are 0
    xv = jnp.dot(f, V, preferred_element_type=jnp.float32)
    x2v2 = jnp.dot(f * f, V * V, preferred_element_type=jnp.float32)
    wide = 0.5 * (xv * xv - x2v2)                         # (tb, 128), cols >=50 are 0
    wd = w_mix * deep + (1.0 - w_mix) * wide              # (tb, 128)

    # place `short` into lanes [FM_K, FM_K+D) with a tiny 0/1 selector matmul
    ncols = o_ref.shape[-1]
    r = jax.lax.broadcasted_iota(jnp.int32, (dim, ncols), 0)
    c = jax.lax.broadcasted_iota(jnp.int32, (dim, ncols), 1)
    sel = (c == r + FM_K).astype(jnp.float32)             # (16, 128)
    o_ref[...] = wd + jnp.dot(short, sel, preferred_element_type=jnp.float32)


def front(seq_embed, mask, feat, params, tb):
    Bp = seq_embed.shape[0]
    return pl.pallas_call(
        functools.partial(_front_kernel, dim=EMBED_DIM, w_mix=W_MIX),
        out_shape=jax.ShapeDtypeStruct((Bp, FRONT_OUT), jnp.float32),
        grid_spec=pltpu.PrefetchScalarGridSpec(
            num_scalar_prefetch=0,
            grid=(Bp // tb,),
            in_specs=[
                pl.BlockSpec((tb, MAX_LEN, EMBED_DIM), lambda b: (b, 0, 0)),
                pl.BlockSpec((tb, 1, MAX_LEN), lambda b: (b, 0, 0)),
                pl.BlockSpec((EMBED_DIM, EMBED_DIM), lambda b: (0, 0)),
                pl.BlockSpec((tb, N_FEAT), lambda b: (b, 0)),
                pl.BlockSpec((N_FEAT, DNN_UNITS[0]), lambda b: (0, 0)),
                pl.BlockSpec((1, DNN_UNITS[0]), lambda b: (0, 0)),
                pl.BlockSpec((DNN_UNITS[0], DNN_UNITS[1]), lambda b: (0, 0)),
                pl.BlockSpec((1, DNN_UNITS[1]), lambda b: (0, 0)),
                pl.BlockSpec((DNN_UNITS[1], FRONT_OUT), lambda b: (0, 0)),
                pl.BlockSpec((1, FRONT_OUT), lambda b: (0, 0)),
                pl.BlockSpec((N_FEAT, FRONT_OUT), lambda b: (0, 0)),
            ],
            out_specs=pl.BlockSpec((tb, FRONT_OUT), lambda b: (b, 0)),
        ),
        compiler_params=pltpu.CompilerParams(dimension_semantics=("parallel",)),
    )(seq_embed, mask, params["attn_w"], feat,
      params["dnn_w1"], params["dnn_b1"], params["dnn_w2"], params["dnn_b2"],
      params["dnn_w3"], params["dnn_b3"], params["fm_v"])


# ----------------------------------------------------------------------------
# Kernel 2: linear (+bias, optional relu) for fc1/fc2/fc3
#   - no K grid axis (full-K panels: each weight byte streamed exactly once)
#   - big M tile (<=128), N tiled (default 512) -> fits VMEM on v5e/v6e/v7x
# ----------------------------------------------------------------------------
def _linear_kernel(x_ref, w_ref, b_ref, o_ref, *, relu):
    out = jnp.dot(x_ref[...], w_ref[...], preferred_element_type=jnp.float32) + b_ref[...]
    if relu:
        out = jnp.maximum(out, 0.0)
    o_ref[...] = out.astype(o_ref.dtype)


def linear(x, w, b, *, relu, tn=512):
    M, K = x.shape
    Kw, N = w.shape
    assert K == Kw and N % 128 == 0 and K % 8 == 0
    tn = min(tn, N)
    while N % tn:
        tn //= 2
    tm = min(128, _round_up(M, 8))
    Mp = _round_up(M, tm)
    if Mp != M:
        x = jnp.pad(x, ((0, Mp - M), (0, 0)))

    out = pl.pallas_call(
        functools.partial(_linear_kernel, relu=relu),
        out_shape=jax.ShapeDtypeStruct((Mp, N), jnp.float32),
        grid_spec=pltpu.PrefetchScalarGridSpec(
            num_scalar_prefetch=0,
            grid=(Mp // tm, N // tn),
            in_specs=[pl.BlockSpec((tm, K), lambda i, j: (i, 0)),
                      pl.BlockSpec((K, tn), lambda i, j: (0, j)),
                      pl.BlockSpec((1, tn), lambda i, j: (0, j))],
            out_specs=pl.BlockSpec((tm, tn), lambda i, j: (i, j)),
        ),
        compiler_params=pltpu.CompilerParams(
            dimension_semantics=("parallel", "parallel"),
            vmem_limit_bytes=64 * 1024 * 1024),
        cost_estimate=pl.CostEstimate(
            flops=2 * Mp * N * K,
            transcendentals=0,
            bytes_accessed=4 * (Mp * K + K * N + Mp * N + N)),
    )(x, w, b)
    return out[:M] if Mp != M else out


# ----------------------------------------------------------------------------
# Parameters (fc weights pre-padded ONCE here, not per forward) + forward
# ----------------------------------------------------------------------------
def init_params(key, feat_num):
    ks = jax.random.split(key, 12)
    s = 0.05

    def rn(k, shape):
        return (s * jax.random.normal(k, shape)).astype(jnp.float32)

    def pad2(a, rows, cols):
        return jnp.pad(a, ((0, rows - a.shape[0]), (0, cols - a.shape[1])))

    dnn_w3 = rn(ks[4], (DNN_UNITS[1], DNN_UNITS[2]))       # (128, 50)
    fm_v = rn(ks[5], (N_FEAT, FM_K))                       # (30, 50)
    fc1_w = rn(ks[6], (ALL_DIM, 1024))                     # (66, 1024)
    fc3_w = rn(ks[10], (2048, OUT_DIM))                    # (2048, 3953)
    fc3_b = rn(ks[11], (OUT_DIM,))

    return {
        "item_emb": rn(ks[0], (feat_num, EMBED_DIM)),
        "attn_w": rn(ks[1], (EMBED_DIM, EMBED_DIM)),
        "dnn_w1": rn(ks[2], (N_FEAT, DNN_UNITS[0])),
        "dnn_b1": jnp.zeros((1, DNN_UNITS[0]), jnp.float32),
        "dnn_w2": rn(ks[3], (DNN_UNITS[0], DNN_UNITS[1])),
        "dnn_b2": jnp.zeros((1, DNN_UNITS[1]), jnp.float32),
        # lane-padded to 128 cols so wide_deep lands in cols [0, 50) of the fused output
        "dnn_w3": pad2(dnn_w3, DNN_UNITS[1], FRONT_OUT),
        "dnn_b3": jnp.zeros((1, FRONT_OUT), jnp.float32),
        "fm_v": pad2(fm_v, N_FEAT, FRONT_OUT),
        # fc weights pre-padded once (extra rows/cols are exact zeros)
        "fc1_w": pad2(fc1_w, FRONT_OUT, 1024),             # (128, 1024)
        "fc1_b": rn(ks[7], (1, 1024)),
        "fc2_w": rn(ks[8], (1024, 2048)),
        "fc2_b": rn(ks[9], (1, 2048)),
        "fc3_w": pad2(fc3_w, 2048, OUT_PAD),               # (2048, 4096)
        "fc3_b": jnp.pad(fc3_b, (0, OUT_PAD - OUT_DIM)).reshape(1, -1),
    }


def deepnet_forward(params, inputs):
    B = inputs.shape[0]
    tb = min(32, _round_up(B, 8))           # batch tile for the fused front kernel
    Bp = _round_up(B, tb)
    if Bp != B:
        inputs = jnp.pad(inputs, ((0, Bp - B), (0, 0)))    # pad batch ONCE

    seq_ids = inputs[:, :MAX_LEN].astype(jnp.int32)        # (Bp, L)
    feat = inputs[:, MAX_LEN:].astype(jnp.float32)         # (Bp, 30)
    mask = (seq_ids != 0).astype(jnp.float32)[:, None, :]  # (Bp, 1, L)
    # TODO(synk): embedding gather stays in XLA (data-dependent row gather).
    seq_embed = jnp.take(params["item_emb"], seq_ids, axis=0)

    all_feat = front(seq_embed, mask, feat, params, tb)    # (Bp, 128), lane-dense
    h = linear(all_feat, params["fc1_w"], params["fc1_b"], relu=True)   # (Bp, 1024)
    h = linear(h, params["fc2_w"], params["fc2_b"], relu=True)          # (Bp, 2048)
    out = linear(h, params["fc3_w"], params["fc3_b"], relu=False)       # (Bp, 4096)
    return out[:B, :OUT_DIM]


def deepnet_reference(params, inputs):
    seq_ids = inputs[:, :MAX_LEN].astype(jnp.int32)
    feat = inputs[:, MAX_LEN:].astype(jnp.float32)
    mask = (seq_ids != 0).astype(jnp.float32)
    e = params["item_emb"][seq_ids]
    q = jax.nn.relu(e @ params["attn_w"])
    s = jnp.einsum("bld,bmd->blm", q, q) / jnp.sqrt(jnp.float32(EMBED_DIM))
    s = jnp.where(mask[:, None, :] == 0.0, -1e9, s)
    short = jnp.mean(jnp.einsum("blm,bmd->bld", jax.nn.softmax(s, -1), e), axis=1)
    w3 = params["dnn_w3"][:, :DNN_UNITS[2]]
    b3 = params["dnn_b3"][:, :DNN_UNITS[2]]
    V = params["fm_v"][:, :FM_K]
    h = jax.nn.relu(feat @ params["dnn_w1"] + params["dnn_b1"])
    h = jax.nn.relu(h @ params["dnn_w2"] + params["dnn_b2"])
    deep = jax.nn.relu(h @ w3 + b3)
    xv = feat @ V
    wide = 0.5 * (xv * xv - (feat * feat) @ (V * V))
    wd = W_MIX * deep + (1.0 - W_MIX) * wide
    all_feat = jnp.concatenate([wd, short], axis=1)
    r = jax.nn.relu(all_feat @ params["fc1_w"][:ALL_DIM] + params["fc1_b"])
    r = jax.nn.relu(r @ params["fc2_w"] + params["fc2_b"])
    return r @ params["fc3_w"][:, :OUT_DIM] + params["fc3_b"][:, :OUT_DIM]


if __name__ == "__main__":
    B = 2
    FEAT_NUM = 100
    key = jax.random.PRNGKey(0)
    k_par, k_seq, k_feat = jax.random.split(key, 3)

    params = init_params(k_par, FEAT_NUM)
    seq_ids = jax.random.randint(k_seq, (B, MAX_LEN), 0, FEAT_NUM)   # contains zeros -> masked
    feats = jax.random.normal(k_feat, (B, N_FEAT), dtype=jnp.float32)
    inputs = jnp.concatenate([seq_ids.astype(jnp.float32), feats], axis=1)   # (B, 70)

    out = jax.jit(deepnet_forward)(params, inputs)
    out = jax.block_until_ready(out)
    assert out.shape == (B, OUT_DIM), out.shape

    ref = deepnet_reference(params, inputs)
    assert jnp.allclose(out, ref, rtol=1e-2, atol=1e-3), float(jnp.max(jnp.abs(out - ref)))

    print("KERNEL_OK")
</pallas_src>

<mosaic_0001>
module attributes {stable_mosaic.version = 11 : i64} {
  func.func @_front_kernel(%arg0: i32, %arg1: memref<8x40x16xf32, #tpu.memory_space<vmem>>, %arg2: memref<8x1x40xf32, #tpu.memory_space<vmem>>, %arg3: memref<16x16xf32, #tpu.memory_space<vmem>>, %arg4: memref<8x30xf32, #tpu.memory_space<vmem>>, %arg5: memref<30x56xf32, #tpu.memory_space<vmem>>, %arg6: memref<1x56xf32, #tpu.memory_space<vmem>>, %arg7: memref<56x128xf32, #tpu.memory_space<vmem>>, %arg8: memref<1x128xf32, #tpu.memory_space<vmem>>, %arg9: memref<128x128xf32, #tpu.memory_space<vmem>>, %arg10: memref<1x128xf32, #tpu.memory_space<vmem>>, %arg11: memref<30x128xf32, #tpu.memory_space<vmem>>, %arg12: memref<8x128xf32, #tpu.memory_space<vmem>>) attributes {dimension_semantics = [#tpu.dimension_semantics<parallel>], iteration_bounds = array<i64: 1>, scalar_prefetch = 0 : i64, scratch_operands = 0 : i64, tpu.core_type = #tpu.core_type<tc>, window_params = [{transform_indices = @transform_0, window_bounds = array<i64: 8, 40, 16>}, {transform_indices = @transform_1, window_bounds = array<i64: 8, 1, 40>}, {pipeline_mode = #tpu.pipeline_mode<synchronous>, transform_indices = @transform_2, window_bounds = array<i64: 16, 16>}, {transform_indices = @transform_3, window_bounds = array<i64: 8, 30>}, {pipeline_mode = #tpu.pipeline_mode<synchronous>, transform_indices = @transform_4, window_bounds = array<i64: 30, 56>}, {pipeline_mode = #tpu.pipeline_mode<synchronous>, transform_indices = @transform_5, window_bounds = array<i64: 1, 56>}, {pipeline_mode = #tpu.pipeline_mode<synchronous>, transform_indices = @transform_6, window_bounds = array<i64: 56, 128>}, {pipeline_mode = #tpu.pipeline_mode<synchronous>, transform_indices = @transform_7, window_bounds = array<i64: 1, 128>}, {pipeline_mode = #tpu.pipeline_mode<synchronous>, transform_indices = @transform_8, window_bounds = array<i64: 128, 128>}, {pipeline_mode = #tpu.pipeline_mode<synchronous>, transform_indices = @transform_9, window_bounds = array<i64: 1, 128>}, {pipeline_mode = #tpu.pipeline_mode<synchronous>, transform_indices = @transform_10, window_bounds = array<i64: 30, 128>}, {transform_indices = @transform_11, window_bounds = array<i64: 8, 128>}]} {
    %c0 = arith.constant 0 : index
    %c0_0 = arith.constant 0 : index
    %c0_1 = arith.constant 0 : index
    %0 = vector.load %arg1[%c0, %c0_0, %c0_1] : memref<8x40x16xf32, #tpu.memory_space<vmem>>, vector<8x40x16xf32>
    %c0_2 = arith.constant 0 : index
    %c0_3 = arith.constant 0 : index
    %1 = vector.load %arg3[%c0_2, %c0_3] : memref<16x16xf32, #tpu.memory_space<vmem>>, vector<16x16xf32>
    "tpu.trace_start"() <{level = 10 : i32, message = "bld,de->ble"}> : () -> ()
    %cst = arith.constant dense<0.000000e+00> : vector<8x40x16xf32>
    %2 = tpu.matmul %0, %1, %cst {dimension_numbers = #tpu.dot_dimension_numbers<[2], [0], [0, 1], [1], [0, 0, 0, 1, 1, 1], [], []>} : vector<8x40x16xf32>, vector<16x16xf32>, vector<8x40x16xf32> -> vector<8x40x16xf32>
    "tpu.trace_stop"() : () -> ()
    %cst_4 = arith.constant 0.000000e+00 : f32
    %3 = vector.broadcast %cst_4 : f32 to vector<8x40x16xf32>
    %4 = arith.maximumf %2, %3 : vector<8x40x16xf32>
    "tpu.trace_start"() <{level = 10 : i32, message = "bld,bmd->blm"}> : () -> ()
    %cst_5 = arith.constant dense<0.000000e+00> : vector<8x40x40xf32>
    %5 = tpu.matmul %4, %4, %cst_5 {dimension_numbers = #tpu.dot_dimension_numbers<[2], [2], [1], [1], [0, 0, 0, 1, 1, 1], [0], [0]>} : vector<8x40x16xf32>, vector<8x40x16xf32>, vector<8x40x40xf32> -> vector<8x40x40xf32>
    %cst_6 = arith.constant 1.600000e+01 : f32
    "tpu.trace_stop"() : () -> ()
    %6 = math.sqrt %cst_6 : f32
    %7 = vector.broadcast %6 : f32 to vector<8x40x40xf32>
    %8 = arith.divf %5, %7 : vector<8x40x40xf32>
    %c0_7 = arith.constant 0 : index
    %c0_8 = arith.constant 0 : index
    %c0_9 = arith.constant 0 : index
    %9 = vector.load %arg2[%c0_7, %c0_8, %c0_9] : memref<8x1x40xf32, #tpu.memory_space<vmem>>, vector<8x1x40xf32>
    %cst_10 = arith.constant 0.000000e+00 : f32
    %10 = vector.broadcast %cst_10 : f32 to vector<8x1x40xf32>
    %11 = arith.cmpf oeq, %9, %10 : vector<8x1x40xf32>
    %cst_11 = arith.constant -1.000000e+09 : f32
    %12 = vector.shape_cast %11 : vector<8x1x40xi1> to vector<8x1x40xi1>
    %13 = vector.broadcast %12 : vector<8x1x40xi1> to vector<8x40x40xi1>
    %14 = vector.broadcast %cst_11 : f32 to vector<8x40x40xf32>
    %15 = arith.select %13, %14, %8 : vector<8x40x40xi1>, vector<8x40x40xf32>
    %cst_12 = arith.constant dense<0xFF800000> : vector<8x40xf32>
    %16 = vector.multi_reduction <maximumf>, %15, %cst_12 [2] : vector<8x40x40xf32> to vector<8x40xf32>
    %17 = vector.shape_cast %16 : vector<8x40xf32> to vector<8x40x1xf32>
    %18 = vector.broadcast %17 : vector<8x40x1xf32> to vector<8x40x40xf32>
    %19 = arith.subf %15, %18 : vector<8x40x40xf32>
    %20 = math.exp %19 : vector<8x40x40xf32>
    %cst_13 = arith.constant dense<0.000000e+00> : vector<8x40xf32>
    %21 = vector.multi_reduction <add>, %20, %cst_13 [2] : vector<8x40x40xf32> to vector<8x40xf32>
    %22 = vector.shape_cast %21 : vector<8x40xf32> to vector<8x40x1xf32>
    %23 = vector.broadcast %22 : vector<8x40x1xf32> to vector<8x40x40xf32>
    %24 = arith.divf %20, %23 : vector<8x40x40xf32>
    "tpu.trace_start"() <{level = 10 : i32, message = "blm,bmd->bld"}> : () -> ()
    %cst_14 = arith.constant dense<0.000000e+00> : vector<8x40x16xf32>
    %25 = tpu.matmul %24, %0, %cst_14 {dimension_numbers = #tpu.dot_dimension_numbers<[2], [1], [1], [2], [0, 0, 0, 1, 1, 2], [0], [0]>} : vector<8x40x40xf32>, vector<8x40x16xf32>, vector<8x40x16xf32> -> vector<8x40x16xf32>
    "tpu.trace_stop"() : () -> ()
    %cst_15 = arith.constant dense<0.000000e+00> : vector<8x16xf32>
    %26 = vector.multi_reduction <add>, %25, %cst_15 [1] : vector<8x40x16xf32> to vector<8x16xf32>
    %cst_16 = arith.constant 4.000000e+01 : f32
    %27 = vector.broadcast %cst_16 : f32 to vector<8x16xf32>
    %28 = arith.divf %26, %27 : vector<8x16xf32>
    %c0_17 = arith.constant 0 : index
    %c0_18 = arith.constant 0 : index
    %29 = vector.load %arg4[%c0_17, %c0_18] : memref<8x30xf32, #tpu.memory_space<vmem>>, vector<8x30xf32>
    %c0_19 = arith.constant 0 : index
    %c0_20 = arith.constant 0 : index
    %30 = vector.load %arg5[%c0_19, %c0_20] : memref<30x56xf32, #tpu.memory_space<vmem>>, vector<30x56xf32>
    %cst_21 = arith.constant dense<0.000000e+00> : vector<8x56xf32>
    %31 = tpu.matmul %29, %30, %cst_21 {dimension_numbers = #tpu.dot_dimension_numbers<[1], [0], [0], [1], [0, 0, 1, 1], [], []>} : vector<8x30xf32>, vector<30x56xf32>, vector<8x56xf32> -> vector<8x56xf32>
    %c0_22 = arith.constant 0 : index
    %c0_23 = arith.constant 0 : index
    %32 = vector.load %arg6[%c0_22, %c0_23] : memref<1x56xf32, #tpu.memory_space<vmem>>, vector<1x56xf32>
    %33 = vector.broadcast %32 : vector<1x56xf32> to vector<8x56xf32>
    %34 = arith.addf %31, %33 : vector<8x56xf32>
    %cst_24 = arith.constant 0.000000e+00 : f32
    %35 = vector.broadcast %cst_24 : f32 to vector<8x56xf32>
    %36 = arith.maximumf %34, %35 : vector<8x56xf32>
    %c0_25 = arith.constant 0 : index
    %c0_26 = arith.constant 0 : index
    %37 = vector.load %arg7[%c0_25, %c0_26] : memref<56x128xf32, #tpu.memory_space<vmem>>, vector<56x128xf32>
    %cst_27 = arith.constant dense<0.000000e+00> : vector<8x128xf32>
    %38 = tpu.matmul %36, %37, %cst_27 {dimension_numbers = #tpu.dot_dimension_numbers<[1], [0], [0], [1], [0, 0, 1, 1], [], []>} : vector<8x56xf32>, vector<56x128xf32>, vector<8x128xf32> -> vector<8x128xf32>
    %c0_28 = arith.constant 0 : index
    %c0_29 = arith.constant 0 : index
    %39 = vector.load %arg8[%c0_28, %c0_29] : memref<1x128xf32, #tpu.memory_space<vmem>>, vector<1x128xf32>
    %40 = vector.broadcast %39 : vector<1x128xf32> to vector<8x128xf32>
    %41 = arith.addf %38, %40 : vector<8x128xf32>
    %cst_30 = arith.constant 0.000000e+00 : f32
    %42 = vector.broadcast %cst_30 : f32 to vector<8x128xf32>
    %43 = arith.maximumf %41, %42 : vector<8x128xf32>
    %c0_31 = arith.constant 0 : index
    %c0_32 = arith.constant 0 : index
    %44 = vector.load %arg9[%c0_31, %c0_32] : memref<128x128xf32, #tpu.memory_space<vmem>>, vector<128x128xf32>
    %cst_33 = arith.constant dense<0.000000e+00> : vector<8x128xf32>
    %45 = tpu.matmul %43, %44, %cst_33 {dimension_numbers = #tpu.dot_dimension_numbers<[1], [0], [0], [1], [0, 0, 1, 1], [], []>} : vector<8x128xf32>, vector<128x128xf32>, vector<8x128xf32> -> vector<8x128xf32>
    %c0_34 = arith.constant 0 : index
    %c0_35 = arith.constant 0 : index
    %46 = vector.load %arg10[%c0_34, %c0_35] : memref<1x128xf32, #tpu.memory_space<vmem>>, vector<1x128xf32>
    %47 = vector.broadcast %46 : vector<1x128xf32> to vector<8x128xf32>
    %48 = arith.addf %45, %47 : vector<8x128xf32>
    %cst_36 = arith.constant 0.000000e+00 : f32
    %49 = vector.broadcast %cst_36 : f32 to vector<8x128xf32>
    %50 = arith.maximumf %48, %49 : vector<8x128xf32>
    %c0_37 = arith.constant 0 : index
    %c0_38 = arith.constant 0 : index
    %51 = vector.load %arg11[%c0_37, %c0_38] : memref<30x128xf32, #tpu.memory_space<vmem>>, vector<30x128xf32>
    %cst_39 = arith.constant dense<0.000000e+00> : vector<8x128xf32>
    %52 = tpu.matmul %29, %51, %cst_39 {dimension_numbers = #tpu.dot_dimension_numbers<[1], [0], [0], [1], [0, 0, 1, 1], [], []>} : vector<8x30xf32>, vector<30x128xf32>, vector<8x128xf32> -> vector<8x128xf32>
    %53 = arith.mulf %29, %29 : vector<8x30xf32>
    %54 = arith.mulf %51, %51 : vector<30x128xf32>
    %cst_40 = arith.constant dense<0.000000e+00> : vector<8x128xf32>
    %55 = tpu.matmul %53, %54, %cst_40 {dimension_numbers = #tpu.dot_dimension_numbers<[1], [0], [0], [1], [0, 0, 1, 1], [], []>} : vector<8x30xf32>, vector<30x128xf32>, vector<8x128xf32> -> vector<8x128xf32>
    %56 = arith.mulf %52, %52 : vector<8x128xf32>
    %57 = arith.subf %56, %55 : vector<8x128xf32>
    %cst_41 = arith.constant 5.000000e-01 : f32
    %58 = vector.broadcast %cst_41 : f32 to vector<8x128xf32>
    %59 = arith.mulf %58, %57 : vector<8x128xf32>
    %cst_42 = arith.constant 5.000000e-01 : f32
    %60 = vector.broadcast %cst_42 : f32 to vector<8x128xf32>
    %61 = arith.mulf %60, %50 : vector<8x128xf32>
    %cst_43 = arith.constant 5.000000e-01 : f32
    %62 = vector.broadcast %cst_43 : f32 to vector<8x128xf32>
    %63 = arith.mulf %62, %59 : vector<8x128xf32>
    %64 = arith.addf %61, %63 : vector<8x128xf32>
    %65 = tpu.iota {dimensions = array<i32: 0>} : vector<16x128xi32>
    %66 = tpu.iota {dimensions = array<i32: 1>} : vector<16x128xi32>
    %c50_i32 = arith.constant 50 : i32
    %67 = vector.broadcast %c50_i32 : i32 to vector<16x128xi32>
    %68 = arith.addi %65, %67 : vector<16x128xi32>
    %69 = arith.cmpi eq, %66, %68 : vector<16x128xi32>
    %70 = arith.extui %69 : vector<16x128xi1> to vector<16x128xi32>
    %71 = arith.sitofp %70 : vector<16x128xi32> to vector<16x128xf32>
    %cst_44 = arith.constant dense<0.000000e+00> : vector<8x128xf32>
    %72 = tpu.matmul %28, %71, %cst_44 {dimension_numbers = #tpu.dot_dimension_numbers<[1], [0], [0], [1], [0, 0, 1, 1], [], []>} : vector<8x16xf32>, vector<16x128xf32>, vector<8x128xf32> -> vector<8x128xf32>
    %73 = arith.addf %64, %72 : vector<8x128xf32>
    %c0_45 = arith.constant 0 : index
    %c0_46 = arith.constant 0 : index
    %74 = vector.load %arg12[%c0_45, %c0_46] : memref<8x128xf32, #tpu.memory_space<vmem>>, vector<8x128xf32>
    tpu.vector_store %arg12[%c0_45, %c0_46], %73 {strides = array<i32>} : memref<8x128xf32, #tpu.memory_space<vmem>>, vector<8x128xf32>,
    return
  }
  func.func @transform_0(%arg0: i32) -> (i32, i32, i32) {
    %c0_i32 = arith.constant 0 : i32
    %c0_i32_0 = arith.constant 0 : i32
    %c0_i32_1 = arith.constant 0 : i32
    return %arg0, %c0_i32, %c0_i32_0 : i32, i32, i32
  }
  func.func @transform_1(%arg0: i32) -> (i32, i32, i32) {
    %c0_i32 = arith.constant 0 : i32
    %c0_i32_0 = arith.constant 0 : i32
    %c0_i32_1 = arith.constant 0 : i32
    return %arg0, %c0_i32, %c0_i32_0 : i32, i32, i32
  }
  func.func @transform_2(%arg0: i32) -> (i32, i32) {
    %c0_i32 = arith.constant 0 : i32
    %c0_i32_0 = arith.constant 0 : i32
    %c0_i32_1 = arith.constant 0 : i32
    return %c0_i32, %c0_i32_0 : i32, i32
  }
  func.func @transform_3(%arg0: i32) -> (i32, i32) {
    %c0_i32 = arith.constant 0 : i32
    %c0_i32_0 = arith.constant 0 : i32
    return %arg0, %c0_i32 : i32, i32
  }
  func.func @transform_4(%arg0: i32) -> (i32, i32) {
    %c0_i32 = arith.constant 0 : i32
    %c0_i32_0 = arith.constant 0 : i32
    %c0_i32_1 = arith.constant 0 : i32
    return %c0_i32, %c0_i32_0 : i32, i32
  }
  func.func @transform_5(%arg0: i32) -> (i32, i32) {
    %c0_i32 = arith.constant 0 : i32
    %c0_i32_0 = arith.constant 0 : i32
    %c0_i32_1 = arith.constant 0 : i32
    return %c0_i32, %c0_i32_0 : i32, i32
  }
  func.func @transform_6(%arg0: i32) -> (i32, i32) {
    %c0_i32 = arith.constant 0 : i32
    %c0_i32_0 = arith.constant 0 : i32
    %c0_i32_1 = arith.constant 0 : i32
    return %c0_i32, %c0_i32_0 : i32, i32
  }
  func.func @transform_7(%arg0: i32) -> (i32, i32) {
    %c0_i32 = arith.constant 0 : i32
    %c0_i32_0 = arith.constant 0 : i32
    %c0_i32_1 = arith.constant 0 : i32
    return %c0_i32, %c0_i32_0 : i32, i32
  }
  func.func @transform_8(%arg0: i32) -> (i32, i32) {
    %c0_i32 = arith.constant 0 : i32
    %c0_i32_0 = arith.constant 0 : i32
    %c0_i32_1 = arith.constant 0 : i32
    return %c0_i32, %c0_i32_0 : i32, i32
  }
  func.func @transform_9(%arg0: i32) -> (i32, i32) {
    %c0_i32 = arith.constant 0 : i32
    %c0_i32_0 = arith.constant 0 : i32
    %c0_i32_1 = arith.constant 0 : i32
    return %c0_i32, %c0_i32_0 : i32, i32
  }
  func.func @transform_10(%arg0: i32) -> (i32, i32) {
    %c0_i32 = arith.constant 0 : i32
    %c0_i32_0 = arith.constant 0 : i32
    %c0_i32_1 = arith.constant 0 : i32
    return %c0_i32, %c0_i32_0 : i32, i32
  }
  func.func @transform_11(%arg0: i32) -> (i32, i32) {
    %c0_i32 = arith.constant 0 : i32
    %c0_i32_0 = arith.constant 0 : i32
    return %arg0, %c0_i32 : i32, i32
  }
}

module attributes {stable_mosaic.version = 11 : i64} {
  func.func @_linear_kernel(%arg0: i32, %arg1: i32, %arg2: memref<8x128xf32, #tpu.memory_space<vmem>>, %arg3: memref<128x512xf32, #tpu.memory_space<vmem>>, %arg4: memref<1x512xf32, #tpu.memory_space<vmem>>, %arg5: memref<8x512xf32, #tpu.memory_space<vmem>>) attributes {dimension_semantics = [#tpu.dimension_semantics<parallel>, #tpu.dimension_semantics<parallel>], iteration_bounds = array<i64: 1, 2>, scalar_prefetch = 0 : i64, scratch_operands = 0 : i64, tpu.core_type = #tpu.core_type<tc>, window_params = [{transform_indices = @transform_0, window_bounds = array<i64: 8, 128>}, {transform_indices = @transform_1, window_bounds = array<i64: 128, 512>}, {transform_indices = @transform_2, window_bounds = array<i64: 1, 512>}, {transform_indices = @transform_3, window_bounds = array<i64: 8, 512>}]} {
    %c0 = arith.constant 0 : index
    %c0_0 = arith.constant 0 : index
    %0 = vector.load %arg2[%c0, %c0_0] : memref<8x128xf32, #tpu.memory_space<vmem>>, vector<8x128xf32>
    %c0_1 = arith.constant 0 : index
    %c0_2 = arith.constant 0 : index
    %1 = vector.load %arg3[%c0_1, %c0_2] : memref<128x512xf32, #tpu.memory_space<vmem>>, vector<128x512xf32>
    %cst = arith.constant dense<0.000000e+00> : vector<8x512xf32>
    %2 = tpu.matmul %0, %1, %cst {dimension_numbers = #tpu.dot_dimension_numbers<[1], [0], [0], [1], [0, 0, 1, 1], [], []>} : vector<8x128xf32>, vector<128x512xf32>, vector<8x512xf32> -> vector<8x512xf32>
    %c0_3 = arith.constant 0 : index
    %c0_4 = arith.constant 0 : index
    %3 = vector.load %arg4[%c0_3, %c0_4] : memref<1x512xf32, #tpu.memory_space<vmem>>, vector<1x512xf32>
    %4 = vector.broadcast %3 : vector<1x512xf32> to vector<8x512xf32>
    %5 = arith.addf %2, %4 : vector<8x512xf32>
    %cst_5 = arith.constant 0.000000e+00 : f32
    %6 = vector.broadcast %cst_5 : f32 to vector<8x512xf32>
    %7 = arith.maximumf %5, %6 : vector<8x512xf32>
    %c0_6 = arith.constant 0 : index
    %c0_7 = arith.constant 0 : index
    %8 = vector.load %arg5[%c0_6, %c0_7] : memref<8x512xf32, #tpu.memory_space<vmem>>, vector<8x512xf32>
    tpu.vector_store %arg5[%c0_6, %c0_7], %7 {strides = array<i32>} : memref<8x512xf32, #tpu.memory_space<vmem>>, vector<8x512xf32>,
    return
  }
  func.func @transform_0(%arg0: i32, %arg1: i32) -> (i32, i32) {
    %c0_i32 = arith.constant 0 : i32
    %c0_i32_0 = arith.constant 0 : i32
    return %arg0, %c0_i32 : i32, i32
  }
  func.func @transform_1(%arg0: i32, %arg1: i32) -> (i32, i32) {
    %c0_i32 = arith.constant 0 : i32
    %c0_i32_0 = arith.constant 0 : i32
    return %c0_i32, %arg1 : i32, i32
  }
  func.func @transform_2(%arg0: i32, %arg1: i32) -> (i32, i32) {
    %c0_i32 = arith.constant 0 : i32
    %c0_i32_0 = arith.constant 0 : i32
    return %c0_i32, %arg1 : i32, i32
  }
  func.func @transform_3(%arg0: i32, %arg1: i32) -> (i32, i32) {
    %c0_i32 = arith.constant 0 : i32
    return %arg0, %arg1 : i32, i32
  }
}

module attributes {stable_mosaic.version = 11 : i64} {
  func.func @_linear_kernel(%arg0: i32, %arg1: i32, %arg2: memref<8x1024xf32, #tpu.memory_space<vmem>>, %arg3: memref<1024x512xf32, #tpu.memory_space<vmem>>, %arg4: memref<1x512xf32, #tpu.memory_space<vmem>>, %arg5: memref<8x512xf32, #tpu.memory_space<vmem>>) attributes {dimension_semantics = [#tpu.dimension_semantics<parallel>, #tpu.dimension_semantics<parallel>], iteration_bounds = array<i64: 1, 4>, scalar_prefetch = 0 : i64, scratch_operands = 0 : i64, tpu.core_type = #tpu.core_type<tc>, window_params = [{transform_indices = @transform_0, window_bounds = array<i64: 8, 1024>}, {transform_indices = @transform_1, window_bounds = array<i64: 1024, 512>}, {transform_indices = @transform_2, window_bounds = array<i64: 1, 512>}, {transform_indices = @transform_3, window_bounds = array<i64: 8, 512>}]} {
    %c0 = arith.constant 0 : index
    %c0_0 = arith.constant 0 : index
    %0 = vector.load %arg2[%c0, %c0_0] : memref<8x1024xf32, #tpu.memory_space<vmem>>, vector<8x1024xf32>
    %c0_1 = arith.constant 0 : index
    %c0_2 = arith.constant 0 : index
    %1 = vector.load %arg3[%c0_1, %c0_2] : memref<1024x512xf32, #tpu.memory_space<vmem>>, vector<1024x512xf32>
    %cst = arith.constant dense<0.000000e+00> : vector<8x512xf32>
    %2 = tpu.matmul %0, %1, %cst {dimension_numbers = #tpu.dot_dimension_numbers<[1], [0], [0], [1], [0, 0, 1, 1], [], []>} : vector<8x1024xf32>, vector<1024x512xf32>, vector<8x512xf32> -> vector<8x512xf32>
    %c0_3 = arith.constant 0 : index
    %c0_4 = arith.constant 0 : index
    %3 = vector.load %arg4[%c0_3, %c0_4] : memref<1x512xf32, #tpu.memory_space<vmem>>, vector<1x512xf32>
    %4 = vector.broadcast %3 : vector<1x512xf32> to vector<8x512xf32>
    %5 = arith.addf %2, %4 : vector<8x512xf32>
    %cst_5 = arith.constant 0.000000e+00 : f32
    %6 = vector.broadcast %cst_5 : f32 to vector<8x512xf32>
    %7 = arith.maximumf %5, %6 : vector<8x512xf32>
    %c0_6 = arith.constant 0 : index
    %c0_7 = arith.constant 0 : index
    %8 = vector.load %arg5[%c0_6, %c0_7] : memref<8x512xf32, #tpu.memory_space<vmem>>, vector<8x512xf32>
    tpu.vector_store %arg5[%c0_6, %c0_7], %7 {strides = array<i32>} : memref<8x512xf32, #tpu.memory_space<vmem>>, vector<8x512xf32>,
    return
  }
  func.func @transform_0(%arg0: i32, %arg1: i32) -> (i32, i32) {
    %c0_i32 = arith.constant 0 : i32
    %c0_i32_0 = arith.constant 0 : i32
    return %arg0, %c0_i32 : i32, i32
  }
  func.func @transform_1(%arg0: i32, %arg1: i32) -> (i32, i32) {
    %c0_i32 = arith.constant 0 : i32
    %c0_i32_0 = arith.constant 0 : i32
    return %c0_i32, %arg1 : i32, i32
  }
  func.func @transform_2(%arg0: i32, %arg1: i32) -> (i32, i32) {
    %c0_i32 = arith.constant 0 : i32
    %c0_i32_0 = arith.constant 0 : i32
    return %c0_i32, %arg1 : i32, i32
  }
  func.func @transform_3(%arg0: i32, %arg1: i32) -> (i32, i32) {
    %c0_i32 = arith.constant 0 : i32
    return %arg0, %arg1 : i32, i32
  }
}

module attributes {stable_mosaic.version = 11 : i64} {
  func.func @_linear_kernel(%arg0: i32, %arg1: i32, %arg2: memref<8x2048xf32, #tpu.memory_space<vmem>>, %arg3: memref<2048x512xf32, #tpu.memory_space<vmem>>, %arg4: memref<1x512xf32, #tpu.memory_space<vmem>>, %arg5: memref<8x512xf32, #tpu.memory_space<vmem>>) attributes {dimension_semantics = [#tpu.dimension_semantics<parallel>, #tpu.dimension_semantics<parallel>], iteration_bounds = array<i64: 1, 8>, scalar_prefetch = 0 : i64, scratch_operands = 0 : i64, tpu.core_type = #tpu.core_type<tc>, window_params = [{transform_indices = @transform_0, window_bounds = array<i64: 8, 2048>}, {transform_indices = @transform_1, window_bounds = array<i64: 2048, 512>}, {transform_indices = @transform_2, window_bounds = array<i64: 1, 512>}, {transform_indices = @transform_3, window_bounds = array<i64: 8, 512>}]} {
    %c0 = arith.constant 0 : index
    %c0_0 = arith.constant 0 : index
    %0 = vector.load %arg2[%c0, %c0_0] : memref<8x2048xf32, #tpu.memory_space<vmem>>, vector<8x2048xf32>
    %c0_1 = arith.constant 0 : index
    %c0_2 = arith.constant 0 : index
    %1 = vector.load %arg3[%c0_1, %c0_2] : memref<2048x512xf32, #tpu.memory_space<vmem>>, vector<2048x512xf32>
    %cst = arith.constant dense<0.000000e+00> : vector<8x512xf32>
    %2 = tpu.matmul %0, %1, %cst {dimension_numbers = #tpu.dot_dimension_numbers<[1], [0], [0], [1], [0, 0, 1, 1], [], []>} : vector<8x2048xf32>, vector<2048x512xf32>, vector<8x512xf32> -> vector<8x512xf32>
    %c0_3 = arith.constant 0 : index
    %c0_4 = arith.constant 0 : index
    %3 = vector.load %arg4[%c0_3, %c0_4] : memref<1x512xf32, #tpu.memory_space<vmem>>, vector<1x512xf32>
    %4 = vector.broadcast %3 : vector<1x512xf32> to vector<8x512xf32>
    %5 = arith.addf %2, %4 : vector<8x512xf32>
    %c0_5 = arith.constant 0 : index
    %c0_6 = arith.constant 0 : index
    %6 = vector.load %arg5[%c0_5, %c0_6] : memref<8x512xf32, #tpu.memory_space<vmem>>, vector<8x512xf32>
    tpu.vector_store %arg5[%c0_5, %c0_6], %5 {strides = array<i32>} : memref<8x512xf32, #tpu.memory_space<vmem>>, vector<8x512xf32>,
    return
  }
  func.func @transform_0(%arg0: i32, %arg1: i32) -> (i32, i32) {
    %c0_i32 = arith.constant 0 : i32
    %c0_i32_0 = arith.constant 0 : i32
    return %arg0, %c0_i32 : i32, i32
  }
  func.func @transform_1(%arg0: i32, %arg1: i32) -> (i32, i32) {
    %c0_i32 = arith.constant 0 : i32
    %c0_i32_0 = arith.constant 0 : i32
    return %c0_i32, %arg1 : i32, i32
  }
  func.func @transform_2(%arg0: i32, %arg1: i32) -> (i32, i32) {
    %c0_i32 = arith.constant 0 : i32
    %c0_i32_0 = arith.constant 0 : i32
    return %c0_i32, %arg1 : i32, i32
  }
  func.func @transform_3(%arg0: i32, %arg1: i32) -> (i32, i32) {
    %c0_i32 = arith.constant 0 : i32
    return %arg0, %arg1 : i32, i32
  }
}

</mosaic_0001>

<bundles_post_ra>
// kernel: deepnet_forward.5
= control target key start
LH: loop header
LB: loop body
LE: loop exit
PB: predicated region body
PF: predicated region fallthrough
CT: control target
= control target key end

     0   :  { %s1321_s0 = inlined_call_operand.hbm [shape: f32[8,128], index: 0, kind: input, shape index: {}]   ;;  %s1322_s1 = inlined_call_operand.hbm [shape: f32[128,1024], index: 1, kind: input, shape index: {}]   ;;  %s1323_s2 = inlined_call_operand.hbm [shape: f32[1,1024], index: 2, kind: input, shape index: {}]   ;;  %s1324_s3 = inlined_call_operand.hbm [shape: f32[8,1024], index: 3, kind: output, shape index: {}]  }
   0x1   :  { %1330 = sst [smem:[#allocation12_spill]] %s1322_s1 }
   0x2   :  { %8 = vsyncpa [#allocation3], 0 }
   0x3   :  { %9 = vsyncpa [#allocation6], 0 }
   0x4   :  { %11 = vsyncpa [#allocation6 + $0x1], 0 }
   0x5   :  { %12 = vsyncpa [#allocation4], 0 }
   0x6   :  { %14 = vsyncpa [#allocation4 + $0x1], 0  ;;  %s1004_s12 = smov 0   ;;  %s1006_s13 = smov 0  }
   0x7   :  { %s1008_s14 = smov 0   ;;  %s1010_s15 = smov 0  }
   0x8   :  { %s1012_s16 = smov 0   ;;  %s1014_s17 = smov 0  }
   0x9 LB: > { %s29_s18 = sadd.s32 1, %s970_s16  ;;  %s65_s19 = sadd.s32 1, %s962_s14  ;;  %s974_s17 = sphi %s1014_s17, %s20_s17   ;;  %s970_s16 = sphi %s1012_s16, %s1350_s16   ;;  %s966_s15 = sphi %s1010_s15, %s1349_s15   ;;  %s962_s14 = sphi %s1008_s14, %s1348_s14   ;;  %s958_s13 = sphi %s1006_s13, %s1347_s13   ;;  %s954_s12 = sphi %s1004_s12, %s1346_s12  }
   0xa   : > { %p30_p0 = scmp.ge.s32.totalorder %s29_s18, 2  ;;  %p72_p1 = scmp.ne.s32.totalorder %s962_s14, %s958_s13 }
   0xb   : > { %p73_p2 = scmp.eq.s32.totalorder %s974_s17, 0  ;;  %p744_p5 = scmp.lt.s32.totalorder %s974_s17, 2 }
   0xc   : > { %s1352_s18 = smov (%p30_p0, %s29_s18), 0  ;;  %s169_s21 = sand.u32 1, %s974_s17  }
   0xd   : > { %p74_p4 = por %p73_p2, %p72_p1  ;;  %s62_s20 = ssub.s32 %s970_s16, %s1352_s18 }
   0xe   : > { %p63_p6 = scmp.eq.s32.totalorder %s62_s20, 0  ;;  %s171_s22 = sand.u32 1, %s962_s14  }
   0xf   : > { %s651_s23 = sshll.u32 %s970_s16, 9  ;;  %s635_s25 = sshll.u32 %s171_s22, 9 }
  0x10   : > { %s1052_s24 = scalar_select %p63_p6, %s962_s14, %s65_s19  }
  0x11   : > { %s1331_s1 = sld [smem:[#allocation12_spill]]  ;;  %p1061_p7 = pnand %p744_p5, %p74_p4 }
  0x12   : > { %s173_s30 = scalar_lea.vmem [#allocation5], %s635_s25  ;;  %s1067_s5 = scalar_lea.sflag [#allocation6], %s169_s21 }
  0x13   : > { %s180_s4 = sshll.u32 %s173_s30, 4  ;;  %p802_p9 = pneg %p1061_p7  ;;  %s1065_s4 = int_to_ptr.vmem [resolvable:$true] %s180_s4 }
  0x17   : > { %s1059_s28 = scalar_lea.hbm %s1331_s1, %s651_s23  ;;  %s805_s9 = scalar_lea.hbm %s1331_s1, 16384 }
  0x18   : > { %s800_s6 = scalar_lea.hbm %s1059_s28, 8192  ;;  %p806_p12 = scmp.lt.u32.totalorder %s1059_s28, %s1331_s1 }
  0x19   : > { %p801_p8 = scmp.ne.s32.totalorder %s1059_s28, %s800_s6  ;;  %p807_p13 = scmp.lt.u32.totalorder %s805_s9, %s800_s6 }
  0x1a   : > { %p809_p2 = scmp.lt.u32.totalorder %s800_s6, %s1059_s28 }
  0x1b   : > { %p803_p10 = pnand %p802_p9, %p801_p8  ;;  %p808_p0 = por %p807_p13, %p806_p12 }
  0x1d   : > { %p804_p11 = pneg %p803_p10  ;;  %p810_p4 = por %p809_p2, %p808_p0 }
  0x1f   : > { %p811_p5 = pnand %p810_p4, %p804_p11 }
  0x21   : > { %814 = shalt.err (!%p811_p5)
}
  0x22   : > { %s815_s19 = scalar_lea.vmem %s1065_s4, 8192  ;;  %s976_s20 = smov [#allocation5]  }
  0x23   : > { %p816_p6 = scmp.ne.s32.totalorder %s1065_s4, %s815_s19  ;;  %s820_s21 = sshll.u32 %s976_s20, 4  ;;  %s821_s21 = int_to_ptr.vmem [resolvable:$false] %s820_s21 }
  0x24   : > { %s822_s23 = scalar_lea.vmem %s821_s21, 16384  ;;  %p823_p3 = scmp.lt.s32.totalorder %s1065_s4, %s821_s21 }
  0x25   : > { %p818_p8 = pnand %p816_p6, %p802_p9  ;;  %p824_p12 = scmp.lt.s32.totalorder %s822_s23, %s815_s19 }
  0x27   : > { %p819_p10 = pneg %p818_p8  ;;  %p825_p13 = por %p824_p12, %p823_p3 }
  0x29   : > { %p826_p0 = pnand %p825_p13, %p819_p10 }
  0x2b   : > { %829 = shalt.err (!%p826_p0)
}
  0x2c   : > { %s977_s25 = smov 1024   ;;  %s978_s26 = smov 512  }
  0x2d   : > { %s979_s27 = smov 32   ;;  %s1096_s30 = sadd.s32 4294967295, %s974_s17  }
  0x2e   : > { %735 = dma.hbm_to_vmem [thread:$0]  (!%p1061_p7), %s1059_s28, 8192, %s1065_s4, %s1067_s5, %s977_s25, %s978_s26, %s979_s27  }
  0x2f   : > { %s631_s6 = sadd.s32 4294967294, %s974_s17   ;;  %p78_p3 = scmp.ne.s32.totalorder %s958_s13, %s954_s12 }
  0x30   : > { %p1325_p11 = scmp.eq.s32.totalorder %s1096_s30, 0  ;;  %p130_p2 = scmp.eq.s32.totalorder %s1096_s30, 1 }
  0x31   : > { %p136_p4 = scmp.eq.s32.totalorder %s631_s6, 1  ;;  %p632_p6 = scmp.ge.s32.totalorder %s974_s17, 1 }
  0x32   : > { %p1105_p5 = por %p1325_p11, %p78_p3  ;;  %p1113_p8 = por %p130_p2, %p72_p1 }
  0x33   : > { %p1117_p10 = por %p136_p4, %p78_p3  ;;  %p143_p12 = scmp.lt.s32.totalorder %s974_s17, 3 }
  0x34   : > { %s1333_s7 = scalar_select %p1105_p5, 1, 0 }
  0x35   : > { %s1334_s28 = scalar_select %p1113_p8, 1, 0 }
  0x36   : > { %s1335_s4 = scalar_select %p1117_p10, 1, 0 }
  0x37   : > { %s638_s8 = sshll.u32 %s171_s22, 2  ;;  %p1124_p13 = pnand %p632_p6, %p143_p12 }
  0x38   : > { %s980_s10 = smov [#allocation2]   ;;  %s652_s19 = sshll.u32 %s970_s16, 6 }
  0x39   : > { %s1336_s9 = scalar_select %p1124_p13, 1, 0 }
  0x3a   : > { %s158_s11 = sshll.u32 %s980_s10, 4  ;;  %p728_p1 = pneg %p1124_p13  ;;  %s1128_s11 = int_to_ptr.vmem [resolvable:$true] %s158_s11 }
  0x3b   : > { %s1136_s23 = scalar_lea.hbm %s1323_s2, %s652_s19  ;;  %s194_s22 = scalar_lea.vmem [#allocation7], %s638_s8 }
  0x3c   : > { %s202_s25 = sshll.u32 %s194_s22, 4  ;;  %p1140_p0 = pnand %p728_p1, %p1325_p11  ;;  %s203_s25 = int_to_ptr.vmem [resolvable:$true] %s202_s25 }
  0x3d   : > { %s830_s27 = scalar_lea.hbm %s1136_s23, 64  ;;  %s835_s19 = scalar_lea.hbm %s1323_s2, 128 }
  0x3e   : > { %s1337_s26 = scalar_select %p1140_p0, 1, 0 }
  0x3f   : > { %p831_p3 = scmp.ne.s32.totalorder %s1136_s23, %s830_s27  ;;  %p836_p6 = scmp.lt.u32.totalorder %s1136_s23, %s1323_s2 }
  0x40   : > { %p837_p12 = scmp.lt.u32.totalorder %s835_s19, %s830_s27  ;;  %p839_p11 = scmp.lt.u32.totalorder %s830_s27, %s1136_s23 }
  0x41   : > { %p833_p2 = pnand %p831_p3, %p802_p9 }
  0x42   : > { %p838_p1 = por %p837_p12, %p836_p6 }
  0x43   : > { %p834_p4 = pneg %p833_p2 }
  0x44   : > { %p840_p10 = por %p839_p11, %p838_p1 }
  0x46   : > { %p841_p8 = pnand %p840_p10, %p834_p4 }
  0x48   : > { %844 = shalt.err (!%p841_p8)
}
  0x49   : > { %s845_s8 = scalar_lea.vmem %s203_s25, 64  ;;  %s981_s22 = smov [#allocation7]  }
  0x4a   : > { %p846_p5 = scmp.ne.s32.totalorder %s203_s25, %s845_s8  ;;  %s850_s6 = sshll.u32 %s981_s22, 4  ;;  %s851_s6 = int_to_ptr.vmem [resolvable:$false] %s850_s6 }
  0x4b   : > { %s852_s10 = scalar_lea.vmem %s851_s6, 128  ;;  %p853_p13 = scmp.lt.s32.totalorder %s203_s25, %s851_s6 }
  0x4c   : > { %p848_p3 = pnand %p846_p5, %p802_p9  ;;  %p854_p0 = scmp.lt.s32.totalorder %s852_s10, %s845_s8 }
  0x4e   : > { %p849_p2 = pneg %p848_p3  ;;  %p855_p6 = por %p854_p0, %p853_p13 }
  0x50   : > { %p856_p12 = pnand %p855_p6, %p849_p2 }
  0x52   : > { %859 = shalt.err (!%p856_p12)
}
  0x53   : > { %738 = dma.hbm_to_vmem [thread:$0]  (!%p1061_p7), %s1136_s23, 64, %s203_s25, %s1067_s5  }
  0x54   : > { %s860_s20 = scalar_lea.hbm %s1321_s0, 128  ;;  %p1338_p11 = scmp.ne.s32.totalorder %s1337_s26, 0 }
  0x55   : > { %p861_p9 = scmp.ne.s32.totalorder %s1321_s0, %s860_s20  ;;  %p867_p13 = scmp.lt.u32.totalorder %s860_s20, %s1321_s0 }
  0x56   : > { %p862_p5 = pneg %p1338_p11 }
  0x58   : > { %p863_p8 = pnand %p862_p5, %p861_p9 }
  0x5a   : > { %p864_p10 = pneg %p863_p8 }
  0x5c   : > { %p869_p0 = pnand %p867_p13, %p864_p10 }
  0x5e   : > { %872 = shalt.err (!%p869_p0)
}
  0x5f   : > { %s873_s29 = scalar_lea.vmem %s1128_s11, 128  ;;  %p881_p3 = scmp.lt.s32.totalorder %s1128_s11, %s1128_s11 }
  0x60   : > { %p874_p7 = scmp.ne.s32.totalorder %s1128_s11, %s873_s29  ;;  %p882_p2 = scmp.lt.s32.totalorder %s873_s29, %s873_s29 }
  0x62   : > { %p876_p4 = pnand %p874_p7, %p862_p5  ;;  %p883_p6 = por %p882_p2, %p881_p3 }
  0x64   : > { %p877_p1 = pneg %p876_p4 }
  0x66   : > { %p884_p12 = pnand %p883_p6, %p877_p1 }
  0x68   : > { %887 = shalt.err (!%p884_p12)
}
  0x69   : > { %731 = dma.hbm_to_vmem [thread:$0]  (!%p1338_p11), %s1321_s0, 128, %s1128_s11, [#allocation3]  }
  0x6a   : > { %p1339_p9 = scmp.ne.s32.totalorder %s1336_s9, 0 }
  0x6b   : > { %p1340_p8 = scmp.eq.s32.totalorder (!%p1339_p9), %s1096_s30, 0 }
  0x6c   : > { %211 = sbr.rel (%p1339_p9) target bundleno = 389 (0x185), region = 32 }
  0x73   : > { %941 = dma.done.wait (%p1340_p8), [#allocation3], 128   ;;  %p1341_p5 = pmov %p1340_p8 }
  0x74   : > { %s217_s23 = sand.u32 1, %s1096_s30   ;;  %s1193_s25 = sand.u32 1, %s958_s13  }
  0x75   : > { %943 = vsyncadd (%p1341_p5), [#allocation3], 4294967168  ;;  %s643_s26 = sshll.u32 %s1193_s25, 9  ;;  %s218_s6 = scalar_lea.sflag [#allocation6], %s217_s23 }
  0x76   : > { %s1196_s10 = scalar_lea.vmem [#allocation5], %s643_s26  ;;  %p1342_p11 = scmp.ne.s32.totalorder %s1333_s7, 0 }
  0x78   : > { %945 = dma.done.wait (%p1342_p11), %s218_s6, 8256  }
  0x79   : > { %947 = vsyncadd (%p1342_p11), %s218_s6, 4294959040  ;;  %v982_v0 = vmov 0.0   ;;  %v263_v1 = vld [vmem:[%s1196_s10 + $0x8] sm:$0xff]  ;;  %v265_v3 = vld [vmem:[%s1196_s10 + $0x18] sm:$0xff]  ;;  %s644_s30 = sshll.u32 %s1193_s25, 2  ;;  %s645_s9 = sshll.u32 %s1193_s25, 5 }
  0x7a   : > { %412 = vmatprep.mubr.f32.mxu0 %v982_v0  ;;  %483 = vmatprep.mubr.f32.mxu1 %v982_v0  ;;  %v267_v2 = vld [vmem:[%s1196_s10 + $0x28] sm:$0xff]  ;;  %v269_v5 = vld [vmem:[%s1196_s10 + $0x38] sm:$0xff]  ;;  %v262_v6 = vld [vmem:[%s1196_s10] sm:$0xff]  ;;  %s230_s7 = scalar_lea.vmem [#allocation7], %s644_s30  ;;  %s653_s11 = sshll.u32 %s966_s15, 9 }
  0x7b   : > { %v654_v4 = vpack.c.bf16 %v267_v2, %v263_v1  ;;  %v266_v7 = vld [vmem:[%s1196_s10 + $0x20] sm:$0xff]  ;;  %v686_v8 = vpack.c.bf16 %v269_v5, %v265_v3  ;;  %v264_v10 = vld [vmem:[%s1196_s10 + $0x10] sm:$0xff]  ;;  %v271_v12 = vld [vmem:[%s1196_s10 + $0x48] sm:$0xff]  ;;  %s257_s27 = scalar_lea.vmem [#allocation8], %s645_s9  ;;  %s1272_s8 = scalar_lea.hbm %s1324_s3, %s653_s11 }
  0x7c   : > { %v656_v9 = vpack.c.bf16 %v266_v7, %v262_v6  ;;  %v268_v11 = vld [vmem:[%s1196_s10 + $0x30] sm:$0xff]  ;;  %v275_v14 = vld [vmem:[%s1196_s10 + $0x68] sm:$0xff]  ;;  %v273_v15 = vld [vmem:[%s1196_s10 + $0x58] sm:$0xff]  ;;  %s515_s19 = sshll.u32 %s257_s27, 4  ;;  %s499_s15 = scalar_lea.sflag [#allocation4], %s1193_s25  ;;  %s1274_s19 = int_to_ptr.vmem [resolvable:$true] %s515_s19 }
  0x7d   : > { %655 = vmatprep.subr.bf16.mxu0 %v654_v4  ;;  %v688_v13 = vpack.c.bf16 %v268_v11, %v264_v10  ;;  %v277_v16 = vld [vmem:[%s1196_s10 + $0x78] sm:$0xff]  ;;  %687 = vmatprep.subr.bf16.mxu1 %v686_v8  ;;  %v658_v17 = vpack.c.bf16 %v275_v14, %v271_v12  ;;  %v270_v19 = vld [vmem:[%s1196_s10 + $0x40] sm:$0xff]  ;;  %v272_v21 = vld [vmem:[%s1196_s10 + $0x50] sm:$0xff]  ;;  %s888_s22 = scalar_lea.vmem %s1274_s19, 512  ;;  %p1343_p13 = scmp.ne.s32.totalorder %s1334_s28, 0 }
  0x7e   : > { %657 = vmatpush1.bf16.msra.mxu0 %v656_v9  ;;  %v690_v18 = vpack.c.bf16 %v277_v16, %v273_v15  ;;  %v274_v20 = vld [vmem:[%s1196_s10 + $0x60] sm:$0xff]  ;;  %v276_v23 = vld [vmem:[%s1196_s10 + $0x70] sm:$0xff]  ;;  %v279_v24 = vld [vmem:[%s1196_s10 + $0x88] sm:$0xff]  ;;  %p889_p10 = scmp.ne.s32.totalorder %s1274_s19, %s888_s22  ;;  %s983_s29 = smov [#allocation8]  }
  0x7f   : > { %689 = vmatpush1.bf16.msra.mxu1 %v688_v13  ;;  %v660_v22 = vpack.c.bf16 %v274_v20, %v270_v19  ;;  %v283_v25 = vld [vmem:[%s1196_s10 + $0xa8] sm:$0xff]  ;;  %659 = vmatprep.subr.bf16.mxu0 %v658_v17  ;;  %v692_v26 = vpack.c.bf16 %v276_v23, %v272_v21  ;;  %v281_v28 = vld [vmem:[%s1196_s10 + $0x98] sm:$0xff]  ;;  %v278_v30 = vld [vmem:[%s1196_s10 + $0x80] sm:$0xff]  ;;  %s892_s1 = sshll.u32 %s983_s29, 4  ;;  %s893_s1 = int_to_ptr.vmem [resolvable:$false] %s892_s1 }
  0x80   : > { %691 = vmatprep.subr.bf16.mxu1 %v690_v18  ;;  %v662_v27 = vpack.c.bf16 %v283_v25, %v279_v24  ;;  %v285_v29 = vld [vmem:[%s1196_s10 + $0xb8] sm:$0xff]  ;;  %v282_v32 = vld [vmem:[%s1196_s10 + $0xa0] sm:$0xff]  ;;  %v280_v33 = vld [vmem:[%s1196_s10 + $0x90] sm:$0xff]  ;;  %p890_p0 = pnand %p889_p10, %p1343_p13  ;;  %s894_s5 = scalar_lea.vmem %s893_s1, 1024 }
  0x81   : > { %v694_v31 = vpack.c.bf16 %v285_v29, %v281_v28  ;;  %v284_v34 = vld [vmem:[%s1196_s10 + $0xb0] sm:$0xff]  ;;  %v664_v35 = vpack.c.bf16 %v282_v32, %v278_v30  ;;  %v287_v36 = vld [vmem:[%s1196_s10 + $0xc8] sm:$0xff]  ;;  %v289_v38 = vld [vmem:[%s1196_s10 + $0xd8] sm:$0xff]  ;;  %p895_p4 = scmp.lt.s32.totalorder %s1274_s19, %s893_s1  ;;  %p896_p1 = scmp.lt.s32.totalorder %s894_s5, %s888_s22 }
  0x82   : > { %661 = vmatpush1.bf16.msra.mxu0 %v660_v22  ;;  %v291_v37 = vld [vmem:[%s1196_s10 + $0xe8] sm:$0xff]  ;;  %v696_v39 = vpack.c.bf16 %v284_v34, %v280_v33  ;;  %v293_v41 = vld [vmem:[%s1196_s10 + $0xf8] sm:$0xff]  ;;  %v286_v42 = vld [vmem:[%s1196_s10 + $0xc0] sm:$0xff]  ;;  %v328_v34 = vlaneseq  ;;  %p891_p7 = pneg %p890_p0 }
  0x83   : > { %693 = vmatpush1.bf16.msra.mxu1 %v692_v26  ;;  %663 = vmatprep.subr.bf16.mxu0 %v662_v27  ;;  %v666_v40 = vpack.c.bf16 %v291_v37, %v287_v36  ;;  %v290_v43 = vld [vmem:[%s1196_s10 + $0xe0] sm:$0xff]  ;;  %v698_v44 = vpack.c.bf16 %v293_v41, %v289_v38  ;;  %v288_v45 = vld [vmem:[%s1196_s10 + $0xd0] sm:$0xff]  ;;  %v295_v47 = vld [vmem:[%s1196_s10 + $0x108] sm:$0xff]  ;;  %p897_p3 = por %p896_p1, %p895_p4 }
  0x84   : > { %695 = vmatprep.subr.bf16.mxu1 %v694_v31  ;;  %v292_v46 = vld [vmem:[%s1196_s10 + $0xf0] sm:$0xff]  ;;  %v299_v48 = vld [vmem:[%s1196_s10 + $0x128] sm:$0xff]  ;;  %v297_v49 = vld [vmem:[%s1196_s10 + $0x118] sm:$0xff]  ;;  %v668_v51 = vpack.c.bf16 %v290_v43, %v286_v42 }
  0x85   : > { %v301_v50 = vld [vmem:[%s1196_s10 + $0x138] sm:$0xff]  ;;  %v700_v52 = vpack.c.bf16 %v292_v46, %v288_v45  ;;  %v670_v53 = vpack.c.bf16 %v299_v48, %v295_v47  ;;  %v294_v54 = vld [vmem:[%s1196_s10 + $0x100] sm:$0xff]  ;;  %v296_v56 = vld [vmem:[%s1196_s10 + $0x110] sm:$0xff]  ;;  %p898_p2 = pnand %p897_p3, %p891_p7 }
  0x86   : > { %665 = vmatpush1.bf16.msra.mxu0 %v664_v35  ;;  %v298_v55 = vld [vmem:[%s1196_s10 + $0x120] sm:$0xff]  ;;  %v702_v57 = vpack.c.bf16 %v301_v50, %v297_v49  ;;  %v300_v58 = vld [vmem:[%s1196_s10 + $0x130] sm:$0xff]  ;;  %v303_v59 = vld [vmem:[%s1196_s10 + $0x148] sm:$0xff]  ;;  %v329_v35 = vshrl.u32 %v328_v34, 7 }
  0x87   : > { %697 = vmatpush1.bf16.msra.mxu1 %v696_v39  ;;  %667 = vmatprep.subr.bf16.mxu0 %v666_v40  ;;  %v307_v60 = vld [vmem:[%s1196_s10 + $0x168] sm:$0xff]  ;;  %v305_v61 = vld [vmem:[%s1196_s10 + $0x158] sm:$0xff]  ;;  %v672_v63 = vpack.c.bf16 %v298_v55, %v294_v54  ;;  %v704_v0 = vpack.c.bf16 %v300_v58, %v296_v56  ;;  %v302_v2 = vld [vmem:[%s1196_s10 + $0x140] sm:$0xff] }
  0x88   : > { %699 = vmatprep.subr.bf16.mxu1 %v698_v44  ;;  %v309_v62 = vld [vmem:[%s1196_s10 + $0x178] sm:$0xff]  ;;  %v674_v1 = vpack.c.bf16 %v307_v60, %v303_v59  ;;  %v306_v3 = vld [vmem:[%s1196_s10 + $0x160] sm:$0xff]  ;;  %v304_v4 = vld [vmem:[%s1196_s10 + $0x150] sm:$0xff]  ;;  %v330_v36 = vsub.s32 0, %v329_v35  ;;  %v338_v38 = vsub.s32 2, %v329_v35  ;;  %v334_v39 = vsub.s32 1, %v329_v35 }
  0x89   : > { %v706_v5 = vpack.c.bf16 %v309_v62, %v305_v61  ;;  %v308_v6 = vld [vmem:[%s1196_s10 + $0x170] sm:$0xff]  ;;  %v311_v7 = vld [vmem:[%s1196_s10 + $0x188] sm:$0xff]  ;;  %v313_v9 = vld [vmem:[%s1196_s10 + $0x198] sm:$0xff]  ;;  %v676_v11 = vpack.c.bf16 %v306_v3, %v302_v2  ;;  %v342_v40 = vsub.s32 3, %v329_v35 }
  0x8a   : > { %669 = vmatpush1.bf16.msra.mxu0 %v668_v51  ;;  %v315_v8 = vld [vmem:[%s1196_s10 + $0x1a8] sm:$0xff]  ;;  %v317_v10 = vld [vmem:[%s1196_s10 + $0x1b8] sm:$0xff]  ;;  %v708_v12 = vpack.c.bf16 %v308_v6, %v304_v4  ;;  %v310_v14 = vld [vmem:[%s1196_s10 + $0x180] sm:$0xff] }
  0x8b   : > { %701 = vmatpush1.bf16.msra.mxu1 %v700_v52  ;;  %671 = vmatprep.subr.bf16.mxu0 %v670_v53  ;;  %v678_v13 = vpack.c.bf16 %v315_v8, %v311_v7  ;;  %v314_v15 = vld [vmem:[%s1196_s10 + $0x1a0] sm:$0xff]  ;;  %v312_v16 = vld [vmem:[%s1196_s10 + $0x190] sm:$0xff]  ;;  %v710_v17 = vpack.c.bf16 %v317_v10, %v313_v9  ;;  %v319_v19 = vld [vmem:[%s1196_s10 + $0x1c8] sm:$0xff] }
  0x8c   : > { %703 = vmatprep.subr.bf16.mxu1 %v702_v57  ;;  %v316_v18 = vld [vmem:[%s1196_s10 + $0x1b0] sm:$0xff]  ;;  %v323_v20 = vld [vmem:[%s1196_s10 + $0x1e8] sm:$0xff]  ;;  %v321_v21 = vld [vmem:[%s1196_s10 + $0x1d8] sm:$0xff]  ;;  %v680_v23 = vpack.c.bf16 %v314_v15, %v310_v14 }
  0x8d   : > { %v325_v22 = vld [vmem:[%s1196_s10 + $0x1f8] sm:$0xff]  ;;  %v712_v24 = vpack.c.bf16 %v316_v18, %v312_v16  ;;  %v682_v25 = vpack.c.bf16 %v323_v20, %v319_v19  ;;  %v318_v26 = vld [vmem:[%s1196_s10 + $0x1c0] sm:$0xff]  ;;  %v320_v29 = vld [vmem:[%s1196_s10 + $0x1d0] sm:$0xff] }
  0x8e   : > { %673 = vmatpush1.bf16.msra.mxu0 %v672_v63  ;;  %v322_v27 = vld [vmem:[%s1196_s10 + $0x1e0] sm:$0xff]  ;;  %v714_v28 = vpack.c.bf16 %v325_v22, %v321_v21  ;;  %v324_v30 = vld [vmem:[%s1196_s10 + $0x1f0] sm:$0xff]  ;;  %v261_v33 = vld [vmem:[#allocation2] sm:$0xff] }
  0x8f   : > { %705 = vmatpush1.bf16.msra.mxu1 %v704_v0  ;;  %675 = vmatprep.subr.bf16.mxu0 %v674_v1  ;;  %v684_v31 = vpack.c.bf16 %v322_v27, %v318_v26  ;;  %v716_v32 = vpack.c.bf16 %v324_v30, %v320_v29  ;;  %v326_v37 = vld [vmem:[%s230_s7] sm:$0xf] }
  0x90   : > { %707 = vmatprep.subr.bf16.mxu1 %v706_v5  ;;  %v331_v41 = vrot.slane %v326_v37, %v330_v36  ;;  %v339_v42 = vrot.slane %v326_v37, %v338_v38  ;;  %v335_v43 = vrot.slane %v326_v37, %v334_v39  ;;  %v343_v44 = vrot.slane %v326_v37, %v342_v40 }
  0x92   : > { %677 = vmatpush1.bf16.msra.mxu0 %v676_v11 }
  0x93   : > { %709 = vmatpush1.bf16.msra.mxu1 %v708_v12  ;;  %679 = vmatprep.subr.bf16.mxu0 %v678_v13 }
  0x94   : > { %711 = vmatprep.subr.bf16.mxu1 %v710_v17 }
  0x96   : > { %681 = vmatpush1.bf16.msra.mxu0 %v680_v23 }
  0x97   : > { %713 = vmatpush1.bf16.msra.mxu1 %v712_v24  ;;  %683 = vmatprep.subr.bf16.mxu0 %v682_v25 }
  0x98   : > { %715 = vmatprep.subr.bf16.mxu1 %v714_v28 }
  0x9a   : > { %685 = vmatpush1.bf16.msra.mxu0 %v684_v31 }
  0x9b   : > { %717 = vmatpush1.bf16.msra.mxu1 %v716_v32 }
  0x9d   : > { %413 = vmatmul.mubr.f32.vlgmr.msra.gmra.mrb[0].mxu0 %v261_v33 }
  0x9e   : > { %484 = vmatmul.mubr.f32.vlgmr.msra.gmra.mrb[0].mxu1 %v261_v33 }
 0x170   : > { %v414_v45 = vpop.f32.mrb[0].mxu0 }
 0x171   : > { %v415_v46 = vadd.f32 %v414_v45, %v331_v41  ;;  %v485_v47 = vpop.f32.mrb[0].mxu1  ;;  %v416_v48 = vpop.f32.mrb[1].mxu0 }
 0x172   : > { %v486_v49 = vadd.f32 %v485_v47, %v339_v42  ;;  %v417_v50 = vadd.f32 %v416_v48, %v335_v43  ;;  %v487_v51 = vpop.f32.mrb[1].mxu1 }
 0x173   : > { %v490_v52 = vmax.f32 %v415_v46, 0.0  ;;  %v488_v53 = vadd.f32 %v487_v51, %v343_v44 }
 0x174   : > { %v492_v54 = vmax.f32 %v486_v49, 0.0  ;;  %v491_v55 = vmax.f32 %v417_v50, 0.0 }
 0x175   : > { %494 = vst [vmem:[%s257_s27] sm:$0xff] %v490_v52  ;;  %v493_v56 = vmax.f32 %v488_v53, 0.0 }
 0x176   : > { %496 = vst [vmem:[%s257_s27 + $0x10] sm:$0xff] %v492_v54  ;;  %495 = vst [vmem:[%s257_s27 + $0x8] sm:$0xff] %v491_v55 }
 0x177   : > { %497 = vst [vmem:[%s257_s27 + $0x18] sm:$0xff] %v493_v56 }
 0x178   : > { %901 = shalt.err (!%p898_p2)
}
 0x179   : > { %s902_s23 = scalar_lea.hbm %s1272_s8, 512  ;;  %s906_s6 = scalar_lea.hbm %s1324_s3, 1024 }
 0x17a   : > { %p903_p6 = scmp.ne.s32.totalorder %s1272_s8, %s902_s23  ;;  %p907_p8 = scmp.lt.u32.totalorder %s1272_s8, %s1324_s3 }
 0x17b   : > { %p908_p5 = scmp.lt.u32.totalorder %s906_s6, %s902_s23  ;;  %p910_p10 = scmp.lt.u32.totalorder %s902_s23, %s1272_s8 }
 0x17c   : > { %p904_p12 = pnand %p903_p6, %p1343_p13 }
 0x17d   : > { %p909_p11 = por %p908_p5, %p907_p8 }
 0x17e   : > { %p905_p9 = pneg %p904_p12 }
 0x17f   : > { %p911_p0 = por %p910_p10, %p909_p11 }
 0x181   : > { %p912_p7 = pnand %p911_p0, %p905_p9 }
 0x183   : > { %915 = shalt.err (!%p912_p7)
}
 0x184   : > { %726 = dma.vmem_to_hbm [thread:$0]  (%p1343_p13), %s1274_s19, 512, %s1272_s8, %s499_s15  }
 0x185 PF: > { %s527_s7 = sand.u32 1, %s954_s12   ;;  %p1344_p4 = scmp.ne.s32.totalorder %s1335_s4, 0 }
 0x186   : > { %p1345_p1 = scmp.ge.s32.totalorder %s974_s17, 2  ;;  %s528_s9 = scalar_lea.sflag [#allocation4], %s527_s7 }
 0x188   : > { %p740_p3 = pnand %p1345_p1, %p1344_p4 }
 0x18a   : > { %949 = dma.done.wait (!%p740_p3), %s528_s9, 512  }
 0x18b   : > { %951 = vsyncadd (!%p740_p3), %s528_s9, 4294966784  ;;  %s20_s17 = sadd.s32 1, %s974_s17   ;;  %s1346_s12 = smov %s958_s13 }
 0x18c   : > { %p17_p2 = scmp.ge.s32.totalorder %s20_s17, 4   ;;  %s1347_s13 = smov %s962_s14 }
 0x18d   : > { %s1348_s14 = smov %s1052_s24  ;;  %s1349_s15 = smov %s970_s16 }
 0x18e   : > { %s1350_s16 = smov %s1352_s18  ;;  %19 = sbr.rel (!%p17_p2) target bundleno = 9 (0x9), region = 94 }
 0x195   :  { %533 = vsyncpa [#allocation3], 1 }
 0x196   :  { %535 = vsyncpa [#allocation3 + $0x1], 1 }
 0x197   :  { %536 = vsyncpa [#allocation6], 1 }
 0x198   :  { %538 = vsyncpa [#allocation6 + $0x1], 1 }
 0x199   :  { %539 = vsyncpa [#allocation4], 1 }
 0x19a   :  { %541 = vsyncpa [#allocation4 + $0x1], 1 }

// kernel: deepnet_forward.4
= control target key start
LH: loop header
LB: loop body
LE: loop exit
PB: predicated region body
PF: predicated region fallthrough
CT: control target
= control target key end

     0   :  { %16 = vsyncpa [#allocation3], 0  ;;  %s6962_s0 = inlined_call_operand.vmem [shape: f32[8,40,16], index: 0, kind: input, shape index: {}]   ;;  %s6963_s1 = inlined_call_operand.vmem [shape: f32[8,1,40], index: 1, kind: input, shape index: {}]   ;;  %s6964_s2 = inlined_call_operand.hbm [shape: f32[16,16], index: 2, kind: input, shape index: {}]   ;;  %s6965_s3 = inlined_call_operand.vmem [shape: f32[8,30], index: 3, kind: input, shape index: {}]   ;;  %s6966_s4 = inlined_call_operand.hbm [shape: f32[30,56], index: 4, kind: input, shape index: {}]   ;;  %s6967_s5 = inlined_call_operand.hbm [shape: f32[1,56], index: 5, kind: input, shape index: {}]   ;;  %s6968_s6 = inlined_call_operand.hbm [shape: f32[56,128], index: 6, kind: input, shape index: {}]   ;;  %s6969_s7 = inlined_call_operand.hbm [shape: f32[1,128], index: 7, kind: input, shape index: {}]   ;;  %s6970_s8 = inlined_call_operand.hbm [shape: f32[128,128], index: 8, kind: input, shape index: {}]   ;;  %s6971_s9 = inlined_call_operand.hbm [shape: f32[1,128], index: 9, kind: input, shape index: {}]   ;;  %s6972_s10 = inlined_call_operand.hbm [shape: f32[30,128], index: 10, kind: input, shape index: {}]   ;;  %s6973_s11 = inlined_call_operand.hbm [shape: f32[8,128], index: 11, kind: output, shape index: {}]  }
   0x1   :  { %17 = vsyncpa [#allocation6], 0 }
   0x2   :  { %18 = vsyncpa [#allocation9], 0 }
   0x3   :  { %19 = vsyncpa [#allocation12], 0 }
   0x4   :  { %20 = vsyncpa [#allocation15], 0 }
   0x5   :  { %21 = vsyncpa [#allocation4], 0  ;;  %s5115_s17 = smov [#allocation5]   ;;  %s5116_s19 = smov [#allocation8]  }
   0x6   :  { %s45_s18 = sshll.u32 %s5115_s17, 4  ;;  %s67_s20 = sshll.u32 %s5116_s19, 4  ;;  %s46_s18 = int_to_ptr.vmem [resolvable:$true] %s45_s18  ;;  %s5192_s20 = int_to_ptr.vmem [resolvable:$true] %s67_s20 }
   0x7   :  { %s4905_s23 = scalar_lea.hbm %s6966_s4, 512 }
   0x8   :  { %p4906_p0 = scmp.ne.s32.totalorder %s6966_s4, %s4905_s23  ;;  %p4909_p1 = scmp.lt.u32.totalorder %s4905_s23, %s6966_s4 }
   0xa   :  { %p4911_p2 = pnand %p4909_p1, %p4906_p0 }
   0xc   :  { %4914 = shalt.err (!%p4911_p2)
}
   0xd   :  { %s4915_s28 = scalar_lea.vmem %s46_s18, 512  ;;  %p4920_p4 = scmp.lt.s32.totalorder %s46_s18, %s46_s18 }
   0xe   :  { %p4916_p3 = scmp.ne.s32.totalorder %s46_s18, %s4915_s28  ;;  %p4921_p5 = scmp.lt.s32.totalorder %s4915_s28, %s4915_s28 }
  0x10   :  { %p4922_p6 = por %p4921_p5, %p4920_p4 }
  0x12   :  { %p4923_p7 = pnand %p4922_p6, %p4916_p3 }
  0x14   :  { %4926 = shalt.err (!%p4923_p7)
}
  0x15   :  { %s5117_s29 = smov 128   ;;  %s5118_s30 = smov 8  }
  0x16   :  { %51 = dma.hbm_to_vmem [thread:$0]  %s6966_s4, 512, %s46_s18, [#allocation6], %s5117_s29, %s5117_s29, %s5118_s30  }
  0x17   :  { %s4927_s16 = scalar_lea.hbm %s6968_s6, 896 }
  0x18   :  { %p4928_p8 = scmp.ne.s32.totalorder %s6968_s6, %s4927_s16  ;;  %p4931_p9 = scmp.lt.u32.totalorder %s4927_s16, %s6968_s6 }
  0x1a   :  { %p4933_p10 = pnand %p4931_p9, %p4928_p8 }
  0x1c   :  { %4936 = shalt.err (!%p4933_p10)
}
  0x1d   :  { %s4937_s23 = scalar_lea.vmem %s5192_s20, 896  ;;  %p4942_p12 = scmp.lt.s32.totalorder %s5192_s20, %s5192_s20 }
  0x1e   :  { %p4938_p11 = scmp.ne.s32.totalorder %s5192_s20, %s4937_s23  ;;  %p4943_p13 = scmp.lt.s32.totalorder %s4937_s23, %s4937_s23 }
  0x20   :  { %p4944_p0 = por %p4943_p13, %p4942_p12 }
  0x22   :  { %p4945_p1 = pnand %p4944_p0, %p4938_p11 }
  0x24   :  { %4948 = shalt.err (!%p4945_p1)
}
  0x25   :  { %73 = dma.hbm_to_vmem [thread:$0]  %s6968_s6, 896, %s5192_s20, [#allocation9], %s5117_s29, %s5117_s29, %s5118_s30  }
  0x26   :  { %s5119_s24 = smov [#allocation11]   ;;  %s5120_s26 = smov [#allocation2]  }
  0x27   :  { %s89_s25 = sshll.u32 %s5119_s24, 4  ;;  %s31_s27 = sshll.u32 %s5120_s26, 4  ;;  %s90_s25 = int_to_ptr.vmem [resolvable:$true] %s89_s25  ;;  %s5229_s27 = int_to_ptr.vmem [resolvable:$true] %s31_s27 }
  0x28   :  { %s4949_s13 = scalar_lea.hbm %s6970_s8, 2048 }
  0x29   :  { %p4950_p2 = scmp.ne.s32.totalorder %s6970_s8, %s4949_s13  ;;  %p4953_p3 = scmp.lt.u32.totalorder %s4949_s13, %s6970_s8 }
  0x2b   :  { %p4955_p4 = pnand %p4953_p3, %p4950_p2 }
  0x2d   :  { %4958 = shalt.err (!%p4955_p4)
}
  0x2e   :  { %s4959_s6 = scalar_lea.vmem %s90_s25, 2048  ;;  %p4964_p6 = scmp.lt.s32.totalorder %s90_s25, %s90_s25 }
  0x2f   :  { %p4960_p5 = scmp.ne.s32.totalorder %s90_s25, %s4959_s6  ;;  %p4965_p7 = scmp.lt.s32.totalorder %s4959_s6, %s4959_s6 }
  0x31   :  { %p4966_p8 = por %p4965_p7, %p4964_p6 }
  0x33   :  { %p4967_p9 = pnand %p4966_p8, %p4960_p5 }
  0x35   :  { %4970 = shalt.err (!%p4967_p9)
}
  0x36   :  { %95 = dma.hbm_to_vmem [thread:$0]  %s6970_s8, 2048, %s90_s25, [#allocation12], %s5117_s29, %s5117_s29, %s5118_s30  }
  0x37   :  { %s4971_s23 = scalar_lea.hbm %s6964_s2, 256 }
  0x38   :  { %p4972_p10 = scmp.ne.s32.totalorder %s6964_s2, %s4971_s23  ;;  %p4975_p11 = scmp.lt.u32.totalorder %s4971_s23, %s6964_s2 }
  0x3a   :  { %p4977_p12 = pnand %p4975_p11, %p4972_p10 }
  0x3c   :  { %4980 = shalt.err (!%p4977_p12)
}
  0x3d   :  { %s4981_s28 = scalar_lea.vmem %s5229_s27, 256  ;;  %p4986_p0 = scmp.lt.s32.totalorder %s5229_s27, %s5229_s27 }
  0x3e   :  { %p4982_p13 = scmp.ne.s32.totalorder %s5229_s27, %s4981_s28  ;;  %p4987_p1 = scmp.lt.s32.totalorder %s4981_s28, %s4981_s28 }
  0x40   :  { %p4988_p2 = por %p4987_p1, %p4986_p0 }
  0x42   :  { %p4989_p3 = pnand %p4988_p2, %p4982_p13 }
  0x44   :  { %4992 = shalt.err (!%p4989_p3)
}
  0x45   :  { %37 = dma.hbm_to_vmem [thread:$0]  %s6964_s2, 256, %s5229_s27, [#allocation3], %s5117_s29, %s5117_s29, %s5118_s30  }
  0x46   :  { %s5121_s12 = smov [#allocation7]   ;;  %s5122_s14 = smov [#allocation10]  }
  0x47   :  { %s58_s13 = sshll.u32 %s5121_s12, 4  ;;  %s80_s15 = sshll.u32 %s5122_s14, 4  ;;  %s59_s13 = int_to_ptr.vmem [resolvable:$true] %s58_s13  ;;  %s81_s15 = int_to_ptr.vmem [resolvable:$true] %s80_s15 }
  0x48   :  { %s4993_s6 = scalar_lea.hbm %s6967_s5, 16 }
  0x49   :  { %p4994_p4 = scmp.ne.s32.totalorder %s6967_s5, %s4993_s6  ;;  %p4997_p5 = scmp.lt.u32.totalorder %s4993_s6, %s6967_s5 }
  0x4b   :  { %p4999_p6 = pnand %p4997_p5, %p4994_p4 }
  0x4d   :  { %5002 = shalt.err (!%p4999_p6)
}
  0x4e   :  { %s5003_s2 = scalar_lea.vmem %s59_s13, 16  ;;  %s5007_s27 = scalar_lea.vmem %s59_s13, 32 }
  0x4f   :  { %p5004_p7 = scmp.ne.s32.totalorder %s59_s13, %s5003_s2  ;;  %p5008_p8 = scmp.lt.s32.totalorder %s59_s13, %s59_s13 }
  0x50   :  { %p5009_p9 = scmp.lt.s32.totalorder %s5007_s27, %s5003_s2 }
  0x52   :  { %p5010_p10 = por %p5009_p9, %p5008_p8 }
  0x54   :  { %p5011_p11 = pnand %p5010_p10, %p5004_p7 }
  0x56   :  { %5014 = shalt.err (!%p5011_p11)
}
  0x57   :  { %61 = dma.hbm_to_vmem [thread:$0]  %s6967_s5, 16, %s59_s13, [#allocation6]  }
  0x58   :  { %s5015_s26 = scalar_lea.hbm %s6969_s7, 16 }
  0x59   :  { %p5016_p12 = scmp.ne.s32.totalorder %s6969_s7, %s5015_s26  ;;  %p5019_p13 = scmp.lt.u32.totalorder %s5015_s26, %s6969_s7 }
  0x5b   :  { %p5021_p0 = pnand %p5019_p13, %p5016_p12 }
  0x5d   :  { %5024 = shalt.err (!%p5021_p0)
}
  0x5e   :  { %s5025_s14 = scalar_lea.vmem %s81_s15, 16  ;;  %s5029_s16 = scalar_lea.vmem %s81_s15, 32 }
  0x5f   :  { %p5026_p1 = scmp.ne.s32.totalorder %s81_s15, %s5025_s14  ;;  %p5030_p2 = scmp.lt.s32.totalorder %s81_s15, %s81_s15 }
  0x60   :  { %p5031_p3 = scmp.lt.s32.totalorder %s5029_s16, %s5025_s14 }
  0x62   :  { %p5032_p4 = por %p5031_p3, %p5030_p2 }
  0x64   :  { %p5033_p5 = pnand %p5032_p4, %p5026_p1 }
  0x66   :  { %5036 = shalt.err (!%p5033_p5)
}
  0x67   :  { %83 = dma.hbm_to_vmem [thread:$0]  %s6969_s7, 16, %s81_s15, [#allocation9]  }
  0x68   :  { %s5123_s17 = smov [#allocation13]   ;;  %s5124_s20 = smov [#allocation14]  }
  0x69   :  { %s102_s6 = sshll.u32 %s5123_s17, 4  ;;  %s111_s19 = sshll.u32 %s5124_s20, 4  ;;  %s103_s6 = int_to_ptr.vmem [resolvable:$true] %s102_s6  ;;  %s5290_s19 = int_to_ptr.vmem [resolvable:$true] %s111_s19 }
  0x6a   :  { %s5037_s2 = scalar_lea.hbm %s6971_s9, 16 }
  0x6b   :  { %p5038_p6 = scmp.ne.s32.totalorder %s6971_s9, %s5037_s2  ;;  %p5041_p7 = scmp.lt.u32.totalorder %s5037_s2, %s6971_s9 }
  0x6d   :  { %p5043_p8 = pnand %p5041_p7, %p5038_p6 }
  0x6f   :  { %5046 = shalt.err (!%p5043_p8)
}
  0x70   :  { %s5047_s7 = scalar_lea.vmem %s103_s6, 16  ;;  %s5051_s15 = scalar_lea.vmem %s103_s6, 32 }
  0x71   :  { %p5048_p9 = scmp.ne.s32.totalorder %s103_s6, %s5047_s7  ;;  %p5052_p10 = scmp.lt.s32.totalorder %s103_s6, %s103_s6 }
  0x72   :  { %p5053_p11 = scmp.lt.s32.totalorder %s5051_s15, %s5047_s7 }
  0x74   :  { %p5054_p12 = por %p5053_p11, %p5052_p10 }
  0x76   :  { %p5055_p13 = pnand %p5054_p12, %p5048_p9 }
  0x78   :  { %5058 = shalt.err (!%p5055_p13)
}
  0x79   :  { %105 = dma.hbm_to_vmem [thread:$0]  %s6971_s9, 16, %s103_s6, [#allocation12]  }
  0x7a   :  { %s5059_s25 = scalar_lea.hbm %s6972_s10, 512 }
  0x7b   :  { %p5060_p0 = scmp.ne.s32.totalorder %s6972_s10, %s5059_s25  ;;  %p5063_p1 = scmp.lt.u32.totalorder %s5059_s25, %s6972_s10 }
  0x7d   :  { %p5065_p2 = pnand %p5063_p1, %p5060_p0 }
  0x7f   :  { %5068 = shalt.err (!%p5065_p2)
}
  0x80   :  { %s5069_s13 = scalar_lea.vmem %s5290_s19, 512  ;;  %p5074_p4 = scmp.lt.s32.totalorder %s5290_s19, %s5290_s19 }
  0x81   :  { %p5070_p3 = scmp.ne.s32.totalorder %s5290_s19, %s5069_s13  ;;  %p5075_p5 = scmp.lt.s32.totalorder %s5069_s13, %s5069_s13 }
  0x83   :  { %p5076_p6 = por %p5075_p5, %p5074_p4 }
  0x85   :  { %p5077_p7 = pnand %p5076_p6, %p5070_p3 }
  0x87   :  { %5080 = shalt.err (!%p5077_p7)
}
  0x88   :  { %117 = dma.hbm_to_vmem [thread:$0]  %s6972_s10, 512, %s5290_s19, [#allocation15], %s5117_s29, %s5117_s29, %s5118_s30  }
  0x89   :  { %5103 = dma.done.wait [#allocation3], 256  }
  0x8a   :  { %5104 = vsyncadd [#allocation3], 4294967040 }
  0x8b   :  { %5105 = dma.done.wait [#allocation6], 528  }
  0x8c   :  { %5106 = vsyncadd [#allocation6], 4294966768 }
  0x8d   :  { %5107 = dma.done.wait [#allocation9], 912  }
  0x8e   :  { %5108 = vsyncadd [#allocation9], 4294966384 }
  0x8f   :  { %5109 = dma.done.wait [#allocation12], 2064  }
  0x90   :  { %5110 = vsyncadd [#allocation12], 4294965232 }
  0x91   :  { %5111 = dma.done.wait [#allocation15], 512  }
  0x92   :  { %5112 = vsyncadd [#allocation15], 4294966784  ;;  %vm184_vm0 = vcmask 130048   ;;  %v182_v0 = vld [vmem:[#allocation2] sm:$0xff]  ;;  %v183_v1 = vld [vmem:[#allocation2 + $0x8] sm:$0xff]  ;;  %v6986_v58 = vmov 0.0|0.0  }
  0x93   :  { %v5327_v2 = vld [vmem:[%s6962_s0] sm:$0xff]  ;;  %v4547_v3 = vpack.c.bf16 %v183_v1, %v182_v0  ;;  %v5332_v4 = vld [vmem:[%s6962_s0 + $0x8] sm:$0xff]  ;;  %v5339_v5 = vld [vmem:[%s6962_s0 + $0x10] sm:$0xff]  ;;  %4551 = vmatprep.subr.bf16.mxu1 %v6986_v58  ;;  %vm5126_vm1 = vmmov 0   ;;  %v6997_v59 = vmov 0.0   ;;  %vm1595_vm5 = vcmask 326656  }
  0x94   :  { %3995 = vmatprep.mubr.msk.f32.mxu0 %vm184_vm0, %v5327_v2  ;;  %v5344_v6 = vld [vmem:[%s6962_s0 + $0x18] sm:$0xff]  ;;  %v5353_v9 = vld [vmem:[%s6962_s0 + $0x28] sm:$0xff]  ;;  %v5358_v10 = vld [vmem:[%s6962_s0 + $0x30] sm:$0xff]  ;;  %4065 = vmatprep.mubr.msk.f32.mxu1 %vm5126_vm1, %v6997_v59 }
  0x95   :  { %4548 = vmatprep.subr.bf16.mxu0 %v4547_v3  ;;  %v5365_v12 = vld [vmem:[%s6962_s0 + $0x38] sm:$0xff]  ;;  %v5370_v13 = vld [vmem:[%s6962_s0 + $0x40] sm:$0xff]  ;;  %v5377_v15 = vld [vmem:[%s6962_s0 + $0x50] sm:$0xff]  ;;  %v7057_v0 = vpack.c.bf16 %v5358_v10, %v5353_v9 }
  0x96   :  { %4550 = vmatpush3.bf16.msra.mxu0 %v4547_v3  ;;  %v5382_v16 = vld [vmem:[%s6962_s0 + $0x58] sm:$0xff]  ;;  %v5389_v18 = vld [vmem:[%s6962_s0 + $0x60] sm:$0xff]  ;;  %v5394_v19 = vld [vmem:[%s6962_s0 + $0x68] sm:$0xff] }
  0x97   :  { %v5399_v20 = vld [vmem:[%s6962_s0 + $0x78] sm:$0xff]  ;;  %v5406_v22 = vld [vmem:[%s6962_s0 + $0x80] sm:$0xff]  ;;  %v5411_v23 = vld [vmem:[%s6962_s0 + $0x88] sm:$0xff]  ;;  %4583 = vmatprep.subr.bf16.mxu0 %v6986_v58 }
  0x98   :  { %7017 = vst [vmem:[#allocation23_spill] sm:$0xff] %v5399_v20  ;;  %7018 = vst [vmem:[#allocation24_spill] sm:$0xff] %v5406_v22  ;;  %v5416_v24 = vld [vmem:[%s6962_s0 + $0x90] sm:$0xff]  ;;  %v5427_v27 = vld [vmem:[%s6962_s0 + $0xa0] sm:$0xff] }
  0x99   :  { %7019 = vst [vmem:[#allocation25_spill] sm:$0xff] %v5411_v23  ;;  %7020 = vst [vmem:[#allocation26_spill] sm:$0xff] %v5416_v24  ;;  %3996 = vmatmul.mubr.msk.f32.vlgmr.msra.gmra.mrb[0].mxu0 %vm184_vm0, %v5332_v4  ;;  %v5432_v28 = vld [vmem:[%s6962_s0 + $0xa8] sm:$0xff]  ;;  %v5441_v30 = vld [vmem:[%s6962_s0 + $0xb0] sm:$0xff] }
  0x9a   :  { %3998 = vmatprep.mubr.msk.f32.mxu0 %vm184_vm0, %v5339_v5  ;;  %7021 = vst [vmem:[#allocation27_spill] sm:$0xff] %v5441_v30  ;;  %v5446_v31 = vld [vmem:[%s6962_s0 + $0xb8] sm:$0xff]  ;;  %v5451_v32 = vld [vmem:[%s6962_s0 + $0x20] sm:$0xff]  ;;  %v5458_v34 = vld [vmem:[%s6962_s0 + $0xc8] sm:$0xff] }
  0x9b   :  { %7022 = vst [vmem:[#allocation28_spill] sm:$0xff] %v5458_v34  ;;  %v5463_v35 = vld [vmem:[%s6962_s0 + $0xd0] sm:$0xff]  ;;  %v5470_v37 = vld [vmem:[%s6962_s0 + $0xd8] sm:$0xff]  ;;  %v5475_v38 = vld [vmem:[%s6962_s0 + $0xe0] sm:$0xff] }
  0x9c   :  { %7023 = vst [vmem:[#allocation29_spill] sm:$0xff] %v5463_v35  ;;  %7024 = vst [vmem:[#allocation30_spill] sm:$0xff] %v5470_v37  ;;  %v5480_v39 = vld [vmem:[%s6962_s0 + $0xf0] sm:$0xff]  ;;  %v5489_v41 = vld [vmem:[%s6962_s0 + $0xf8] sm:$0xff] }
  0x9d   :  { %7025 = vst [vmem:[#allocation31_spill] sm:$0xff] %v5475_v38  ;;  %7026 = vst [vmem:[#allocation32_spill] sm:$0xff] %v5480_v39  ;;  %3999 = vmatmul.mubr.msk.f32.gmra.mrb[2].mxu0 %vm184_vm0, %v5344_v6  ;;  %v5494_v42 = vld [vmem:[%s6962_s0 + $0x100] sm:$0xff]  ;;  %v5499_v43 = vld [vmem:[%s6962_s0 + $0x108] sm:$0xff] }
  0x9e   :  { %7027 = vst [vmem:[#allocation33_spill] sm:$0xff] %v5489_v41  ;;  %7028 = vst [vmem:[#allocation34_spill] sm:$0xff] %v5494_v42  ;;  %4001 = vmatprep.mubr.msk.f32.mxu0 %vm184_vm0, %v5451_v32  ;;  %v5510_v46 = vld [vmem:[%s6962_s0 + $0x118] sm:$0xff]  ;;  %v5515_v47 = vld [vmem:[%s6962_s0 + $0x120] sm:$0xff] }
  0x9f   :  { %7029 = vst [vmem:[#allocation35_spill] sm:$0xff] %v5499_v43  ;;  %7030 = vst [vmem:[#allocation36_spill] sm:$0xff] %v5510_v46  ;;  %v5530_v49 = vld [vmem:[%s6962_s0 + $0x48] sm:$0xff]  ;;  %v156_v50 = vld [vmem:[%s6962_s0 + $0x70] sm:$0xff] }
  0xa0   :  { %7031 = vst [vmem:[#allocation37_spill] sm:$0xff] %v5515_v47  ;;  %v161_v51 = vld [vmem:[%s6962_s0 + $0x98] sm:$0xff]  ;;  %v166_v52 = vld [vmem:[%s6962_s0 + $0xc0] sm:$0xff]  ;;  %v171_v53 = vld [vmem:[%s6962_s0 + $0xe8] sm:$0xff] }
  0xa1   :  { %4002 = vmatmul.mubr.msk.f32.gmra.mrb[4].mxu0 %vm184_vm0, %v5353_v9  ;;  %v176_v54 = vld [vmem:[%s6962_s0 + $0x110] sm:$0xff]  ;;  %v179_v55 = vld [vmem:[%s6962_s0 + $0x128] sm:$0xff]  ;;  %v181_v57 = vld [vmem:[%s6962_s0 + $0x138] sm:$0xff]  ;;  %v7000_v9 = vlaneseq }
  0xa2   :  { %4004 = vmatprep.mubr.msk.f32.mxu0 %vm184_vm0, %v5358_v10  ;;  %v180_v56 = vld [vmem:[%s6962_s0 + $0x130] sm:$0xff]  ;;  %vm5618_vm2 = vmpackc.low %vm184_vm0, %vm184_vm0  ;;  %v1491_v10 = vld [vmem:[%s6963_s1] sm:$0x1] }
  0xa3   :  { %vm1499_vm3 = vcmp.eq.f32.partialorder %v1491_v10, 0.0 }
  0xa5   :  { %4005 = vmatmul.mubr.msk.f32.gmra.mrb[6].mxu0 %vm184_vm0, %v5365_v12 }
  0xa6   :  { %4007 = vmatprep.mubr.msk.f32.mxu0 %vm184_vm0, %v5370_v13 }
  0xa9   :  { %4008 = vmatmul.mubr.msk.f32.gmra.mrb[8].mxu0 %vm184_vm0, %v5530_v49 }
  0xaa   :  { %4010 = vmatprep.mubr.msk.f32.mxu0 %vm184_vm0, %v5377_v15 }
  0xad   :  { %4011 = vmatmul.mubr.msk.f32.gmra.mrb[10].mxu0 %vm184_vm0, %v5382_v16 }
  0xae   :  { %4013 = vmatprep.mubr.msk.f32.mxu0 %vm184_vm0, %v5389_v18 }
  0xb1   :  { %4014 = vmatmul.mubr.msk.f32.gmra.mrb[12].mxu0 %vm184_vm0, %v5394_v19 }
  0xb2   :  { %4016 = vmatprep.mubr.msk.f32.mxu0 %vm184_vm0, %v156_v50 }
  0xb5   :  { %4017 = vmatmul.mubr.msk.f32.gmra.mrb[14].mxu0 %vm184_vm0, %v5399_v20 }
  0xb6   :  { %4019 = vmatprep.mubr.msk.f32.mxu0 %vm184_vm0, %v5406_v22 }
  0xb9   :  { %4020 = vmatmul.mubr.msk.f32.gmra.mrb[16].mxu0 %vm184_vm0, %v5411_v23 }
  0xba   :  { %4022 = vmatprep.mubr.msk.f32.mxu0 %vm184_vm0, %v5416_v24 }
  0xbd   :  { %4023 = vmatmul.mubr.msk.f32.gmra.mrb[18].mxu0 %vm184_vm0, %v161_v51 }
  0xbe   :  { %4025 = vmatprep.mubr.msk.f32.mxu0 %vm184_vm0, %v5427_v27 }
  0xc1   :  { %4026 = vmatmul.mubr.msk.f32.gmra.mrb[20].mxu0 %vm184_vm0, %v5432_v28 }
  0xc2   :  { %4028 = vmatprep.mubr.msk.f32.mxu0 %vm184_vm0, %v5441_v30 }
  0xc5   :  { %4029 = vmatmul.mubr.msk.f32.gmra.mrb[22].mxu0 %vm184_vm0, %v5446_v31 }
  0xc6   :  { %4031 = vmatprep.mubr.msk.f32.mxu0 %vm184_vm0, %v166_v52 }
  0xc9   :  { %4032 = vmatmul.mubr.msk.f32.gmra.mrb[24].mxu0 %vm184_vm0, %v5458_v34 }
  0xca   :  { %4034 = vmatprep.mubr.msk.f32.mxu0 %vm184_vm0, %v5463_v35 }
  0xcd   :  { %4035 = vmatmul.mubr.msk.f32.gmra.mrb[26].mxu0 %vm184_vm0, %v5470_v37 }
  0xce   :  { %4037 = vmatprep.mubr.msk.f32.mxu0 %vm184_vm0, %v5475_v38 }
  0xd1   :  { %4038 = vmatmul.mubr.msk.f32.gmra.mrb[28].mxu0 %vm184_vm0, %v171_v53 }
  0xd2   :  { %4040 = vmatprep.mubr.msk.f32.mxu0 %vm184_vm0, %v5480_v39 }
  0xd5   :  { %4041 = vmatmul.mubr.msk.f32.gmra.mrb[30].mxu0 %vm184_vm0, %v5489_v41 }
  0xd6   :  { %4043 = vmatprep.mubr.msk.f32.mxu0 %vm184_vm0, %v5494_v42 }
  0xd9   :  { %4044 = vmatmul.mubr.msk.f32.gmra.mrb[32].mxu0 %vm184_vm0, %v5499_v43 }
  0xda   :  { %4046 = vmatprep.mubr.msk.f32.mxu0 %vm184_vm0, %v176_v54 }
  0xdd   :  { %4047 = vmatmul.mubr.msk.f32.gmra.mrb[34].mxu0 %vm184_vm0, %v5510_v46 }
  0xde   :  { %4049 = vmatprep.mubr.msk.f32.mxu0 %vm184_vm0, %v5515_v47 }
  0xe1   :  { %4050 = vmatmul.mubr.msk.f32.gmra.mrb[36].mxu0 %vm184_vm0, %v179_v55 }
  0xe2   :  { %4052 = vmatprep.mubr.msk.f32.mxu0 %vm184_vm0, %v180_v56 }
  0xe5   :  { %4053 = vmatmul.mubr.msk.f32.gmra.mrb[38].mxu0 %vm184_vm0, %v181_v57 }
  0xe6   :  { %4165 = vmatprep.mubr.msk.f32.mxu0 %vm5126_vm1, %v6997_v59 }
 0x16c   :  { %v3997_v60 = vpop.f32.mrb[0].mxu0 }
 0x16d   :  { %v571_v61 = vmax.f32 %v3997_v60, 0.0  ;;  %v371_v62 = vpop.f32.mrb[1].mxu0 }
 0x16e   :  { %v570_v63 = vmax.f32 %v371_v62, 0.0 }
 0x170   :  { %v4552_v1 = vpack.c.bf16 %v571_v61, %v570_v63  ;;  %v4000_v3 = vpop.f32.mrb[2].mxu0 }
 0x171   :  { %v573_v50 = vmax.f32 %v4000_v3, 0.0  ;;  %v381_v51 = vpop.f32.mrb[3].mxu0 }
 0x172   :  { %v572_v52 = vmax.f32 %v381_v51, 0.0  ;;  %4554 = vmatpush3.bf16.xpose.msk.msra.mxu1 %vm5618_vm2, %v4552_v1 }
 0x173   :  { %4555 = vmatprep.subr.bf16.mxu1 %v6986_v58 }
 0x174   :  { %v4556_v53 = vpack.c.bf16 %v573_v50, %v572_v52  ;;  %v5625_v54 = vpop.f32.mrb[4].mxu0 }
 0x175   :  { %v391_v55 = vpop.f32.mrb[5].mxu0  ;;  %v575_v60 = vmax.f32 %v5625_v54, 0.0 }
 0x176   :  { %v574_v36 = vmax.f32 %v391_v55, 0.0 }
 0x178   :  { %v5627_v56 = vpop.f32.mrb[6].mxu0 }
 0x179   :  { %v5629_v57 = vpop.f32.mrb[7].mxu0  ;;  %v6983_v48 = vmax.f32 %v5627_v56, 0.0 }
 0x17a   :  { %v576_v62 = vmax.f32 %v5629_v57, 0.0  ;;  %4558 = vmatpush3.bf16.xpose.msk.msra.mxu1 %vm5618_vm2, %v4556_v53 }
 0x17b   :  { %4063 = vmatprep.subr.mxu1 %v6997_v59 }
 0x17c   :  { %v4560_v1 = vpack.c.bf16 %v576_v62, %v575_v60  ;;  %v5638_v3 = vpop.f32.mrb[8].mxu0 }
 0x17d   :  { %v5640_v51 = vpop.f32.mrb[9].mxu0 }
 0x17e   :  { %v6980_v40 = vmax.f32 %v5640_v51, 0.0 }
 0x180   :  { %v4564_v54 = vpack.c.bf16 %v6980_v40, %v6983_v48  ;;  %v5648_v53 = vpop.f32.mrb[10].mxu0 }
 0x181   :  { %v6976_v26 = vmax.f32 %v5648_v53, 0.0  ;;  %v5651_v25 = vpop.f32.mrb[11].mxu0 }
 0x182   :  { %v6979_v45 = vmax.f32 %v5651_v25, 0.0  ;;  %4064 = vmatpush3.xpose.msk.msra.mxu1 %vm184_vm0, %v574_v36 }
 0x183   :  { %4559 = vmatprep.subr.bf16.mxu1 %v6986_v58 }
 0x184   :  { %v4568_v55 = vpack.c.bf16 %v6976_v26, %v6979_v45  ;;  %v5660_v44 = vpop.f32.mrb[12].mxu0  ;;  %v579_v26 = vmax.f32 %v5638_v3, 0.0 }
 0x185   :  { %v6974_v33 = vmax.f32 %v5660_v44, 0.0  ;;  %v5663_v29 = vpop.f32.mrb[13].mxu0  ;;  %4066 = vmatmul.mubr.msk.f32.vlgmr.msra.gmra.mrb[0].mxu1 %vm184_vm0, %v570_v63 }
 0x186   :  { %v6975_v21 = vmax.f32 %v5663_v29, 0.0  ;;  %4562 = vmatpush3.bf16.xpose.msk.msra.mxu1 %vm5618_vm2, %v4560_v1  ;;  %4068 = vmatprep.mubr.msk.f32.mxu1 %vm5126_vm1, %v6997_v59 }
 0x187   :  { %4563 = vmatprep.subr.bf16.mxu1 %v6986_v58 }
 0x188   :  { %v4572_v17 = vpack.c.bf16 %v6974_v33, %v6975_v21  ;;  %v5676_v14 = vpop.f32.mrb[14].mxu0 }
 0x189   :  { %v5678_v11 = vpop.f32.mrb[15].mxu0  ;;  %4069 = vmatmul.mubr.msk.f32.gmra.mrb[2].mxu1 %vm184_vm0, %v571_v61  ;;  %v6978_v8 = vmax.f32 %v5676_v14, 0.0 }
 0x18a   :  { %4071 = vmatprep.mubr.msk.f32.mxu1 %vm5126_vm1, %v6997_v59 }
 0x18c   :  { %v5683_v63 = vpop.f32.mrb[16].mxu0 }
 0x18d   :  { %v5685_v1 = vpop.f32.mrb[17].mxu0  ;;  %4072 = vmatmul.mubr.msk.f32.gmra.mrb[4].mxu1 %vm184_vm0, %v572_v52  ;;  %v6982_v21 = vmax.f32 %v5683_v63, 0.0 }
 0x18e   :  { %v6977_v7 = vmax.f32 %v5685_v1, 0.0  ;;  %4566 = vmatpush3.bf16.xpose.msk.msra.mxu1 %vm5618_vm2, %v4564_v54  ;;  %4074 = vmatprep.mubr.msk.f32.mxu1 %vm5126_vm1, %v6997_v59 }
 0x18f   :  { %4088 = vmatprep.subr.mxu1 %v6997_v59 }
 0x190   :  { %v5699_v61 = vpack.c.bf16 %v6977_v7, %v6978_v8  ;;  %v5701_v33 = vpop.f32.mrb[18].mxu0 }
 0x191   :  { %v5703_v52 = vpop.f32.mrb[19].mxu0  ;;  %4075 = vmatmul.mubr.msk.f32.gmra.mrb[6].mxu1 %vm184_vm0, %v573_v50 }
 0x192   :  { %v6981_v54 = vmax.f32 %v5703_v52, 0.0  ;;  %4077 = vmatprep.mubr.msk.f32.mxu1 %vm5126_vm1, %v6997_v59 }
 0x194   :  { %v5715_v7 = vpack.c.bf16 %v6981_v54, %v6982_v21  ;;  %v5717_v8 = vpop.f32.mrb[20].mxu0 }
 0x195   :  { %v6985_v45 = vmax.f32 %v5717_v8, 0.0  ;;  %v471_v50 = vpop.f32.mrb[21].mxu0  ;;  %4078 = vmatmul.mubr.msk.f32.gmra.mrb[8].mxu1 %vm184_vm0, %v574_v36 }
 0x196   :  { %v590_v40 = vmax.f32 %v471_v50, 0.0  ;;  %4089 = vmatpush3.xpose.msk.msra.mxu1 %vm184_vm0, %v579_v26  ;;  %4090 = vmatprep.mubr.msk.f32.mxu1 %vm5126_vm1, %v6997_v59 }
 0x197   :  { %4567 = vmatprep.subr.bf16.mxu1 %v6986_v58 }
 0x198   :  { %v4584_v3 = vpack.c.bf16 %v6985_v45, %v590_v40  ;;  %v5727_v54 = vpop.f32.mrb[22].mxu0 }
 0x199   :  { %4091 = vmatmul.mubr.msk.f32.vlgmr.msra.gmra.mrb[10].mxu1 %vm184_vm0, %v575_v60  ;;  %v6984_v21 = vmax.f32 %v5727_v54, 0.0  ;;  %v5731_v48 = vpop.f32.mrb[23].mxu0 }
 0x19a   :  { %4570 = vmatpush3.bf16.xpose.msk.msra.mxu1 %vm5618_vm2, %v4568_v55  ;;  %4586 = vmatpush3.bf16.xpose.msk.msra.mxu0 %vm5618_vm2, %v4584_v3  ;;  %v592_v36 = vmax.f32 %v5731_v48, 0.0  ;;  %v7034_v3 = vmax.f32 %v5627_v56, 0.0 }
 0x19b   :  { %4093 = vmatprep.mubr.msk.f32.mxu1 %vm5126_vm1, %v6997_v59  ;;  %4571 = vmatprep.subr.bf16.mxu1 %v6986_v58 }
 0x19c   :  { %v4588_v60 = vpack.c.bf16 %v6984_v21, %v592_v36  ;;  %4587 = vmatprep.subr.bf16.mxu0 %v6986_v58  ;;  %v5744_v50 = vpop.f32.mrb[24].mxu0 }
 0x19d   :  { %4094 = vmatmul.mubr.msk.f32.gmra.mrb[12].mxu1 %vm184_vm0, %v576_v62  ;;  %v5749_v55 = vpop.f32.mrb[25].mxu0  ;;  %v6989_v45 = vmax.f32 %v5744_v50, 0.0 }
 0x19e   :  { %4096 = vmatprep.mubr.msk.f32.mxu1 %vm5126_vm1, %v6997_v59 }
 0x1a0   :  { %v5753_v48 = vpop.f32.mrb[26].mxu0 }
 0x1a1   :  { %4097 = vmatmul.mubr.msk.f32.gmra.mrb[14].mxu1 %vm184_vm0, %v7034_v3  ;;  %v5758_v21 = vpop.f32.mrb[27].mxu0  ;;  %v6994_v3 = vmax.f32 %v5753_v48, 0.0 }
 0x1a2   :  { %4574 = vmatpush3.bf16.xpose.msk.msra.mxu1 %vm5618_vm2, %v4572_v17  ;;  %4590 = vmatpush3.bf16.xpose.msk.msra.mxu0 %vm5618_vm2, %v4588_v60  ;;  %v6988_v57 = vmax.f32 %v5758_v21, 0.0  ;;  %v7035_v17 = vmax.f32 %v5640_v51, 0.0 }
 0x1a3   :  { %4099 = vmatprep.mubr.msk.f32.mxu1 %vm5126_vm1, %v6997_v59  ;;  %4113 = vmatprep.subr.mxu1 %v6997_v59 }
 0x1a4   :  { %v5773_v56 = vpack.c.bf16 %v6988_v57, %v6989_v45  ;;  %v5775_v62 = vpop.f32.mrb[28].mxu0  ;;  %4163 = vmatprep.subr.mxu0 %v6997_v59  ;;  %v584_v57 = vmax.f32 %v5678_v11, 0.0  ;;  %v594_v45 = vmax.f32 %v5749_v55, 0.0  ;;  %v7036_v11 = vmov 0.0|0.0  }
 0x1a5   :  { %4100 = vmatmul.mubr.msk.f32.gmra.mrb[16].mxu1 %vm184_vm0, %v7035_v17  ;;  %v5781_v60 = vpop.f32.mrb[29].mxu0 }
 0x1a6   :  { %v6993_v58 = vmax.f32 %v5781_v60, 0.0  ;;  %4102 = vmatprep.mubr.msk.f32.mxu1 %vm5126_vm1, %v6997_v59 }
 0x1a8   :  { %v5793_v51 = vpack.c.bf16 %v6993_v58, %v6994_v3  ;;  %v5795_v17 = vpop.f32.mrb[30].mxu0  ;;  %v7037_v3 = vmax.f32 %v5651_v25, 0.0 }
 0x1a9   :  { %v6995_v46 = vmax.f32 %v5795_v17, 0.0  ;;  %v521_v47 = vpop.f32.mrb[31].mxu0  ;;  %4103 = vmatmul.mubr.msk.f32.gmra.mrb[18].mxu1 %vm184_vm0, %v579_v26 }
 0x1aa   :  { %v600_v37 = vmax.f32 %v521_v47, 0.0  ;;  %4114 = vmatpush3.xpose.msk.msra.mxu1 %vm184_vm0, %v584_v57  ;;  %4164 = vmatpush3.xpose.msk.msra.mxu0 %vm184_vm0, %v594_v45 }
 0x1ab   :  { %4115 = vmatprep.mubr.msk.f32.mxu1 %vm5126_vm1, %v6997_v59  ;;  %4575 = vmatprep.subr.bf16.mxu1 %v7036_v11 }
 0x1ac   :  { %v4600_v55 = vpack.c.bf16 %v6995_v46, %v600_v37  ;;  %4599 = vmatprep.subr.bf16.mxu0 %v7036_v11  ;;  %v5807_v58 = vpop.f32.mrb[32].mxu0 }
 0x1ad   :  { %4116 = vmatmul.mubr.msk.f32.vlgmr.msra.gmra.mrb[20].mxu1 %vm184_vm0, %v7037_v3  ;;  %4166 = vmatmul.mubr.msk.f32.vlgmr.msra.gmra.mrb[40].mxu0 %vm184_vm0, %v590_v40  ;;  %v6996_v26 = vmax.f32 %v5807_v58, 0.0  ;;  %v531_v47 = vpop.f32.mrb[33].mxu0  ;;  %v7039_v3 = vmax.f32 %v5717_v8, 0.0 }
 0x1ae   :  { %4578 = vmatpush3.bf16.xpose.msk.msra.mxu1 %vm5618_vm2, %v5699_v61  ;;  %4602 = vmatpush3.bf16.xpose.msk.msra.mxu0 %vm5618_vm2, %v4600_v55  ;;  %v602_v46 = vmax.f32 %v531_v47, 0.0  ;;  %v7038_v61 = vmax.f32 %v5648_v53, 0.0  ;;  %v7040_v53 = vmax.f32 %v5663_v29, 0.0  ;;  %v7043_v29 = vmov 0.0  }
 0x1af   :  { %4118 = vmatprep.mubr.msk.f32.mxu1 %vm5126_vm1, %v6997_v59  ;;  %4168 = vmatprep.mubr.msk.f32.mxu0 %vm5126_vm1, %v6997_v59 }
 0x1b0   :  { %v4604_v25 = vpack.c.bf16 %v6996_v26, %v602_v46  ;;  %4579 = vmatprep.subr.bf16.mxu1 %v7036_v11  ;;  %4603 = vmatprep.subr.bf16.mxu0 %v7036_v11  ;;  %v5827_v40 = vpop.f32.mrb[34].mxu0 }
 0x1b1   :  { %4119 = vmatmul.mubr.msk.f32.gmra.mrb[22].mxu1 %vm184_vm0, %v7038_v61  ;;  %4169 = vmatmul.mubr.msk.f32.gmra.mrb[42].mxu0 %vm184_vm0, %v7039_v3  ;;  %v5835_v55 = vpop.f32.mrb[35].mxu0  ;;  %v605_v47 = vmax.f32 %v5827_v40, 0.0  ;;  %v7042_v3 = vmax.f32 %v5727_v54, 0.0 }
 0x1b2   :  { %4121 = vmatprep.mubr.msk.f32.mxu1 %vm5126_vm1, %v6997_v59  ;;  %4171 = vmatprep.mubr.msk.f32.mxu0 %vm5126_vm1, %v6997_v59 }
 0x1b4   :  { %v5842_v26 = vpop.f32.mrb[36].mxu0 }
 0x1b5   :  { %4122 = vmatmul.mubr.msk.f32.gmra.mrb[24].mxu1 %vm184_vm0, %v7040_v53  ;;  %4172 = vmatmul.mubr.msk.f32.gmra.mrb[44].mxu0 %vm184_vm0, %v592_v36  ;;  %v5848_v8 = vpop.f32.mrb[37].mxu0 }
 0x1b6   :  { %4582 = vmatpush3.bf16.xpose.msk.msra.mxu1 %vm5618_vm2, %v5715_v7  ;;  %4606 = vmatpush3.bf16.xpose.msk.msra.mxu0 %vm5618_vm2, %v4604_v25  ;;  %v6999_v61 = vmax.f32 %v5848_v8, 0.0  ;;  %v7041_v25 = vmax.f32 %v5660_v44, 0.0  ;;  %v589_v44 = vmax.f32 %v5701_v33, 0.0  ;;  %v7045_v33 = vmax.f32 %v5676_v14, 0.0 }
 0x1b7   :  { %4124 = vmatprep.mubr.msk.f32.mxu1 %vm5126_vm1, %v6997_v59  ;;  %4174 = vmatprep.mubr.msk.f32.mxu0 %vm5126_vm1, %v6997_v59  ;;  %v7047_v14 = vmax.f32 %v5685_v1, 0.0  ;;  %v7058_v1 = vmax.f32 %v5848_v8, 0.0 }
 0x1b8   :  { %4138 = vmatprep.subr.mxu1 %v6997_v59  ;;  %4213 = vmatprep.subr.mxu0 %v6997_v59  ;;  %v4608_v7 = vpack.c.bf16 %v6999_v61, %v605_v47  ;;  %v5867_v36 = vpop.f32.mrb[38].mxu0  ;;  %v604_v59 = vmax.f32 %v5835_v55, 0.0 }
 0x1b9   :  { %4125 = vmatmul.mubr.msk.f32.gmra.mrb[26].mxu1 %vm184_vm0, %v7041_v25  ;;  %4175 = vmatmul.mubr.msk.f32.gmra.mrb[46].mxu0 %vm184_vm0, %v7042_v3  ;;  %v5875_v53 = vpop.f32.mrb[39].mxu0  ;;  %v7044_v25 = vmax.f32 %v5842_v26, 0.0 }
 0x1ba   :  { %4127 = vmatprep.mubr.msk.f32.mxu1 %vm5126_vm1, %v7043_v29  ;;  %4177 = vmatprep.mubr.msk.f32.mxu0 %vm5126_vm1, %v7043_v29  ;;  %v608_v61 = vmax.f32 %v5875_v53, 0.0 }
 0x1bc   :  { %v4612_v54 = vpack.c.bf16 %v608_v61, %v7044_v25 }
 0x1bd   :  { %4128 = vmatmul.mubr.msk.f32.gmra.mrb[28].mxu1 %vm184_vm0, %v584_v57  ;;  %4178 = vmatmul.mubr.msk.f32.gmra.mrb[48].mxu0 %vm184_vm0, %v594_v45  ;;  %v7046_v45 = vpack.c.bf16 %v5332_v4, %v5327_v2  ;;  %v7049_v2 = vpack.c.bf16 %v5344_v6, %v5339_v5  ;;  %v7050_v4 = vmax.f32 %v5683_v63, 0.0  ;;  %v7051_v5 = vmax.f32 %v5703_v52, 0.0 }
 0x1be   :  { %4139 = vmatpush3.xpose.msk.msra.mxu1 %vm184_vm0, %v589_v44  ;;  %4214 = vmatpush3.xpose.msk.msra.mxu0 %vm184_vm0, %v604_v59  ;;  %v7052_v6 = vmax.f32 %v5807_v58, 0.0  ;;  %v7054_v58 = vmax.f32 %v5758_v21, 0.0  ;;  %v7056_v63 = vmax.f32 %v5781_v60, 0.0  ;;  %v609_v21 = vmax.f32 %v5867_v36, 0.0 }
 0x1bf   :  { %4140 = vmatprep.mubr.msk.f32.mxu1 %vm5126_vm1, %v7043_v29  ;;  %4215 = vmatprep.mubr.msk.f32.mxu0 %vm5126_vm1, %v7043_v29  ;;  %v7059_v52 = vpack.c.bf16 %v5370_v13, %v5365_v12  ;;  %v6030_v12 = vshrl.u32 %v7000_v9, 7 }
 0x1c0   :  { %4591 = vmatprep.subr.bf16.mxu1 %v7036_v11  ;;  %4615 = vmatprep.subr.bf16.mxu0 %v7036_v11 }
 0x1c1   :  { %4141 = vmatmul.mubr.msk.f32.vlgmr.msra.gmra.mrb[30].mxu1 %vm184_vm0, %v7045_v33  ;;  %4216 = vmatmul.mubr.msk.f32.vlgmr.msra.gmra.mrb[50].mxu0 %vm184_vm0, %v600_v37  ;;  %v7048_v37 = vmax.f32 %v5795_v17, 0.0  ;;  %7061 = vst [vmem:[#allocation38_spill] sm:$0xff] %v6030_v12  ;;  %v6033_v13 = vsub.s32 0, %v6030_v12 }
 0x1c2   :  { %4594 = vmatpush3.bf16.xpose.msk.msra.mxu1 %vm5618_vm2, %v5773_v56  ;;  %4143 = vmatprep.mubr.msk.f32.mxu1 %vm5126_vm1, %v7043_v29 }
 0x1c3   :  { %4218 = vmatprep.mubr.msk.f32.mxu0 %vm5126_vm1, %v7043_v29  ;;  %4595 = vmatprep.subr.bf16.mxu1 %v7036_v11 }
 0x1c4   :  { %4617 = vmatpush3.bf16.msra.mxu0 %v7046_v45 }
 0x1c5   :  { %4144 = vmatmul.mubr.msk.f32.gmra.mrb[32].mxu1 %vm184_vm0, %v7047_v14  ;;  %4219 = vmatmul.mubr.msk.f32.gmra.mrb[52].mxu0 %vm184_vm0, %v7048_v37 }
 0x1c6   :  { %4146 = vmatprep.mubr.msk.f32.mxu1 %vm5126_vm1, %v7043_v29  ;;  %4221 = vmatprep.mubr.msk.f32.mxu0 %vm5126_vm1, %v7043_v29 }
 0x1c7   :  { %4618 = vmatprep.subr.bf16.mxu0 %v7036_v11 }
 0x1c8   :  { %4620 = vmatpush3.bf16.msra.mxu0 %v7049_v2 }
 0x1c9   :  { %4147 = vmatmul.mubr.msk.f32.gmra.mrb[34].mxu1 %vm184_vm0, %v7050_v4  ;;  %4222 = vmatmul.mubr.msk.f32.gmra.mrb[54].mxu0 %vm184_vm0, %v602_v46  ;;  %v599_v46 = vmax.f32 %v5775_v62, 0.0 }
 0x1ca   :  { %4598 = vmatpush3.bf16.xpose.msk.msra.mxu1 %vm5618_vm2, %v5793_v51  ;;  %4149 = vmatprep.mubr.msk.f32.mxu1 %vm5126_vm1, %v7043_v29 }
 0x1cb   :  { %4224 = vmatprep.mubr.msk.f32.mxu0 %vm5126_vm1, %v7043_v29  ;;  %4188 = vmatprep.subr.mxu1 %v7043_v29 }
 0x1cc   :  { %4263 = vmatprep.subr.mxu0 %v7043_v29 }
 0x1cd   :  { %4150 = vmatmul.mubr.msk.f32.gmra.mrb[36].mxu1 %vm184_vm0, %v7051_v5  ;;  %4225 = vmatmul.mubr.msk.f32.gmra.mrb[56].mxu0 %vm184_vm0, %v7052_v6 }
 0x1ce   :  { %4152 = vmatprep.mubr.msk.f32.mxu1 %vm5126_vm1, %v7043_v29  ;;  %4227 = vmatprep.mubr.msk.f32.mxu0 %vm5126_vm1, %v7043_v29 }
 0x1cf   :  { %4264 = vmatpush3.msra.mxu0 %v5451_v32  ;;  %v7053_v32 = vmax.f32 %v5744_v50, 0.0  ;;  %v7060_v50 = vmov %v7044_v25 }
 0x1d0   :  { %4627 = vmatprep.subr.bf16.mxu0 %v7036_v11 }
 0x1d1   :  { %4153 = vmatmul.mubr.msk.f32.gmra.mrb[38].mxu1 %vm184_vm0, %v589_v44  ;;  %4228 = vmatmul.mubr.msk.f32.gmra.mrb[58].mxu0 %vm184_vm0, %v604_v59  ;;  %v7055_v59 = vmax.f32 %v5753_v48, 0.0 }
 0x1d2   :  { %4189 = vmatpush3.xpose.msk.msra.mxu1 %vm184_vm0, %v599_v46  ;;  %4190 = vmatprep.mubr.msk.f32.mxu1 %vm5126_vm1, %v7043_v29 }
 0x1d3   :  { %4607 = vmatprep.subr.bf16.mxu1 %v7036_v11  ;;  %4265 = vmatprep.mubr.msk.f32.mxu0 %vm5126_vm1, %v7043_v29 }
 0x1d5   :  { %4191 = vmatmul.mubr.msk.f32.vlgmr.msra.gmra.mrb[40].mxu1 %vm184_vm0, %v7053_v32 }
 0x1d6   :  { %4193 = vmatprep.mubr.msk.f32.mxu1 %vm5126_vm1, %v7043_v29  ;;  %4610 = vmatpush3.bf16.xpose.msk.msra.mxu1 %vm5618_vm2, %v4608_v7 }
 0x1d7   :  { %4611 = vmatprep.subr.bf16.mxu1 %v7036_v11 }
 0x1d9   :  { %4194 = vmatmul.mubr.msk.f32.gmra.mrb[42].mxu1 %vm184_vm0, %v7054_v58 }
 0x1da   :  { %4196 = vmatprep.mubr.msk.f32.mxu1 %vm5126_vm1, %v7043_v29 }
 0x1dd   :  { %4197 = vmatmul.mubr.msk.f32.gmra.mrb[44].mxu1 %vm184_vm0, %v7055_v59 }
 0x1de   :  { %4199 = vmatprep.mubr.msk.f32.mxu1 %vm5126_vm1, %v7043_v29  ;;  %4614 = vmatpush3.bf16.xpose.msk.msra.mxu1 %vm5618_vm2, %v4612_v54 }
 0x1df   :  { %4238 = vmatprep.subr.mxu1 %v7043_v29 }
 0x1e1   :  { %4200 = vmatmul.mubr.msk.f32.gmra.mrb[46].mxu1 %vm184_vm0, %v7056_v63  ;;  %v1493_v63 = vld [vmem:[%s6963_s1 + $0x2] sm:$0x1] }
 0x1e2   :  { %4202 = vmatprep.mubr.msk.f32.mxu1 %vm5126_vm1, %v7043_v29  ;;  %vm1501_vm6 = vcmp.eq.f32.partialorder %v1493_v63, 0.0 }
 0x1e5   :  { %4203 = vmatmul.mubr.msk.f32.gmra.mrb[48].mxu1 %vm184_vm0, %v599_v46 }
 0x1e6   :  { %4239 = vmatpush3.xpose.msk.msra.mxu1 %vm184_vm0, %v609_v21  ;;  %4240 = vmatprep.mubr.msk.f32.mxu1 %vm5126_vm1, %v7043_v29 }
 0x1e7   :  { %4621 = vmatprep.subr.bf16.mxu1 %v7036_v11 }
 0x1e9   :  { %4241 = vmatmul.mubr.msk.f32.vlgmr.msra.gmra.mrb[50].mxu1 %vm184_vm0, %v605_v47 }
 0x1ea   :  { %4243 = vmatprep.mubr.msk.f32.mxu1 %vm5126_vm1, %v7043_v29  ;;  %4623 = vmatpush3.bf16.msra.mxu1 %v7057_v0 }
 0x1eb   :  { %4624 = vmatprep.subr.bf16.mxu1 %v7036_v11 }
 0x1ed   :  { %4244 = vmatmul.mubr.msk.f32.gmra.mrb[52].mxu1 %vm184_vm0, %v7058_v1 }
 0x1ee   :  { %4246 = vmatprep.mubr.msk.f32.mxu1 %vm5126_vm1, %v7043_v29  ;;  %4626 = vmatpush3.bf16.msra.mxu1 %v7059_v52 }
 0x1ef   :  { %4288 = vmatprep.subr.mxu1 %v7043_v29 }
 0x1f1   :  { %4247 = vmatmul.mubr.msk.f32.gmra.mrb[54].mxu1 %vm184_vm0, %v7060_v50 }
 0x1f2   :  { %4249 = vmatprep.mubr.msk.f32.mxu1 %vm5126_vm1, %v7043_v29  ;;  %4289 = vmatpush3.msra.mxu1 %v5530_v49  ;;  %v7001_v49 = vmov 0  }
 0x1f3   :  { %4633 = vmatprep.subr.bf16.mxu1 %v7036_v11  ;;  %v1507_v48 = vsel %vm1499_vm3, 1, %v7001_v49  ;;  %v1509_v50 = vsel %vm1501_vm6, 1, %v7001_v49 }
 0x1f4   :  { %v1518_v57 = vrot.slane %v1507_v48, %v6033_v13  ;;  %v1526_v48 = vrot.slane %v1509_v50, %v6033_v13 }
 0x1f5   :  { %4250 = vmatmul.mubr.msk.f32.gmra.mrb[56].mxu1 %vm184_vm0, %v608_v61 }
 0x1f6   :  { %4252 = vmatprep.mubr.msk.f32.mxu1 %vm5126_vm1, %v7043_v29  ;;  %vm6037_vm4 = vcmp.eq.s32.totalorder %v1518_v57, 1  ;;  %vm6086_vm7 = vcmp.eq.s32.totalorder %v1526_v48, 1 }
 0x1f9   :  { %4253 = vmatmul.mubr.msk.f32.gmra.mrb[58].mxu1 %vm184_vm0, %v609_v21 }
 0x1fa   :  { %4290 = vmatprep.mubr.msk.f32.mxu1 %vm5126_vm1, %v7043_v29 }
 0x258   :  { %v691_v56 = vpop.f32.mrb[0].mxu1 }
 0x259   :  { %v1451_v60 = vmul.f32 0.25, %v691_v56  ;;  %v4067_v51 = vpop.f32.mrb[1].mxu1 }
 0x25a   :  { %v1495_v51 = vld [vmem:[%s6963_s1 + $0x4] sm:$0x1] }
 0x25b   :  { %v6043_v17 = vsel %vm6037_vm4, -1e+09, %v1451_v60  ;;  %vm1503_vm8 = vcmp.eq.f32.partialorder %v1495_v51, 0.0 }
 0x25c   :  { %v696_v26 = vpop.f32.mrb[2].mxu1  ;;  %v1596_v40 = vsel %vm1595_vm5, %v6043_v17, -inf }
 0x25d   :  { %v1452_v55 = vmul.f32 0.25, %v696_v26  ;;  %1597 = vmax.xlane.f32.xlu0 %v1596_v40  ;;  %v4070_v47 = vpop.f32.mrb[3].mxu1 }
 0x25f   :  { %v6049_v8 = vsel %vm6037_vm4, -1e+09, %v1452_v55 }
 0x260   :  { %v701_v61 = vpop.f32.mrb[4].mxu1  ;;  %v1599_v7 = vsel %vm1595_vm5, %v6049_v8, -inf }
 0x261   :  { %v1453_v36 = vmul.f32 0.25, %v701_v61  ;;  %1600 = vmax.xlane.f32.xlu0 %v1599_v7  ;;  %v4073_v3 = vpop.f32.mrb[5].mxu1 }
 0x263   :  { %v6055_v53 = vsel %vm6037_vm4, -1e+09, %v1453_v36 }
 0x264   :  { %v706_v44 = vpop.f32.mrb[6].mxu1  ;;  %v1602_v25 = vsel %vm1595_vm5, %v6055_v53, -inf }
 0x265   :  { %v1454_v54 = vmul.f32 0.25, %v706_v44  ;;  %1603 = vmax.xlane.f32.xlu1 %v1602_v25  ;;  %v4076_v33 = vpop.f32.mrb[7].mxu1 }
 0x267   :  { %v6061_v45 = vsel %vm6037_vm4, -1e+09, %v1454_v54  ;;  %v1511_v54 = vsel %vm1503_vm8, 1, %v7001_v49  ;;  %vm5129_vm8 = vmmov 1  }
 0x268   :  { %v711_v14 = vpop.f32.mrb[8].mxu1  ;;  %v1605_v37 = vsel %vm1595_vm5, %v6061_v45, -inf }
 0x269   :  { %v1455_v2 = vmul.f32 0.25, %v711_v14  ;;  %1606 = vmax.xlane.f32.xlu1 %v1605_v37  ;;  %v4079_v4 = vpop.f32.mrb[9].mxu1 }
 0x26b   :  { %v6067_v5 = vsel %vm6037_vm4, -1e+09, %v1455_v2 }
 0x26c   :  { %v6069_v6 = vpop.f32.mrb[10].mxu1  ;;  %v1608_v46 = vsel %vm1595_vm5, %v6067_v5, -inf }
 0x26d   :  { %1609 = vmax.xlane.f32.xlu0 %v1608_v46  ;;  %v4092_v32 = vpop.f32.mrb[11].mxu1 }
 0x270   :  { %v6073_v58 = vpop.f32.mrb[12].mxu1 }
 0x271   :  { %v4095_v59 = vpop.f32.mrb[13].mxu1 }
 0x272   :  { %v1534_v59 = vrot.slane %v1511_v54, %v6033_v13 }
 0x274   :  { %v6078_v21 = vpop.f32.mrb[14].mxu1  ;;  %vm6116_vm9 = vcmp.eq.s32.totalorder %v1534_v59, 1 }
 0x275   :  { %v4098_v0 = vpop.f32.mrb[15].mxu1 }
 0x278   :  { %v6080_v1 = vpop.f32.mrb[16].mxu1 }
 0x279   :  { %v4101_v52 = vpop.f32.mrb[17].mxu1 }
 0x27c   :  { %v6083_v10 = vpop.f32.mrb[18].mxu1 }
 0x27d   :  { %v4104_v57 = vpop.f32.mrb[19].mxu1 }
 0x27e   :  { %v1497_v57 = vld [vmem:[%s6963_s1 + $0x6] sm:$0x1] }
 0x27f   :  { %vm1505_vm10 = vcmp.eq.f32.partialorder %v1497_v57, 0.0 }
 0x280   :  { %v901_v56 = vpop.f32.mrb[20].mxu1  ;;  %v1111_v62 = vpop.f32.mrb[40].mxu0 }
 0x281   :  { %v1461_v26 = vmul.f32 0.25, %v901_v56  ;;  %v4117_v40 = vpop.f32.mrb[21].mxu1  ;;  %v4167_v55 = vpop.f32.mrb[41].mxu0  ;;  %v1471_v0 = vmul.f32 0.25, %v1111_v62 }
 0x283   :  { %v6095_v47 = vsel %vm6086_vm7, -1e+09, %v1461_v26 }
 0x284   :  { %v906_v61 = vpop.f32.mrb[22].mxu1  ;;  %v1116_v7 = vpop.f32.mrb[42].mxu0  ;;  %v1626_v36 = vsel %vm1595_vm5, %v6095_v47, -inf }
 0x285   :  { %v1462_v3 = vmul.f32 0.25, %v906_v61  ;;  %1627 = vmax.xlane.f32.xlu1 %v1626_v36  ;;  %v4120_v44 = vpop.f32.mrb[23].mxu1  ;;  %v4170_v25 = vpop.f32.mrb[43].mxu0  ;;  %v1472_v55 = vmul.f32 0.25, %v1116_v7 }
 0x287   :  { %v6102_v33 = vsel %vm6086_vm7, -1e+09, %v1462_v3  ;;  %v6128_v3 = vsel %vm6116_vm9, -1e+09, %v1471_v0 }
 0x288   :  { %v911_v14 = vpop.f32.mrb[24].mxu1  ;;  %v1121_v37 = vpop.f32.mrb[44].mxu0  ;;  %v1629_v2 = vsel %vm1595_vm5, %v6102_v33, -inf  ;;  %v1656_v7 = vsel %vm1595_vm5, %v6128_v3, -inf }
 0x289   :  { %v1463_v4 = vmul.f32 0.25, %v911_v14  ;;  %1630 = vmax.xlane.f32.xlu0 %v1629_v2  ;;  %v4123_v46 = vpop.f32.mrb[25].mxu1  ;;  %v4173_v32 = vpop.f32.mrb[45].mxu0  ;;  %v1473_v25 = vmul.f32 0.25, %v1121_v37  ;;  %v6143_v37 = vsel %vm6116_vm9, -1e+09, %v1472_v55 }
 0x28b   :  { %v6109_v63 = vsel %vm6086_vm7, -1e+09, %v1463_v4  ;;  %v1513_v4 = vsel %vm1505_vm10, 1, %v7001_v49  ;;  %v6147_v57 = vsel %vm6116_vm9, -1e+09, %v1473_v25  ;;  %vm3017_vm10 = vcmask 244736  }
 0x28c   :  { %v916_v52 = vpop.f32.mrb[26].mxu1  ;;  %v1126_v50 = vpop.f32.mrb[46].mxu0  ;;  %v1632_v48 = vsel %vm1595_vm5, %v6109_v63, -inf  ;;  %v1662_v55 = vsel %vm1595_vm5, %v6147_v57, -inf }
 0x28d   :  { %v1464_v56 = vmul.f32 0.25, %v916_v52  ;;  %1633 = vmax.xlane.f32.xlu1 %v1632_v48  ;;  %v4126_v51 = vpop.f32.mrb[27].mxu1  ;;  %v4176_v26 = vpop.f32.mrb[47].mxu0  ;;  %v1474_v32 = vmul.f32 0.25, %v1126_v50  ;;  %v1542_v50 = vrot.slane %v1513_v4, %v6033_v13 }
 0x28e   :  { %v1659_v51 = vsel %vm1595_vm5, %v6143_v37, -inf }
 0x28f   :  { %v6122_v62 = vsel %vm6086_vm7, -1e+09, %v1464_v56  ;;  %vm6164_vm11 = vcmp.eq.s32.totalorder %v1542_v50, 1 }
 0x290   :  { %v921_v61 = vpop.f32.mrb[28].mxu1  ;;  %v1635_v36 = vsel %vm1595_vm5, %v6122_v62, -inf  ;;  %v1131_v44 = vpop.f32.mrb[48].mxu0 }
 0x291   :  { %v1465_v54 = vmul.f32 0.25, %v921_v61  ;;  %1636 = vmax.xlane.f32.xlu0 %v1635_v36  ;;  %v4129_v14 = vpop.f32.mrb[29].mxu1  ;;  %v4179_v2 = vpop.f32.mrb[49].mxu0  ;;  %v1475_v60 = vmul.f32 0.25, %v1131_v44  ;;  %v6158_v44 = vsel %vm6116_vm9, -1e+09, %v1474_v32 }
 0x293   :  { %v6133_v46 = vsel %vm6086_vm7, -1e+09, %v1465_v54  ;;  %v6162_v14 = vsel %vm6116_vm9, -1e+09, %v1475_v60  ;;  %vm3021_vm7 = vcmask 1045504  }
 0x294   :  { %v6137_v59 = vpop.f32.mrb[30].mxu1  ;;  %v1638_v0 = vsel %vm1595_vm5, %v6133_v46, -inf  ;;  %v1321_v52 = vpop.f32.mrb[50].mxu0  ;;  %v1668_v32 = vsel %vm1595_vm5, %v6162_v14, -inf  ;;  %vm6629_vm9 = vmpackc.low %vm3021_vm7, %vm5129_vm8  ;;  %vm3476_vm7 = vcmask 1047559  }
 0x295   :  { %1639 = vmax.xlane.f32.xlu1 %v1638_v0  ;;  %v4142_v48 = vpop.f32.mrb[31].mxu1  ;;  %1657 = vmax.xlane.f32.xlu0 %v1656_v7  ;;  %v4217_v56 = vpop.f32.mrb[51].mxu0  ;;  %v1481_v61 = vmul.f32 0.25, %v1321_v52  ;;  %v1665_v0 = vsel %vm1595_vm5, %v6158_v44, -inf }
 0x297   :  { %v6176_v48 = vsel %vm6164_vm11, -1e+09, %v1481_v61 }
 0x298   :  { %v6152_v26 = vpop.f32.mrb[32].mxu1  ;;  %v1326_v36 = vpop.f32.mrb[52].mxu0 }
 0x299   :  { %v4145_v54 = vpop.f32.mrb[33].mxu1  ;;  %1660 = vmax.xlane.f32.xlu1 %v1659_v51  ;;  %1663 = vmax.xlane.f32.xlu0 %v1662_v55  ;;  %v1482_v25 = vmul.f32 0.25, %v1326_v36  ;;  %v4220_v2 = vpop.f32.mrb[53].mxu0  ;;  %v1686_v36 = vsel %vm1595_vm5, %v6176_v48, -inf }
 0x29b   :  { %v6180_v50 = vsel %vm6164_vm11, -1e+09, %v1482_v25 }
 0x29c   :  { %v6168_v7 = vpop.f32.mrb[34].mxu1  ;;  %v1331_v52 = vpop.f32.mrb[54].mxu0  ;;  %v1689_v54 = vsel %vm1595_vm5, %v6180_v50, -inf }
 0x29d   :  { %v4148_v40 = vpop.f32.mrb[35].mxu1  ;;  %1666 = vmax.xlane.f32.xlu1 %v1665_v0  ;;  %1669 = vmax.xlane.f32.xlu0 %v1668_v32  ;;  %v1483_v60 = vmul.f32 0.25, %v1331_v52  ;;  %v4223_v56 = vpop.f32.mrb[55].mxu0 }
 0x29f   :  { %v6190_v32 = vsel %vm6164_vm11, -1e+09, %v1483_v60 }
 0x2a0   :  { %v6182_v51 = vpop.f32.mrb[36].mxu1  ;;  %v1336_v55 = vpop.f32.mrb[56].mxu0  ;;  %v1692_v56 = vsel %vm1595_vm5, %v6190_v32, -inf }
 0x2a1   :  { %v1484_v61 = vmul.f32 0.25, %v1336_v55  ;;  %v4151_v2 = vpop.f32.mrb[37].mxu1  ;;  %1687 = vmax.xlane.f32.xlu1 %v1686_v36  ;;  %1690 = vmax.xlane.f32.xlu0 %v1689_v54  ;;  %v4226_v0 = vpop.f32.mrb[57].mxu0 }
 0x2a3   :  { %v6194_v25 = vsel %vm6164_vm11, -1e+09, %v1484_v61 }
 0x2a4   :  { %v6196_v52 = vpop.f32.mrb[38].mxu1  ;;  %v1341_v40 = vpop.f32.mrb[58].mxu0  ;;  %v1695_v55 = vsel %vm1595_vm5, %v6194_v25, -inf }
 0x2a5   :  { %v1485_v36 = vmul.f32 0.25, %v1341_v40  ;;  %v4154_v54 = vpop.f32.mrb[39].mxu1  ;;  %1693 = vmax.xlane.f32.xlu1 %v1692_v56  ;;  %1696 = vmax.xlane.f32.xlu0 %v1695_v55  ;;  %v4229_v2 = vpop.f32.mrb[59].mxu0 }
 0x2a7   :  { %v6204_v60 = vsel %vm6164_vm11, -1e+09, %v1485_v36  ;;  %vm3110_vm11 = vcmask 457728  }
 0x2a8   :  { %v6206_v61 = vpop.f32.mrb[40].mxu1  ;;  %v1698_v0 = vsel %vm1595_vm5, %v6204_v60, -inf }
 0x2a9   :  { %v4192_v9 = vpop.f32.mrb[41].mxu1  ;;  %1699 = vmax.xlane.f32.xlu1 %v1698_v0 }
 0x2ac   :  { %v6210_v49 = vpop.f32.mrb[42].mxu1 }
 0x2ad   :  { %v4195_v12 = vpop.f32.mrb[43].mxu1 }
 0x2b0   :  { %v6212_v38 = vpop.f32.mrb[44].mxu1 }
 0x2b1   :  { %v4198_v40 = vpop.f32.mrb[45].mxu1 }
 0x2b4   :  { %v6214_v56 = vpop.f32.mrb[46].mxu1 }
 0x2b5   :  { %v4201_v55 = vpop.f32.mrb[47].mxu1 }
 0x2b8   :  { %v6216_v54 = vpop.f32.mrb[48].mxu1 }
 0x2b9   :  { %v4204_v4 = vpop.f32.mrb[49].mxu1 }
 0x2bc   :  { %v6218_v36 = vpop.f32.mrb[50].mxu1 }
 0x2bd   :  { %v4242_v2 = vpop.f32.mrb[51].mxu1 }
 0x2c0   :  { %v6220_v34 = vpop.f32.mrb[52].mxu1 }
 0x2c1   :  { %v4245_v35 = vpop.f32.mrb[53].mxu1 }
 0x2c4   :  { %v6222_v9 = vpop.f32.mrb[54].mxu1 }
 0x2c5   :  { %v4248_v0 = vpop.f32.mrb[55].mxu1 }
 0x2c8   :  { %v6224_v23 = vpop.f32.mrb[56].mxu1 }
 0x2c9   :  { %v4251_v12 = vpop.f32.mrb[57].mxu1 }
 0x2cc   :  { %v6226_v24 = vpop.f32.mrb[58].mxu1 }
 0x2cd   :  { %v4254_v40 = vpop.f32.mrb[59].mxu1 }
 0x2ea   :  { %v1598_v20 = vpop.xlane.xlu0 %1597 }
 0x2eb   :  { %v1716_v55 = vsub.f32 %v6043_v17, %v1598_v20 }
 0x2ed   :  { %v1756_v22 = vmul.f32 1.442695, %v1716_v55 }
 0x2ee   :  { %v1601_v4 = vpop.xlane.xlu0 %1600 }
 0x2ef   :  { %4737 = vpow2.f32 %v1756_v22  ;;  %v1717_v2 = vsub.f32 %v6049_v8, %v1601_v4 }
 0x2f1   :  { %v1758_v42 = vmul.f32 1.442695, %v1717_v2 }
 0x2f2   :  { %v1604_v43 = vpop.xlane.xlu1 %1603 }
 0x2f3   :  { %4739 = vpow2.f32 %v1758_v42  ;;  %v1718_v35 = vsub.f32 %v6055_v53, %v1604_v43 }
 0x2f5   :  { %v1760_v0 = vmul.f32 1.442695, %v1718_v35 }
 0x2f6   :  { %v1607_v39 = vpop.xlane.xlu1 %1606 }
 0x2f7   :  { %4741 = vpow2.f32 %v1760_v0  ;;  %v1719_v12 = vsub.f32 %v6061_v45, %v1607_v39 }
 0x2f9   :  { %v6232_v41 = vpop.eup %4737  ;;  %v1762_v40 = vmul.f32 1.442695, %v1719_v12 }
 0x2fa   :  { %v1610_v30 = vpop.xlane.xlu0 %1609  ;;  %v1836_v20 = vsel %vm1595_vm5, %v6232_v41, 0.0 }
 0x2fb   :  { %4743 = vpow2.f32 %v1762_v40  ;;  %v1720_v22 = vsub.f32 %v6067_v5, %v1610_v30  ;;  %1837 = vadd.xlane.f32.xlu0 %v1836_v20 }
 0x2fd   :  { %v6237_v17 = vpop.eup %4739  ;;  %v1764_v42 = vmul.f32 1.442695, %v1720_v22 }
 0x2fe   :  { %v1839_v43 = vsel %vm1595_vm5, %v6237_v17, 0.0 }
 0x2ff   :  { %4745 = vpow2.f32 %v1764_v42  ;;  %1840 = vadd.xlane.f32.xlu1 %v1839_v43 }
 0x301   :  { %v6241_v39 = vpop.eup %4741 }
 0x302   :  { %v1842_v8 = vsel %vm1595_vm5, %v6241_v39, 0.0 }
 0x303   :  { %1843 = vadd.xlane.f32.xlu0 %v1842_v8 }
 0x305   :  { %v6245_v53 = vpop.eup %4743 }
 0x306   :  { %v1845_v30 = vsel %vm1595_vm5, %v6245_v53, 0.0 }
 0x307   :  { %1846 = vadd.xlane.f32.xlu1 %v1845_v30 }
 0x309   :  { %v6249_v45 = vpop.eup %4745 }
 0x30a   :  { %v1848_v5 = vsel %vm1595_vm5, %v6249_v45, 0.0 }
 0x30b   :  { %1849 = vadd.xlane.f32.xlu0 %v1848_v5 }
 0x312   :  { %v1628_v55 = vpop.xlane.xlu1 %1627 }
 0x313   :  { %v1726_v4 = vsub.f32 %v6095_v47, %v1628_v55 }
 0x315   :  { %v1776_v2 = vmul.f32 1.442695, %v1726_v4 }
 0x316   :  { %v1631_v35 = vpop.xlane.xlu0 %1630 }
 0x317   :  { %4747 = vpow2.f32 %v1776_v2  ;;  %v1727_v0 = vsub.f32 %v6102_v33, %v1631_v35 }
 0x319   :  { %v1778_v12 = vmul.f32 1.442695, %v1727_v0 }
 0x31a   :  { %v1634_v40 = vpop.xlane.xlu1 %1633 }
 0x31b   :  { %4749 = vpow2.f32 %v1778_v12  ;;  %v1728_v20 = vsub.f32 %v6109_v63, %v1634_v40 }
 0x31d   :  { %v1780_v22 = vmul.f32 1.442695, %v1728_v20 }
 0x31e   :  { %v1637_v42 = vpop.xlane.xlu0 %1636 }
 0x31f   :  { %4751 = vpow2.f32 %v1780_v22  ;;  %v1729_v43 = vsub.f32 %v6122_v62, %v1637_v42 }
 0x321   :  { %v6257_v8 = vpop.eup %4747  ;;  %v1782_v30 = vmul.f32 1.442695, %v1729_v43 }
 0x322   :  { %v1640_v5 = vpop.xlane.xlu1 %1639  ;;  %v1658_v47 = vpop.xlane.xlu0 %1657  ;;  %v1866_v55 = vsel %vm1595_vm5, %v6257_v8, 0.0 }
 0x323   :  { %4753 = vpow2.f32 %v1782_v30  ;;  %v1730_v33 = vsub.f32 %v6133_v46, %v1640_v5  ;;  %v1736_v4 = vsub.f32 %v6128_v3, %v1658_v47  ;;  %1867 = vadd.xlane.f32.xlu1 %v1866_v55 }
 0x325   :  { %v6263_v63 = vpop.eup %4749  ;;  %v1784_v2 = vmul.f32 1.442695, %v1730_v33  ;;  %v1796_v35 = vmul.f32 1.442695, %v1736_v4 }
 0x326   :  { %v1661_v0 = vpop.xlane.xlu1 %1660  ;;  %v1664_v62 = vpop.xlane.xlu0 %1663  ;;  %v1869_v12 = vsel %vm1595_vm5, %v6263_v63, 0.0 }
 0x327   :  { %4755 = vpow2.f32 %v1784_v2  ;;  %v1737_v40 = vsub.f32 %v6143_v37, %v1661_v0  ;;  %v1738_v20 = vsub.f32 %v6147_v57, %v1664_v62  ;;  %1870 = vadd.xlane.f32.xlu0 %v1869_v12 }
 0x328   :  { %4757 = vpow2.f32 %v1796_v35 }
 0x329   :  { %v6269_v46 = vpop.eup %4751  ;;  %v1798_v3 = vmul.f32 1.442695, %v1737_v40  ;;  %v1800_v22 = vmul.f32 1.442695, %v1738_v20 }
 0x32a   :  { %v1667_v42 = vpop.xlane.xlu1 %1666  ;;  %v1670_v43 = vpop.xlane.xlu0 %1669  ;;  %v1872_v30 = vsel %vm1595_vm5, %v6269_v46, 0.0 }
 0x32b   :  { %4759 = vpow2.f32 %v1798_v3  ;;  %v1739_v5 = vsub.f32 %v6158_v44, %v1667_v42  ;;  %v1740_v47 = vsub.f32 %v6162_v14, %v1670_v43  ;;  %1873 = vadd.xlane.f32.xlu1 %v1872_v30  ;;  %v1492_v42 = vld [vmem:[%s6963_s1 + $0x1] sm:$0x1] }
 0x32c   :  { %4761 = vpow2.f32 %v1800_v22  ;;  %vm1500_vm12 = vcmp.eq.f32.partialorder %v1492_v42, 0.0 }
 0x32d   :  { %v6275_v37 = vpop.eup %4753  ;;  %v1802_v57 = vmul.f32 1.442695, %v1739_v5  ;;  %v1804_v55 = vmul.f32 1.442695, %v1740_v47 }
 0x32e   :  { %v1688_v33 = vpop.xlane.xlu1 %1687  ;;  %v1691_v4 = vpop.xlane.xlu0 %1690  ;;  %v1875_v2 = vsel %vm1595_vm5, %v6275_v37, 0.0 }
 0x32f   :  { %4763 = vpow2.f32 %v1802_v57  ;;  %v1746_v35 = vsub.f32 %v6176_v48, %v1688_v33  ;;  %v1747_v0 = vsub.f32 %v6180_v50, %v1691_v4  ;;  %1876 = vadd.xlane.f32.xlu0 %v1875_v2 }
 0x330   :  { %4765 = vpow2.f32 %v1804_v55 }
 0x331   :  { %v6281_v44 = vpop.eup %4755  ;;  %v1816_v14 = vmul.f32 1.442695, %v1746_v35  ;;  %v1818_v62 = vmul.f32 1.442695, %v1747_v0  ;;  %v7070_v0 = vmov 0  }
 0x332   :  { %v6283_v12 = vpop.eup %4757  ;;  %v1694_v40 = vpop.xlane.xlu1 %1693  ;;  %v1878_v3 = vsel %vm1595_vm5, %v6281_v44, 0.0 }
 0x333   :  { %v1697_v20 = vpop.xlane.xlu0 %1696  ;;  %4767 = vpow2.f32 %v1816_v14  ;;  %v1748_v22 = vsub.f32 %v6190_v32, %v1694_v40  ;;  %v1896_v50 = vsel %vm1595_vm5, %v6283_v12, 0.0  ;;  %1879 = vadd.xlane.f32.xlu1 %v1878_v3  ;;  %v1508_v14 = vsel %vm1500_vm12, 1, %v7070_v0 }
 0x334   :  { %v1749_v48 = vsub.f32 %v6194_v25, %v1697_v20  ;;  %4769 = vpow2.f32 %v1818_v62  ;;  %1897 = vadd.xlane.f32.xlu0 %v1896_v50  ;;  %v1522_v40 = vrot.slane %v1508_v14, %v6033_v13  ;;  %v1456_v50 = vmul.f32 0.25, %v6069_v6 }
 0x335   :  { %v6294_v43 = vpop.eup %4759  ;;  %v1820_v30 = vmul.f32 1.442695, %v1748_v22  ;;  %v1458_v6 = vmul.f32 0.25, %v6078_v21  ;;  %vm3466_vm12 = vcmask 1042434  }
 0x336   :  { %v1822_v5 = vmul.f32 1.442695, %v1749_v48  ;;  %v6296_v47 = vpop.eup %4761  ;;  %v1700_v57 = vpop.xlane.xlu1 %1699  ;;  %v1899_v32 = vsel %vm1595_vm5, %v6294_v43, 0.0  ;;  %v1494_v48 = vld [vmem:[%s6963_s1 + $0x3] sm:$0x1]  ;;  %vm6327_vm13 = vcmp.eq.s32.totalorder %v1522_v40, 1 }
 0x337   :  { %4771 = vpow2.f32 %v1820_v30  ;;  %v1750_v25 = vsub.f32 %v6204_v60, %v1700_v57  ;;  %v1902_v55 = vsel %vm1595_vm5, %v6296_v47, 0.0  ;;  %1900 = vadd.xlane.f32.xlu1 %v1899_v32  ;;  %vm1502_vm14 = vcmp.eq.f32.partialorder %v1494_v48, 0.0 }
 0x338   :  { %4773 = vpow2.f32 %v1822_v5  ;;  %1903 = vadd.xlane.f32.xlu0 %v1902_v55  ;;  %v1457_v32 = vmul.f32 0.25, %v6073_v58  ;;  %v6341_v55 = vsel %vm6327_vm13, -1e+09, %v1456_v50  ;;  %v1459_v58 = vmul.f32 0.25, %v6080_v1  ;;  %v1496_v1 = vld [vmem:[%s6963_s1 + $0x5] sm:$0x1] }
 0x339   :  { %v6303_v33 = vpop.eup %4763  ;;  %v1824_v4 = vmul.f32 1.442695, %v1750_v25  ;;  %v1460_v40 = vmul.f32 0.25, %v6083_v10  ;;  %v1466_v50 = vmul.f32 0.25, %v6137_v59  ;;  %vm1504_vm15 = vcmp.eq.f32.partialorder %v1496_v1, 0.0 }
 0x33a   :  { %v6305_v2 = vpop.eup %4765  ;;  %v1905_v35 = vsel %vm1595_vm5, %v6303_v33, 0.0  ;;  %v6353_v21 = vsel %vm6327_vm13, -1e+09, %v1457_v32  ;;  %v6371_v10 = vsel %vm6327_vm13, -1e+09, %v1459_v58  ;;  %v1467_v32 = vmul.f32 0.25, %v6152_v26 }
 0x33b   :  { %4775 = vpow2.f32 %v1824_v4  ;;  %v1908_v60 = vsel %vm1595_vm5, %v6305_v2, 0.0  ;;  %1906 = vadd.xlane.f32.xlu1 %v1905_v35  ;;  %v1510_v35 = vsel %vm1502_vm14, 1, %v7070_v0  ;;  %v1614_v48 = vsel %vm1595_vm5, %v6353_v21, -inf }
 0x33c   :  { %1909 = vadd.xlane.f32.xlu0 %v1908_v60  ;;  %v1611_v60 = vsel %vm1595_vm5, %v6341_v55, -inf  ;;  %v1620_v59 = vsel %vm1595_vm5, %v6371_v10, -inf  ;;  %v1469_v30 = vmul.f32 0.25, %v6182_v51  ;;  %v1498_v51 = vld [vmem:[%s6963_s1 + $0x7] sm:$0x1]  ;;  %vm3470_vm14 = vcmask 1044484  }
 0x33d   :  { %v6312_v62 = vpop.eup %4767  ;;  %vm1506_vm4 = vcmp.eq.f32.partialorder %v1498_v51, 0.0 }
 0x33e   :  { %v6315_v20 = vpop.eup %4769  ;;  %v1926_v3 = vsel %vm1595_vm5, %v6312_v62, 0.0 }
 0x33f   :  { %v1929_v22 = vsel %vm1595_vm5, %v6315_v20, 0.0  ;;  %1927 = vadd.xlane.f32.xlu1 %v1926_v3  ;;  %v6358_v3 = vsel %vm6327_vm13, -1e+09, %v1458_v6 }
 0x340   :  { %1930 = vadd.xlane.f32.xlu0 %v1929_v22  ;;  %v1530_v22 = vrot.slane %v1510_v35, %v6033_v13  ;;  %v1512_v35 = vsel %vm1504_vm15, 1, %v7070_v0  ;;  %vm3472_vm15 = vcmask 1045509  }
 0x341   :  { %v6325_v42 = vpop.eup %4771 }
 0x342   :  { %v6331_v5 = vpop.eup %4773  ;;  %v1932_v57 = vsel %vm1595_vm5, %v6325_v42, 0.0  ;;  %vm6378_vm2 = vcmp.eq.s32.totalorder %v1530_v22, 1  ;;  %v1470_v22 = vmul.f32 0.25, %v6196_v52  ;;  %v1489_v52 = vmul.f32 0.25, %v6224_v23 }
 0x343   :  { %v1935_v25 = vsel %vm1595_vm5, %v6331_v5, 0.0  ;;  %1933 = vadd.xlane.f32.xlu1 %v1932_v57  ;;  %v1617_v57 = vsel %vm1595_vm5, %v6358_v3, -inf  ;;  %v6390_v26 = vsel %vm6378_vm2, -1e+09, %v1466_v50  ;;  %v1476_v50 = vmul.f32 0.25, %v6206_v61 }
 0x344   :  { %1936 = vadd.xlane.f32.xlu0 %v1935_v25  ;;  %v6376_v25 = vsel %vm6327_vm13, -1e+09, %v1460_v40  ;;  %v1538_v40 = vrot.slane %v1512_v35, %v6033_v13  ;;  %v6426_v61 = vsel %vm6378_vm2, -1e+09, %v1470_v22  ;;  %vm3468_vm13 = vcmask 1043459  }
 0x345   :  { %v6343_v4 = vpop.eup %4775  ;;  %v1623_v58 = vsel %vm1595_vm5, %v6376_v25, -inf }
 0x346   :  { %v1938_v14 = vsel %vm1595_vm5, %v6343_v4, 0.0  ;;  %vm6415_vm3 = vcmp.eq.s32.totalorder %v1538_v40, 1  ;;  %v1479_v40 = vmul.f32 0.25, %v6214_v56 }
 0x347   :  { %1939 = vadd.xlane.f32.xlu1 %v1938_v14  ;;  %v1468_v14 = vmul.f32 0.25, %v6168_v7  ;;  %v1641_v7 = vsel %vm1595_vm5, %v6390_v26, -inf }
 0x348   :  { %1612 = vmax.xlane.f32.xlu0 %v1611_v60  ;;  %v6395_v60 = vsel %vm6378_vm2, -1e+09, %v1467_v32 }
 0x349   :  { %v1644_v1 = vsel %vm1595_vm5, %v6395_v60, -inf }
 0x34b   :  { %1615 = vmax.xlane.f32.xlu1 %v1614_v48  ;;  %v6405_v48 = vsel %vm6378_vm2, -1e+09, %v1468_v14  ;;  %v1478_v14 = vmul.f32 0.25, %v6212_v38  ;;  %v1480_v38 = vmul.f32 0.25, %v6216_v54  ;;  %v1487_v54 = vmul.f32 0.25, %v6220_v34 }
 0x34c   :  { %1618 = vmax.xlane.f32.xlu0 %v1617_v57  ;;  %v6413_v57 = vsel %vm6378_vm2, -1e+09, %v1469_v30  ;;  %v1647_v32 = vsel %vm1595_vm5, %v6405_v48, -inf  ;;  %v1514_v30 = vsel %vm1506_vm4, 1, %v7070_v0  ;;  %vm3474_vm2 = vcmask 1046534  }
 0x34d   :  { %v1650_v35 = vsel %vm1595_vm5, %v6413_v57, -inf  ;;  %v6446_v22 = vsel %vm6415_vm3, -1e+09, %v1478_v14  ;;  %v1546_v0 = vrot.slane %v1514_v30, %v6033_v13 }
 0x34e   :  { %v1677_v51 = vsel %vm1595_vm5, %v6446_v22, -inf }
 0x34f   :  { %1621 = vmax.xlane.f32.xlu1 %v1620_v59  ;;  %v1477_v59 = vmul.f32 0.25, %v6210_v49  ;;  %v1653_v49 = vsel %vm1595_vm5, %v6426_v61, -inf  ;;  %vm6463_vm6 = vcmp.eq.s32.totalorder %v1546_v0, 1 }
 0x350   :  { %1624 = vmax.xlane.f32.xlu0 %v1623_v58  ;;  %v6431_v58 = vsel %vm6415_vm3, -1e+09, %v1476_v50  ;;  %v6456_v50 = vsel %vm6415_vm3, -1e+09, %v1479_v40  ;;  %v6479_v14 = vsel %vm6463_vm6, -1e+09, %v1487_v54 }
 0x351   :  { %v6441_v6 = vsel %vm6415_vm3, -1e+09, %v1477_v59  ;;  %v6492_v23 = vsel %vm6463_vm6, -1e+09, %v1489_v52 }
 0x352   :  { %v1674_v56 = vsel %vm1595_vm5, %v6441_v6, -inf }
 0x353   :  { %1642 = vmax.xlane.f32.xlu1 %v1641_v7  ;;  %v1671_v7 = vsel %vm1595_vm5, %v6431_v58, -inf }
 0x354   :  { %1645 = vmax.xlane.f32.xlu0 %v1644_v1  ;;  %v1486_v1 = vmul.f32 0.25, %v6218_v36  ;;  %v1680_v36 = vsel %vm1595_vm5, %v6456_v50, -inf }
 0x356   :  { %v6474_v34 = vsel %vm6463_vm6, -1e+09, %v1486_v1 }
 0x357   :  { %1648 = vmax.xlane.f32.xlu1 %v1647_v32  ;;  %v6461_v32 = vsel %vm6415_vm3, -1e+09, %v1480_v38  ;;  %v1701_v30 = vsel %vm1595_vm5, %v6474_v34, -inf  ;;  %v1710_v38 = vsel %vm1595_vm5, %v6492_v23, -inf }
 0x358   :  { %1651 = vmax.xlane.f32.xlu0 %v1650_v35  ;;  %v1683_v59 = vsel %vm1595_vm5, %v6461_v32, -inf  ;;  %v1488_v35 = vmul.f32 0.25, %v6222_v9  ;;  %v1490_v9 = vmul.f32 0.25, %v6226_v24 }
 0x35a   :  { %v6488_v40 = vsel %vm6463_vm6, -1e+09, %v1488_v35  ;;  %v6500_v0 = vsel %vm6463_vm6, -1e+09, %v1490_v9  ;;  %v7079_v35 = vpack.c.bf16 %v5382_v16, %v5377_v15  ;;  %v4897_v16 = vld [vmem:[%s6962_s0 + $0x70] sm:$0xff] }
 0x35b   :  { %1654 = vmax.xlane.f32.xlu1 %v1653_v49  ;;  %v1704_v49 = vsel %vm1595_vm5, %v6479_v14, -inf  ;;  %v1713_v24 = vsel %vm1595_vm5, %v6500_v0, -inf }
 0x35c   :  { %1672 = vmax.xlane.f32.xlu0 %v1671_v7  ;;  %v1707_v7 = vsel %vm1595_vm5, %v6488_v40, -inf }
 0x35f   :  { %1675 = vmax.xlane.f32.xlu1 %v1674_v56 }
 0x360   :  { %1678 = vmax.xlane.f32.xlu0 %v1677_v51 }
 0x363   :  { %1681 = vmax.xlane.f32.xlu1 %v1680_v36 }
 0x364   :  { %1684 = vmax.xlane.f32.xlu0 %v1683_v59 }
 0x367   :  { %1702 = vmax.xlane.f32.xlu1 %v1701_v30 }
 0x368   :  { %1705 = vmax.xlane.f32.xlu0 %v1704_v49  ;;  %v7080_v49 = vpack.c.bf16 %v5394_v19, %v5389_v18 }
 0x36b   :  { %1708 = vmax.xlane.f32.xlu1 %v1707_v7 }
 0x36c   :  { %1711 = vmax.xlane.f32.xlu0 %v1710_v38 }
 0x36f   :  { %1714 = vmax.xlane.f32.xlu1 %v1713_v24 }
 0x388   :  { %v1838_v56 = vpop.xlane.xlu0 %1837 }
 0x389   :  { %4777 = vrcp.f32 %v1838_v56 }
 0x38c   :  { %v1841_v1 = vpop.xlane.xlu1 %1840 }
 0x38d   :  { %4779 = vrcp.f32 %v1841_v1 }
 0x390   :  { %v1844_v51 = vpop.xlane.xlu0 %1843 }
 0x391   :  { %4781 = vrcp.f32 %v1844_v51 }
 0x393   :  { %v4778_v54 = vpop.eup %4777 }
 0x394   :  { %v1957_v36 = vmul.f32 %v4778_v54, %v6232_v41  ;;  %v1847_v59 = vpop.xlane.xlu1 %1846 }
 0x395   :  { %4783 = vrcp.f32 %v1847_v59  ;;  %v7082_v59 = vld [vmem:[#allocation27_spill] sm:$0xff] }
 0x396   :  { %4266 = vmatmul.mubr.msk.f32.vlgmr.msra.gmra.mrb[60].mxu0 %vm1595_vm5, %v1957_v36 }
 0x397   :  { %v4780_v13 = vpop.eup %4779  ;;  %4268 = vmatprep.mubr.msk.f32.mxu0 %vm5126_vm1, %v7043_v29  ;;  %4629 = vmatpush3.bf16.msra.mxu0 %v7079_v35 }
 0x398   :  { %v1850_v52 = vpop.xlane.xlu0 %1849  ;;  %v1959_v30 = vmul.f32 %v4780_v13, %v6237_v17  ;;  %4630 = vmatprep.subr.bf16.mxu0 %v7036_v11  ;;  %v7083_v13 = vpack.c.bf16 %v5446_v31, %v7082_v59 }
 0x399   :  { %4785 = vrcp.f32 %v1850_v52  ;;  %v4898_v52 = vld [vmem:[%s6962_s0 + $0xc0] sm:$0xff] }
 0x39a   :  { %4269 = vmatmul.mubr.msk.f32.gmra.mrb[62].mxu0 %vm1595_vm5, %v1959_v30 }
 0x39b   :  { %v4782_v41 = vpop.eup %4781  ;;  %4271 = vmatprep.mubr.msk.f32.mxu0 %vm5126_vm1, %v7043_v29  ;;  %4632 = vmatpush3.bf16.msra.mxu0 %v7080_v49 }
 0x39c   :  { %v1961_v9 = vmul.f32 %v4782_v41, %v6241_v39  ;;  %4313 = vmatprep.subr.mxu0 %v7043_v29 }
 0x39e   :  { %4272 = vmatmul.mubr.msk.f32.gmra.mrb[64].mxu0 %vm1595_vm5, %v1961_v9 }
 0x39f   :  { %v4784_v15 = vpop.eup %4783  ;;  %4274 = vmatprep.mubr.msk.f32.mxu0 %vm5126_vm1, %v7043_v29  ;;  %4314 = vmatpush3.msra.mxu0 %v4897_v16 }
 0x3a0   :  { %v1963_v17 = vmul.f32 %v4784_v15, %v6245_v53  ;;  %4639 = vmatprep.subr.bf16.mxu0 %v7036_v11 }
 0x3a2   :  { %4275 = vmatmul.mubr.msk.f32.gmra.mrb[66].mxu0 %vm1595_vm5, %v1963_v17 }
 0x3a3   :  { %v4786_v18 = vpop.eup %4785  ;;  %4277 = vmatprep.mubr.msk.f32.mxu0 %vm5126_vm1, %v7043_v29 }
 0x3a4   :  { %v1965_v19 = vmul.f32 %v4786_v18, %v6249_v45  ;;  %v7081_v45 = vpack.c.bf16 %v5432_v28, %v5427_v27 }
 0x3a6   :  { %4278 = vmatmul.mubr.msk.f32.gmra.mrb[68].mxu0 %vm1595_vm5, %v1965_v19 }
 0x3a7   :  { %4315 = vmatprep.mubr.msk.f32.mxu0 %vm5126_vm1, %v7043_v29 }
 0x3b0   :  { %v1868_v39 = vpop.xlane.xlu1 %1867 }
 0x3b1   :  { %4787 = vrcp.f32 %v1868_v39  ;;  %v7085_v39 = vld [vmem:[#allocation32_spill] sm:$0xff] }
 0x3b4   :  { %v1871_v7 = vpop.xlane.xlu0 %1870 }
 0x3b5   :  { %4789 = vrcp.f32 %v1871_v7 }
 0x3b8   :  { %v1874_v53 = vpop.xlane.xlu1 %1873 }
 0x3b9   :  { %4791 = vrcp.f32 %v1874_v53 }
 0x3bb   :  { %v4788_v38 = vpop.eup %4787 }
 0x3bc   :  { %v1977_v24 = vmul.f32 %v4788_v38, %v6257_v8  ;;  %v1877_v56 = vpop.xlane.xlu0 %1876 }
 0x3bd   :  { %4793 = vrcp.f32 %v1877_v56 }
 0x3be   :  { %4316 = vmatmul.mubr.msk.f32.vlgmr.msra.gmra.mrb[70].mxu0 %vm1595_vm5, %v1977_v24 }
 0x3bf   :  { %v4790_v1 = vpop.eup %4789  ;;  %4318 = vmatprep.mubr.msk.f32.mxu0 %vm5126_vm1, %v7043_v29  ;;  %4641 = vmatpush3.bf16.msra.mxu0 %v7081_v45  ;;  %v7088_v45 = vld [vmem:[#allocation34_spill] sm:$0xff] }
 0x3c0   :  { %v1880_v51 = vpop.xlane.xlu1 %1879  ;;  %v1979_v54 = vmul.f32 %v4790_v1, %v6263_v63  ;;  %4642 = vmatprep.subr.bf16.mxu0 %v7036_v11  ;;  %v7087_v1 = vld [vmem:[#allocation35_spill] sm:$0xff] }
 0x3c1   :  { %v1898_v36 = vpop.xlane.xlu0 %1897  ;;  %4795 = vrcp.f32 %v1880_v51  ;;  %v7089_v51 = vpack.c.bf16 %v7087_v1, %v7088_v45 }
 0x3c2   :  { %4319 = vmatmul.mubr.msk.f32.gmra.mrb[72].mxu0 %vm1595_vm5, %v1979_v54  ;;  %4797 = vrcp.f32 %v1898_v36 }
 0x3c3   :  { %v4792_v8 = vpop.eup %4791  ;;  %4321 = vmatprep.mubr.msk.f32.mxu0 %vm5126_vm1, %v7043_v29  ;;  %4644 = vmatpush3.bf16.msra.mxu0 %v7083_v13 }
 0x3c4   :  { %v1901_v27 = vpop.xlane.xlu1 %1900  ;;  %v1981_v28 = vmul.f32 %v4792_v8, %v6269_v46  ;;  %4363 = vmatprep.subr.mxu0 %v7043_v29 }
 0x3c5   :  { %v1904_v63 = vpop.xlane.xlu0 %1903  ;;  %4799 = vrcp.f32 %v1901_v27 }
 0x3c6   :  { %4322 = vmatmul.mubr.msk.f32.gmra.mrb[74].mxu0 %vm1595_vm5, %v1981_v28  ;;  %4801 = vrcp.f32 %v1904_v63 }
 0x3c7   :  { %v4794_v35 = vpop.eup %4793  ;;  %4324 = vmatprep.mubr.msk.f32.mxu0 %vm5126_vm1, %v7043_v29  ;;  %4364 = vmatpush3.msra.mxu0 %v4898_v52 }
 0x3c8   :  { %v1907_v31 = vpop.xlane.xlu1 %1906  ;;  %v1983_v30 = vmul.f32 %v4794_v35, %v6275_v37  ;;  %4651 = vmatprep.subr.bf16.mxu0 %v7036_v11 }
 0x3c9   :  { %v1910_v46 = vpop.xlane.xlu0 %1909  ;;  %4803 = vrcp.f32 %v1907_v31 }
 0x3ca   :  { %4325 = vmatmul.mubr.msk.f32.gmra.mrb[76].mxu0 %vm1595_vm5, %v1983_v30  ;;  %4805 = vrcp.f32 %v1910_v46 }
 0x3cb   :  { %v4796_v41 = vpop.eup %4795  ;;  %4327 = vmatprep.mubr.msk.f32.mxu0 %vm5126_vm1, %v7043_v29 }
 0x3cc   :  { %v1928_v49 = vpop.xlane.xlu1 %1927  ;;  %v1985_v9 = vmul.f32 %v4796_v41, %v6281_v44  ;;  %v4798_v15 = vpop.eup %4797  ;;  %v7084_v44 = vld [vmem:[#allocation33_spill] sm:$0xff] }
 0x3cd   :  { %v1931_v16 = vpop.xlane.xlu0 %1930  ;;  %v1997_v37 = vmul.f32 %v4798_v15, %v6283_v12  ;;  %v7086_v7 = vpack.c.bf16 %v7084_v44, %v7085_v39  ;;  %4807 = vrcp.f32 %v1928_v49  ;;  %v3006_v49 = vld [vmem:[#allocation5] sm:$0xff] }
 0x3ce   :  { %4328 = vmatmul.mubr.msk.f32.gmra.mrb[78].mxu0 %vm1595_vm5, %v1985_v9  ;;  %v3007_v9 = vld [vmem:[#allocation5 + $0x8] sm:$0xff] }
 0x3cf   :  { %4365 = vmatprep.mubr.msk.f32.mxu0 %vm5126_vm1, %v7043_v29  ;;  %v4800_v18 = vpop.eup %4799 }
 0x3d0   :  { %v1934_v17 = vpop.xlane.xlu1 %1933  ;;  %v1999_v38 = vmul.f32 %v4800_v18, %v6294_v43  ;;  %v4802_v12 = vpop.eup %4801 }
 0x3d1   :  { %v1937_v19 = vpop.xlane.xlu0 %1936  ;;  %v2001_v43 = vmul.f32 %v4802_v12, %v6296_v47  ;;  %v4899_v47 = vld [vmem:[%s6962_s0 + $0x110] sm:$0xff] }
 0x3d2   :  { %4366 = vmatmul.mubr.msk.f32.vlgmr.msra.gmra.mrb[80].mxu0 %vm1595_vm5, %v1997_v37 }
 0x3d3   :  { %4368 = vmatprep.mubr.msk.f32.mxu0 %vm5126_vm1, %v7043_v29  ;;  %4653 = vmatpush3.bf16.msra.mxu0 %v7086_v7  ;;  %v4804_v8 = vpop.eup %4803  ;;  %v3008_v7 = vld [vmem:[#allocation5 + $0x10] sm:$0xff] }
 0x3d4   :  { %v6575_v53 = vpop.xlane.xlu1 %1939  ;;  %4654 = vmatprep.subr.bf16.mxu0 %v7036_v11  ;;  %v2003_v35 = vmul.f32 %v4804_v8, %v6303_v33 }
 0x3d5   :  { %v1613_v24 = vpop.xlane.xlu0 %1612 }
 0x3d6   :  { %v1721_v56 = vsub.f32 %v6341_v55, %v1613_v24  ;;  %4369 = vmatmul.mubr.msk.f32.gmra.mrb[82].mxu0 %vm1595_vm5, %v1999_v38  ;;  %v3009_v38 = vld [vmem:[#allocation5 + $0x18] sm:$0x3f] }
 0x3d7   :  { %4371 = vmatprep.mubr.msk.f32.mxu0 %vm5126_vm1, %v7043_v29  ;;  %4656 = vmatpush3.bf16.msra.mxu0 %v7089_v51  ;;  %v4667_v1 = vpack.c.bf16 %v3009_v38, %v3008_v7 }
 0x3d8   :  { %v1766_v54 = vmul.f32 1.442695, %v1721_v56  ;;  %v1616_v36 = vpop.xlane.xlu1 %1615  ;;  %4413 = vmatprep.subr.mxu0 %v7043_v29 }
 0x3d9   :  { %v1619_v59 = vpop.xlane.xlu0 %1618  ;;  %v1722_v55 = vsub.f32 %v6353_v21, %v1616_v36  ;;  %v4806_v21 = vpop.eup %4805 }
 0x3da   :  { %4809 = vpow2.f32 %v1766_v54  ;;  %v1723_v13 = vsub.f32 %v6358_v3, %v1619_v59  ;;  %4372 = vmatmul.mubr.msk.f32.gmra.mrb[84].mxu0 %vm1595_vm5, %v2001_v43  ;;  %v2005_v33 = vmul.f32 %v4806_v21, %v6305_v2  ;;  %v4808_v15 = vpop.eup %4807 }
 0x3db   :  { %4811 = vrcp.f32 %v1931_v16  ;;  %v1768_v27 = vmul.f32 1.442695, %v1722_v55  ;;  %4374 = vmatprep.mubr.msk.f32.mxu0 %vm5126_vm1, %v7043_v29  ;;  %4414 = vmatpush3.msra.mxu0 %v4899_v47  ;;  %v2017_v2 = vmul.f32 %v4808_v15, %v6312_v62 }
 0x3dc   :  { %v1770_v28 = vmul.f32 1.442695, %v1723_v13  ;;  %v1622_v63 = vpop.xlane.xlu1 %1621  ;;  %4663 = vmatprep.subr.bf16.mxu0 %v7036_v11 }
 0x3dd   :  { %4813 = vpow2.f32 %v1768_v27  ;;  %v1625_v3 = vpop.xlane.xlu0 %1624  ;;  %v1724_v52 = vsub.f32 %v6371_v10, %v1622_v63 }
 0x3de   :  { %4815 = vpow2.f32 %v1770_v28  ;;  %v1725_v31 = vsub.f32 %v6376_v25, %v1625_v3  ;;  %4375 = vmatmul.mubr.msk.f32.gmra.mrb[86].mxu0 %vm1595_vm5, %v2003_v35 }
 0x3df   :  { %4817 = vrcp.f32 %v1934_v17  ;;  %v1772_v30 = vmul.f32 1.442695, %v1724_v52  ;;  %4377 = vmatprep.mubr.msk.f32.mxu0 %vm5126_vm1, %v7043_v29  ;;  %v4664_v17 = vpack.c.bf16 %v3007_v9, %v3006_v49 }
 0x3e0   :  { %v1774_v46 = vmul.f32 1.442695, %v1725_v31  ;;  %v1643_v41 = vpop.xlane.xlu1 %1642 }
 0x3e1   :  { %4819 = vpow2.f32 %v1772_v30  ;;  %v1646_v16 = vpop.xlane.xlu0 %1645  ;;  %v1731_v10 = vsub.f32 %v6390_v26, %v1643_v41 }
 0x3e2   :  { %4821 = vpow2.f32 %v1774_v46  ;;  %v1732_v25 = vsub.f32 %v6395_v60, %v1646_v16  ;;  %4378 = vmatmul.mubr.msk.f32.gmra.mrb[88].mxu0 %vm1595_vm5, %v2005_v33 }
 0x3e3   :  { %4823 = vrcp.f32 %v1937_v19  ;;  %v1786_v37 = vmul.f32 1.442695, %v1731_v10  ;;  %4415 = vmatprep.mubr.msk.f32.mxu0 %vm5126_vm1, %v7043_v29 }
 0x3e4   :  { %v6609_v18 = vpop.eup %4809  ;;  %v1788_v44 = vmul.f32 1.442695, %v1732_v25  ;;  %v1649_v39 = vpop.xlane.xlu1 %1648 }
 0x3e5   :  { %v4812_v26 = vpop.eup %4811  ;;  %4825 = vpow2.f32 %v1786_v37  ;;  %v1652_v60 = vpop.xlane.xlu0 %1651  ;;  %v1733_v12 = vsub.f32 %v6405_v48, %v1649_v39  ;;  %v1851_v19 = vsel %vm1595_vm5, %v6609_v18, 0.0 }
 0x3e6   :  { %4827 = vpow2.f32 %v1788_v44  ;;  %v1734_v24 = vsub.f32 %v6413_v57, %v1652_v60  ;;  %1852 = vadd.xlane.f32.xlu0 %v1851_v19  ;;  %4416 = vmatmul.mubr.msk.f32.vlgmr.msra.gmra.mrb[90].mxu0 %vm1595_vm5, %v2017_v2  ;;  %v2019_v54 = vmul.f32 %v4812_v26, %v6315_v20 }
 0x3e7   :  { %v6617_v62 = vpop.eup %4813  ;;  %4829 = vrcp.f32 %v6575_v53  ;;  %v1790_v56 = vmul.f32 1.442695, %v1733_v12  ;;  %4418 = vmatprep.mubr.msk.f32.mxu0 %vm5126_vm1, %v7043_v29  ;;  %4665 = vmatpush3.bf16.msra.mxu0 %v4664_v17 }
 0x3e8   :  { %v6622_v48 = vpop.eup %4815  ;;  %v1792_v45 = vmul.f32 1.442695, %v1734_v24  ;;  %v1655_v51 = vpop.xlane.xlu1 %1654  ;;  %v1854_v57 = vsel %vm1595_vm5, %v6617_v62, 0.0  ;;  %4666 = vmatprep.subr.bf16.mxu0 %v7036_v11 }
 0x3e9   :  { %v4818_v36 = vpop.eup %4817  ;;  %4831 = vpow2.f32 %v1790_v56  ;;  %v1673_v43 = vpop.xlane.xlu0 %1672  ;;  %v1735_v8 = vsub.f32 %v6426_v61, %v1655_v51  ;;  %v1857_v59 = vsel %vm1595_vm5, %v6622_v48, 0.0  ;;  %1855 = vadd.xlane.f32.xlu1 %v1854_v57 }
 0x3ea   :  { %4833 = vpow2.f32 %v1792_v45  ;;  %v1741_v20 = vsub.f32 %v6431_v58, %v1673_v43  ;;  %1858 = vadd.xlane.f32.xlu0 %v1857_v59  ;;  %4419 = vmatmul.mubr.msk.f32.gmra.mrb[92].mxu0 %vm1595_vm5, %v2019_v54  ;;  %v2021_v58 = vmul.f32 %v4818_v36, %v6325_v42 }
 0x3eb   :  { %v6638_v55 = vpop.eup %4819  ;;  %v1794_v13 = vmul.f32 1.442695, %v1735_v8  ;;  %4421 = vmatprep.mubr.msk.f32.mxu0 %vm5126_vm1, %v7043_v29  ;;  %4669 = vmatpush3.bf16.msk.msra.mxu0 %vm6629_vm9, %v4667_v1 }
 0x3ec   :  { %v6644_v61 = vpop.eup %4821  ;;  %v1806_v27 = vmul.f32 1.442695, %v1741_v20  ;;  %v1676_v47 = vpop.xlane.xlu1 %1675  ;;  %v1860_v28 = vsel %vm1595_vm5, %v6638_v55, 0.0  ;;  %4670 = vmatprep.subr.bf16.mxu0 %v7036_v11 }
 0x3ed   :  { %v4824_v63 = vpop.eup %4823  ;;  %4835 = vpow2.f32 %v1794_v13  ;;  %v1679_v35 = vpop.xlane.xlu0 %1678  ;;  %v1742_v21 = vsub.f32 %v6441_v6, %v1676_v47  ;;  %v1863_v3 = vsel %vm1595_vm5, %v6644_v61, 0.0  ;;  %1861 = vadd.xlane.f32.xlu1 %v1860_v28 }
 0x3ee   :  { %4837 = vpow2.f32 %v1806_v27  ;;  %v1743_v52 = vsub.f32 %v6446_v22, %v1679_v35  ;;  %1864 = vadd.xlane.f32.xlu0 %v1863_v3  ;;  %4422 = vmatmul.mubr.msk.f32.gmra.mrb[94].mxu0 %vm1595_vm5, %v2021_v58  ;;  %v2023_v33 = vmul.f32 %v4824_v63, %v6331_v5 }
 0x3ef   :  { %v6655_v31 = vpop.eup %4825  ;;  %v1808_v42 = vmul.f32 1.442695, %v1742_v21  ;;  %4424 = vmatprep.mubr.msk.f32.mxu0 %vm5126_vm1, %v7043_v29 }
 0x3f0   :  { %v6659_v30 = vpop.eup %4827  ;;  %v1810_v46 = vmul.f32 1.442695, %v1743_v52  ;;  %v1682_v6 = vpop.xlane.xlu1 %1681  ;;  %v1881_v41 = vsel %vm1595_vm5, %v6655_v31, 0.0 }
 0x3f1   :  { %v4830_v49 = vpop.eup %4829  ;;  %4839 = vpow2.f32 %v1808_v42  ;;  %v1685_v22 = vpop.xlane.xlu0 %1684  ;;  %v1744_v9 = vsub.f32 %v6456_v50, %v1682_v6  ;;  %v1884_v15 = vsel %vm1595_vm5, %v6659_v30, 0.0  ;;  %1882 = vadd.xlane.f32.xlu1 %v1881_v41  ;;  %v3097_v6 = vld [vmem:[#allocation8 + $0x8] sm:$0xff] }
 0x3f2   :  { %4841 = vpow2.f32 %v1810_v46  ;;  %v1745_v16 = vsub.f32 %v6461_v32, %v1685_v22  ;;  %1885 = vadd.xlane.f32.xlu0 %v1884_v15  ;;  %4425 = vmatmul.mubr.msk.f32.gmra.mrb[96].mxu0 %vm1595_vm5, %v2023_v33  ;;  %v2025_v2 = vmul.f32 %v4830_v49, %v6343_v4  ;;  %v6690_v4 = vld [vmem:[%s6965_s3] sm:$0xff]  ;;  %v3096_v46 = vld [vmem:[#allocation8] sm:$0xff]  ;;  %v3099_v49 = vld [vmem:[#allocation8 + $0x18] sm:$0xff] }
 0x3f3   :  { %v6669_v10 = vpop.eup %4831  ;;  %v1812_v25 = vmul.f32 1.442695, %v1744_v9  ;;  %4427 = vmatprep.mubr.msk.f32.mxu0 %vm5126_vm1, %v7043_v29  ;;  %v4671_v41 = vpack.c.bf16 %v3097_v6, %v3096_v46  ;;  %v3098_v33 = vld [vmem:[#allocation8 + $0x10] sm:$0xff]  ;;  %v3100_v9 = vld [vmem:[#allocation8 + $0x20] sm:$0xff]  ;;  %v3101_v15 = vld [vmem:[#allocation8 + $0x28] sm:$0xff] }
 0x3f4   :  { %v6673_v5 = vpop.eup %4833  ;;  %v1814_v37 = vmul.f32 1.442695, %v1745_v16  ;;  %v1703_v50 = vpop.xlane.xlu1 %1702  ;;  %v1887_v17 = vsel %vm1595_vm5, %v6669_v10, 0.0  ;;  %v4674_v22 = vpack.c.bf16 %v3099_v49, %v3098_v33  ;;  %v4677_v16 = vpack.c.bf16 %v3101_v15, %v3100_v9  ;;  %v7096_v33 = vld [vmem:[#allocation25_spill] sm:$0xff]  ;;  %v4900_v15 = vld [vmem:[%s6962_s0 + $0x98] sm:$0xff] }
 0x3f5   :  { %4843 = vpow2.f32 %v1812_v25  ;;  %v1751_v32 = vsub.f32 %v6474_v34, %v1703_v50  ;;  %v1706_v44 = vpop.xlane.xlu0 %1705  ;;  %v1890_v39 = vsel %vm1595_vm5, %v6673_v5, 0.0  ;;  %1888 = vadd.xlane.f32.xlu1 %v1887_v17  ;;  %v3102_v25 = vld [vmem:[#allocation8 + $0x30] sm:$0xff] }
 0x3f6   :  { %4845 = vpow2.f32 %v1814_v37  ;;  %v1752_v7 = vsub.f32 %v6479_v14, %v1706_v44  ;;  %1891 = vadd.xlane.f32.xlu0 %v1890_v39  ;;  %4428 = vmatmul.mubr.msk.f32.gmra.mrb[98].mxu0 %vm1595_vm5, %v2025_v2 }
 0x3f7   :  { %v6683_v38 = vpop.eup %4835  ;;  %v1826_v26 = vmul.f32 1.442695, %v1751_v32  ;;  %4463 = vmatprep.mubr.msk.f32.mxu0 %vm5126_vm1, %v7043_v29 }
 0x3f8   :  { %v6692_v34 = vpop.eup %4837  ;;  %v1828_v60 = vmul.f32 1.442695, %v1752_v7  ;;  %v1709_v12 = vpop.xlane.xlu1 %1708  ;;  %v1893_v14 = vsel %vm1595_vm5, %v6683_v38, 0.0 }
 0x3f9   :  { %4847 = vpow2.f32 %v1826_v26  ;;  %v1753_v19 = vsub.f32 %v6488_v40, %v1709_v12  ;;  %v1712_v24 = vpop.xlane.xlu0 %1711  ;;  %v1911_v56 = vsel %vm1595_vm5, %v6692_v34, 0.0  ;;  %1894 = vadd.xlane.f32.xlu1 %v1893_v14 }
 0x3fa   :  { %4849 = vpow2.f32 %v1828_v60  ;;  %v1754_v1 = vsub.f32 %v6492_v23, %v1712_v24  ;;  %1912 = vadd.xlane.f32.xlu0 %v1911_v56  ;;  %4464 = vmatmul.mubr.msk.f32.vlgmr.msra.gmra.mrb[100].mxu0 %vm3017_vm10, %v6690_v4 }
 0x3fb   :  { %v6702_v45 = vpop.eup %4839  ;;  %v1830_v51 = vmul.f32 1.442695, %v1753_v19  ;;  %4480 = vmatprep.mubr.msk.f32.mxu0 %vm5126_vm1, %v7043_v29  ;;  %4672 = vmatpush3.bf16.msra.mxu0 %v4671_v41 }
 0x3fc   :  { %v6706_v57 = vpop.eup %4841  ;;  %v1832_v40 = vmul.f32 1.442695, %v1754_v1  ;;  %v1715_v54 = vpop.xlane.xlu1 %1714  ;;  %v1914_v36 = vsel %vm1595_vm5, %v6702_v45, 0.0  ;;  %4673 = vmatprep.subr.bf16.mxu0 %v7036_v11 }
 0x3fd   :  { %4851 = vpow2.f32 %v1830_v51  ;;  %v1755_v23 = vsub.f32 %v6500_v0, %v1715_v54  ;;  %v1917_v43 = vsel %vm1595_vm5, %v6706_v57, 0.0  ;;  %1915 = vadd.xlane.f32.xlu1 %v1914_v36 }
 0x3fe   :  { %4853 = vpow2.f32 %v1832_v40  ;;  %1918 = vadd.xlane.f32.xlu0 %v1917_v43 }
 0x3ff   :  { %v6713_v8 = vpop.eup %4843  ;;  %v1834_v59 = vmul.f32 1.442695, %v1755_v23  ;;  %4675 = vmatpush3.bf16.msra.mxu0 %v4674_v22 }
 0x400   :  { %v6715_v20 = vpop.eup %4845  ;;  %v1920_v13 = vsel %vm1595_vm5, %v6713_v8, 0.0  ;;  %4676 = vmatprep.subr.bf16.mxu0 %v7036_v11 }
 0x401   :  { %4855 = vpow2.f32 %v1834_v59  ;;  %v1923_v27 = vsel %vm1595_vm5, %v6715_v20, 0.0  ;;  %1921 = vadd.xlane.f32.xlu1 %v1920_v13 }
 0x402   :  { %1924 = vadd.xlane.f32.xlu0 %v1923_v27 }
 0x403   :  { %v6721_v0 = vpop.eup %4847  ;;  %4678 = vmatpush3.bf16.msra.mxu0 %v4677_v16 }
 0x404   :  { %v6723_v47 = vpop.eup %4849  ;;  %v1941_v28 = vsel %vm1595_vm5, %v6721_v0, 0.0  ;;  %4478 = vmatprep.subr.mxu0 %v7043_v29 }
 0x405   :  { %v1944_v58 = vsel %vm1595_vm5, %v6723_v47, 0.0  ;;  %1942 = vadd.xlane.f32.xlu1 %v1941_v28 }
 0x406   :  { %1945 = vadd.xlane.f32.xlu0 %v1944_v58 }
 0x407   :  { %v6729_v63 = vpop.eup %4851  ;;  %4479 = vmatpush3.msra.mxu0 %v3102_v25 }
 0x408   :  { %v6731_v35 = vpop.eup %4853  ;;  %v1947_v21 = vsel %vm1595_vm5, %v6729_v63, 0.0  ;;  %4703 = vmatprep.subr.bf16.mxu0 %v7036_v11 }
 0x409   :  { %v1950_v3 = vsel %vm1595_vm5, %v6731_v35, 0.0  ;;  %1948 = vadd.xlane.f32.xlu1 %v1947_v21 }
 0x40a   :  { %1951 = vadd.xlane.f32.xlu0 %v1950_v3  ;;  %v7092_v3 = vld [vmem:[#allocation24_spill] sm:$0xff] }
 0x40b   :  { %v6737_v52 = vpop.eup %4855 }
 0x40c   :  { %v1953_v42 = vsel %vm1595_vm5, %v6737_v52, 0.0 }
 0x40d   :  { %1954 = vadd.xlane.f32.xlu1 %v1953_v42  ;;  %v7093_v42 = vld [vmem:[#allocation23_spill] sm:$0xff] }
 0x40e   :  { %v7094_v46 = vpack.c.bf16 %v7092_v3, %v7093_v42  ;;  %v4901_v42 = vld [vmem:[%s6962_s0 + $0xe8] sm:$0xff] }
 0x469   :  { %v2117_v37 = vpop.f32.mrb[60].mxu0 }
 0x46a   :  { %v4267_v50 = vpop.f32.mrb[61].mxu0  ;;  %v2876_v2 = vsel %vm184_vm0, %v2117_v37, 0.0 }
 0x46d   :  { %v2122_v17 = vpop.f32.mrb[62].mxu0 }
 0x46e   :  { %v2877_v32 = vsel %vm184_vm0, %v2122_v17, 0.0  ;;  %v4270_v44 = vpop.f32.mrb[63].mxu0 }
 0x46f   :  { %v2878_v39 = vadd.f32 %v2877_v32, %v2876_v2 }
 0x471   :  { %v2127_v7 = vpop.f32.mrb[64].mxu0 }
 0x472   :  { %v2879_v26 = vsel %vm184_vm0, %v2127_v7, 0.0  ;;  %v4273_v60 = vpop.f32.mrb[65].mxu0 }
 0x473   :  { %v2880_v12 = vadd.f32 %v2879_v26, %v2878_v39  ;;  %v1853_v14 = vpop.xlane.xlu0 %1852 }
 0x474   :  { %4857 = vrcp.f32 %v1853_v14  ;;  %v7099_v14 = vld [vmem:[#allocation28_spill] sm:$0xff] }
 0x475   :  { %v2132_v19 = vpop.f32.mrb[66].mxu0 }
 0x476   :  { %v2881_v24 = vsel %vm184_vm0, %v2132_v19, 0.0  ;;  %v4276_v56 = vpop.f32.mrb[67].mxu0  ;;  %v1856_v1 = vpop.xlane.xlu1 %1855 }
 0x477   :  { %v2882_v51 = vadd.f32 %v2881_v24, %v2880_v12  ;;  %v1859_v40 = vpop.xlane.xlu0 %1858  ;;  %4859 = vrcp.f32 %v1856_v1  ;;  %v7098_v12 = vld [vmem:[#allocation29_spill] sm:$0xff] }
 0x478   :  { %4861 = vrcp.f32 %v1859_v40  ;;  %v7100_v19 = vpack.c.bf16 %v7098_v12, %v7099_v14 }
 0x479   :  { %v2137_v54 = vpop.f32.mrb[68].mxu0 }
 0x47a   :  { %v2883_v36 = vsel %vm184_vm0, %v2137_v54, 0.0  ;;  %v4279_v23 = vpop.f32.mrb[69].mxu0  ;;  %v1862_v59 = vpop.xlane.xlu1 %1861 }
 0x47b   :  { %v6750_v43 = vadd.f32 %v2883_v36, %v2882_v51  ;;  %4863 = vrcp.f32 %v1862_v59  ;;  %v1865_v28 = vpop.xlane.xlu0 %1864  ;;  %v7101_v36 = vld [vmem:[#allocation31_spill] sm:$0xff]  ;;  %v7102_v23 = vld [vmem:[#allocation30_spill] sm:$0xff] }
 0x47c   :  { %4865 = vrcp.f32 %v1865_v28  ;;  %v7103_v59 = vpack.c.bf16 %v7101_v36, %v7102_v23  ;;  %v4904_v36 = vld [vmem:[%s6962_s0 + $0x138] sm:$0xff] }
 0x47e   :  { %v4858_v13 = vpop.eup %4857  ;;  %v1883_v6 = vpop.xlane.xlu1 %1882 }
 0x47f   :  { %v1967_v27 = vmul.f32 %v4858_v13, %v6609_v18  ;;  %4867 = vrcp.f32 %v1883_v6  ;;  %v7095_v18 = vld [vmem:[#allocation26_spill] sm:$0xff]  ;;  %v1886_v22 = vpop.xlane.xlu0 %1885 }
 0x480   :  { %v7097_v49 = vpack.c.bf16 %v7095_v18, %v7096_v33  ;;  %4869 = vrcp.f32 %v1886_v22 }
 0x481   :  { %v4860_v58 = vpop.eup %4859  ;;  %4291 = vmatmul.mubr.msk.f32.vlgmr.msra.gmra.mrb[60].mxu1 %vm1595_vm5, %v1967_v27 }
 0x482   :  { %4293 = vmatprep.mubr.msk.f32.mxu1 %vm5126_vm1, %v7043_v29  ;;  %v1969_v21 = vmul.f32 %v4860_v58, %v6617_v62  ;;  %4635 = vmatpush3.bf16.msra.mxu1 %v7094_v46  ;;  %v4862_v41 = vpop.eup %4861  ;;  %v1889_v16 = vpop.xlane.xlu1 %1888 }
 0x483   :  { %4636 = vmatprep.subr.bf16.mxu1 %v7036_v11  ;;  %v1971_v62 = vmul.f32 %v4862_v41, %v6622_v48  ;;  %4871 = vrcp.f32 %v1889_v16  ;;  %v1892_v37 = vpop.xlane.xlu0 %1891 }
 0x484   :  { %4873 = vrcp.f32 %v1892_v37 }
 0x485   :  { %4294 = vmatmul.mubr.msk.f32.gmra.mrb[62].mxu1 %vm1595_vm5, %v1969_v21  ;;  %v4864_v9 = vpop.eup %4863 }
 0x486   :  { %4296 = vmatprep.mubr.msk.f32.mxu1 %vm5126_vm1, %v7043_v29  ;;  %4638 = vmatpush3.bf16.msra.mxu1 %v7097_v49  ;;  %v1973_v25 = vmul.f32 %v4864_v9, %v6638_v55  ;;  %v4866_v48 = vpop.eup %4865  ;;  %v1895_v44 = vpop.xlane.xlu1 %1894 }
 0x487   :  { %4338 = vmatprep.subr.mxu1 %v7043_v29  ;;  %v1975_v50 = vmul.f32 %v4866_v48, %v6644_v61  ;;  %4875 = vrcp.f32 %v1895_v44  ;;  %v1913_v24 = vpop.xlane.xlu0 %1912  ;;  %v7104_v44 = vld [vmem:[#allocation37_spill] sm:$0xff] }
 0x488   :  { %4877 = vrcp.f32 %v1913_v24 }
 0x489   :  { %4297 = vmatmul.mubr.msk.f32.gmra.mrb[64].mxu1 %vm1595_vm5, %v1971_v62  ;;  %v4868_v17 = vpop.eup %4867 }
 0x48a   :  { %4299 = vmatprep.mubr.msk.f32.mxu1 %vm5126_vm1, %v7043_v29  ;;  %4339 = vmatpush3.msra.mxu1 %v4900_v15  ;;  %v1987_v55 = vmul.f32 %v4868_v17, %v6655_v31  ;;  %v4870_v39 = vpop.eup %4869  ;;  %v1916_v13 = vpop.xlane.xlu1 %1915  ;;  %v4903_v17 = vld [vmem:[%s6962_s0 + $0x130] sm:$0xff] }
 0x48b   :  { %4645 = vmatprep.subr.bf16.mxu1 %v7036_v11  ;;  %v1989_v56 = vmul.f32 %v4870_v39, %v6659_v30  ;;  %4879 = vrcp.f32 %v1916_v13  ;;  %v1919_v46 = vpop.xlane.xlu0 %1918  ;;  %v7105_v39 = vld [vmem:[#allocation36_spill] sm:$0xff] }
 0x48c   :  { %4881 = vrcp.f32 %v1919_v46 }
 0x48d   :  { %4300 = vmatmul.mubr.msk.f32.gmra.mrb[66].mxu1 %vm1595_vm5, %v1973_v25  ;;  %v4872_v1 = vpop.eup %4871 }
 0x48e   :  { %4302 = vmatprep.mubr.msk.f32.mxu1 %vm5126_vm1, %v7043_v29  ;;  %v1991_v30 = vmul.f32 %v4872_v1, %v6669_v10  ;;  %v4874_v28 = vpop.eup %4873  ;;  %v1922_v22 = vpop.xlane.xlu1 %1921 }
 0x48f   :  { %v1993_v6 = vmul.f32 %v4874_v28, %v6673_v5  ;;  %4883 = vrcp.f32 %v1922_v22  ;;  %v1925_v48 = vpop.xlane.xlu0 %1924 }
 0x490   :  { %4885 = vrcp.f32 %v1925_v48 }
 0x491   :  { %4303 = vmatmul.mubr.msk.f32.gmra.mrb[68].mxu1 %vm1595_vm5, %v1975_v50  ;;  %v2327_v2 = vpop.f32.mrb[70].mxu0  ;;  %v4876_v41 = vpop.eup %4875 }
 0x492   :  { %v4317_v32 = vpop.f32.mrb[71].mxu0  ;;  %4340 = vmatprep.mubr.msk.f32.mxu1 %vm5126_vm1, %v7043_v29  ;;  %v2906_v26 = vsel %vm184_vm0, %v2327_v2, 0.0  ;;  %v1995_v9 = vmul.f32 %v4876_v41, %v6683_v38  ;;  %v4878_v15 = vpop.eup %4877  ;;  %v4902_v38 = vld [vmem:[%s6962_s0 + $0x128] sm:$0xff]  ;;  %s5131_s0 = smov [#allocation16]  }
 0x493   :  { %v2007_v25 = vmul.f32 %v4878_v15, %v6692_v34  ;;  %v4661_v2 = vpack.c.bf16 %v4903_v17, %v4902_v38  ;;  %s3558_s30 = sshll.u32 %s5131_s0, 4  ;;  %s3559_s30 = int_to_ptr.vmem [resolvable:$true] %s3558_s30 }
 0x494   :  { %s5081_s19 = scalar_lea.vmem %s3559_s30, 128  ;;  %p5086_p9 = scmp.lt.s32.totalorder %s3559_s30, %s3559_s30 }
 0x495   :  { %4341 = vmatmul.mubr.msk.f32.vlgmr.msra.gmra.mrb[70].mxu1 %vm1595_vm5, %v1987_v55  ;;  %v2332_v7 = vpop.f32.mrb[72].mxu0  ;;  %v4880_v37 = vpop.eup %4879  ;;  %p5082_p8 = scmp.ne.s32.totalorder %s3559_s30, %s5081_s19  ;;  %p5087_p10 = scmp.lt.s32.totalorder %s5081_s19, %s5081_s19 }
 0x496   :  { %v2907_v61 = vsel %vm184_vm0, %v2332_v7, 0.0  ;;  %v4320_v60 = vpop.f32.mrb[73].mxu0  ;;  %4343 = vmatprep.mubr.msk.f32.mxu1 %vm5126_vm1, %v7043_v29  ;;  %4647 = vmatpush3.bf16.msra.mxu1 %v7100_v19  ;;  %v7106_v7 = vpack.c.bf16 %v7104_v44, %v7105_v39  ;;  %v4882_v12 = vpop.eup %4881 }
 0x497   :  { %v2908_v31 = vadd.f32 %v2907_v61, %v2906_v26  ;;  %4648 = vmatprep.subr.bf16.mxu1 %v7036_v11  ;;  %v1943_v26 = vpop.xlane.xlu1 %1942  ;;  %v2009_v60 = vmul.f32 %v4880_v37, %v6702_v45  ;;  %v2011_v1 = vmul.f32 %v4882_v12, %v6706_v57  ;;  %v3185_v12 = vld [vmem:[#allocation11] sm:$0xff]  ;;  %p5088_p11 = por %p5087_p10, %p5086_p9 }
 0x498   :  { %4887 = vrcp.f32 %v1943_v26 }
 0x499   :  { %4344 = vmatmul.mubr.msk.f32.gmra.mrb[72].mxu1 %vm1595_vm5, %v1989_v56  ;;  %v2337_v51 = vpop.f32.mrb[74].mxu0  ;;  %v4884_v45 = vpop.eup %4883  ;;  %p5089_p12 = pnand %p5088_p11, %p5082_p8 }
 0x49a   :  { %v2909_v40 = vsel %vm184_vm0, %v2337_v51, 0.0  ;;  %v4323_v54 = vpop.f32.mrb[75].mxu0  ;;  %4346 = vmatprep.mubr.msk.f32.mxu1 %vm5126_vm1, %v7043_v29  ;;  %4650 = vmatpush3.bf16.msra.mxu1 %v7103_v59  ;;  %v2013_v59 = vmul.f32 %v4884_v45, %v6713_v8  ;;  %v4886_v13 = vpop.eup %4885 }
 0x49b   :  { %v2910_v27 = vadd.f32 %v2909_v40, %v2908_v31  ;;  %4388 = vmatprep.subr.mxu1 %v7043_v29  ;;  %v1946_v31 = vpop.xlane.xlu0 %1945  ;;  %v1949_v23 = vpop.xlane.xlu1 %1948 }
 0x49c   :  { %4889 = vrcp.f32 %v1946_v31 }
 0x49d   :  { %4347 = vmatmul.mubr.msk.f32.gmra.mrb[74].mxu1 %vm1595_vm5, %v1991_v30  ;;  %v2342_v58 = vpop.f32.mrb[76].mxu0  ;;  %4891 = vrcp.f32 %v1949_v23 }
 0x49e   :  { %v2911_v21 = vsel %vm184_vm0, %v2342_v58, 0.0  ;;  %v4326_v3 = vpop.f32.mrb[77].mxu0  ;;  %4349 = vmatprep.mubr.msk.f32.mxu1 %vm5126_vm1, %v7043_v29  ;;  %4389 = vmatpush3.msra.mxu1 %v4901_v42 }
 0x49f   :  { %v2912_v10 = vadd.f32 %v2911_v21, %v2910_v27  ;;  %4657 = vmatprep.subr.bf16.mxu1 %v7036_v11  ;;  %v1952_v58 = vpop.xlane.xlu0 %1951  ;;  %v2015_v3 = vmul.f32 %v4886_v13, %v6715_v20  ;;  %v3282_v13 = vld [vmem:[#allocation14 + $0x18] sm:$0x3f] }
 0x4a0   :  { %4893 = vrcp.f32 %v1952_v58 }
 0x4a1   :  { %4350 = vmatmul.mubr.msk.f32.gmra.mrb[76].mxu1 %vm1595_vm5, %v1993_v6  ;;  %v2347_v18 = vpop.f32.mrb[78].mxu0  ;;  %v1955_v6 = vpop.xlane.xlu1 %1954 }
 0x4a2   :  { %v2913_v33 = vsel %vm184_vm0, %v2347_v18, 0.0  ;;  %v4329_v49 = vpop.f32.mrb[79].mxu0  ;;  %4352 = vmatprep.mubr.msk.f32.mxu1 %vm5126_vm1, %v7043_v29  ;;  %v4888_v42 = vpop.eup %4887  ;;  %4895 = vrcp.f32 %v1955_v6 }
 0x4a3   :  { %v6817_v62 = vadd.f32 %v2913_v33, %v2912_v10  ;;  %v2027_v10 = vmul.f32 %v4888_v42, %v6721_v0 }
 0x4a5   :  { %4353 = vmatmul.mubr.msk.f32.gmra.mrb[78].mxu1 %vm1595_vm5, %v1995_v9  ;;  %v2537_v5 = vpop.f32.mrb[80].mxu0 }
 0x4a6   :  { %v4367_v16 = vpop.f32.mrb[81].mxu0  ;;  %4390 = vmatprep.mubr.msk.f32.mxu1 %vm5126_vm1, %v7043_v29  ;;  %v2936_v32 = vsel %vm184_vm0, %v2537_v5, 0.0  ;;  %v4890_v41 = vpop.eup %4889 }
 0x4a7   :  { %v2029_v9 = vmul.f32 %v4890_v41, %v6723_v47  ;;  %v4892_v15 = vpop.eup %4891 }
 0x4a8   :  { %v2031_v48 = vmul.f32 %v4892_v15, %v6729_v63  ;;  %v3199_v15 = vld [vmem:[#allocation11 + $0x70] sm:$0xff] }
 0x4a9   :  { %4391 = vmatmul.mubr.msk.f32.vlgmr.msra.gmra.mrb[80].mxu1 %vm1595_vm5, %v2007_v25  ;;  %v2542_v50 = vpop.f32.mrb[82].mxu0 }
 0x4aa   :  { %v2937_v55 = vsel %vm184_vm0, %v2542_v50, 0.0  ;;  %v4370_v34 = vpop.f32.mrb[83].mxu0  ;;  %4393 = vmatprep.mubr.msk.f32.mxu1 %vm5126_vm1, %v7043_v29  ;;  %4659 = vmatpush3.bf16.msra.mxu1 %v7106_v7  ;;  %v4894_v37 = vpop.eup %4893  ;;  %v3731_v7 = vld [vmem:[#allocation7] ss:$0 sm:$0xff] }
 0x4ab   :  { %v2938_v61 = vadd.f32 %v2937_v55, %v2936_v32  ;;  %4660 = vmatprep.subr.bf16.mxu1 %v7036_v11 }
 0x4ac   :  { %v4896_v32 = vpop.eup %4895 }
 0x4ad   :  { %4394 = vmatmul.mubr.msk.f32.gmra.mrb[82].mxu1 %vm1595_vm5, %v2009_v60  ;;  %v2547_v14 = vpop.f32.mrb[84].mxu0  ;;  %v2035_v39 = vmul.f32 %v4896_v32, %v6737_v52  ;;  %v3187_v52 = vld [vmem:[#allocation11 + $0x10] sm:$0xff] }
 0x4ae   :  { %v2939_v19 = vsel %vm184_vm0, %v2547_v14, 0.0  ;;  %v4373_v24 = vpop.f32.mrb[85].mxu0  ;;  %4396 = vmatprep.mubr.msk.f32.mxu1 %vm5126_vm1, %v7043_v29  ;;  %4662 = vmatpush3.bf16.msra.mxu1 %v4661_v2  ;;  %v2033_v2 = vmul.f32 %v4894_v37, %v6731_v35  ;;  %v3186_v14 = vld [vmem:[#allocation11 + $0x8] sm:$0xff] }
 0x4af   :  { %v2940_v56 = vadd.f32 %v2939_v19, %v2938_v61  ;;  %4438 = vmatprep.subr.mxu1 %v7043_v29  ;;  %v4680_v19 = vpack.c.bf16 %v3186_v14, %v3185_v12  ;;  %v3188_v24 = vld [vmem:[#allocation11 + $0x18] sm:$0xff] }
 0x4b0   :  { %v4683_v31 = vpack.c.bf16 %v3188_v24, %v3187_v52 }
 0x4b1   :  { %4397 = vmatmul.mubr.msk.f32.gmra.mrb[84].mxu1 %vm1595_vm5, %v2011_v1  ;;  %v2552_v51 = vpop.f32.mrb[86].mxu0  ;;  %v3190_v1 = vld [vmem:[#allocation11 + $0x28] sm:$0xff] }
 0x4b2   :  { %v2941_v40 = vsel %vm184_vm0, %v2552_v51, 0.0  ;;  %v4376_v54 = vpop.f32.mrb[87].mxu0  ;;  %4399 = vmatprep.mubr.msk.f32.mxu1 %vm5126_vm1, %v7043_v29  ;;  %4439 = vmatpush3.msra.mxu1 %v4904_v36  ;;  %v3279_v51 = vld [vmem:[#allocation14] sm:$0xff]  ;;  %v3192_v36 = vld [vmem:[#allocation11 + $0x38] sm:$0xff] }
 0x4b3   :  { %v2942_v57 = vadd.f32 %v2941_v40, %v2940_v56  ;;  %4679 = vmatprep.subr.bf16.mxu1 %v7036_v11  ;;  %v3189_v56 = vld [vmem:[#allocation11 + $0x20] sm:$0xff]  ;;  %v3280_v40 = vld [vmem:[#allocation14 + $0x8] sm:$0xff] }
 0x4b4   :  { %v4686_v45 = vpack.c.bf16 %v3190_v1, %v3189_v56  ;;  %v3191_v54 = vld [vmem:[#allocation11 + $0x30] sm:$0xff]  ;;  %v4704_v23 = vpack.c.bf16 %v3280_v40, %v3279_v51  ;;  %v3358_v42 = vmul.f32 %v3280_v40, %v3280_v40 }
 0x4b5   :  { %4400 = vmatmul.mubr.msk.f32.gmra.mrb[86].mxu1 %vm1595_vm5, %v2013_v59  ;;  %v2557_v27 = vpop.f32.mrb[88].mxu0  ;;  %v3281_v59 = vld [vmem:[#allocation14 + $0x10] sm:$0xff] }
 0x4b6   :  { %v2943_v30 = vsel %vm184_vm0, %v2557_v27, 0.0  ;;  %v4379_v28 = vpop.f32.mrb[89].mxu0  ;;  %4402 = vmatprep.mubr.msk.f32.mxu1 %vm5126_vm1, %v7043_v29  ;;  %v3193_v27 = vld [vmem:[#allocation11 + $0x40] sm:$0xff]  ;;  %v3359_v41 = vmul.f32 %v3281_v59, %v3281_v59 }
 0x4b7   :  { %v6859_v21 = vadd.f32 %v2943_v30, %v2942_v57  ;;  %v4689_v57 = vpack.c.bf16 %v3192_v36, %v3191_v54  ;;  %v3194_v30 = vld [vmem:[#allocation11 + $0x48] sm:$0xff]  ;;  %v4707_v28 = vpack.c.bf16 %v3282_v13, %v3281_v59 }
 0x4b8   :  { %v4692_v58 = vpack.c.bf16 %v3194_v30, %v3193_v27 }
 0x4b9   :  { %4403 = vmatmul.mubr.msk.f32.gmra.mrb[88].mxu1 %vm1595_vm5, %v2015_v3  ;;  %v2747_v8 = vpop.f32.mrb[90].mxu0  ;;  %v3357_v3 = vmul.f32 %v3279_v51, %v3279_v51 }
 0x4ba   :  { %v4417_v46 = vpop.f32.mrb[91].mxu0  ;;  %4440 = vmatprep.mubr.msk.f32.mxu1 %vm5126_vm1, %v7043_v29  ;;  %v2966_v33 = vsel %vm184_vm0, %v2747_v8, 0.0  ;;  %v3195_v8 = vld [vmem:[#allocation11 + $0x50] sm:$0xff] }
 0x4bb   :  { %v3196_v46 = vld [vmem:[#allocation11 + $0x58] sm:$0xff] }
 0x4bc   :  { %v4695_v6 = vpack.c.bf16 %v3196_v46, %v3195_v8 }
 0x4bd   :  { %4441 = vmatmul.mubr.msk.f32.vlgmr.msra.gmra.mrb[90].mxu1 %vm1595_vm5, %v2027_v10  ;;  %v2752_v18 = vpop.f32.mrb[92].mxu0  ;;  %v4711_v10 = vpack.c.bf16 %v3358_v42, %v3357_v3 }
 0x4be   :  { %v2967_v20 = vsel %vm184_vm0, %v2752_v18, 0.0  ;;  %v4420_v49 = vpop.f32.mrb[93].mxu0  ;;  %4443 = vmatprep.mubr.msk.f32.mxu1 %vm5126_vm1, %v7043_v29  ;;  %4681 = vmatpush3.bf16.msra.mxu1 %v4680_v19  ;;  %v3360_v18 = vmul.f32 %v3282_v13, %v3282_v13 }
 0x4bf   :  { %v2968_v22 = vadd.f32 %v2967_v20, %v2966_v33  ;;  %4682 = vmatprep.subr.bf16.mxu1 %v7036_v11  ;;  %v3197_v33 = vld [vmem:[#allocation11 + $0x60] sm:$0xff]  ;;  %v3198_v20 = vld [vmem:[#allocation11 + $0x68] sm:$0xff] }
 0x4c0   :  { %v4714_v49 = vpack.c.bf16 %v3360_v18, %v3359_v41 }
 0x4c1   :  { %4444 = vmatmul.mubr.msk.f32.gmra.mrb[92].mxu1 %vm1595_vm5, %v2029_v9  ;;  %v2757_v0 = vpop.f32.mrb[94].mxu0  ;;  %v4698_v9 = vpack.c.bf16 %v3198_v20, %v3197_v33 }
 0x4c2   :  { %v2969_v5 = vsel %vm184_vm0, %v2757_v0, 0.0  ;;  %v4423_v16 = vpop.f32.mrb[95].mxu0  ;;  %4446 = vmatprep.mubr.msk.f32.mxu1 %vm5126_vm1, %v7043_v29  ;;  %4684 = vmatpush3.bf16.msra.mxu1 %v4683_v31  ;;  %v3200_v0 = vld [vmem:[#allocation11 + $0x78] sm:$0xff] }
 0x4c3   :  { %v2970_v25 = vadd.f32 %v2969_v5, %v2968_v22  ;;  %4685 = vmatprep.subr.bf16.mxu1 %v7036_v11  ;;  %v3356_v22 = vmul.f32 %v6690_v4, %v6690_v4  ;;  %v4701_v5 = vpack.c.bf16 %v3200_v0, %v3199_v15 }
 0x4c5   :  { %4447 = vmatmul.mubr.msk.f32.gmra.mrb[94].mxu1 %vm1595_vm5, %v2031_v48  ;;  %v2762_v50 = vpop.f32.mrb[96].mxu0 }
 0x4c6   :  { %v2971_v38 = vsel %vm184_vm0, %v2762_v50, 0.0  ;;  %v4426_v47 = vpop.f32.mrb[97].mxu0  ;;  %4449 = vmatprep.mubr.msk.f32.mxu1 %vm5126_vm1, %v7043_v29  ;;  %4687 = vmatpush3.bf16.msra.mxu1 %v4686_v45 }
 0x4c7   :  { %v2972_v17 = vadd.f32 %v2971_v38, %v2970_v25  ;;  %4688 = vmatprep.subr.bf16.mxu1 %v7036_v11  ;;  %v2885_v38 = vrot.slane %v6750_v43, 4 }
 0x4c9   :  { %4450 = vmatmul.mubr.msk.f32.gmra.mrb[96].mxu1 %vm1595_vm5, %v2033_v2  ;;  %v2767_v55 = vpop.f32.mrb[98].mxu0 }
 0x4ca   :  { %v2973_v34 = vsel %vm184_vm0, %v2767_v55, 0.0  ;;  %v4429_v63 = vpop.f32.mrb[99].mxu0  ;;  %4452 = vmatprep.mubr.msk.f32.mxu1 %vm5126_vm1, %v7043_v29  ;;  %4690 = vmatpush3.bf16.msra.mxu1 %v4689_v57 }
 0x4cb   :  { %v6886_v44 = vadd.f32 %v2973_v34, %v2972_v17  ;;  %4691 = vmatprep.subr.bf16.mxu1 %v7036_v11  ;;  %v2915_v17 = vrot.slane %v6817_v62, 4 }
 0x4cd   :  { %4453 = vmatmul.mubr.msk.f32.gmra.mrb[98].mxu1 %vm1595_vm5, %v2035_v39  ;;  %v3091_v26 = vpop.f32.mrb[100].mxu0  ;;  %v2916_v63 = vadd.f32 %v2915_v17, %v6817_v62  ;;  %vm3464_vm5 = vcmask 1041409  }
 0x4ce   :  { %v3092_v61 = vadd.f32 %v3731_v7, %v3091_v26  ;;  %v4465_v35 = vpop.f32.mrb[101].mxu0  ;;  %4515 = vmatprep.mubr.msk.f32.mxu1 %vm5126_vm1, %v7043_v29  ;;  %4693 = vmatpush3.bf16.msra.mxu1 %v4692_v58  ;;  %v2945_v58 = vrot.slane %v6859_v21, 4 }
 0x4cf   :  { %4694 = vmatprep.subr.bf16.mxu1 %v7036_v11 }
 0x4d0   :  { %v3095_v60 = vmax.f32 %v3092_v61, 0.0  ;;  %v2946_v33 = vadd.f32 %v2945_v58, %v6859_v21 }
 0x4d2   :  { %4481 = vmatmul.mubr.msk.f32.vlgmr.msra.gmra.mrb[102].mxu0 %vm3110_vm11, %v3095_v60  ;;  %4696 = vmatpush3.bf16.msra.mxu1 %v4695_v6  ;;  %v2917_v60 = vrot.slane %v2916_v63, 2 }
 0x4d3   :  { %4526 = vmatprep.mubr.msk.f32.mxu0 %vm5126_vm1, %v7043_v29  ;;  %4705 = vmatpush3.bf16.msra.mxu0 %v4704_v23 }
 0x4d4   :  { %4706 = vmatprep.subr.bf16.mxu0 %v7036_v11  ;;  %4697 = vmatprep.subr.bf16.mxu1 %v7036_v11  ;;  %v2918_v56 = vadd.f32 %v2917_v60, %v2916_v63 }
 0x4d6   :  { %4699 = vmatpush3.bf16.msra.mxu1 %v4698_v9  ;;  %v2919_v40 = vrot.slane %v2918_v56, 1 }
 0x4d7   :  { %4709 = vmatpush3.bf16.msk.msra.mxu0 %vm6629_vm9, %v4707_v28  ;;  %4700 = vmatprep.subr.bf16.mxu1 %v7036_v11 }
 0x4d8   :  { %4710 = vmatprep.subr.bf16.mxu0 %v7036_v11  ;;  %v2920_v28 = vadd.f32 %v2919_v40, %v2918_v56 }
 0x4da   :  { %4527 = vmatmul.mubr.msk.f32.vlgmr.msra.gmra.mrb[104].mxu0 %vm3017_vm10, %v6690_v4  ;;  %4702 = vmatpush3.bf16.msra.mxu1 %v4701_v5  ;;  %v2999_v18 = vmul.f32 0.025, %v2920_v28  ;;  %v2947_v5 = vrot.slane %v2946_v33, 2 }
 0x4db   :  { %4712 = vmatpush3.bf16.msra.mxu0 %v4711_v10  ;;  %4537 = vmatprep.mubr.msk.f32.mxu0 %vm5126_vm1, %v7043_v29 }
 0x4dc   :  { %4713 = vmatprep.subr.bf16.mxu0 %v7036_v11  ;;  %4717 = vmatprep.subr.bf16.mxu1 %v7036_v11  ;;  %v2886_v11 = vadd.f32 %v2885_v38, %v6750_v43 }
 0x4de   :  { %v2887_v61 = vrot.slane %v2886_v11, 2 }
 0x4df   :  { %4716 = vmatpush3.bf16.msk.msra.mxu0 %vm6629_vm9, %v4714_v49 }
 0x4e0   :  { %v2888_v52 = vadd.f32 %v2887_v61, %v2886_v11 }
 0x4e2   :  { %4538 = vmatmul.mubr.msk.f32.vlgmr.msra.gmra.mrb[106].mxu0 %vm3017_vm10, %v3356_v22  ;;  %v2889_v45 = vrot.slane %v2888_v52, 1 }
 0x4e4   :  { %v2890_v13 = vadd.f32 %v2889_v45, %v2888_v52 }
 0x4e6   :  { %v2997_v10 = vmul.f32 0.025, %v2890_v13 }
 0x554   :  { %v2222_v16 = vpop.f32.mrb[60].mxu1 }
 0x555   :  { %v4292_v25 = vpop.f32.mrb[61].mxu1  ;;  %v2891_v4 = vsel %vm184_vm0, %v2222_v16, 0.0 }
 0x558   :  { %v2227_v48 = vpop.f32.mrb[62].mxu1 }
 0x559   :  { %v2892_v37 = vsel %vm184_vm0, %v2227_v48, 0.0  ;;  %v4295_v53 = vpop.f32.mrb[63].mxu1 }
 0x55a   :  { %v2893_v50 = vadd.f32 %v2892_v37, %v2891_v4  ;;  %v2948_v53 = vadd.f32 %v2947_v5, %v2946_v33 }
 0x55c   :  { %v2232_v47 = vpop.f32.mrb[64].mxu1  ;;  %v2949_v21 = vrot.slane %v2948_v53, 1 }
 0x55d   :  { %v2894_v2 = vsel %vm184_vm0, %v2232_v47, 0.0  ;;  %v4298_v32 = vpop.f32.mrb[65].mxu1 }
 0x55e   :  { %v2895_v55 = vadd.f32 %v2894_v2, %v2893_v50 }
 0x560   :  { %v2237_v34 = vpop.f32.mrb[66].mxu1 }
 0x561   :  { %v2896_v39 = vsel %vm184_vm0, %v2237_v34, 0.0  ;;  %v4301_v7 = vpop.f32.mrb[67].mxu1 }
 0x562   :  { %v2897_v26 = vadd.f32 %v2896_v39, %v2895_v55  ;;  %v2950_v7 = vadd.f32 %v2949_v21, %v2948_v53 }
 0x564   :  { %v2242_v35 = vpop.f32.mrb[68].mxu1  ;;  %v3001_v52 = vmul.f32 0.025, %v2950_v7 }
 0x565   :  { %v2898_v12 = vsel %vm184_vm0, %v2242_v35, 0.0  ;;  %v4304_v14 = vpop.f32.mrb[69].mxu1 }
 0x566   :  { %v2899_v19 = vadd.f32 %v2898_v12, %v2897_v26  ;;  %v2975_v26 = vrot.slane %v6886_v44, 4 }
 0x568   :  { %v2900_v24 = vrot.slane %v2899_v19, 4  ;;  %v2432_v31 = vpop.f32.mrb[70].mxu1 }
 0x569   :  { %v4342_v1 = vpop.f32.mrb[71].mxu1  ;;  %v2921_v54 = vsel %vm184_vm0, %v2432_v31, 0.0 }
 0x56a   :  { %v2901_v43 = vadd.f32 %v2900_v24, %v2899_v19  ;;  %v2976_v24 = vadd.f32 %v2975_v26, %v6886_v44 }
 0x56c   :  { %v2902_v51 = vrot.slane %v2901_v43, 2  ;;  %v2437_v62 = vpop.f32.mrb[72].mxu1 }
 0x56d   :  { %v2922_v36 = vsel %vm184_vm0, %v2437_v62, 0.0  ;;  %v4345_v23 = vpop.f32.mrb[73].mxu1  ;;  %v2977_v62 = vrot.slane %v2976_v24, 2 }
 0x56e   :  { %v2903_v57 = vadd.f32 %v2902_v51, %v2901_v43  ;;  %v2923_v59 = vadd.f32 %v2922_v36, %v2921_v54 }
 0x570   :  { %v2904_v27 = vrot.slane %v2903_v57, 1  ;;  %v2442_v30 = vpop.f32.mrb[74].mxu1 }
 0x571   :  { %v2924_v3 = vsel %vm184_vm0, %v2442_v30, 0.0  ;;  %v4348_v42 = vpop.f32.mrb[75].mxu1 }
 0x572   :  { %v2905_v8 = vadd.f32 %v2904_v27, %v2903_v57  ;;  %v2925_v46 = vadd.f32 %v2924_v3, %v2923_v59  ;;  %v2978_v59 = vadd.f32 %v2977_v62, %v2976_v24 }
 0x574   :  { %v2998_v6 = vmul.f32 0.025, %v2905_v8  ;;  %v2447_v41 = vpop.f32.mrb[76].mxu1  ;;  %v2979_v44 = vrot.slane %v2978_v59, 1 }
 0x575   :  { %v2926_v20 = vsel %vm184_vm0, %v2447_v41, 0.0  ;;  %v4351_v49 = vpop.f32.mrb[77].mxu1 }
 0x576   :  { %v3465_v22 = vsel %vm3464_vm5, %v2998_v6, %v2997_v10  ;;  %v2927_v9 = vadd.f32 %v2926_v20, %v2925_v46  ;;  %v2980_v41 = vadd.f32 %v2979_v44, %v2978_v59 }
 0x577   :  { %v3467_v15 = vsel %vm3466_vm12, %v2999_v18, %v3465_v22 }
 0x578   :  { %v2452_v0 = vpop.f32.mrb[78].mxu1 }
 0x579   :  { %v2928_v16 = vsel %vm184_vm0, %v2452_v0, 0.0  ;;  %v4354_v25 = vpop.f32.mrb[79].mxu1 }
 0x57a   :  { %v2929_v48 = vadd.f32 %v2928_v16, %v2927_v9  ;;  %v7107_v16 = vld [vmem:[#allocation38_spill] sm:$0xff] }
 0x57b   :  { %v3445_v25 = vadd.s32 8, %v7107_v16  ;;  %v3448_v21 = vadd.s32 50, %v7107_v16 }
 0x57c   :  { %v2930_v4 = vrot.slane %v2929_v48, 4  ;;  %v2642_v37 = vpop.f32.mrb[80].mxu1 }
 0x57d   :  { %v4392_v50 = vpop.f32.mrb[81].mxu1  ;;  %v2951_v2 = vsel %vm184_vm0, %v2642_v37, 0.0 }
 0x57e   :  { %v2931_v38 = vadd.f32 %v2930_v4, %v2929_v48 }
 0x580   :  { %v2932_v47 = vrot.slane %v2931_v38, 2  ;;  %v2647_v17 = vpop.f32.mrb[82].mxu1 }
 0x581   :  { %v2952_v32 = vsel %vm184_vm0, %v2647_v17, 0.0  ;;  %v4395_v55 = vpop.f32.mrb[83].mxu1 }
 0x582   :  { %v2933_v11 = vadd.f32 %v2932_v47, %v2931_v38  ;;  %v2953_v34 = vadd.f32 %v2952_v32, %v2951_v2  ;;  %v7108_v47 = vlaneseq  ;;  %v3449_v2 = vadd.s32 50, %v3445_v25  ;;  %v3734_v55 = vld [vmem:[#allocation10] ss:$0 sm:$0xff] }
 0x584   :  { %v2934_v63 = vrot.slane %v2933_v11, 1  ;;  %v2652_v39 = vpop.f32.mrb[84].mxu1  ;;  %v3447_v17 = vand.u32 127, %v7108_v47 }
 0x585   :  { %v2954_v61 = vsel %vm184_vm0, %v2652_v39, 0.0  ;;  %v4398_v35 = vpop.f32.mrb[85].mxu1 }
 0x586   :  { %v2935_v60 = vadd.f32 %v2934_v63, %v2933_v11  ;;  %v2955_v12 = vadd.f32 %v2954_v61, %v2953_v34  ;;  %vm3450_vm3 = vcmp.eq.s32.totalorder %v3447_v17, %v3448_v21  ;;  %vm3451_vm4 = vcmp.eq.s32.totalorder %v3447_v17, %v3449_v2 }
 0x587   :  { %vm4718_vm6 = vmpackc.low %vm3451_vm4, %vm3450_vm3 }
 0x588   :  { %v3000_v14 = vmul.f32 0.025, %v2935_v60  ;;  %v2657_v19 = vpop.f32.mrb[86].mxu1  ;;  %v5130_v60 = vmov 1.0|1.0  }
 0x589   :  { %v2956_v31 = vsel %vm184_vm0, %v2657_v19, 0.0  ;;  %v4401_v56 = vpop.f32.mrb[87].mxu1 }
 0x58a   :  { %v3469_v1 = vsel %vm3468_vm13, %v3000_v14, %v3467_v15  ;;  %v2957_v43 = vadd.f32 %v2956_v31, %v2955_v12  ;;  %v3003_v15 = vmul.f32 0.025, %v2980_v41 }
 0x58b   :  { %v3471_v45 = vsel %vm3470_vm14, %v3001_v52, %v3469_v1 }
 0x58c   :  { %v2662_v51 = vpop.f32.mrb[88].mxu1 }
 0x58d   :  { %v2958_v40 = vsel %vm184_vm0, %v2662_v51, 0.0  ;;  %v4404_v54 = vpop.f32.mrb[89].mxu1  ;;  %v3736_v51 = vld [vmem:[#allocation13] ss:$0 sm:$0xff] }
 0x58e   :  { %v2959_v36 = vadd.f32 %v2958_v40, %v2957_v43 }
 0x590   :  { %v2960_v23 = vrot.slane %v2959_v36, 4  ;;  %v2852_v57 = vpop.f32.mrb[90].mxu1 }
 0x591   :  { %v4442_v13 = vpop.f32.mrb[91].mxu1  ;;  %v2981_v58 = vsel %vm184_vm0, %v2852_v57, 0.0 }
 0x592   :  { %v2961_v27 = vadd.f32 %v2960_v23, %v2959_v36 }
 0x594   :  { %v2962_v30 = vrot.slane %v2961_v27, 2  ;;  %v2857_v28 = vpop.f32.mrb[92].mxu1 }
 0x595   :  { %v2982_v3 = vsel %vm184_vm0, %v2857_v28, 0.0  ;;  %v4445_v42 = vpop.f32.mrb[93].mxu1 }
 0x596   :  { %v2963_v8 = vadd.f32 %v2962_v30, %v2961_v27  ;;  %v2983_v46 = vadd.f32 %v2982_v3, %v2981_v58 }
 0x598   :  { %v2964_v10 = vrot.slane %v2963_v8, 1  ;;  %v2862_v6 = vpop.f32.mrb[94].mxu1 }
 0x599   :  { %v2984_v18 = vsel %vm184_vm0, %v2862_v6, 0.0  ;;  %v4448_v33 = vpop.f32.mrb[95].mxu1 }
 0x59a   :  { %v2965_v20 = vadd.f32 %v2964_v10, %v2963_v8  ;;  %v2985_v49 = vadd.f32 %v2984_v18, %v2983_v46 }
 0x59c   :  { %v3002_v22 = vmul.f32 0.025, %v2965_v20  ;;  %v2867_v9 = vpop.f32.mrb[96].mxu1 }
 0x59d   :  { %v2986_v0 = vsel %vm184_vm0, %v2867_v9, 0.0  ;;  %v4451_v5 = vpop.f32.mrb[97].mxu1 }
 0x59e   :  { %v2987_v48 = vadd.f32 %v2986_v0, %v2985_v49  ;;  %v3473_v4 = vsel %vm3472_vm15, %v3002_v22, %v3471_v45 }
 0x59f   :  { %v3475_v37 = vsel %vm3474_vm2, %v3003_v15, %v3473_v4 }
 0x5a0   :  { %v2872_v53 = vpop.f32.mrb[98].mxu1 }
 0x5a1   :  { %v2988_v50 = vsel %vm184_vm0, %v2872_v53, 0.0  ;;  %v4454_v38 = vpop.f32.mrb[99].mxu1 }
 0x5a2   :  { %v2989_v32 = vadd.f32 %v2988_v50, %v2987_v48 }
 0x5a4   :  { %v2990_v11 = vrot.slane %v2989_v32, 4 }
 0x5a5   :  { %v3180_v34 = vpop.f32.mrb[102].mxu0 }
 0x5a6   :  { %v2991_v63 = vadd.f32 %v2990_v11, %v2989_v32  ;;  %v3181_v39 = vadd.f32 %v3734_v55, %v3180_v34  ;;  %v4482_v7 = vpop.f32.mrb[103].mxu0 }
 0x5a8   :  { %v2992_v26 = vrot.slane %v2991_v63, 2  ;;  %v3184_v61 = vmax.f32 %v3181_v39, 0.0 }
 0x5aa   :  { %v2993_v35 = vadd.f32 %v2992_v26, %v2991_v63  ;;  %4516 = vmatmul.mubr.f32.vlgmr.msra.gmra.mrb[100].mxu1 %v3184_v61 }
 0x5ab   :  { %4719 = vmatpush3.bf16.msk.msra.mxu1 %vm4718_vm6, %v5130_v60  ;;  %4544 = vmatprep.mubr.msk.f32.mxu1 %vm5126_vm1, %v7043_v29 }
 0x5ac   :  { %v2994_v12 = vrot.slane %v2993_v35, 1 }
 0x5ad   :  { %v3352_v24 = vpop.f32.mrb[104].mxu0 }
 0x5ae   :  { %v2995_v14 = vadd.f32 %v2994_v12, %v2993_v35  ;;  %v4528_v31 = vpop.f32.mrb[105].mxu0  ;;  %v3437_v56 = vmul.f32 %v3352_v24, %v3352_v24 }
 0x5b0   :  { %v3004_v19 = vmul.f32 0.025, %v2995_v14 }
 0x5b2   :  { %v3477_v52 = vsel %vm3476_vm7, %v3004_v19, %v3475_v37 }
 0x5b3   :  { %4545 = vmatmul.mubr.msk.f32.vlgmr.msra.gmra.mrb[102].mxu1 %vm184_vm0, %v3477_v52 }
 0x5b5   :  { %v3433_v1 = vpop.f32.mrb[106].mxu0 }
 0x5b6   :  { %v3438_v43 = vsub.f32 %v3437_v56, %v3433_v1  ;;  %v4539_v45 = vpop.f32.mrb[107].mxu0 }
 0x5b8   :  { %v3439_v54 = vmul.f32 0.5, %v3438_v43 }
 0x5ba   :  { %v3441_v57 = vmul.f32 0.5, %v3439_v54 }
 0x67d   :  { %v3274_v62 = vpop.f32.mrb[100].mxu1 }
 0x67e   :  { %v3275_v40 = vadd.f32 %v3736_v51, %v3274_v62  ;;  %v4517_v36 = vpop.f32.mrb[101].mxu1 }
 0x680   :  { %v3278_v23 = vmax.f32 %v3275_v40, 0.0 }
 0x682   :  { %v3440_v29 = vmul.f32 0.5, %v3278_v23 }
 0x684   :  { %v3442_v59 = vadd.f32 %v3441_v57, %v3440_v29 }
 0x686   :  { %v3546_v13 = vpop.f32.mrb[102].mxu1 }
 0x687   :  { %v3550_v27 = vadd.f32 %v3546_v13, %v3442_v59  ;;  %v4546_v30 = vpop.f32.mrb[103].mxu1 }
 0x689   :  { %3551 = vst [vmem:[#allocation16] sm:$0xff] %v3550_v27 }
 0x68a   :  { %5092 = shalt.err (!%p5089_p12)
}
 0x68b   :  { %s5093_s2 = scalar_lea.hbm %s6973_s11, 128 }
 0x68c   :  { %p5094_p13 = scmp.ne.s32.totalorder %s6973_s11, %s5093_s2  ;;  %p5097_p0 = scmp.lt.u32.totalorder %s5093_s2, %s6973_s11 }
 0x68e   :  { %p5099_p1 = pnand %p5097_p0, %p5094_p13 }
 0x690   :  { %5102 = shalt.err (!%p5099_p1)
}
 0x691   :  { %3561 = dma.vmem_to_hbm [thread:$0]  %s3559_s30, 128, %s6973_s11, [#allocation4]  }
 0x692   :  { %5113 = dma.done.wait [#allocation4], 128  }
 0x693   :  { %5114 = vsyncadd [#allocation4], 4294967168 }
 0x694   :  { %3565 = vsyncpa [#allocation3], 1 }
 0x695   :  { %3566 = vsyncpa [#allocation6], 1 }
 0x696   :  { %3567 = vsyncpa [#allocation9], 1 }
 0x697   :  { %3568 = vsyncpa [#allocation12], 1 }
 0x698   :  { %3569 = vsyncpa [#allocation15], 1 }
 0x699   :  { %3570 = vsyncpa [#allocation4], 1 }

// kernel: deepnet_forward.6
= control target key start
LH: loop header
LB: loop body
LE: loop exit
PB: predicated region body
PF: predicated region fallthrough
CT: control target
= control target key end

     0   :  { %s3111_s0 = inlined_call_operand.hbm [shape: f32[8,1024], index: 0, kind: input, shape index: {}]   ;;  %s3112_s1 = inlined_call_operand.hbm [shape: f32[1024,2048], index: 1, kind: input, shape index: {}]   ;;  %s3113_s2 = inlined_call_operand.hbm [shape: f32[1,2048], index: 2, kind: input, shape index: {}]   ;;  %s3114_s3 = inlined_call_operand.hbm [shape: f32[8,2048], index: 3, kind: output, shape index: {}]  }
   0x1   :  { %3120 = sst [smem:[#allocation12_spill]] %s3112_s1 }
   0x2   :  { %8 = vsyncpa [#allocation3], 0 }
   0x3   :  { %9 = vsyncpa [#allocation6], 0 }
   0x4   :  { %11 = vsyncpa [#allocation6 + $0x1], 0 }
   0x5   :  { %12 = vsyncpa [#allocation4], 0 }
   0x6   :  { %14 = vsyncpa [#allocation4 + $0x1], 0  ;;  %s2348_s12 = smov 0   ;;  %s2350_s13 = smov 0  }
   0x7   :  { %s2352_s14 = smov 0   ;;  %s2354_s15 = smov 0  }
   0x8   :  { %s2356_s16 = smov 0   ;;  %s2358_s17 = smov 0  }
   0x9 LB: > { %s29_s18 = sadd.s32 1, %s2315_s16  ;;  %s65_s19 = sadd.s32 1, %s2307_s14  ;;  %s2319_s17 = sphi %s2358_s17, %s20_s17   ;;  %s2315_s16 = sphi %s2356_s16, %s3139_s16   ;;  %s2311_s15 = sphi %s2354_s15, %s3138_s15   ;;  %s2307_s14 = sphi %s2352_s14, %s3137_s14   ;;  %s2303_s13 = sphi %s2350_s13, %s3136_s13   ;;  %s2299_s12 = sphi %s2348_s12, %s3135_s12  }
   0xa   : > { %p30_p0 = scmp.ge.s32.totalorder %s29_s18, 4  ;;  %p72_p1 = scmp.ne.s32.totalorder %s2307_s14, %s2303_s13 }
   0xb   : > { %p73_p2 = scmp.eq.s32.totalorder %s2319_s17, 0  ;;  %p2090_p4 = scmp.lt.s32.totalorder %s2319_s17, 4 }
   0xc   : > { %s3141_s18 = smov (%p30_p0, %s29_s18), 0  ;;  %s170_s21 = sand.u32 1, %s2319_s17  }
   0xd   : > { %p74_p3 = por %p73_p2, %p72_p1  ;;  %s62_s20 = ssub.s32 %s2315_s16, %s3141_s18 }
   0xe   : > { %p63_p5 = scmp.eq.s32.totalorder %s62_s20, 0  ;;  %s172_s22 = sand.u32 1, %s2307_s14  }
   0xf   : > { %s1533_s23 = sshll.u32 %s2315_s16, 9  ;;  %s1517_s25 = sshll.u32 %s172_s22, 12 }
  0x10   : > { %s2395_s24 = scalar_select %p63_p5, %s2307_s14, %s65_s19  }
  0x11   : > { %s3121_s1 = sld [smem:[#allocation12_spill]]  ;;  %p2404_p6 = pnand %p2090_p4, %p74_p3 }
  0x12   : > { %s174_s30 = scalar_lea.vmem [#allocation5], %s1517_s25  ;;  %s2410_s5 = scalar_lea.sflag [#allocation6], %s170_s21 }
  0x13   : > { %s181_s4 = sshll.u32 %s174_s30, 4  ;;  %p2147_p8 = pneg %p2404_p6  ;;  %s2408_s4 = int_to_ptr.vmem [resolvable:$true] %s181_s4 }
  0x17   : > { %s2402_s28 = scalar_lea.hbm %s3121_s1, %s1533_s23  ;;  %s2150_s9 = scalar_lea.hbm %s3121_s1, 262144 }
  0x18   : > { %s2145_s6 = scalar_lea.hbm %s2402_s28, 65536  ;;  %p2151_p11 = scmp.lt.u32.totalorder %s2402_s28, %s3121_s1 }
  0x19   : > { %p2146_p7 = scmp.ne.s32.totalorder %s2402_s28, %s2145_s6  ;;  %p2152_p12 = scmp.lt.u32.totalorder %s2150_s9, %s2145_s6 }
  0x1a   : > { %p2154_p0 = scmp.lt.u32.totalorder %s2145_s6, %s2402_s28 }
  0x1b   : > { %p2148_p9 = pnand %p2147_p8, %p2146_p7  ;;  %p2153_p13 = por %p2152_p12, %p2151_p11 }
  0x1d   : > { %p2149_p10 = pneg %p2148_p9  ;;  %p2155_p2 = por %p2154_p0, %p2153_p13 }
  0x1f   : > { %p2156_p3 = pnand %p2155_p2, %p2149_p10 }
  0x21   : > { %2159 = shalt.err (!%p2156_p3)
}
  0x22   : > { %s2160_s19 = scalar_lea.vmem %s2408_s4, 65536  ;;  %s2321_s20 = smov [#allocation5]  }
  0x23   : > { %p2161_p4 = scmp.ne.s32.totalorder %s2408_s4, %s2160_s19  ;;  %s2165_s21 = sshll.u32 %s2321_s20, 4  ;;  %s2166_s21 = int_to_ptr.vmem [resolvable:$false] %s2165_s21 }
  0x24   : > { %s2167_s23 = scalar_lea.vmem %s2166_s21, 131072  ;;  %p2168_p9 = scmp.lt.s32.totalorder %s2408_s4, %s2166_s21 }
  0x25   : > { %p2163_p5 = pnand %p2161_p4, %p2147_p8  ;;  %p2169_p11 = scmp.lt.s32.totalorder %s2167_s23, %s2160_s19 }
  0x27   : > { %p2164_p7 = pneg %p2163_p5  ;;  %p2170_p12 = por %p2169_p11, %p2168_p9 }
  0x29   : > { %p2171_p13 = pnand %p2170_p12, %p2164_p7 }
  0x2b   : > { %2174 = shalt.err (!%p2171_p13)
}
  0x2c   : > { %s2322_s25 = smov 2048   ;;  %s2323_s26 = smov 512  }
  0x2d   : > { %s2324_s27 = smov 32   ;;  %s2439_s30 = sadd.s32 4294967295, %s2319_s17  }
  0x2e   : > { %2081 = dma.hbm_to_vmem [thread:$0]  (!%p2404_p6), %s2402_s28, 65536, %s2408_s4, %s2410_s5, %s2322_s25, %s2323_s26, %s2324_s27  }
  0x2f   : > { %s1513_s6 = sadd.s32 4294967294, %s2319_s17   ;;  %p78_p10 = scmp.ne.s32.totalorder %s2303_s13, %s2299_s12 }
  0x30   : > { %p3115_p0 = scmp.eq.s32.totalorder %s2439_s30, 0  ;;  %p130_p2 = scmp.eq.s32.totalorder %s2439_s30, 3 }
  0x31   : > { %p136_p3 = scmp.eq.s32.totalorder %s1513_s6, 3  ;;  %p1514_p5 = scmp.ge.s32.totalorder %s2319_s17, 1 }
  0x32   : > { %p2448_p4 = por %p3115_p0, %p78_p10  ;;  %p2456_p7 = por %p130_p2, %p72_p1 }
  0x33   : > { %p2460_p9 = por %p136_p3, %p78_p10  ;;  %p143_p11 = scmp.lt.s32.totalorder %s2319_s17, 5 }
  0x34   : > { %s3123_s7 = scalar_select %p2448_p4, 1, 0 }
  0x35   : > { %s3124_s28 = scalar_select %p2456_p7, 1, 0 }
  0x36   : > { %s3125_s4 = scalar_select %p2460_p9, 1, 0 }
  0x37   : > { %s1520_s8 = sshll.u32 %s172_s22, 2  ;;  %p2467_p12 = pnand %p1514_p5, %p143_p11 }
  0x38   : > { %s2325_s10 = smov [#allocation2]   ;;  %s1534_s19 = sshll.u32 %s2315_s16, 6 }
  0x39   : > { %s3126_s9 = scalar_select %p2467_p12, 1, 0 }
  0x3a   : > { %s159_s11 = sshll.u32 %s2325_s10, 4  ;;  %p2074_p1 = pneg %p2467_p12  ;;  %s2471_s11 = int_to_ptr.vmem [resolvable:$true] %s159_s11 }
  0x3b   : > { %s2479_s23 = scalar_lea.hbm %s3113_s2, %s1534_s19  ;;  %s195_s22 = scalar_lea.vmem [#allocation7], %s1520_s8 }
  0x3c   : > { %s203_s25 = sshll.u32 %s195_s22, 4  ;;  %p2483_p13 = pnand %p2074_p1, %p3115_p0  ;;  %s204_s25 = int_to_ptr.vmem [resolvable:$true] %s203_s25 }
  0x3d   : > { %s2175_s27 = scalar_lea.hbm %s2479_s23, 64  ;;  %s2180_s19 = scalar_lea.hbm %s3113_s2, 256 }
  0x3e   : > { %s3127_s26 = scalar_select %p2483_p13, 1, 0 }
  0x3f   : > { %p2176_p10 = scmp.ne.s32.totalorder %s2479_s23, %s2175_s27  ;;  %p2181_p5 = scmp.lt.u32.totalorder %s2479_s23, %s3113_s2 }
  0x40   : > { %p2182_p11 = scmp.lt.u32.totalorder %s2180_s19, %s2175_s27  ;;  %p2184_p0 = scmp.lt.u32.totalorder %s2175_s27, %s2479_s23 }
  0x41   : > { %p2178_p2 = pnand %p2176_p10, %p2147_p8 }
  0x42   : > { %p2183_p1 = por %p2182_p11, %p2181_p5 }
  0x43   : > { %p2179_p3 = pneg %p2178_p2 }
  0x44   : > { %p2185_p9 = por %p2184_p0, %p2183_p1 }
  0x46   : > { %p2186_p7 = pnand %p2185_p9, %p2179_p3 }
  0x48   : > { %2189 = shalt.err (!%p2186_p7)
}
  0x49   : > { %s2190_s8 = scalar_lea.vmem %s204_s25, 64  ;;  %s2326_s22 = smov [#allocation7]  }
  0x4a   : > { %p2191_p4 = scmp.ne.s32.totalorder %s204_s25, %s2190_s8  ;;  %s2195_s6 = sshll.u32 %s2326_s22, 4  ;;  %s2196_s6 = int_to_ptr.vmem [resolvable:$false] %s2195_s6 }
  0x4b   : > { %s2197_s10 = scalar_lea.vmem %s2196_s6, 128  ;;  %p2198_p12 = scmp.lt.s32.totalorder %s204_s25, %s2196_s6 }
  0x4c   : > { %p2193_p10 = pnand %p2191_p4, %p2147_p8  ;;  %p2199_p13 = scmp.lt.s32.totalorder %s2197_s10, %s2190_s8 }
  0x4e   : > { %p2194_p2 = pneg %p2193_p10  ;;  %p2200_p5 = por %p2199_p13, %p2198_p12 }
  0x50   : > { %p2201_p11 = pnand %p2200_p5, %p2194_p2 }
  0x52   : > { %2204 = shalt.err (!%p2201_p11)
}
  0x53   : > { %2084 = dma.hbm_to_vmem [thread:$0]  (!%p2404_p6), %s2479_s23, 64, %s204_s25, %s2410_s5  }
  0x54   : > { %s2205_s20 = scalar_lea.hbm %s3111_s0, 1024  ;;  %p3128_p0 = scmp.ne.s32.totalorder %s3127_s26, 0 }
  0x55   : > { %p2206_p8 = scmp.ne.s32.totalorder %s3111_s0, %s2205_s20  ;;  %p2212_p12 = scmp.lt.u32.totalorder %s2205_s20, %s3111_s0 }
  0x56   : > { %p2207_p4 = pneg %p3128_p0 }
  0x58   : > { %p2208_p7 = pnand %p2207_p4, %p2206_p8 }
  0x5a   : > { %p2209_p9 = pneg %p2208_p7 }
  0x5c   : > { %p2214_p13 = pnand %p2212_p12, %p2209_p9 }
  0x5e   : > { %2217 = shalt.err (!%p2214_p13)
}
  0x5f   : > { %s2218_s29 = scalar_lea.vmem %s2471_s11, 1024  ;;  %p2226_p10 = scmp.lt.s32.totalorder %s2471_s11, %s2471_s11 }
  0x60   : > { %p2219_p6 = scmp.ne.s32.totalorder %s2471_s11, %s2218_s29  ;;  %p2227_p2 = scmp.lt.s32.totalorder %s2218_s29, %s2218_s29 }
  0x62   : > { %p2221_p3 = pnand %p2219_p6, %p2207_p4  ;;  %p2228_p5 = por %p2227_p2, %p2226_p10 }
  0x64   : > { %p2222_p1 = pneg %p2221_p3 }
  0x66   : > { %p2229_p11 = pnand %p2228_p5, %p2222_p1 }
  0x68   : > { %2232 = shalt.err (!%p2229_p11)
}
  0x69   : > { %2077 = dma.hbm_to_vmem [thread:$0]  (!%p3128_p0), %s3111_s0, 1024, %s2471_s11, [#allocation3]  }
  0x6a   : > { %p3129_p8 = scmp.ne.s32.totalorder %s3126_s9, 0 }
  0x6b   : > { %p3130_p7 = scmp.eq.s32.totalorder (!%p3129_p8), %s2439_s30, 0 }
  0x6c   : > { %212 = sbr.rel (%p3129_p8) target bundleno = 613 (0x265), region = 32 }
  0x73   : > { %2286 = dma.done.wait (%p3130_p7), [#allocation3], 1024   ;;  %p3131_p4 = pmov %p3130_p7 }
  0x74   : > { %s218_s23 = sand.u32 1, %s2439_s30   ;;  %s2536_s25 = sand.u32 1, %s2303_s13  }
  0x75   : > { %2288 = vsyncadd (%p3131_p4), [#allocation3], 4294966272  ;;  %s1525_s26 = sshll.u32 %s2536_s25, 12  ;;  %s219_s6 = scalar_lea.sflag [#allocation6], %s218_s23 }
  0x76   : > { %s2539_s10 = scalar_lea.vmem [#allocation5], %s1525_s26  ;;  %p3132_p0 = scmp.ne.s32.totalorder %s3123_s7, 0 }
  0x78   : > { %2290 = dma.done.wait (%p3132_p0), %s219_s6, 65600  }
  0x79   : > { %2292 = vsyncadd (%p3132_p0), %s219_s6, 4294901696  ;;  %v271_v0 = vld [vmem:[%s2539_s10 + $0x8] sm:$0xff]  ;;  %v273_v2 = vld [vmem:[%s2539_s10 + $0x18] sm:$0xff]  ;;  %s1526_s30 = sshll.u32 %s2536_s25, 2  ;;  %s1527_s9 = sshll.u32 %s2536_s25, 5 }
  0x7a   : > { %v275_v1 = vld [vmem:[%s2539_s10 + $0x28] sm:$0xff]  ;;  %v277_v4 = vld [vmem:[%s2539_s10 + $0x38] sm:$0xff]  ;;  %v270_v5 = vld [vmem:[%s2539_s10] sm:$0xff]  ;;  %s231_s7 = scalar_lea.vmem [#allocation7], %s1526_s30  ;;  %s1535_s11 = sshll.u32 %s2311_s15, 9 }
  0x7b   : > { %v1536_v3 = vpack.c.bf16 %v275_v1, %v271_v0  ;;  %v274_v6 = vld [vmem:[%s2539_s10 + $0x20] sm:$0xff]  ;;  %v1792_v7 = vpack.c.bf16 %v277_v4, %v273_v2  ;;  %v272_v9 = vld [vmem:[%s2539_s10 + $0x10] sm:$0xff]  ;;  %v279_v11 = vld [vmem:[%s2539_s10 + $0x48] sm:$0xff]  ;;  %s258_s27 = scalar_lea.vmem [#allocation8], %s1527_s9  ;;  %s3063_s8 = scalar_lea.hbm %s3114_s3, %s1535_s11 }
  0x7c   : > { %v1538_v8 = vpack.c.bf16 %v274_v6, %v270_v5  ;;  %v276_v10 = vld [vmem:[%s2539_s10 + $0x30] sm:$0xff]  ;;  %v283_v13 = vld [vmem:[%s2539_s10 + $0x68] sm:$0xff]  ;;  %v281_v14 = vld [vmem:[%s2539_s10 + $0x58] sm:$0xff]  ;;  %s1397_s19 = sshll.u32 %s258_s27, 4  ;;  %s1381_s15 = scalar_lea.sflag [#allocation4], %s2536_s25  ;;  %s3065_s19 = int_to_ptr.vmem [resolvable:$true] %s1397_s19 }
  0x7d   : > { %1537 = vmatprep.subr.bf16.mxu0 %v1536_v3  ;;  %v1794_v12 = vpack.c.bf16 %v276_v10, %v272_v9  ;;  %v285_v15 = vld [vmem:[%s2539_s10 + $0x78] sm:$0xff]  ;;  %1793 = vmatprep.subr.bf16.mxu1 %v1792_v7  ;;  %v1540_v16 = vpack.c.bf16 %v283_v13, %v279_v11  ;;  %v278_v18 = vld [vmem:[%s2539_s10 + $0x40] sm:$0xff]  ;;  %v280_v20 = vld [vmem:[%s2539_s10 + $0x50] sm:$0xff]  ;;  %s2233_s22 = scalar_lea.vmem %s3065_s19, 512  ;;  %p3133_p12 = scmp.ne.s32.totalorder %s3124_s28, 0 }
  0x7e   : > { %1539 = vmatpush1.bf16.msra.mxu0 %v1538_v8  ;;  %v1796_v17 = vpack.c.bf16 %v285_v15, %v281_v14  ;;  %v282_v19 = vld [vmem:[%s2539_s10 + $0x60] sm:$0xff]  ;;  %v284_v22 = vld [vmem:[%s2539_s10 + $0x70] sm:$0xff]  ;;  %v287_v23 = vld [vmem:[%s2539_s10 + $0x88] sm:$0xff]  ;;  %p2234_p9 = scmp.ne.s32.totalorder %s3065_s19, %s2233_s22  ;;  %s2327_s29 = smov [#allocation8]  }
  0x7f   : > { %1795 = vmatpush1.bf16.msra.mxu1 %v1794_v12  ;;  %v1542_v21 = vpack.c.bf16 %v282_v19, %v278_v18  ;;  %v291_v24 = vld [vmem:[%s2539_s10 + $0xa8] sm:$0xff]  ;;  %1541 = vmatprep.subr.bf16.mxu0 %v1540_v16  ;;  %v1798_v25 = vpack.c.bf16 %v284_v22, %v280_v20  ;;  %v289_v27 = vld [vmem:[%s2539_s10 + $0x98] sm:$0xff]  ;;  %v286_v29 = vld [vmem:[%s2539_s10 + $0x80] sm:$0xff]  ;;  %s2237_s1 = sshll.u32 %s2327_s29, 4  ;;  %s2238_s1 = int_to_ptr.vmem [resolvable:$false] %s2237_s1 }
  0x80   : > { %1797 = vmatprep.subr.bf16.mxu1 %v1796_v17  ;;  %v1544_v26 = vpack.c.bf16 %v291_v24, %v287_v23  ;;  %v293_v28 = vld [vmem:[%s2539_s10 + $0xb8] sm:$0xff]  ;;  %v290_v31 = vld [vmem:[%s2539_s10 + $0xa0] sm:$0xff]  ;;  %v288_v32 = vld [vmem:[%s2539_s10 + $0x90] sm:$0xff]  ;;  %p2235_p13 = pnand %p2234_p9, %p3133_p12  ;;  %s2239_s5 = scalar_lea.vmem %s2238_s1, 1024 }
  0x81   : > { %v1800_v30 = vpack.c.bf16 %v293_v28, %v289_v27  ;;  %v292_v33 = vld [vmem:[%s2539_s10 + $0xb0] sm:$0xff]  ;;  %v1546_v34 = vpack.c.bf16 %v290_v31, %v286_v29  ;;  %v295_v35 = vld [vmem:[%s2539_s10 + $0xc8] sm:$0xff]  ;;  %v297_v37 = vld [vmem:[%s2539_s10 + $0xd8] sm:$0xff]  ;;  %p2240_p3 = scmp.lt.s32.totalorder %s3065_s19, %s2238_s1  ;;  %p2241_p1 = scmp.lt.s32.totalorder %s2239_s5, %s2233_s22 }
  0x82   : > { %1543 = vmatpush1.bf16.msra.mxu0 %v1542_v21  ;;  %v299_v36 = vld [vmem:[%s2539_s10 + $0xe8] sm:$0xff]  ;;  %v1802_v38 = vpack.c.bf16 %v292_v33, %v288_v32  ;;  %v301_v40 = vld [vmem:[%s2539_s10 + $0xf8] sm:$0xff]  ;;  %v294_v41 = vld [vmem:[%s2539_s10 + $0xc0] sm:$0xff]  ;;  %p2236_p6 = pneg %p2235_p13 }
  0x83   : > { %1799 = vmatpush1.bf16.msra.mxu1 %v1798_v25  ;;  %1545 = vmatprep.subr.bf16.mxu0 %v1544_v26  ;;  %v1548_v39 = vpack.c.bf16 %v299_v36, %v295_v35  ;;  %v298_v42 = vld [vmem:[%s2539_s10 + $0xe0] sm:$0xff]  ;;  %v1804_v43 = vpack.c.bf16 %v301_v40, %v297_v37  ;;  %v296_v44 = vld [vmem:[%s2539_s10 + $0xd0] sm:$0xff]  ;;  %v303_v46 = vld [vmem:[%s2539_s10 + $0x108] sm:$0xff]  ;;  %p2242_p10 = por %p2241_p1, %p2240_p3 }
  0x84   : > { %1801 = vmatprep.subr.bf16.mxu1 %v1800_v30  ;;  %v300_v45 = vld [vmem:[%s2539_s10 + $0xf0] sm:$0xff]  ;;  %v307_v47 = vld [vmem:[%s2539_s10 + $0x128] sm:$0xff]  ;;  %v305_v48 = vld [vmem:[%s2539_s10 + $0x118] sm:$0xff]  ;;  %v1550_v50 = vpack.c.bf16 %v298_v42, %v294_v41 }
  0x85   : > { %v309_v49 = vld [vmem:[%s2539_s10 + $0x138] sm:$0xff]  ;;  %v1806_v51 = vpack.c.bf16 %v300_v45, %v296_v44  ;;  %v1552_v52 = vpack.c.bf16 %v307_v47, %v303_v46  ;;  %v302_v53 = vld [vmem:[%s2539_s10 + $0x100] sm:$0xff]  ;;  %v304_v55 = vld [vmem:[%s2539_s10 + $0x110] sm:$0xff]  ;;  %p2243_p2 = pnand %p2242_p10, %p2236_p6 }
  0x86   : > { %1547 = vmatpush1.bf16.msra.mxu0 %v1546_v34  ;;  %v306_v54 = vld [vmem:[%s2539_s10 + $0x120] sm:$0xff]  ;;  %v1808_v56 = vpack.c.bf16 %v309_v49, %v305_v48  ;;  %v308_v57 = vld [vmem:[%s2539_s10 + $0x130] sm:$0xff]  ;;  %v311_v58 = vld [vmem:[%s2539_s10 + $0x148] sm:$0xff] }
  0x87   : > { %1803 = vmatpush1.bf16.msra.mxu1 %v1802_v38  ;;  %1549 = vmatprep.subr.bf16.mxu0 %v1548_v39  ;;  %v315_v59 = vld [vmem:[%s2539_s10 + $0x168] sm:$0xff]  ;;  %v313_v60 = vld [vmem:[%s2539_s10 + $0x158] sm:$0xff]  ;;  %v1554_v62 = vpack.c.bf16 %v306_v54, %v302_v53  ;;  %v1810_v63 = vpack.c.bf16 %v308_v57, %v304_v55  ;;  %v310_v1 = vld [vmem:[%s2539_s10 + $0x140] sm:$0xff] }
  0x88   : > { %1805 = vmatprep.subr.bf16.mxu1 %v1804_v43  ;;  %v317_v61 = vld [vmem:[%s2539_s10 + $0x178] sm:$0xff]  ;;  %v1556_v0 = vpack.c.bf16 %v315_v59, %v311_v58  ;;  %v314_v2 = vld [vmem:[%s2539_s10 + $0x160] sm:$0xff]  ;;  %v312_v3 = vld [vmem:[%s2539_s10 + $0x150] sm:$0xff] }
  0x89   : > { %v1812_v4 = vpack.c.bf16 %v317_v61, %v313_v60  ;;  %v316_v5 = vld [vmem:[%s2539_s10 + $0x170] sm:$0xff]  ;;  %v319_v6 = vld [vmem:[%s2539_s10 + $0x188] sm:$0xff]  ;;  %v321_v8 = vld [vmem:[%s2539_s10 + $0x198] sm:$0xff]  ;;  %v1558_v10 = vpack.c.bf16 %v314_v2, %v310_v1 }
  0x8a   : > { %1551 = vmatpush1.bf16.msra.mxu0 %v1550_v50  ;;  %v323_v7 = vld [vmem:[%s2539_s10 + $0x1a8] sm:$0xff]  ;;  %v325_v9 = vld [vmem:[%s2539_s10 + $0x1b8] sm:$0xff]  ;;  %v1814_v11 = vpack.c.bf16 %v316_v5, %v312_v3  ;;  %v318_v13 = vld [vmem:[%s2539_s10 + $0x180] sm:$0xff] }
  0x8b   : > { %1807 = vmatpush1.bf16.msra.mxu1 %v1806_v51  ;;  %1553 = vmatprep.subr.bf16.mxu0 %v1552_v52  ;;  %v1560_v12 = vpack.c.bf16 %v323_v7, %v319_v6  ;;  %v322_v14 = vld [vmem:[%s2539_s10 + $0x1a0] sm:$0xff]  ;;  %v320_v15 = vld [vmem:[%s2539_s10 + $0x190] sm:$0xff]  ;;  %v1816_v16 = vpack.c.bf16 %v325_v9, %v321_v8  ;;  %v327_v18 = vld [vmem:[%s2539_s10 + $0x1c8] sm:$0xff] }
  0x8c   : > { %1809 = vmatprep.subr.bf16.mxu1 %v1808_v56  ;;  %v324_v17 = vld [vmem:[%s2539_s10 + $0x1b0] sm:$0xff]  ;;  %v331_v19 = vld [vmem:[%s2539_s10 + $0x1e8] sm:$0xff]  ;;  %v329_v20 = vld [vmem:[%s2539_s10 + $0x1d8] sm:$0xff]  ;;  %v1562_v22 = vpack.c.bf16 %v322_v14, %v318_v13 }
  0x8d   : > { %v333_v21 = vld [vmem:[%s2539_s10 + $0x1f8] sm:$0xff]  ;;  %v1818_v23 = vpack.c.bf16 %v324_v17, %v320_v15  ;;  %v1564_v24 = vpack.c.bf16 %v331_v19, %v327_v18  ;;  %v326_v25 = vld [vmem:[%s2539_s10 + $0x1c0] sm:$0xff]  ;;  %v328_v27 = vld [vmem:[%s2539_s10 + $0x1d0] sm:$0xff] }
  0x8e   : > { %1555 = vmatpush1.bf16.msra.mxu0 %v1554_v62  ;;  %v330_v26 = vld [vmem:[%s2539_s10 + $0x1e0] sm:$0xff]  ;;  %v1820_v28 = vpack.c.bf16 %v333_v21, %v329_v20  ;;  %v332_v29 = vld [vmem:[%s2539_s10 + $0x1f0] sm:$0xff]  ;;  %v335_v30 = vld [vmem:[%s2539_s10 + $0x208] sm:$0xff] }
  0x8f   : > { %1811 = vmatpush1.bf16.msra.mxu1 %v1810_v63  ;;  %1557 = vmatprep.subr.bf16.mxu0 %v1556_v0  ;;  %v339_v31 = vld [vmem:[%s2539_s10 + $0x228] sm:$0xff]  ;;  %v337_v32 = vld [vmem:[%s2539_s10 + $0x218] sm:$0xff]  ;;  %v1566_v34 = vpack.c.bf16 %v330_v26, %v326_v25  ;;  %v1822_v35 = vpack.c.bf16 %v332_v29, %v328_v27  ;;  %v334_v37 = vld [vmem:[%s2539_s10 + $0x200] sm:$0xff] }
  0x90   : > { %1813 = vmatprep.subr.bf16.mxu1 %v1812_v4  ;;  %v341_v33 = vld [vmem:[%s2539_s10 + $0x238] sm:$0xff]  ;;  %v1568_v36 = vpack.c.bf16 %v339_v31, %v335_v30  ;;  %v338_v38 = vld [vmem:[%s2539_s10 + $0x220] sm:$0xff]  ;;  %v336_v39 = vld [vmem:[%s2539_s10 + $0x210] sm:$0xff] }
  0x91   : > { %v1824_v40 = vpack.c.bf16 %v341_v33, %v337_v32  ;;  %v340_v41 = vld [vmem:[%s2539_s10 + $0x230] sm:$0xff]  ;;  %v343_v42 = vld [vmem:[%s2539_s10 + $0x248] sm:$0xff]  ;;  %v345_v44 = vld [vmem:[%s2539_s10 + $0x258] sm:$0xff]  ;;  %v1570_v46 = vpack.c.bf16 %v338_v38, %v334_v37 }
  0x92   : > { %1559 = vmatpush1.bf16.msra.mxu0 %v1558_v10  ;;  %v347_v43 = vld [vmem:[%s2539_s10 + $0x268] sm:$0xff]  ;;  %v349_v45 = vld [vmem:[%s2539_s10 + $0x278] sm:$0xff]  ;;  %v1826_v47 = vpack.c.bf16 %v340_v41, %v336_v39  ;;  %v342_v49 = vld [vmem:[%s2539_s10 + $0x240] sm:$0xff] }
  0x93   : > { %1815 = vmatpush1.bf16.msra.mxu1 %v1814_v11  ;;  %1561 = vmatprep.subr.bf16.mxu0 %v1560_v12  ;;  %v1572_v48 = vpack.c.bf16 %v347_v43, %v343_v42  ;;  %v346_v50 = vld [vmem:[%s2539_s10 + $0x260] sm:$0xff]  ;;  %v344_v51 = vld [vmem:[%s2539_s10 + $0x250] sm:$0xff]  ;;  %v1828_v52 = vpack.c.bf16 %v349_v45, %v345_v44  ;;  %v351_v54 = vld [vmem:[%s2539_s10 + $0x288] sm:$0xff] }
  0x94   : > { %1817 = vmatprep.subr.bf16.mxu1 %v1816_v16  ;;  %v348_v53 = vld [vmem:[%s2539_s10 + $0x270] sm:$0xff]  ;;  %v355_v55 = vld [vmem:[%s2539_s10 + $0x2a8] sm:$0xff]  ;;  %v353_v56 = vld [vmem:[%s2539_s10 + $0x298] sm:$0xff]  ;;  %v1574_v58 = vpack.c.bf16 %v346_v50, %v342_v49 }
  0x95   : > { %v357_v57 = vld [vmem:[%s2539_s10 + $0x2b8] sm:$0xff]  ;;  %v1830_v59 = vpack.c.bf16 %v348_v53, %v344_v51  ;;  %v1576_v60 = vpack.c.bf16 %v355_v55, %v351_v54  ;;  %v350_v61 = vld [vmem:[%s2539_s10 + $0x280] sm:$0xff]  ;;  %v352_v63 = vld [vmem:[%s2539_s10 + $0x290] sm:$0xff] }
  0x96   : > { %1563 = vmatpush1.bf16.msra.mxu0 %v1562_v22  ;;  %v354_v62 = vld [vmem:[%s2539_s10 + $0x2a0] sm:$0xff]  ;;  %v1832_v0 = vpack.c.bf16 %v357_v57, %v353_v56  ;;  %v356_v1 = vld [vmem:[%s2539_s10 + $0x2b0] sm:$0xff]  ;;  %v359_v2 = vld [vmem:[%s2539_s10 + $0x2c8] sm:$0xff] }
  0x97   : > { %1819 = vmatpush1.bf16.msra.mxu1 %v1818_v23  ;;  %1565 = vmatprep.subr.bf16.mxu0 %v1564_v24  ;;  %v363_v3 = vld [vmem:[%s2539_s10 + $0x2e8] sm:$0xff]  ;;  %v361_v4 = vld [vmem:[%s2539_s10 + $0x2d8] sm:$0xff]  ;;  %v1578_v6 = vpack.c.bf16 %v354_v62, %v350_v61  ;;  %v358_v7 = vld [vmem:[%s2539_s10 + $0x2c0] sm:$0xff]  ;;  %v1834_v8 = vpack.c.bf16 %v356_v1, %v352_v63 }
  0x98   : > { %1821 = vmatprep.subr.bf16.mxu1 %v1820_v28  ;;  %v365_v5 = vld [vmem:[%s2539_s10 + $0x2f8] sm:$0xff]  ;;  %v1580_v9 = vpack.c.bf16 %v363_v3, %v359_v2  ;;  %v362_v10 = vld [vmem:[%s2539_s10 + $0x2e0] sm:$0xff]  ;;  %v360_v11 = vld [vmem:[%s2539_s10 + $0x2d0] sm:$0xff] }
  0x99   : > { %v364_v12 = vld [vmem:[%s2539_s10 + $0x2f0] sm:$0xff]  ;;  %v1836_v13 = vpack.c.bf16 %v365_v5, %v361_v4  ;;  %v367_v14 = vld [vmem:[%s2539_s10 + $0x308] sm:$0xff]  ;;  %v369_v17 = vld [vmem:[%s2539_s10 + $0x318] sm:$0xff]  ;;  %v1582_v19 = vpack.c.bf16 %v362_v10, %v358_v7 }
  0x9a   : > { %1567 = vmatpush1.bf16.msra.mxu0 %v1566_v34  ;;  %v371_v15 = vld [vmem:[%s2539_s10 + $0x328] sm:$0xff]  ;;  %v373_v18 = vld [vmem:[%s2539_s10 + $0x338] sm:$0xff]  ;;  %v1838_v20 = vpack.c.bf16 %v364_v12, %v360_v11  ;;  %v366_v22 = vld [vmem:[%s2539_s10 + $0x300] sm:$0xff] }
  0x9b   : > { %1823 = vmatpush1.bf16.msra.mxu1 %v1822_v35  ;;  %1569 = vmatprep.subr.bf16.mxu0 %v1568_v36  ;;  %v263_v16 = vld [vmem:[#allocation2 + $0x8] sm:$0xff]  ;;  %v1584_v21 = vpack.c.bf16 %v371_v15, %v367_v14  ;;  %v370_v23 = vld [vmem:[%s2539_s10 + $0x320] sm:$0xff]  ;;  %v368_v24 = vld [vmem:[%s2539_s10 + $0x310] sm:$0xff]  ;;  %v1840_v25 = vpack.c.bf16 %v373_v18, %v369_v17 }
  0x9c   : > { %1825 = vmatprep.subr.bf16.mxu1 %v1824_v40  ;;  %868 = vmatprep.mubr.f32.mxu0 %v263_v16  ;;  %v372_v26 = vld [vmem:[%s2539_s10 + $0x330] sm:$0xff]  ;;  %v375_v27 = vld [vmem:[%s2539_s10 + $0x348] sm:$0xff]  ;;  %v377_v29 = vld [vmem:[%s2539_s10 + $0x358] sm:$0xff]  ;;  %v1586_v31 = vpack.c.bf16 %v370_v23, %v366_v22 }
  0x9d   : > { %1152 = vmatprep.mubr.f32.mxu1 %v263_v16  ;;  %v379_v28 = vld [vmem:[%s2539_s10 + $0x368] sm:$0xff]  ;;  %v381_v30 = vld [vmem:[%s2539_s10 + $0x378] sm:$0xff]  ;;  %v1842_v32 = vpack.c.bf16 %v372_v26, %v368_v24  ;;  %v374_v34 = vld [vmem:[%s2539_s10 + $0x340] sm:$0xff] }
  0x9e   : > { %1571 = vmatpush1.bf16.msra.mxu0 %v1570_v46  ;;  %v1588_v33 = vpack.c.bf16 %v379_v28, %v375_v27  ;;  %v378_v35 = vld [vmem:[%s2539_s10 + $0x360] sm:$0xff]  ;;  %v376_v36 = vld [vmem:[%s2539_s10 + $0x350] sm:$0xff]  ;;  %v1844_v37 = vpack.c.bf16 %v381_v30, %v377_v29  ;;  %v383_v39 = vld [vmem:[%s2539_s10 + $0x388] sm:$0xff] }
  0x9f   : > { %1827 = vmatpush1.bf16.msra.mxu1 %v1826_v47  ;;  %1573 = vmatprep.subr.bf16.mxu0 %v1572_v48  ;;  %v380_v38 = vld [vmem:[%s2539_s10 + $0x370] sm:$0xff]  ;;  %v387_v40 = vld [vmem:[%s2539_s10 + $0x3a8] sm:$0xff]  ;;  %v385_v41 = vld [vmem:[%s2539_s10 + $0x398] sm:$0xff]  ;;  %v1590_v43 = vpack.c.bf16 %v378_v35, %v374_v34 }
  0xa0   : > { %1829 = vmatprep.subr.bf16.mxu1 %v1828_v52  ;;  %v389_v42 = vld [vmem:[%s2539_s10 + $0x3b8] sm:$0xff]  ;;  %v1846_v44 = vpack.c.bf16 %v380_v38, %v376_v36  ;;  %v1592_v45 = vpack.c.bf16 %v387_v40, %v383_v39  ;;  %v382_v46 = vld [vmem:[%s2539_s10 + $0x380] sm:$0xff]  ;;  %v384_v48 = vld [vmem:[%s2539_s10 + $0x390] sm:$0xff] }
  0xa1   : > { %v386_v47 = vld [vmem:[%s2539_s10 + $0x3a0] sm:$0xff]  ;;  %v1848_v49 = vpack.c.bf16 %v389_v42, %v385_v41  ;;  %v388_v50 = vld [vmem:[%s2539_s10 + $0x3b0] sm:$0xff]  ;;  %v391_v51 = vld [vmem:[%s2539_s10 + $0x3c8] sm:$0xff] }
  0xa2   : > { %1575 = vmatpush1.bf16.msra.mxu0 %v1574_v58  ;;  %v395_v52 = vld [vmem:[%s2539_s10 + $0x3e8] sm:$0xff]  ;;  %v393_v53 = vld [vmem:[%s2539_s10 + $0x3d8] sm:$0xff]  ;;  %v1594_v55 = vpack.c.bf16 %v386_v47, %v382_v46  ;;  %v1850_v56 = vpack.c.bf16 %v388_v50, %v384_v48  ;;  %v390_v58 = vld [vmem:[%s2539_s10 + $0x3c0] sm:$0xff] }
  0xa3   : > { %1831 = vmatpush1.bf16.msra.mxu1 %v1830_v59  ;;  %1577 = vmatprep.subr.bf16.mxu0 %v1576_v60  ;;  %v397_v54 = vld [vmem:[%s2539_s10 + $0x3f8] sm:$0xff]  ;;  %v1596_v57 = vpack.c.bf16 %v395_v52, %v391_v51  ;;  %v394_v59 = vld [vmem:[%s2539_s10 + $0x3e0] sm:$0xff]  ;;  %v392_v60 = vld [vmem:[%s2539_s10 + $0x3d0] sm:$0xff] }
  0xa4   : > { %1833 = vmatprep.subr.bf16.mxu1 %v1832_v0  ;;  %v1852_v61 = vpack.c.bf16 %v397_v54, %v393_v53  ;;  %v396_v62 = vld [vmem:[%s2539_s10 + $0x3f0] sm:$0xff]  ;;  %v399_v63 = vld [vmem:[%s2539_s10 + $0x408] sm:$0xff]  ;;  %v401_v1 = vld [vmem:[%s2539_s10 + $0x418] sm:$0xff]  ;;  %v1598_v3 = vpack.c.bf16 %v394_v59, %v390_v58 }
  0xa5   : > { %v403_v0 = vld [vmem:[%s2539_s10 + $0x428] sm:$0xff]  ;;  %v405_v2 = vld [vmem:[%s2539_s10 + $0x438] sm:$0xff]  ;;  %v1854_v4 = vpack.c.bf16 %v396_v62, %v392_v60  ;;  %v402_v7 = vld [vmem:[%s2539_s10 + $0x420] sm:$0xff] }
  0xa6   : > { %1579 = vmatpush1.bf16.msra.mxu0 %v1578_v6  ;;  %v1600_v5 = vpack.c.bf16 %v403_v0, %v399_v63  ;;  %v398_v6 = vld [vmem:[%s2539_s10 + $0x400] sm:$0xff]  ;;  %v404_v10 = vld [vmem:[%s2539_s10 + $0x430] sm:$0xff]  ;;  %v407_v11 = vld [vmem:[%s2539_s10 + $0x448] sm:$0xff] }
  0xa7   : > { %1835 = vmatpush1.bf16.msra.mxu1 %v1834_v8  ;;  %1581 = vmatprep.subr.bf16.mxu0 %v1580_v9  ;;  %v400_v8 = vld [vmem:[%s2539_s10 + $0x410] sm:$0xff]  ;;  %v1856_v9 = vpack.c.bf16 %v405_v2, %v401_v1  ;;  %v411_v12 = vld [vmem:[%s2539_s10 + $0x468] sm:$0xff]  ;;  %v413_v14 = vld [vmem:[%s2539_s10 + $0x478] sm:$0xff]  ;;  %v1602_v16 = vpack.c.bf16 %v402_v7, %v398_v6 }
  0xa8   : > { %1837 = vmatprep.subr.bf16.mxu1 %v1836_v13  ;;  %v409_v13 = vld [vmem:[%s2539_s10 + $0x458] sm:$0xff]  ;;  %v262_v15 = vld [vmem:[#allocation2] sm:$0xff]  ;;  %v1858_v17 = vpack.c.bf16 %v404_v10, %v400_v8  ;;  %v1604_v18 = vpack.c.bf16 %v411_v12, %v407_v11  ;;  %v412_v23 = vld [vmem:[%s2539_s10 + $0x470] sm:$0xff] }
  0xa9   : > { %v1860_v22 = vpack.c.bf16 %v413_v14, %v409_v13  ;;  %v415_v24 = vld [vmem:[%s2539_s10 + $0x488] sm:$0xff]  ;;  %v417_v26 = vld [vmem:[%s2539_s10 + $0x498] sm:$0xff]  ;;  %v420_v35 = vld [vmem:[%s2539_s10 + $0x4b0] sm:$0xff] }
  0xaa   : > { %1583 = vmatpush1.bf16.msra.mxu0 %v1582_v19  ;;  %v406_v19 = vld [vmem:[%s2539_s10 + $0x440] sm:$0xff]  ;;  %v421_v27 = vld [vmem:[%s2539_s10 + $0x4b8] sm:$0xff]  ;;  %v423_v36 = vld [vmem:[%s2539_s10 + $0x4c8] sm:$0xff] }
  0xab   : > { %1839 = vmatpush1.bf16.msra.mxu1 %v1838_v20  ;;  %1585 = vmatprep.subr.bf16.mxu0 %v1584_v21  ;;  %v410_v20 = vld [vmem:[%s2539_s10 + $0x460] sm:$0xff]  ;;  %v408_v21 = vld [vmem:[%s2539_s10 + $0x450] sm:$0xff]  ;;  %v1864_v34 = vpack.c.bf16 %v421_v27, %v417_v26  ;;  %v425_v38 = vld [vmem:[%s2539_s10 + $0x4d8] sm:$0xff] }
  0xac   : > { %1841 = vmatprep.subr.bf16.mxu1 %v1840_v25  ;;  %v419_v25 = vld [vmem:[%s2539_s10 + $0x4a8] sm:$0xff]  ;;  %v1606_v28 = vpack.c.bf16 %v410_v20, %v406_v19  ;;  %v1862_v29 = vpack.c.bf16 %v412_v23, %v408_v21  ;;  %v429_v39 = vld [vmem:[%s2539_s10 + $0x4f8] sm:$0xff]  ;;  %v428_v47 = vld [vmem:[%s2539_s10 + $0x4f0] sm:$0xff] }
  0xad   : > { %v1608_v30 = vpack.c.bf16 %v419_v25, %v415_v24  ;;  %v1868_v46 = vpack.c.bf16 %v429_v39, %v425_v38  ;;  %v431_v48 = vld [vmem:[%s2539_s10 + $0x508] sm:$0xff]  ;;  %v433_v50 = vld [vmem:[%s2539_s10 + $0x518] sm:$0xff]  ;;  %v436_v59 = vld [vmem:[%s2539_s10 + $0x530] sm:$0xff] }
  0xae   : > { %1587 = vmatpush1.bf16.msra.mxu0 %v1586_v31  ;;  %v414_v31 = vld [vmem:[%s2539_s10 + $0x480] sm:$0xff]  ;;  %v437_v51 = vld [vmem:[%s2539_s10 + $0x538] sm:$0xff]  ;;  %v439_v60 = vld [vmem:[%s2539_s10 + $0x548] sm:$0xff] }
  0xaf   : > { %1843 = vmatpush1.bf16.msra.mxu1 %v1842_v32  ;;  %1589 = vmatprep.subr.bf16.mxu0 %v1588_v33  ;;  %v418_v32 = vld [vmem:[%s2539_s10 + $0x4a0] sm:$0xff]  ;;  %v416_v33 = vld [vmem:[%s2539_s10 + $0x490] sm:$0xff]  ;;  %v1872_v58 = vpack.c.bf16 %v437_v51, %v433_v50  ;;  %v441_v62 = vld [vmem:[%s2539_s10 + $0x558] sm:$0xff] }
  0xb0   : > { %1845 = vmatprep.subr.bf16.mxu1 %v1844_v37  ;;  %v427_v37 = vld [vmem:[%s2539_s10 + $0x4e8] sm:$0xff]  ;;  %v1610_v40 = vpack.c.bf16 %v418_v32, %v414_v31  ;;  %v1866_v41 = vpack.c.bf16 %v420_v35, %v416_v33  ;;  %v445_v63 = vld [vmem:[%s2539_s10 + $0x578] sm:$0xff]  ;;  %v444_v7 = vld [vmem:[%s2539_s10 + $0x570] sm:$0xff] }
  0xb1   : > { %v1612_v42 = vpack.c.bf16 %v427_v37, %v423_v36  ;;  %v1876_v6 = vpack.c.bf16 %v445_v63, %v441_v62  ;;  %v447_v8 = vld [vmem:[%s2539_s10 + $0x588] sm:$0xff]  ;;  %v449_v10 = vld [vmem:[%s2539_s10 + $0x598] sm:$0xff]  ;;  %v446_v13 = vld [vmem:[%s2539_s10 + $0x580] sm:$0xff] }
  0xb2   : > { %1591 = vmatpush1.bf16.msra.mxu0 %v1590_v43  ;;  %v422_v43 = vld [vmem:[%s2539_s10 + $0x4c0] sm:$0xff]  ;;  %v453_v11 = vld [vmem:[%s2539_s10 + $0x5b8] sm:$0xff]  ;;  %v455_v20 = vld [vmem:[%s2539_s10 + $0x5c8] sm:$0xff] }
  0xb3   : > { %1847 = vmatpush1.bf16.msra.mxu1 %v1846_v44  ;;  %1593 = vmatprep.subr.bf16.mxu0 %v1592_v45  ;;  %v426_v44 = vld [vmem:[%s2539_s10 + $0x4e0] sm:$0xff]  ;;  %v424_v45 = vld [vmem:[%s2539_s10 + $0x4d0] sm:$0xff]  ;;  %v1880_v19 = vpack.c.bf16 %v453_v11, %v449_v10  ;;  %v459_v21 = vld [vmem:[%s2539_s10 + $0x5e8] sm:$0xff] }
  0xb4   : > { %1849 = vmatprep.subr.bf16.mxu1 %v1848_v49  ;;  %v435_v49 = vld [vmem:[%s2539_s10 + $0x528] sm:$0xff]  ;;  %v1614_v52 = vpack.c.bf16 %v426_v44, %v422_v43  ;;  %v1870_v53 = vpack.c.bf16 %v428_v47, %v424_v45  ;;  %v457_v23 = vld [vmem:[%s2539_s10 + $0x5d8] sm:$0xff]  ;;  %v1628_v27 = vpack.c.bf16 %v459_v21, %v455_v20  ;;  %v460_v32 = vld [vmem:[%s2539_s10 + $0x5f0] sm:$0xff] }
  0xb5   : > { %v1616_v54 = vpack.c.bf16 %v435_v49, %v431_v48  ;;  %v461_v24 = vld [vmem:[%s2539_s10 + $0x5f8] sm:$0xff]  ;;  %v463_v33 = vld [vmem:[%s2539_s10 + $0x608] sm:$0xff]  ;;  %v468_v44 = vld [vmem:[%s2539_s10 + $0x630] sm:$0xff] }
  0xb6   : > { %1595 = vmatpush1.bf16.msra.mxu0 %v1594_v55  ;;  %v430_v55 = vld [vmem:[%s2539_s10 + $0x500] sm:$0xff]  ;;  %v1884_v31 = vpack.c.bf16 %v461_v24, %v457_v23  ;;  %v465_v35 = vld [vmem:[%s2539_s10 + $0x618] sm:$0xff]  ;;  %v471_v45 = vld [vmem:[%s2539_s10 + $0x648] sm:$0xff] }
  0xb7   : > { %1851 = vmatpush1.bf16.msra.mxu1 %v1850_v56  ;;  %1597 = vmatprep.subr.bf16.mxu0 %v1596_v57  ;;  %v434_v56 = vld [vmem:[%s2539_s10 + $0x520] sm:$0xff]  ;;  %v432_v57 = vld [vmem:[%s2539_s10 + $0x510] sm:$0xff]  ;;  %v469_v36 = vld [vmem:[%s2539_s10 + $0x638] sm:$0xff] }
  0xb8   : > { %1853 = vmatprep.subr.bf16.mxu1 %v1852_v61  ;;  %v443_v61 = vld [vmem:[%s2539_s10 + $0x568] sm:$0xff]  ;;  %v1618_v0 = vpack.c.bf16 %v434_v56, %v430_v55  ;;  %v1874_v1 = vpack.c.bf16 %v436_v59, %v432_v57  ;;  %v1888_v43 = vpack.c.bf16 %v469_v36, %v465_v35  ;;  %v473_v47 = vld [vmem:[%s2539_s10 + $0x658] sm:$0xff]  ;;  %v476_v56 = vld [vmem:[%s2539_s10 + $0x670] sm:$0xff] }
  0xb9   : > { %v1620_v2 = vpack.c.bf16 %v443_v61, %v439_v60  ;;  %v477_v48 = vld [vmem:[%s2539_s10 + $0x678] sm:$0xff]  ;;  %v479_v57 = vld [vmem:[%s2539_s10 + $0x688] sm:$0xff]  ;;  %v494_v24 = vld [vmem:[%s2539_s10 + $0x700] sm:$0xff] }
  0xba   : > { %1599 = vmatpush1.bf16.msra.mxu0 %v1598_v3  ;;  %v438_v3 = vld [vmem:[%s2539_s10 + $0x540] sm:$0xff]  ;;  %v1892_v55 = vpack.c.bf16 %v477_v48, %v473_v47  ;;  %v481_v59 = vld [vmem:[%s2539_s10 + $0x698] sm:$0xff] }
  0xbb   : > { %1855 = vmatpush1.bf16.msra.mxu1 %v1854_v4  ;;  %1601 = vmatprep.subr.bf16.mxu0 %v1600_v5  ;;  %v442_v4 = vld [vmem:[%s2539_s10 + $0x560] sm:$0xff]  ;;  %v440_v5 = vld [vmem:[%s2539_s10 + $0x550] sm:$0xff]  ;;  %v485_v60 = vld [vmem:[%s2539_s10 + $0x6b8] sm:$0xff] }
  0xbc   : > { %1857 = vmatprep.subr.bf16.mxu1 %v1856_v9  ;;  %v451_v9 = vld [vmem:[%s2539_s10 + $0x5a8] sm:$0xff]  ;;  %v1622_v12 = vpack.c.bf16 %v442_v4, %v438_v3  ;;  %v1878_v14 = vpack.c.bf16 %v444_v7, %v440_v5  ;;  %v1896_v3 = vpack.c.bf16 %v485_v60, %v481_v59  ;;  %v484_v4 = vld [vmem:[%s2539_s10 + $0x6b0] sm:$0xff]  ;;  %v489_v7 = vld [vmem:[%s2539_s10 + $0x6d8] sm:$0xff] }
  0xbd   : > { %869 = vmatmul.mubr.f32.vlgmr.msra.gmra.mrb[0].mxu0 %v262_v15  ;;  %v487_v5 = vld [vmem:[%s2539_s10 + $0x6c8] sm:$0xff]  ;;  %v501_v20 = vld [vmem:[%s2539_s10 + $0x738] sm:$0xff]  ;;  %v502_v36 = vld [vmem:[%s2539_s10 + $0x740] sm:$0xff] }
  0xbe   : > { %1603 = vmatpush1.bf16.msra.mxu0 %v1602_v16  ;;  %1153 = vmatmul.mubr.f32.vlgmr.msra.gmra.mrb[0].mxu1 %v262_v15  ;;  %v1624_v15 = vpack.c.bf16 %v451_v9, %v447_v8  ;;  %v450_v16 = vld [vmem:[%s2539_s10 + $0x5a0] sm:$0xff]  ;;  %v493_v8 = vld [vmem:[%s2539_s10 + $0x6f8] sm:$0xff] }
  0xbf   : > { %1859 = vmatpush1.bf16.msra.mxu1 %v1858_v17  ;;  %1605 = vmatprep.subr.bf16.mxu0 %v1604_v18  ;;  %v448_v17 = vld [vmem:[%s2539_s10 + $0x590] sm:$0xff]  ;;  %v1626_v25 = vpack.c.bf16 %v450_v16, %v446_v13  ;;  %v490_v13 = vld [vmem:[%s2539_s10 + $0x6e0] sm:$0xff] }
  0xc0   : > { %1861 = vmatprep.subr.bf16.mxu1 %v1860_v22  ;;  %v452_v18 = vld [vmem:[%s2539_s10 + $0x5b0] sm:$0xff]  ;;  %v265_v22 = vld [vmem:[#allocation2 + $0x18] sm:$0xff]  ;;  %v510_v48 = vld [vmem:[%s2539_s10 + $0x780] sm:$0xff] }
  0xc1   : > { %939 = vmatprep.mubr.f32.mxu0 %v265_v22  ;;  %1223 = vmatprep.mubr.f32.mxu1 %v265_v22  ;;  %v1882_v26 = vpack.c.bf16 %v452_v18, %v448_v17  ;;  %v492_v16 = vld [vmem:[%s2539_s10 + $0x6f0] sm:$0xff]  ;;  %v495_v17 = vld [vmem:[%s2539_s10 + $0x708] sm:$0xff]  ;;  %v518_v60 = vld [vmem:[%s2539_s10 + $0x7c0] sm:$0xff] }
  0xc2   : > { %1607 = vmatpush1.bf16.msra.mxu0 %v1606_v28  ;;  %v454_v28 = vld [vmem:[%s2539_s10 + $0x5c0] sm:$0xff]  ;;  %v499_v18 = vld [vmem:[%s2539_s10 + $0x728] sm:$0xff] }
  0xc3   : > { %1863 = vmatpush1.bf16.msra.mxu1 %v1862_v29  ;;  %1609 = vmatprep.subr.bf16.mxu0 %v1608_v30  ;;  %v458_v29 = vld [vmem:[%s2539_s10 + $0x5e0] sm:$0xff]  ;;  %v456_v30 = vld [vmem:[%s2539_s10 + $0x5d0] sm:$0xff]  ;;  %v1648_v23 = vpack.c.bf16 %v499_v18, %v495_v17 }
  0xc4   : > { %1865 = vmatprep.subr.bf16.mxu1 %v1864_v34  ;;  %v467_v34 = vld [vmem:[%s2539_s10 + $0x628] sm:$0xff]  ;;  %v1630_v37 = vpack.c.bf16 %v458_v29, %v454_v28  ;;  %v1886_v38 = vpack.c.bf16 %v460_v32, %v456_v30  ;;  %v500_v28 = vld [vmem:[%s2539_s10 + $0x730] sm:$0xff]  ;;  %v509_v32 = vld [vmem:[%s2539_s10 + $0x778] sm:$0xff] }
  0xc5   : > { %v1632_v39 = vpack.c.bf16 %v467_v34, %v463_v33  ;;  %v503_v29 = vld [vmem:[%s2539_s10 + $0x748] sm:$0xff]  ;;  %v264_v17 = vld [vmem:[#allocation2 + $0x10] sm:$0xff] }
  0xc6   : > { %1611 = vmatpush1.bf16.msra.mxu0 %v1610_v40  ;;  %v462_v40 = vld [vmem:[%s2539_s10 + $0x600] sm:$0xff]  ;;  %v507_v30 = vld [vmem:[%s2539_s10 + $0x768] sm:$0xff] }
  0xc7   : > { %1867 = vmatpush1.bf16.msra.mxu1 %v1866_v41  ;;  %1613 = vmatprep.subr.bf16.mxu0 %v1612_v42  ;;  %v466_v41 = vld [vmem:[%s2539_s10 + $0x620] sm:$0xff]  ;;  %v464_v42 = vld [vmem:[%s2539_s10 + $0x610] sm:$0xff]  ;;  %v1652_v35 = vpack.c.bf16 %v507_v30, %v503_v29  ;;  %v549_v29 = vld [vmem:[%s2539_s10 + $0x8b8] sm:$0xff] }
  0xc8   : > { %1869 = vmatprep.subr.bf16.mxu1 %v1868_v46  ;;  %v475_v46 = vld [vmem:[%s2539_s10 + $0x668] sm:$0xff]  ;;  %v1634_v49 = vpack.c.bf16 %v466_v41, %v462_v40  ;;  %v1890_v50 = vpack.c.bf16 %v468_v44, %v464_v42  ;;  %v508_v40 = vld [vmem:[%s2539_s10 + $0x770] sm:$0xff]  ;;  %v517_v44 = vld [vmem:[%s2539_s10 + $0x7b8] sm:$0xff] }
  0xc9   : > { %v1636_v51 = vpack.c.bf16 %v475_v46, %v471_v45  ;;  %v511_v41 = vld [vmem:[%s2539_s10 + $0x788] sm:$0xff] }
  0xca   : > { %1615 = vmatpush1.bf16.msra.mxu0 %v1614_v52  ;;  %v470_v52 = vld [vmem:[%s2539_s10 + $0x640] sm:$0xff]  ;;  %v515_v42 = vld [vmem:[%s2539_s10 + $0x7a8] sm:$0xff] }
  0xcb   : > { %1871 = vmatpush1.bf16.msra.mxu1 %v1870_v53  ;;  %1617 = vmatprep.subr.bf16.mxu0 %v1616_v54  ;;  %v474_v53 = vld [vmem:[%s2539_s10 + $0x660] sm:$0xff]  ;;  %v472_v54 = vld [vmem:[%s2539_s10 + $0x650] sm:$0xff]  ;;  %v1656_v47 = vpack.c.bf16 %v515_v42, %v511_v41  ;;  %v267_v30 = vld [vmem:[#allocation2 + $0x28] sm:$0xff] }
  0xcc   : > { %1873 = vmatprep.subr.bf16.mxu1 %v1872_v58  ;;  %v483_v58 = vld [vmem:[%s2539_s10 + $0x6a8] sm:$0xff]  ;;  %v1638_v61 = vpack.c.bf16 %v474_v53, %v470_v52  ;;  %v1894_v62 = vpack.c.bf16 %v476_v56, %v472_v54  ;;  %v516_v52 = vld [vmem:[%s2539_s10 + $0x7b0] sm:$0xff]  ;;  %v525_v56 = vld [vmem:[%s2539_s10 + $0x7f8] sm:$0xff] }
  0xcd   : > { %v1640_v63 = vpack.c.bf16 %v483_v58, %v479_v57  ;;  %v519_v53 = vld [vmem:[%s2539_s10 + $0x7c8] sm:$0xff]  ;;  %v553_v41 = vld [vmem:[%s2539_s10 + $0x8d8] sm:$0xff] }
  0xce   : > { %1619 = vmatpush1.bf16.msra.mxu0 %v1618_v0  ;;  %v478_v0 = vld [vmem:[%s2539_s10 + $0x680] sm:$0xff]  ;;  %v523_v54 = vld [vmem:[%s2539_s10 + $0x7e8] sm:$0xff]  ;;  %v557_v42 = vld [vmem:[%s2539_s10 + $0x8f8] sm:$0xff] }
  0xcf   : > { %1875 = vmatpush1.bf16.msra.mxu1 %v1874_v1  ;;  %1621 = vmatprep.subr.bf16.mxu0 %v1620_v2  ;;  %v482_v1 = vld [vmem:[%s2539_s10 + $0x6a0] sm:$0xff]  ;;  %v480_v2 = vld [vmem:[%s2539_s10 + $0x690] sm:$0xff]  ;;  %v1660_v59 = vpack.c.bf16 %v523_v54, %v519_v53  ;;  %v561_v53 = vld [vmem:[%s2539_s10 + $0x918] sm:$0xff] }
  0xd0   : > { %1877 = vmatprep.subr.bf16.mxu1 %v1876_v6  ;;  %v491_v6 = vld [vmem:[%s2539_s10 + $0x6e8] sm:$0xff]  ;;  %v1642_v9 = vpack.c.bf16 %v482_v1, %v478_v0  ;;  %v1898_v10 = vpack.c.bf16 %v484_v4, %v480_v2  ;;  %v524_v0 = vld [vmem:[%s2539_s10 + $0x7f0] sm:$0xff]  ;;  %v533_v4 = vld [vmem:[%s2539_s10 + $0x838] sm:$0xff] }
  0xd1   : > { %v1644_v11 = vpack.c.bf16 %v491_v6, %v487_v5  ;;  %v527_v1 = vld [vmem:[%s2539_s10 + $0x808] sm:$0xff]  ;;  %v565_v54 = vld [vmem:[%s2539_s10 + $0x938] sm:$0xff] }
  0xd2   : > { %1623 = vmatpush1.bf16.msra.mxu0 %v1622_v12  ;;  %v486_v12 = vld [vmem:[%s2539_s10 + $0x6c0] sm:$0xff]  ;;  %v531_v2 = vld [vmem:[%s2539_s10 + $0x828] sm:$0xff] }
  0xd3   : > { %1879 = vmatpush1.bf16.msra.mxu1 %v1878_v14  ;;  %1625 = vmatprep.subr.bf16.mxu0 %v1624_v15  ;;  %v488_v14 = vld [vmem:[%s2539_s10 + $0x6d0] sm:$0xff]  ;;  %v1900_v15 = vpack.c.bf16 %v493_v8, %v489_v7  ;;  %v1646_v21 = vpack.c.bf16 %v490_v13, %v486_v12  ;;  %v1664_v7 = vpack.c.bf16 %v531_v2, %v527_v1  ;;  %v526_v8 = vld [vmem:[%s2539_s10 + $0x800] sm:$0xff]  ;;  %v535_v13 = vld [vmem:[%s2539_s10 + $0x848] sm:$0xff] }
  0xd4   : > { %1881 = vmatprep.subr.bf16.mxu1 %v1880_v19  ;;  %v497_v19 = vld [vmem:[%s2539_s10 + $0x718] sm:$0xff]  ;;  %v1902_v22 = vpack.c.bf16 %v492_v16, %v488_v14  ;;  %v532_v12 = vld [vmem:[%s2539_s10 + $0x830] sm:$0xff]  ;;  %v539_v14 = vld [vmem:[%s2539_s10 + $0x868] sm:$0xff] }
  0xd5   : > { %v541_v16 = vld [vmem:[%s2539_s10 + $0x878] sm:$0xff] }
  0xd6   : > { %1627 = vmatpush1.bf16.msra.mxu0 %v1626_v25  ;;  %v498_v25 = vld [vmem:[%s2539_s10 + $0x720] sm:$0xff]  ;;  %v569_v1 = vld [vmem:[%s2539_s10 + $0x958] sm:$0xff] }
  0xd7   : > { %1883 = vmatpush1.bf16.msra.mxu1 %v1882_v26  ;;  %1629 = vmatprep.subr.bf16.mxu0 %v1628_v27  ;;  %v496_v26 = vld [vmem:[%s2539_s10 + $0x710] sm:$0xff]  ;;  %v1904_v27 = vpack.c.bf16 %v501_v20, %v497_v19  ;;  %v1650_v33 = vpack.c.bf16 %v498_v25, %v494_v24  ;;  %v1668_v20 = vpack.c.bf16 %v539_v14, %v535_v13  ;;  %v573_v2 = vld [vmem:[%s2539_s10 + $0x978] sm:$0xff] }
  0xd8   : > { %1885 = vmatprep.subr.bf16.mxu1 %v1884_v31  ;;  %v505_v31 = vld [vmem:[%s2539_s10 + $0x758] sm:$0xff]  ;;  %v1906_v34 = vpack.c.bf16 %v500_v28, %v496_v26  ;;  %v540_v25 = vld [vmem:[%s2539_s10 + $0x870] sm:$0xff]  ;;  %v543_v26 = vld [vmem:[%s2539_s10 + $0x888] sm:$0xff] }
  0xd9   : > { %v545_v28 = vld [vmem:[%s2539_s10 + $0x898] sm:$0xff] }
  0xda   : > { %1631 = vmatpush1.bf16.msra.mxu0 %v1630_v37  ;;  %v506_v37 = vld [vmem:[%s2539_s10 + $0x760] sm:$0xff]  ;;  %v577_v13 = vld [vmem:[%s2539_s10 + $0x998] sm:$0xff] }
  0xdb   : > { %1887 = vmatpush1.bf16.msra.mxu1 %v1886_v38  ;;  %1633 = vmatprep.subr.bf16.mxu0 %v1632_v39  ;;  %v504_v38 = vld [vmem:[%s2539_s10 + $0x750] sm:$0xff]  ;;  %v1908_v39 = vpack.c.bf16 %v509_v32, %v505_v31  ;;  %v1654_v45 = vpack.c.bf16 %v506_v37, %v502_v36  ;;  %v1928_v37 = vpack.c.bf16 %v549_v29, %v545_v28  ;;  %v581_v14 = vld [vmem:[%s2539_s10 + $0x9b8] sm:$0xff] }
  0xdc   : > { %1889 = vmatprep.subr.bf16.mxu1 %v1888_v43  ;;  %v513_v43 = vld [vmem:[%s2539_s10 + $0x798] sm:$0xff]  ;;  %v1910_v46 = vpack.c.bf16 %v508_v40, %v504_v38  ;;  %v544_v36 = vld [vmem:[%s2539_s10 + $0x890] sm:$0xff]  ;;  %v555_v40 = vld [vmem:[%s2539_s10 + $0x8e8] sm:$0xff] }
  0xdd   : > { %v548_v38 = vld [vmem:[%s2539_s10 + $0x8b0] sm:$0xff] }
  0xde   : > { %1635 = vmatpush1.bf16.msra.mxu0 %v1634_v49  ;;  %v514_v49 = vld [vmem:[%s2539_s10 + $0x7a0] sm:$0xff] }
  0xdf   : > { %1891 = vmatpush1.bf16.msra.mxu1 %v1890_v50  ;;  %1637 = vmatprep.subr.bf16.mxu0 %v1636_v51  ;;  %v512_v50 = vld [vmem:[%s2539_s10 + $0x790] sm:$0xff]  ;;  %v1912_v51 = vpack.c.bf16 %v517_v44, %v513_v43  ;;  %v1658_v57 = vpack.c.bf16 %v514_v49, %v510_v48  ;;  %v1930_v44 = vpack.c.bf16 %v548_v38, %v544_v36  ;;  %v595_v36 = vld [vmem:[%s2539_s10 + $0xa28] sm:$0xff]  ;;  %v597_v38 = vld [vmem:[%s2539_s10 + $0xa38] sm:$0xff] }
  0xe0   : > { %1893 = vmatprep.subr.bf16.mxu1 %v1892_v55  ;;  %v521_v55 = vld [vmem:[%s2539_s10 + $0x7d8] sm:$0xff]  ;;  %v1914_v58 = vpack.c.bf16 %v516_v52, %v512_v50  ;;  %v552_v48 = vld [vmem:[%s2539_s10 + $0x8d0] sm:$0xff]  ;;  %v1932_v49 = vpack.c.bf16 %v557_v42, %v553_v41  ;;  %v563_v52 = vld [vmem:[%s2539_s10 + $0x928] sm:$0xff] }
  0xe1   : > { %v556_v50 = vld [vmem:[%s2539_s10 + $0x8f0] sm:$0xff]  ;;  %v590_v42 = vld [vmem:[%s2539_s10 + $0xa00] sm:$0xff] }
  0xe2   : > { %1639 = vmatpush1.bf16.msra.mxu0 %v1638_v61  ;;  %v522_v61 = vld [vmem:[%s2539_s10 + $0x7e0] sm:$0xff] }
  0xe3   : > { %1895 = vmatpush1.bf16.msra.mxu1 %v1894_v62  ;;  %1641 = vmatprep.subr.bf16.mxu0 %v1640_v63  ;;  %v520_v62 = vld [vmem:[%s2539_s10 + $0x7d0] sm:$0xff]  ;;  %v1916_v63 = vpack.c.bf16 %v525_v56, %v521_v55  ;;  %v1662_v5 = vpack.c.bf16 %v522_v61, %v518_v60  ;;  %v1934_v56 = vpack.c.bf16 %v556_v50, %v552_v48  ;;  %v603_v48 = vld [vmem:[%s2539_s10 + $0xa68] sm:$0xff]  ;;  %v605_v50 = vld [vmem:[%s2539_s10 + $0xa78] sm:$0xff] }
  0xe4   : > { %1897 = vmatprep.subr.bf16.mxu1 %v1896_v3  ;;  %v529_v3 = vld [vmem:[%s2539_s10 + $0x818] sm:$0xff]  ;;  %v1918_v6 = vpack.c.bf16 %v524_v0, %v520_v62  ;;  %v560_v60 = vld [vmem:[%s2539_s10 + $0x910] sm:$0xff]  ;;  %v1936_v61 = vpack.c.bf16 %v565_v54, %v561_v53  ;;  %v571_v0 = vld [vmem:[%s2539_s10 + $0x968] sm:$0xff] }
  0xe5   : > { %v564_v62 = vld [vmem:[%s2539_s10 + $0x930] sm:$0xff]  ;;  %v598_v54 = vld [vmem:[%s2539_s10 + $0xa40] sm:$0xff] }
  0xe6   : > { %1643 = vmatpush1.bf16.msra.mxu0 %v1642_v9  ;;  %v530_v9 = vld [vmem:[%s2539_s10 + $0x820] sm:$0xff] }
  0xe7   : > { %1899 = vmatpush1.bf16.msra.mxu1 %v1898_v10  ;;  %1645 = vmatprep.subr.bf16.mxu0 %v1644_v11  ;;  %v528_v10 = vld [vmem:[%s2539_s10 + $0x810] sm:$0xff]  ;;  %v1920_v11 = vpack.c.bf16 %v533_v4, %v529_v3  ;;  %v1666_v18 = vpack.c.bf16 %v530_v9, %v526_v8  ;;  %v1938_v4 = vpack.c.bf16 %v564_v62, %v560_v60  ;;  %v611_v60 = vld [vmem:[%s2539_s10 + $0xaa8] sm:$0xff]  ;;  %v613_v62 = vld [vmem:[%s2539_s10 + $0xab8] sm:$0xff] }
  0xe8   : > { %1901 = vmatprep.subr.bf16.mxu1 %v1900_v15  ;;  %v537_v15 = vld [vmem:[%s2539_s10 + $0x858] sm:$0xff]  ;;  %v1922_v19 = vpack.c.bf16 %v532_v12, %v528_v10  ;;  %v568_v8 = vld [vmem:[%s2539_s10 + $0x950] sm:$0xff]  ;;  %v1940_v9 = vpack.c.bf16 %v573_v2, %v569_v1  ;;  %v579_v12 = vld [vmem:[%s2539_s10 + $0x9a8] sm:$0xff] }
  0xe9   : > { %v1924_v24 = vpack.c.bf16 %v541_v16, %v537_v15  ;;  %v572_v10 = vld [vmem:[%s2539_s10 + $0x970] sm:$0xff]  ;;  %v606_v2 = vld [vmem:[%s2539_s10 + $0xa80] sm:$0xff] }
  0xea   : > { %1647 = vmatpush1.bf16.msra.mxu0 %v1646_v21  ;;  %v534_v21 = vld [vmem:[%s2539_s10 + $0x840] sm:$0xff]  ;;  %v1942_v16 = vpack.c.bf16 %v572_v10, %v568_v8  ;;  %v619_v8 = vld [vmem:[%s2539_s10 + $0xae8] sm:$0xff]  ;;  %v621_v10 = vld [vmem:[%s2539_s10 + $0xaf8] sm:$0xff] }
  0xeb   : > { %1903 = vmatpush1.bf16.msra.mxu1 %v1902_v22  ;;  %1649 = vmatprep.subr.bf16.mxu0 %v1648_v23  ;;  %v538_v22 = vld [vmem:[%s2539_s10 + $0x860] sm:$0xff]  ;;  %v536_v23 = vld [vmem:[%s2539_s10 + $0x850] sm:$0xff] }
  0xec   : > { %1905 = vmatprep.subr.bf16.mxu1 %v1904_v27  ;;  %v547_v27 = vld [vmem:[%s2539_s10 + $0x8a8] sm:$0xff]  ;;  %v1670_v31 = vpack.c.bf16 %v538_v22, %v534_v21  ;;  %v1926_v32 = vpack.c.bf16 %v540_v25, %v536_v23  ;;  %v1944_v21 = vpack.c.bf16 %v581_v14, %v577_v13  ;;  %v580_v22 = vld [vmem:[%s2539_s10 + $0x9b0] sm:$0xff]  ;;  %v585_v25 = vld [vmem:[%s2539_s10 + $0x9d8] sm:$0xff] }
  0xed   : > { %v583_v23 = vld [vmem:[%s2539_s10 + $0x9c8] sm:$0xff]  ;;  %v614_v14 = vld [vmem:[%s2539_s10 + $0xac0] sm:$0xff] }
  0xee   : > { %1651 = vmatpush1.bf16.msra.mxu0 %v1650_v33  ;;  %v1672_v33 = vpack.c.bf16 %v547_v27, %v543_v26  ;;  %v589_v26 = vld [vmem:[%s2539_s10 + $0x9f8] sm:$0xff] }
  0xef   : > { %1907 = vmatpush1.bf16.msra.mxu1 %v1906_v34  ;;  %1653 = vmatprep.subr.bf16.mxu0 %v1652_v35  ;;  %v542_v34 = vld [vmem:[%s2539_s10 + $0x880] sm:$0xff] }
  0xf0   : > { %1909 = vmatprep.subr.bf16.mxu1 %v1908_v39  ;;  %v546_v35 = vld [vmem:[%s2539_s10 + $0x8a0] sm:$0xff]  ;;  %v551_v39 = vld [vmem:[%s2539_s10 + $0x8c8] sm:$0xff] }
  0xf1   : > { %v1674_v43 = vpack.c.bf16 %v546_v35, %v542_v34  ;;  %v588_v34 = vld [vmem:[%s2539_s10 + $0x9f0] sm:$0xff]  ;;  %v591_v35 = vld [vmem:[%s2539_s10 + $0xa08] sm:$0xff] }
  0xf2   : > { %1655 = vmatpush1.bf16.msra.mxu0 %v1654_v45  ;;  %v1676_v45 = vpack.c.bf16 %v555_v40, %v551_v39  ;;  %v1696_v41 = vpack.c.bf16 %v595_v36, %v591_v35 }
  0xf3   : > { %1911 = vmatpush1.bf16.msra.mxu1 %v1910_v46  ;;  %1657 = vmatprep.subr.bf16.mxu0 %v1656_v47  ;;  %v550_v46 = vld [vmem:[%s2539_s10 + $0x8c0] sm:$0xff] }
  0xf4   : > { %1913 = vmatprep.subr.bf16.mxu1 %v1912_v51  ;;  %v554_v47 = vld [vmem:[%s2539_s10 + $0x8e0] sm:$0xff]  ;;  %v559_v51 = vld [vmem:[%s2539_s10 + $0x908] sm:$0xff] }
  0xf5   : > { %v1678_v55 = vpack.c.bf16 %v554_v47, %v550_v46  ;;  %v596_v46 = vld [vmem:[%s2539_s10 + $0xa30] sm:$0xff]  ;;  %v599_v47 = vld [vmem:[%s2539_s10 + $0xa48] sm:$0xff] }
  0xf6   : > { %1659 = vmatpush1.bf16.msra.mxu0 %v1658_v57  ;;  %v1680_v57 = vpack.c.bf16 %v563_v52, %v559_v51  ;;  %v1700_v53 = vpack.c.bf16 %v603_v48, %v599_v47 }
  0xf7   : > { %1915 = vmatpush1.bf16.msra.mxu1 %v1914_v58  ;;  %1661 = vmatprep.subr.bf16.mxu0 %v1660_v59  ;;  %v558_v58 = vld [vmem:[%s2539_s10 + $0x900] sm:$0xff] }
  0xf8   : > { %1917 = vmatprep.subr.bf16.mxu1 %v1916_v63  ;;  %v562_v59 = vld [vmem:[%s2539_s10 + $0x920] sm:$0xff]  ;;  %v567_v63 = vld [vmem:[%s2539_s10 + $0x948] sm:$0xff] }
  0xf9   : > { %v1682_v3 = vpack.c.bf16 %v562_v59, %v558_v58  ;;  %v604_v58 = vld [vmem:[%s2539_s10 + $0xa70] sm:$0xff]  ;;  %v607_v59 = vld [vmem:[%s2539_s10 + $0xa88] sm:$0xff] }
  0xfa   : > { %1663 = vmatpush1.bf16.msra.mxu0 %v1662_v5  ;;  %v1684_v5 = vpack.c.bf16 %v571_v0, %v567_v63  ;;  %v1704_v1 = vpack.c.bf16 %v611_v60, %v607_v59 }
  0xfb   : > { %1919 = vmatpush1.bf16.msra.mxu1 %v1918_v6  ;;  %1665 = vmatprep.subr.bf16.mxu0 %v1664_v7  ;;  %v566_v6 = vld [vmem:[%s2539_s10 + $0x940] sm:$0xff] }
  0xfc   : > { %1921 = vmatprep.subr.bf16.mxu1 %v1920_v11  ;;  %v570_v7 = vld [vmem:[%s2539_s10 + $0x960] sm:$0xff]  ;;  %v575_v11 = vld [vmem:[%s2539_s10 + $0x988] sm:$0xff] }
  0xfd   : > { %940 = vmatmul.mubr.f32.vlgmr.msra.gmra.mrb[0].mxu0 %v264_v17  ;;  %v1686_v15 = vpack.c.bf16 %v570_v7, %v566_v6  ;;  %v612_v6 = vld [vmem:[%s2539_s10 + $0xab0] sm:$0xff]  ;;  %v615_v7 = vld [vmem:[%s2539_s10 + $0xac8] sm:$0xff] }
  0xfe   : > { %1667 = vmatpush1.bf16.msra.mxu0 %v1666_v18  ;;  %1224 = vmatmul.mubr.f32.vlgmr.msra.gmra.mrb[0].mxu1 %v264_v17  ;;  %v1688_v17 = vpack.c.bf16 %v579_v12, %v575_v11  ;;  %v574_v18 = vld [vmem:[%s2539_s10 + $0x980] sm:$0xff]  ;;  %v1708_v13 = vpack.c.bf16 %v619_v8, %v615_v7 }
  0xff   : > { %1923 = vmatpush1.bf16.msra.mxu1 %v1922_v19  ;;  %1669 = vmatprep.subr.bf16.mxu0 %v1668_v20  ;;  %v578_v19 = vld [vmem:[%s2539_s10 + $0x9a0] sm:$0xff]  ;;  %v576_v20 = vld [vmem:[%s2539_s10 + $0x990] sm:$0xff] }
 0x100   : > { %1925 = vmatprep.subr.bf16.mxu1 %v1924_v24  ;;  %1010 = vmatprep.mubr.f32.mxu0 %v267_v30  ;;  %v587_v24 = vld [vmem:[%s2539_s10 + $0x9e8] sm:$0xff]  ;;  %v1690_v27 = vpack.c.bf16 %v578_v19, %v574_v18  ;;  %v1946_v28 = vpack.c.bf16 %v580_v22, %v576_v20  ;;  %v620_v18 = vld [vmem:[%s2539_s10 + $0xaf0] sm:$0xff]  ;;  %v629_v22 = vld [vmem:[%s2539_s10 + $0xb38] sm:$0xff] }
 0x101   : > { %1294 = vmatprep.mubr.f32.mxu1 %v267_v30  ;;  %v1692_v29 = vpack.c.bf16 %v587_v24, %v583_v23  ;;  %v582_v30 = vld [vmem:[%s2539_s10 + $0x9c0] sm:$0xff]  ;;  %v623_v19 = vld [vmem:[%s2539_s10 + $0xb08] sm:$0xff] }
 0x102   : > { %1671 = vmatpush1.bf16.msra.mxu0 %v1670_v31  ;;  %v586_v31 = vld [vmem:[%s2539_s10 + $0x9e0] sm:$0xff]  ;;  %v627_v20 = vld [vmem:[%s2539_s10 + $0xb28] sm:$0xff] }
 0x103   : > { %1927 = vmatpush1.bf16.msra.mxu1 %v1926_v32  ;;  %1673 = vmatprep.subr.bf16.mxu0 %v1672_v33  ;;  %v584_v32 = vld [vmem:[%s2539_s10 + $0x9d0] sm:$0xff]  ;;  %v1948_v33 = vpack.c.bf16 %v589_v26, %v585_v25  ;;  %v1694_v39 = vpack.c.bf16 %v586_v31, %v582_v30  ;;  %v1712_v25 = vpack.c.bf16 %v627_v20, %v623_v19  ;;  %v622_v26 = vld [vmem:[%s2539_s10 + $0xb00] sm:$0xff]  ;;  %v631_v31 = vld [vmem:[%s2539_s10 + $0xb48] sm:$0xff] }
 0x104   : > { %1929 = vmatprep.subr.bf16.mxu1 %v1928_v37  ;;  %v593_v37 = vld [vmem:[%s2539_s10 + $0xa18] sm:$0xff]  ;;  %v1950_v40 = vpack.c.bf16 %v588_v34, %v584_v32  ;;  %v628_v30 = vld [vmem:[%s2539_s10 + $0xb30] sm:$0xff]  ;;  %v635_v32 = vld [vmem:[%s2539_s10 + $0xb68] sm:$0xff] }
 0x105   : > { %v637_v34 = vld [vmem:[%s2539_s10 + $0xb78] sm:$0xff]  ;;  %v266_v19 = vld [vmem:[#allocation2 + $0x20] sm:$0xff] }
 0x106   : > { %1675 = vmatpush1.bf16.msra.mxu0 %v1674_v43  ;;  %v594_v43 = vld [vmem:[%s2539_s10 + $0xa20] sm:$0xff] }
 0x107   : > { %1931 = vmatpush1.bf16.msra.mxu1 %v1930_v44  ;;  %1677 = vmatprep.subr.bf16.mxu0 %v1676_v45  ;;  %v592_v44 = vld [vmem:[%s2539_s10 + $0xa10] sm:$0xff]  ;;  %v1952_v45 = vpack.c.bf16 %v597_v38, %v593_v37  ;;  %v1698_v51 = vpack.c.bf16 %v594_v43, %v590_v42  ;;  %v1716_v37 = vpack.c.bf16 %v635_v32, %v631_v31  ;;  %v630_v38 = vld [vmem:[%s2539_s10 + $0xb40] sm:$0xff]  ;;  %v639_v43 = vld [vmem:[%s2539_s10 + $0xb88] sm:$0xff] }
 0x108   : > { %1933 = vmatprep.subr.bf16.mxu1 %v1932_v49  ;;  %v601_v49 = vld [vmem:[%s2539_s10 + $0xa58] sm:$0xff]  ;;  %v1954_v52 = vpack.c.bf16 %v596_v46, %v592_v44  ;;  %v636_v42 = vld [vmem:[%s2539_s10 + $0xb70] sm:$0xff]  ;;  %v643_v44 = vld [vmem:[%s2539_s10 + $0xba8] sm:$0xff] }
 0x109   : > { %v645_v46 = vld [vmem:[%s2539_s10 + $0xbb8] sm:$0xff] }
 0x10a   : > { %1679 = vmatpush1.bf16.msra.mxu0 %v1678_v55  ;;  %v602_v55 = vld [vmem:[%s2539_s10 + $0xa60] sm:$0xff]  ;;  %v677_v31 = vld [vmem:[%s2539_s10 + $0xcb8] sm:$0xff] }
 0x10b   : > { %1935 = vmatpush1.bf16.msra.mxu1 %v1934_v56  ;;  %1681 = vmatprep.subr.bf16.mxu0 %v1680_v57  ;;  %v600_v56 = vld [vmem:[%s2539_s10 + $0xa50] sm:$0xff]  ;;  %v1956_v57 = vpack.c.bf16 %v605_v50, %v601_v49  ;;  %v1702_v63 = vpack.c.bf16 %v602_v55, %v598_v54  ;;  %v1720_v49 = vpack.c.bf16 %v643_v44, %v639_v43  ;;  %v638_v50 = vld [vmem:[%s2539_s10 + $0xb80] sm:$0xff]  ;;  %v647_v55 = vld [vmem:[%s2539_s10 + $0xbc8] sm:$0xff] }
 0x10c   : > { %1937 = vmatprep.subr.bf16.mxu1 %v1936_v61  ;;  %v609_v61 = vld [vmem:[%s2539_s10 + $0xa98] sm:$0xff]  ;;  %v1958_v0 = vpack.c.bf16 %v604_v58, %v600_v56  ;;  %v644_v54 = vld [vmem:[%s2539_s10 + $0xbb0] sm:$0xff]  ;;  %v651_v56 = vld [vmem:[%s2539_s10 + $0xbe8] sm:$0xff] }
 0x10d   : > { %v653_v58 = vld [vmem:[%s2539_s10 + $0xbf8] sm:$0xff] }
 0x10e   : > { %1683 = vmatpush1.bf16.msra.mxu0 %v1682_v3  ;;  %v610_v3 = vld [vmem:[%s2539_s10 + $0xaa0] sm:$0xff]  ;;  %v269_v32 = vld [vmem:[#allocation2 + $0x38] sm:$0xff] }
 0x10f   : > { %1939 = vmatpush1.bf16.msra.mxu1 %v1938_v4  ;;  %1685 = vmatprep.subr.bf16.mxu0 %v1684_v5  ;;  %v608_v4 = vld [vmem:[%s2539_s10 + $0xa90] sm:$0xff]  ;;  %v1960_v5 = vpack.c.bf16 %v613_v62, %v609_v61  ;;  %v1706_v11 = vpack.c.bf16 %v610_v3, %v606_v2  ;;  %v1724_v61 = vpack.c.bf16 %v651_v56, %v647_v55  ;;  %v646_v62 = vld [vmem:[%s2539_s10 + $0xbc0] sm:$0xff]  ;;  %v655_v3 = vld [vmem:[%s2539_s10 + $0xc08] sm:$0xff] }
 0x110   : > { %1941 = vmatprep.subr.bf16.mxu1 %v1940_v9  ;;  %v617_v9 = vld [vmem:[%s2539_s10 + $0xad8] sm:$0xff]  ;;  %v1962_v12 = vpack.c.bf16 %v612_v6, %v608_v4  ;;  %v652_v2 = vld [vmem:[%s2539_s10 + $0xbf0] sm:$0xff]  ;;  %v659_v4 = vld [vmem:[%s2539_s10 + $0xc28] sm:$0xff] }
 0x111   : > { %v661_v6 = vld [vmem:[%s2539_s10 + $0xc38] sm:$0xff] }
 0x112   : > { %1687 = vmatpush1.bf16.msra.mxu0 %v1686_v15  ;;  %v618_v15 = vld [vmem:[%s2539_s10 + $0xae0] sm:$0xff]  ;;  %v681_v43 = vld [vmem:[%s2539_s10 + $0xcd8] sm:$0xff] }
 0x113   : > { %1943 = vmatpush1.bf16.msra.mxu1 %v1942_v16  ;;  %1689 = vmatprep.subr.bf16.mxu0 %v1688_v17  ;;  %v616_v16 = vld [vmem:[%s2539_s10 + $0xad0] sm:$0xff]  ;;  %v1964_v17 = vpack.c.bf16 %v621_v10, %v617_v9  ;;  %v1710_v23 = vpack.c.bf16 %v618_v15, %v614_v14  ;;  %v1728_v9 = vpack.c.bf16 %v659_v4, %v655_v3  ;;  %v654_v10 = vld [vmem:[%s2539_s10 + $0xc00] sm:$0xff]  ;;  %v663_v15 = vld [vmem:[%s2539_s10 + $0xc48] sm:$0xff] }
 0x114   : > { %1945 = vmatprep.subr.bf16.mxu1 %v1944_v21  ;;  %v625_v21 = vld [vmem:[%s2539_s10 + $0xb18] sm:$0xff]  ;;  %v1966_v24 = vpack.c.bf16 %v620_v18, %v616_v16  ;;  %v660_v14 = vld [vmem:[%s2539_s10 + $0xc30] sm:$0xff]  ;;  %v667_v16 = vld [vmem:[%s2539_s10 + $0xc68] sm:$0xff] }
 0x115   : > { %v669_v18 = vld [vmem:[%s2539_s10 + $0xc78] sm:$0xff] }
 0x116   : > { %1691 = vmatpush1.bf16.msra.mxu0 %v1690_v27  ;;  %v626_v27 = vld [vmem:[%s2539_s10 + $0xb20] sm:$0xff]  ;;  %v685_v44 = vld [vmem:[%s2539_s10 + $0xcf8] sm:$0xff] }
 0x117   : > { %1947 = vmatpush1.bf16.msra.mxu1 %v1946_v28  ;;  %1693 = vmatprep.subr.bf16.mxu0 %v1692_v29  ;;  %v624_v28 = vld [vmem:[%s2539_s10 + $0xb10] sm:$0xff]  ;;  %v1968_v29 = vpack.c.bf16 %v629_v22, %v625_v21  ;;  %v1714_v35 = vpack.c.bf16 %v626_v27, %v622_v26  ;;  %v1732_v22 = vpack.c.bf16 %v667_v16, %v663_v15  ;;  %v689_v55 = vld [vmem:[%s2539_s10 + $0xd18] sm:$0xff] }
 0x118   : > { %1949 = vmatprep.subr.bf16.mxu1 %v1948_v33  ;;  %v633_v33 = vld [vmem:[%s2539_s10 + $0xb58] sm:$0xff]  ;;  %v1970_v36 = vpack.c.bf16 %v628_v30, %v624_v28  ;;  %v668_v27 = vld [vmem:[%s2539_s10 + $0xc70] sm:$0xff]  ;;  %v671_v28 = vld [vmem:[%s2539_s10 + $0xc88] sm:$0xff] }
 0x119   : > { %v673_v30 = vld [vmem:[%s2539_s10 + $0xc98] sm:$0xff] }
 0x11a   : > { %1695 = vmatpush1.bf16.msra.mxu0 %v1694_v39  ;;  %v634_v39 = vld [vmem:[%s2539_s10 + $0xb60] sm:$0xff]  ;;  %v693_v56 = vld [vmem:[%s2539_s10 + $0xd38] sm:$0xff] }
 0x11b   : > { %1951 = vmatpush1.bf16.msra.mxu1 %v1950_v40  ;;  %1697 = vmatprep.subr.bf16.mxu0 %v1696_v41  ;;  %v632_v40 = vld [vmem:[%s2539_s10 + $0xb50] sm:$0xff]  ;;  %v1972_v41 = vpack.c.bf16 %v637_v34, %v633_v33  ;;  %v1718_v47 = vpack.c.bf16 %v634_v39, %v630_v38  ;;  %v1992_v39 = vpack.c.bf16 %v677_v31, %v673_v30  ;;  %v697_v3 = vld [vmem:[%s2539_s10 + $0xd58] sm:$0xff] }
 0x11c   : > { %1953 = vmatprep.subr.bf16.mxu1 %v1952_v45  ;;  %v641_v45 = vld [vmem:[%s2539_s10 + $0xb98] sm:$0xff]  ;;  %v1974_v48 = vpack.c.bf16 %v636_v42, %v632_v40  ;;  %v672_v38 = vld [vmem:[%s2539_s10 + $0xc90] sm:$0xff]  ;;  %v683_v42 = vld [vmem:[%s2539_s10 + $0xce8] sm:$0xff] }
 0x11d   : > { %v676_v40 = vld [vmem:[%s2539_s10 + $0xcb0] sm:$0xff]  ;;  %v701_v4 = vld [vmem:[%s2539_s10 + $0xd78] sm:$0xff] }
 0x11e   : > { %1699 = vmatpush1.bf16.msra.mxu0 %v1698_v51  ;;  %v642_v51 = vld [vmem:[%s2539_s10 + $0xba0] sm:$0xff]  ;;  %v705_v15 = vld [vmem:[%s2539_s10 + $0xd98] sm:$0xff] }
 0x11f   : > { %1955 = vmatpush1.bf16.msra.mxu1 %v1954_v52  ;;  %1701 = vmatprep.subr.bf16.mxu0 %v1700_v53  ;;  %v640_v52 = vld [vmem:[%s2539_s10 + $0xb90] sm:$0xff]  ;;  %v1976_v53 = vpack.c.bf16 %v645_v46, %v641_v45  ;;  %v1722_v59 = vpack.c.bf16 %v642_v51, %v638_v50  ;;  %v1994_v46 = vpack.c.bf16 %v676_v40, %v672_v38  ;;  %v709_v16 = vld [vmem:[%s2539_s10 + $0xdb8] sm:$0xff]  ;;  %v723_v38 = vld [vmem:[%s2539_s10 + $0xe28] sm:$0xff] }
 0x120   : > { %1957 = vmatprep.subr.bf16.mxu1 %v1956_v57  ;;  %v649_v57 = vld [vmem:[%s2539_s10 + $0xbd8] sm:$0xff]  ;;  %v1978_v60 = vpack.c.bf16 %v644_v54, %v640_v52  ;;  %v680_v50 = vld [vmem:[%s2539_s10 + $0xcd0] sm:$0xff]  ;;  %v1996_v51 = vpack.c.bf16 %v685_v44, %v681_v43  ;;  %v691_v54 = vld [vmem:[%s2539_s10 + $0xd28] sm:$0xff] }
 0x121   : > { %v684_v52 = vld [vmem:[%s2539_s10 + $0xcf0] sm:$0xff]  ;;  %v725_v40 = vld [vmem:[%s2539_s10 + $0xe38] sm:$0xff]  ;;  %v718_v44 = vld [vmem:[%s2539_s10 + $0xe00] sm:$0xff] }
 0x122   : > { %1703 = vmatpush1.bf16.msra.mxu0 %v1702_v63  ;;  %v650_v63 = vld [vmem:[%s2539_s10 + $0xbe0] sm:$0xff] }
 0x123   : > { %1959 = vmatpush1.bf16.msra.mxu1 %v1958_v0  ;;  %1705 = vmatprep.subr.bf16.mxu0 %v1704_v1  ;;  %v648_v0 = vld [vmem:[%s2539_s10 + $0xbd0] sm:$0xff]  ;;  %v1980_v1 = vpack.c.bf16 %v653_v58, %v649_v57  ;;  %v1726_v7 = vpack.c.bf16 %v650_v63, %v646_v62  ;;  %v1998_v58 = vpack.c.bf16 %v684_v52, %v680_v50  ;;  %v731_v50 = vld [vmem:[%s2539_s10 + $0xe68] sm:$0xff]  ;;  %v733_v52 = vld [vmem:[%s2539_s10 + $0xe78] sm:$0xff] }
 0x124   : > { %1961 = vmatprep.subr.bf16.mxu1 %v1960_v5  ;;  %v657_v5 = vld [vmem:[%s2539_s10 + $0xc18] sm:$0xff]  ;;  %v1982_v8 = vpack.c.bf16 %v652_v2, %v648_v0  ;;  %v688_v62 = vld [vmem:[%s2539_s10 + $0xd10] sm:$0xff]  ;;  %v2000_v63 = vpack.c.bf16 %v693_v56, %v689_v55  ;;  %v699_v2 = vld [vmem:[%s2539_s10 + $0xd68] sm:$0xff] }
 0x125   : > { %v692_v0 = vld [vmem:[%s2539_s10 + $0xd30] sm:$0xff]  ;;  %v726_v56 = vld [vmem:[%s2539_s10 + $0xe40] sm:$0xff] }
 0x126   : > { %1707 = vmatpush1.bf16.msra.mxu0 %v1706_v11  ;;  %v658_v11 = vld [vmem:[%s2539_s10 + $0xc20] sm:$0xff] }
 0x127   : > { %1963 = vmatpush1.bf16.msra.mxu1 %v1962_v12  ;;  %1709 = vmatprep.subr.bf16.mxu0 %v1708_v13  ;;  %v656_v12 = vld [vmem:[%s2539_s10 + $0xc10] sm:$0xff]  ;;  %v1984_v13 = vpack.c.bf16 %v661_v6, %v657_v5  ;;  %v1730_v20 = vpack.c.bf16 %v658_v11, %v654_v10  ;;  %v2002_v6 = vpack.c.bf16 %v692_v0, %v688_v62  ;;  %v739_v62 = vld [vmem:[%s2539_s10 + $0xea8] sm:$0xff]  ;;  %v741_v0 = vld [vmem:[%s2539_s10 + $0xeb8] sm:$0xff] }
 0x128   : > { %1965 = vmatprep.subr.bf16.mxu1 %v1964_v17  ;;  %v665_v17 = vld [vmem:[%s2539_s10 + $0xc58] sm:$0xff]  ;;  %v1986_v21 = vpack.c.bf16 %v660_v14, %v656_v12  ;;  %v696_v10 = vld [vmem:[%s2539_s10 + $0xd50] sm:$0xff]  ;;  %v2004_v11 = vpack.c.bf16 %v701_v4, %v697_v3  ;;  %v707_v14 = vld [vmem:[%s2539_s10 + $0xda8] sm:$0xff] }
 0x129   : > { %v1988_v26 = vpack.c.bf16 %v669_v18, %v665_v17  ;;  %v700_v12 = vld [vmem:[%s2539_s10 + $0xd70] sm:$0xff]  ;;  %v734_v4 = vld [vmem:[%s2539_s10 + $0xe80] sm:$0xff] }
 0x12a   : > { %1711 = vmatpush1.bf16.msra.mxu0 %v1710_v23  ;;  %v662_v23 = vld [vmem:[%s2539_s10 + $0xc40] sm:$0xff]  ;;  %v2006_v18 = vpack.c.bf16 %v700_v12, %v696_v10  ;;  %v747_v10 = vld [vmem:[%s2539_s10 + $0xee8] sm:$0xff]  ;;  %v749_v12 = vld [vmem:[%s2539_s10 + $0xef8] sm:$0xff] }
 0x12b   : > { %1967 = vmatpush1.bf16.msra.mxu1 %v1966_v24  ;;  %1713 = vmatprep.subr.bf16.mxu0 %v1712_v25  ;;  %v666_v24 = vld [vmem:[%s2539_s10 + $0xc60] sm:$0xff]  ;;  %v664_v25 = vld [vmem:[%s2539_s10 + $0xc50] sm:$0xff] }
 0x12c   : > { %1969 = vmatprep.subr.bf16.mxu1 %v1968_v29  ;;  %v675_v29 = vld [vmem:[%s2539_s10 + $0xca8] sm:$0xff]  ;;  %v1734_v33 = vpack.c.bf16 %v666_v24, %v662_v23  ;;  %v1990_v34 = vpack.c.bf16 %v668_v27, %v664_v25  ;;  %v2008_v23 = vpack.c.bf16 %v709_v16, %v705_v15  ;;  %v708_v24 = vld [vmem:[%s2539_s10 + $0xdb0] sm:$0xff]  ;;  %v713_v27 = vld [vmem:[%s2539_s10 + $0xdd8] sm:$0xff] }
 0x12d   : > { %v711_v25 = vld [vmem:[%s2539_s10 + $0xdc8] sm:$0xff]  ;;  %v742_v16 = vld [vmem:[%s2539_s10 + $0xec0] sm:$0xff] }
 0x12e   : > { %1715 = vmatpush1.bf16.msra.mxu0 %v1714_v35  ;;  %v1736_v35 = vpack.c.bf16 %v675_v29, %v671_v28  ;;  %v717_v28 = vld [vmem:[%s2539_s10 + $0xdf8] sm:$0xff] }
 0x12f   : > { %1971 = vmatpush1.bf16.msra.mxu1 %v1970_v36  ;;  %1717 = vmatprep.subr.bf16.mxu0 %v1716_v37  ;;  %v670_v36 = vld [vmem:[%s2539_s10 + $0xc80] sm:$0xff] }
 0x130   : > { %1973 = vmatprep.subr.bf16.mxu1 %v1972_v41  ;;  %v674_v37 = vld [vmem:[%s2539_s10 + $0xca0] sm:$0xff]  ;;  %v679_v41 = vld [vmem:[%s2539_s10 + $0xcc8] sm:$0xff] }
 0x131   : > { %v1738_v45 = vpack.c.bf16 %v674_v37, %v670_v36  ;;  %v716_v36 = vld [vmem:[%s2539_s10 + $0xdf0] sm:$0xff]  ;;  %v719_v37 = vld [vmem:[%s2539_s10 + $0xe08] sm:$0xff] }
 0x132   : > { %1719 = vmatpush1.bf16.msra.mxu0 %v1718_v47  ;;  %v1740_v47 = vpack.c.bf16 %v683_v42, %v679_v41  ;;  %v1760_v43 = vpack.c.bf16 %v723_v38, %v719_v37 }
 0x133   : > { %1975 = vmatpush1.bf16.msra.mxu1 %v1974_v48  ;;  %1721 = vmatprep.subr.bf16.mxu0 %v1720_v49  ;;  %v678_v48 = vld [vmem:[%s2539_s10 + $0xcc0] sm:$0xff] }
 0x134   : > { %1977 = vmatprep.subr.bf16.mxu1 %v1976_v53  ;;  %v682_v49 = vld [vmem:[%s2539_s10 + $0xce0] sm:$0xff]  ;;  %v687_v53 = vld [vmem:[%s2539_s10 + $0xd08] sm:$0xff] }
 0x135   : > { %v1742_v57 = vpack.c.bf16 %v682_v49, %v678_v48  ;;  %v724_v48 = vld [vmem:[%s2539_s10 + $0xe30] sm:$0xff]  ;;  %v727_v49 = vld [vmem:[%s2539_s10 + $0xe48] sm:$0xff] }
 0x136   : > { %1723 = vmatpush1.bf16.msra.mxu0 %v1722_v59  ;;  %v1744_v59 = vpack.c.bf16 %v691_v54, %v687_v53  ;;  %v1764_v55 = vpack.c.bf16 %v731_v50, %v727_v49 }
 0x137   : > { %1979 = vmatpush1.bf16.msra.mxu1 %v1978_v60  ;;  %1725 = vmatprep.subr.bf16.mxu0 %v1724_v61  ;;  %v686_v60 = vld [vmem:[%s2539_s10 + $0xd00] sm:$0xff] }
 0x138   : > { %1981 = vmatprep.subr.bf16.mxu1 %v1980_v1  ;;  %v690_v61 = vld [vmem:[%s2539_s10 + $0xd20] sm:$0xff]  ;;  %v695_v1 = vld [vmem:[%s2539_s10 + $0xd48] sm:$0xff] }
 0x139   : > { %v1746_v5 = vpack.c.bf16 %v690_v61, %v686_v60  ;;  %v732_v60 = vld [vmem:[%s2539_s10 + $0xe70] sm:$0xff]  ;;  %v735_v61 = vld [vmem:[%s2539_s10 + $0xe88] sm:$0xff] }
 0x13a   : > { %1727 = vmatpush1.bf16.msra.mxu0 %v1726_v7  ;;  %v1748_v7 = vpack.c.bf16 %v699_v2, %v695_v1  ;;  %v1768_v3 = vpack.c.bf16 %v739_v62, %v735_v61 }
 0x13b   : > { %1983 = vmatpush1.bf16.msra.mxu1 %v1982_v8  ;;  %1729 = vmatprep.subr.bf16.mxu0 %v1728_v9  ;;  %v694_v8 = vld [vmem:[%s2539_s10 + $0xd40] sm:$0xff] }
 0x13c   : > { %1985 = vmatprep.subr.bf16.mxu1 %v1984_v13  ;;  %v698_v9 = vld [vmem:[%s2539_s10 + $0xd60] sm:$0xff]  ;;  %v703_v13 = vld [vmem:[%s2539_s10 + $0xd88] sm:$0xff] }
 0x13d   : > { %1011 = vmatmul.mubr.f32.vlgmr.msra.gmra.mrb[0].mxu0 %v266_v19  ;;  %v1750_v17 = vpack.c.bf16 %v698_v9, %v694_v8  ;;  %v740_v8 = vld [vmem:[%s2539_s10 + $0xeb0] sm:$0xff]  ;;  %v743_v9 = vld [vmem:[%s2539_s10 + $0xec8] sm:$0xff] }
 0x13e   : > { %1731 = vmatpush1.bf16.msra.mxu0 %v1730_v20  ;;  %1295 = vmatmul.mubr.f32.vlgmr.msra.gmra.mrb[0].mxu1 %v266_v19  ;;  %v1752_v19 = vpack.c.bf16 %v707_v14, %v703_v13  ;;  %v702_v20 = vld [vmem:[%s2539_s10 + $0xd80] sm:$0xff]  ;;  %v1772_v15 = vpack.c.bf16 %v747_v10, %v743_v9 }
 0x13f   : > { %1987 = vmatpush1.bf16.msra.mxu1 %v1986_v21  ;;  %1733 = vmatprep.subr.bf16.mxu0 %v1732_v22  ;;  %v706_v21 = vld [vmem:[%s2539_s10 + $0xda0] sm:$0xff]  ;;  %v704_v22 = vld [vmem:[%s2539_s10 + $0xd90] sm:$0xff] }
 0x140   : > { %1989 = vmatprep.subr.bf16.mxu1 %v1988_v26  ;;  %1081 = vmatprep.mubr.f32.mxu0 %v269_v32  ;;  %v715_v26 = vld [vmem:[%s2539_s10 + $0xde8] sm:$0xff]  ;;  %v1754_v29 = vpack.c.bf16 %v706_v21, %v702_v20  ;;  %v2010_v30 = vpack.c.bf16 %v708_v24, %v704_v22  ;;  %v748_v20 = vld [vmem:[%s2539_s10 + $0xef0] sm:$0xff]  ;;  %v757_v24 = vld [vmem:[%s2539_s10 + $0xf38] sm:$0xff] }
 0x141   : > { %1365 = vmatprep.mubr.f32.mxu1 %v269_v32  ;;  %v1756_v31 = vpack.c.bf16 %v715_v26, %v711_v25  ;;  %v710_v32 = vld [vmem:[%s2539_s10 + $0xdc0] sm:$0xff]  ;;  %v751_v21 = vld [vmem:[%s2539_s10 + $0xf08] sm:$0xff] }
 0x142   : > { %1735 = vmatpush1.bf16.msra.mxu0 %v1734_v33  ;;  %v714_v33 = vld [vmem:[%s2539_s10 + $0xde0] sm:$0xff]  ;;  %v755_v22 = vld [vmem:[%s2539_s10 + $0xf28] sm:$0xff] }
 0x143   : > { %1991 = vmatpush1.bf16.msra.mxu1 %v1990_v34  ;;  %1737 = vmatprep.subr.bf16.mxu0 %v1736_v35  ;;  %v712_v34 = vld [vmem:[%s2539_s10 + $0xdd0] sm:$0xff]  ;;  %v2012_v35 = vpack.c.bf16 %v717_v28, %v713_v27  ;;  %v1758_v41 = vpack.c.bf16 %v714_v33, %v710_v32  ;;  %v1776_v27 = vpack.c.bf16 %v755_v22, %v751_v21  ;;  %v750_v28 = vld [vmem:[%s2539_s10 + $0xf00] sm:$0xff]  ;;  %v759_v33 = vld [vmem:[%s2539_s10 + $0xf48] sm:$0xff] }
 0x144   : > { %1993 = vmatprep.subr.bf16.mxu1 %v1992_v39  ;;  %v721_v39 = vld [vmem:[%s2539_s10 + $0xe18] sm:$0xff]  ;;  %v2014_v42 = vpack.c.bf16 %v716_v36, %v712_v34  ;;  %v756_v32 = vld [vmem:[%s2539_s10 + $0xf30] sm:$0xff]  ;;  %v763_v34 = vld [vmem:[%s2539_s10 + $0xf68] sm:$0xff] }
 0x145   : > { %v765_v36 = vld [vmem:[%s2539_s10 + $0xf78] sm:$0xff] }
 0x146   : > { %1739 = vmatpush1.bf16.msra.mxu0 %v1738_v45  ;;  %v722_v45 = vld [vmem:[%s2539_s10 + $0xe20] sm:$0xff] }
 0x147   : > { %1995 = vmatpush1.bf16.msra.mxu1 %v1994_v46  ;;  %1741 = vmatprep.subr.bf16.mxu0 %v1740_v47  ;;  %v720_v46 = vld [vmem:[%s2539_s10 + $0xe10] sm:$0xff]  ;;  %v2016_v47 = vpack.c.bf16 %v725_v40, %v721_v39  ;;  %v1762_v53 = vpack.c.bf16 %v722_v45, %v718_v44  ;;  %v1780_v39 = vpack.c.bf16 %v763_v34, %v759_v33  ;;  %v758_v40 = vld [vmem:[%s2539_s10 + $0xf40] sm:$0xff]  ;;  %v767_v45 = vld [vmem:[%s2539_s10 + $0xf88] sm:$0xff] }
 0x148   : > { %1997 = vmatprep.subr.bf16.mxu1 %v1996_v51  ;;  %v729_v51 = vld [vmem:[%s2539_s10 + $0xe58] sm:$0xff]  ;;  %v2018_v54 = vpack.c.bf16 %v724_v48, %v720_v46  ;;  %v764_v44 = vld [vmem:[%s2539_s10 + $0xf70] sm:$0xff]  ;;  %v771_v46 = vld [vmem:[%s2539_s10 + $0xfa8] sm:$0xff] }
 0x149   : > { %v773_v48 = vld [vmem:[%s2539_s10 + $0xfb8] sm:$0xff] }
 0x14a   : > { %1743 = vmatpush1.bf16.msra.mxu0 %v1742_v57  ;;  %v730_v57 = vld [vmem:[%s2539_s10 + $0xe60] sm:$0xff] }
 0x14b   : > { %1999 = vmatpush1.bf16.msra.mxu1 %v1998_v58  ;;  %1745 = vmatprep.subr.bf16.mxu0 %v1744_v59  ;;  %v728_v58 = vld [vmem:[%s2539_s10 + $0xe50] sm:$0xff]  ;;  %v2020_v59 = vpack.c.bf16 %v733_v52, %v729_v51  ;;  %v1766_v1 = vpack.c.bf16 %v730_v57, %v726_v56  ;;  %v1784_v51 = vpack.c.bf16 %v771_v46, %v767_v45  ;;  %v766_v52 = vld [vmem:[%s2539_s10 + $0xf80] sm:$0xff]  ;;  %v775_v57 = vld [vmem:[%s2539_s10 + $0xfc8] sm:$0xff] }
 0x14c   : > { %2001 = vmatprep.subr.bf16.mxu1 %v2000_v63  ;;  %v737_v63 = vld [vmem:[%s2539_s10 + $0xe98] sm:$0xff]  ;;  %v2022_v2 = vpack.c.bf16 %v732_v60, %v728_v58  ;;  %v772_v56 = vld [vmem:[%s2539_s10 + $0xfb0] sm:$0xff]  ;;  %v779_v58 = vld [vmem:[%s2539_s10 + $0xfe8] sm:$0xff] }
 0x14d   : > { %v781_v60 = vld [vmem:[%s2539_s10 + $0xff8] sm:$0xff] }
 0x14e   : > { %1747 = vmatpush1.bf16.msra.mxu0 %v1746_v5  ;;  %v738_v5 = vld [vmem:[%s2539_s10 + $0xea0] sm:$0xff] }
 0x14f   : > { %2003 = vmatpush1.bf16.msra.mxu1 %v2002_v6  ;;  %1749 = vmatprep.subr.bf16.mxu0 %v1748_v7  ;;  %v736_v6 = vld [vmem:[%s2539_s10 + $0xe90] sm:$0xff]  ;;  %v2024_v7 = vpack.c.bf16 %v741_v0, %v737_v63  ;;  %v1770_v13 = vpack.c.bf16 %v738_v5, %v734_v4  ;;  %v1788_v63 = vpack.c.bf16 %v779_v58, %v775_v57  ;;  %v774_v0 = vld [vmem:[%s2539_s10 + $0xfc0] sm:$0xff] }
 0x150   : > { %2005 = vmatprep.subr.bf16.mxu1 %v2004_v11  ;;  %v745_v11 = vld [vmem:[%s2539_s10 + $0xed8] sm:$0xff]  ;;  %v2026_v14 = vpack.c.bf16 %v740_v8, %v736_v6  ;;  %v780_v4 = vld [vmem:[%s2539_s10 + $0xff0] sm:$0xff]  ;;  %v784_v8 = vlaneseq }
 0x152   : > { %1751 = vmatpush1.bf16.msra.mxu0 %v1750_v17  ;;  %v746_v17 = vld [vmem:[%s2539_s10 + $0xee0] sm:$0xff]  ;;  %v785_v9 = vshrl.u32 %v784_v8, 7 }
 0x153   : > { %2007 = vmatpush1.bf16.msra.mxu1 %v2006_v18  ;;  %1753 = vmatprep.subr.bf16.mxu0 %v1752_v19  ;;  %v744_v18 = vld [vmem:[%s2539_s10 + $0xed0] sm:$0xff]  ;;  %v2028_v19 = vpack.c.bf16 %v749_v12, %v745_v11  ;;  %v1774_v25 = vpack.c.bf16 %v746_v17, %v742_v16  ;;  %v782_v11 = vld [vmem:[%s231_s7] sm:$0xf] }
 0x154   : > { %2009 = vmatprep.subr.bf16.mxu1 %v2008_v23  ;;  %v753_v23 = vld [vmem:[%s2539_s10 + $0xf18] sm:$0xff]  ;;  %v2030_v26 = vpack.c.bf16 %v748_v20, %v744_v18  ;;  %v786_v10 = vsub.s32 0, %v785_v9  ;;  %v794_v12 = vsub.s32 2, %v785_v9 }
 0x156   : > { %1755 = vmatpush1.bf16.msra.mxu0 %v1754_v29  ;;  %v754_v29 = vld [vmem:[%s2539_s10 + $0xf20] sm:$0xff]  ;;  %v795_v16 = vrot.slane %v782_v11, %v794_v12 }
 0x157   : > { %2011 = vmatpush1.bf16.msra.mxu1 %v2010_v30  ;;  %1757 = vmatprep.subr.bf16.mxu0 %v1756_v31  ;;  %v752_v30 = vld [vmem:[%s2539_s10 + $0xf10] sm:$0xff]  ;;  %v2032_v31 = vpack.c.bf16 %v757_v24, %v753_v23  ;;  %v1778_v37 = vpack.c.bf16 %v754_v29, %v750_v28 }
 0x158   : > { %2013 = vmatprep.subr.bf16.mxu1 %v2012_v35  ;;  %v761_v35 = vld [vmem:[%s2539_s10 + $0xf58] sm:$0xff]  ;;  %v2034_v38 = vpack.c.bf16 %v756_v32, %v752_v30 }
 0x15a   : > { %1759 = vmatpush1.bf16.msra.mxu0 %v1758_v41  ;;  %v762_v41 = vld [vmem:[%s2539_s10 + $0xf60] sm:$0xff] }
 0x15b   : > { %2015 = vmatpush1.bf16.msra.mxu1 %v2014_v42  ;;  %1761 = vmatprep.subr.bf16.mxu0 %v1760_v43  ;;  %v760_v42 = vld [vmem:[%s2539_s10 + $0xf50] sm:$0xff]  ;;  %v2036_v43 = vpack.c.bf16 %v765_v36, %v761_v35  ;;  %v1782_v49 = vpack.c.bf16 %v762_v41, %v758_v40 }
 0x15c   : > { %2017 = vmatprep.subr.bf16.mxu1 %v2016_v47  ;;  %v769_v47 = vld [vmem:[%s2539_s10 + $0xf98] sm:$0xff]  ;;  %v2038_v50 = vpack.c.bf16 %v764_v44, %v760_v42 }
 0x15e   : > { %1763 = vmatpush1.bf16.msra.mxu0 %v1762_v53  ;;  %v770_v53 = vld [vmem:[%s2539_s10 + $0xfa0] sm:$0xff] }
 0x15f   : > { %2019 = vmatpush1.bf16.msra.mxu1 %v2018_v54  ;;  %1765 = vmatprep.subr.bf16.mxu0 %v1764_v55  ;;  %v768_v54 = vld [vmem:[%s2539_s10 + $0xf90] sm:$0xff]  ;;  %v2040_v55 = vpack.c.bf16 %v773_v48, %v769_v47  ;;  %v1786_v61 = vpack.c.bf16 %v770_v53, %v766_v52 }
 0x160   : > { %2021 = vmatprep.subr.bf16.mxu1 %v2020_v59  ;;  %v777_v59 = vld [vmem:[%s2539_s10 + $0xfd8] sm:$0xff]  ;;  %v2042_v62 = vpack.c.bf16 %v772_v56, %v768_v54 }
 0x162   : > { %1767 = vmatpush1.bf16.msra.mxu0 %v1766_v1  ;;  %v778_v1 = vld [vmem:[%s2539_s10 + $0xfe0] sm:$0xff] }
 0x163   : > { %2023 = vmatpush1.bf16.msra.mxu1 %v2022_v2  ;;  %1769 = vmatprep.subr.bf16.mxu0 %v1768_v3  ;;  %v2044_v2 = vpack.c.bf16 %v781_v60, %v777_v59  ;;  %v776_v3 = vld [vmem:[%s2539_s10 + $0xfd0] sm:$0xff]  ;;  %v1790_v5 = vpack.c.bf16 %v778_v1, %v774_v0 }
 0x164   : > { %2025 = vmatprep.subr.bf16.mxu1 %v2024_v7  ;;  %v2046_v6 = vpack.c.bf16 %v780_v4, %v776_v3  ;;  %v268_v7 = vld [vmem:[#allocation2 + $0x30] sm:$0xff] }
 0x166   : > { %1771 = vmatpush1.bf16.msra.mxu0 %v1770_v13  ;;  %v790_v13 = vsub.s32 1, %v785_v9 }
 0x167   : > { %2027 = vmatpush1.bf16.msra.mxu1 %v2026_v14  ;;  %1773 = vmatprep.subr.bf16.mxu0 %v1772_v15  ;;  %v798_v14 = vsub.s32 3, %v785_v9  ;;  %v787_v15 = vrot.slane %v782_v11, %v786_v10 }
 0x168   : > { %2029 = vmatprep.subr.bf16.mxu1 %v2028_v19  ;;  %v791_v17 = vrot.slane %v782_v11, %v790_v13 }
 0x169   : > { %v799_v18 = vrot.slane %v782_v11, %v798_v14 }
 0x16a   : > { %1775 = vmatpush1.bf16.msra.mxu0 %v1774_v25 }
 0x16b   : > { %2031 = vmatpush1.bf16.msra.mxu1 %v2030_v26  ;;  %1777 = vmatprep.subr.bf16.mxu0 %v1776_v27 }
 0x16c   : > { %2033 = vmatprep.subr.bf16.mxu1 %v2032_v31 }
 0x16e   : > { %1779 = vmatpush1.bf16.msra.mxu0 %v1778_v37 }
 0x16f   : > { %2035 = vmatpush1.bf16.msra.mxu1 %v2034_v38  ;;  %1781 = vmatprep.subr.bf16.mxu0 %v1780_v39 }
 0x170   : > { %2037 = vmatprep.subr.bf16.mxu1 %v2036_v43 }
 0x172   : > { %1783 = vmatpush1.bf16.msra.mxu0 %v1782_v49 }
 0x173   : > { %2039 = vmatpush1.bf16.msra.mxu1 %v2038_v50  ;;  %1785 = vmatprep.subr.bf16.mxu0 %v1784_v51 }
 0x174   : > { %2041 = vmatprep.subr.bf16.mxu1 %v2040_v55 }
 0x176   : > { %1787 = vmatpush1.bf16.msra.mxu0 %v1786_v61 }
 0x177   : > { %2043 = vmatpush1.bf16.msra.mxu1 %v2042_v62  ;;  %1789 = vmatprep.subr.bf16.mxu0 %v1788_v63 }
 0x178   : > { %2045 = vmatprep.subr.bf16.mxu1 %v2044_v2 }
 0x17a   : > { %1791 = vmatpush1.bf16.msra.mxu0 %v1790_v5 }
 0x17b   : > { %2047 = vmatpush1.bf16.msra.mxu1 %v2046_v6 }
 0x17d   : > { %1082 = vmatmul.mubr.f32.vlgmr.msra.gmra.mrb[0].mxu0 %v268_v7 }
 0x17e   : > { %1366 = vmatmul.mubr.f32.vlgmr.msra.gmra.mrb[0].mxu1 %v268_v7 }
 0x250   : > { %v1083_v19 = vpop.f32.mrb[0].mxu0 }
 0x251   : > { %v2048_v20 = vadd.f32 %v1083_v19, %v787_v15  ;;  %v1367_v21 = vpop.f32.mrb[0].mxu1  ;;  %v1085_v22 = vpop.f32.mrb[1].mxu0 }
 0x252   : > { %v2050_v23 = vadd.f32 %v1367_v21, %v795_v16  ;;  %v2049_v24 = vadd.f32 %v1085_v22, %v791_v17  ;;  %v1369_v25 = vpop.f32.mrb[1].mxu1 }
 0x253   : > { %v1372_v26 = vmax.f32 %v2048_v20, 0.0  ;;  %v2051_v27 = vadd.f32 %v1369_v25, %v799_v18 }
 0x254   : > { %v1374_v28 = vmax.f32 %v2050_v23, 0.0  ;;  %v1373_v29 = vmax.f32 %v2049_v24, 0.0 }
 0x255   : > { %1376 = vst [vmem:[%s258_s27] sm:$0xff] %v1372_v26  ;;  %v1375_v30 = vmax.f32 %v2051_v27, 0.0 }
 0x256   : > { %1378 = vst [vmem:[%s258_s27 + $0x10] sm:$0xff] %v1374_v28  ;;  %1377 = vst [vmem:[%s258_s27 + $0x8] sm:$0xff] %v1373_v29 }
 0x257   : > { %1379 = vst [vmem:[%s258_s27 + $0x18] sm:$0xff] %v1375_v30 }
 0x258   : > { %2246 = shalt.err (!%p2243_p2)
}
 0x259   : > { %s2247_s23 = scalar_lea.hbm %s3063_s8, 512  ;;  %s2251_s6 = scalar_lea.hbm %s3114_s3, 2048 }
 0x25a   : > { %p2248_p5 = scmp.ne.s32.totalorder %s3063_s8, %s2247_s23  ;;  %p2252_p7 = scmp.lt.u32.totalorder %s3063_s8, %s3114_s3 }
 0x25b   : > { %p2253_p4 = scmp.lt.u32.totalorder %s2251_s6, %s2247_s23  ;;  %p2255_p9 = scmp.lt.u32.totalorder %s2247_s23, %s3063_s8 }
 0x25c   : > { %p2249_p11 = pnand %p2248_p5, %p3133_p12 }
 0x25d   : > { %p2254_p0 = por %p2253_p4, %p2252_p7 }
 0x25e   : > { %p2250_p8 = pneg %p2249_p11 }
 0x25f   : > { %p2256_p13 = por %p2255_p9, %p2254_p0 }
 0x261   : > { %p2257_p6 = pnand %p2256_p13, %p2250_p8 }
 0x263   : > { %2260 = shalt.err (!%p2257_p6)
}
 0x264   : > { %2072 = dma.vmem_to_hbm [thread:$0]  (%p3133_p12), %s3065_s19, 512, %s3063_s8, %s1381_s15  }
 0x265 PF: > { %p2092_p3 = scmp.ge.s32.totalorder %s2319_s17, 2  ;;  %s1409_s7 = sand.u32 1, %s2299_s12  }
 0x266   : > { %p3134_p1 = scmp.ne.s32.totalorder %s3125_s4, 0  ;;  %s1410_s9 = scalar_lea.sflag [#allocation4], %s1409_s7 }
 0x268   : > { %p2086_p10 = pnand %p2092_p3, %p3134_p1 }
 0x26a   : > { %2294 = dma.done.wait (!%p2086_p10), %s1410_s9, 512  }
 0x26b   : > { %2296 = vsyncadd (!%p2086_p10), %s1410_s9, 4294966784  ;;  %s20_s17 = sadd.s32 1, %s2319_s17   ;;  %s3135_s12 = smov %s2303_s13 }
 0x26c   : > { %p17_p2 = scmp.ge.s32.totalorder %s20_s17, 6   ;;  %s3136_s13 = smov %s2307_s14 }
 0x26d   : > { %s3137_s14 = smov %s2395_s24  ;;  %s3138_s15 = smov %s2315_s16 }
 0x26e   : > { %s3139_s16 = smov %s3141_s18  ;;  %19 = sbr.rel (!%p17_p2) target bundleno = 9 (0x9), region = 94 }
 0x275   :  { %1415 = vsyncpa [#allocation3], 1 }
 0x276   :  { %1417 = vsyncpa [#allocation3 + $0x1], 1 }
 0x277   :  { %1418 = vsyncpa [#allocation6], 1 }
 0x278   :  { %1420 = vsyncpa [#allocation6 + $0x1], 1 }
 0x279   :  { %1421 = vsyncpa [#allocation4], 1 }
 0x27a   :  { %1423 = vsyncpa [#allocation4 + $0x1], 1 }

// kernel: deepnet_forward.7
= control target key start
LH: loop header
LB: loop body
LE: loop exit
PB: predicated region body
PF: predicated region fallthrough
CT: control target
= control target key end

     0   :  { %s5235_s0 = inlined_call_operand.hbm [shape: f32[8,2048], index: 0, kind: input, shape index: {}]   ;;  %s5236_s1 = inlined_call_operand.hbm [shape: f32[2048,4096], index: 1, kind: input, shape index: {}]   ;;  %s5237_s2 = inlined_call_operand.hbm [shape: f32[1,4096], index: 2, kind: input, shape index: {}]   ;;  %s5238_s3 = inlined_call_operand.hbm [shape: f32[8,4096], index: 3, kind: output, shape index: {}]  }
   0x1   :  { %5244 = sst [smem:[#allocation12_spill]] %s5236_s1 }
   0x2   :  { %8 = vsyncpa [#allocation3], 0 }
   0x3   :  { %9 = vsyncpa [#allocation6], 0 }
   0x4   :  { %11 = vsyncpa [#allocation6 + $0x1], 0 }
   0x5   :  { %12 = vsyncpa [#allocation4], 0 }
   0x6   :  { %14 = vsyncpa [#allocation4 + $0x1], 0  ;;  %s3960_s12 = smov 0   ;;  %s3962_s13 = smov 0  }
   0x7   :  { %s3964_s14 = smov 0   ;;  %s3966_s15 = smov 0  }
   0x8   :  { %s3968_s16 = smov 0   ;;  %s3970_s17 = smov 0  }
   0x9 LB: > { %s29_s18 = sadd.s32 1, %s3927_s16  ;;  %s65_s19 = sadd.s32 1, %s3919_s14  ;;  %s3931_s17 = sphi %s3970_s17, %s20_s17   ;;  %s3927_s16 = sphi %s3968_s16, %s5263_s16   ;;  %s3923_s15 = sphi %s3966_s15, %s5262_s15   ;;  %s3919_s14 = sphi %s3964_s14, %s5261_s14   ;;  %s3915_s13 = sphi %s3962_s13, %s5260_s13   ;;  %s3911_s12 = sphi %s3960_s12, %s5259_s12  }
   0xa   : > { %p30_p0 = scmp.ge.s32.totalorder %s29_s18, 8  ;;  %p72_p1 = scmp.ne.s32.totalorder %s3919_s14, %s3915_s13 }
   0xb   : > { %p73_p2 = scmp.eq.s32.totalorder %s3931_s17, 0  ;;  %p3702_p4 = scmp.lt.s32.totalorder %s3931_s17, 8 }
   0xc   : > { %s5265_s18 = smov (%p30_p0, %s29_s18), 0  ;;  %s170_s21 = sand.u32 1, %s3931_s17  }
   0xd   : > { %p74_p3 = por %p73_p2, %p72_p1  ;;  %s62_s20 = ssub.s32 %s3927_s16, %s5265_s18 }
   0xe   : > { %p63_p5 = scmp.eq.s32.totalorder %s62_s20, 0  ;;  %s172_s22 = sand.u32 1, %s3919_s14  }
   0xf   : > { %s2617_s23 = sshll.u32 %s3927_s16, 9  ;;  %s2601_s25 = sshll.u32 %s172_s22, 13 }
  0x10   : > { %s4007_s24 = scalar_select %p63_p5, %s3919_s14, %s65_s19  }
  0x11   : > { %s5245_s1 = sld [smem:[#allocation12_spill]]  ;;  %p4016_p6 = pnand %p3702_p4, %p74_p3 }
  0x12   : > { %s174_s30 = scalar_lea.vmem [#allocation5], %s2601_s25  ;;  %s4022_s5 = scalar_lea.sflag [#allocation6], %s170_s21 }
  0x13   : > { %s181_s4 = sshll.u32 %s174_s30, 4  ;;  %p3759_p8 = pneg %p4016_p6  ;;  %s4020_s4 = int_to_ptr.vmem [resolvable:$true] %s181_s4 }
  0x17   : > { %s4014_s28 = scalar_lea.hbm %s5245_s1, %s2617_s23  ;;  %s3762_s9 = scalar_lea.hbm %s5245_s1, 1048576 }
  0x18   : > { %s3757_s6 = scalar_lea.hbm %s4014_s28, 131072  ;;  %p3763_p11 = scmp.lt.u32.totalorder %s4014_s28, %s5245_s1 }
  0x19   : > { %p3758_p7 = scmp.ne.s32.totalorder %s4014_s28, %s3757_s6  ;;  %p3764_p12 = scmp.lt.u32.totalorder %s3762_s9, %s3757_s6 }
  0x1a   : > { %p3766_p0 = scmp.lt.u32.totalorder %s3757_s6, %s4014_s28 }
  0x1b   : > { %p3760_p9 = pnand %p3759_p8, %p3758_p7  ;;  %p3765_p13 = por %p3764_p12, %p3763_p11 }
  0x1d   : > { %p3761_p10 = pneg %p3760_p9  ;;  %p3767_p2 = por %p3766_p0, %p3765_p13 }
  0x1f   : > { %p3768_p3 = pnand %p3767_p2, %p3761_p10 }
  0x21   : > { %3771 = shalt.err (!%p3768_p3)
}
  0x22   : > { %s3772_s19 = scalar_lea.vmem %s4020_s4, 131072  ;;  %s3933_s20 = smov [#allocation5]  }
  0x23   : > { %p3773_p4 = scmp.ne.s32.totalorder %s4020_s4, %s3772_s19  ;;  %s3777_s21 = sshll.u32 %s3933_s20, 4  ;;  %s3778_s21 = int_to_ptr.vmem [resolvable:$false] %s3777_s21 }
  0x24   : > { %s3779_s23 = scalar_lea.vmem %s3778_s21, 262144  ;;  %p3780_p9 = scmp.lt.s32.totalorder %s4020_s4, %s3778_s21 }
  0x25   : > { %p3775_p5 = pnand %p3773_p4, %p3759_p8  ;;  %p3781_p11 = scmp.lt.s32.totalorder %s3779_s23, %s3772_s19 }
  0x27   : > { %p3776_p7 = pneg %p3775_p5  ;;  %p3782_p12 = por %p3781_p11, %p3780_p9 }
  0x29   : > { %p3783_p13 = pnand %p3782_p12, %p3776_p7 }
  0x2b   : > { %3786 = shalt.err (!%p3783_p13)
}
  0x2c   : > { %s3934_s25 = smov 4096   ;;  %s3935_s26 = smov 512  }
  0x2d   : > { %s3936_s27 = smov 32   ;;  %s4051_s30 = sadd.s32 4294967295, %s3931_s17  }
  0x2e   : > { %3693 = dma.hbm_to_vmem [thread:$0]  (!%p4016_p6), %s4014_s28, 131072, %s4020_s4, %s4022_s5, %s3934_s25, %s3935_s26, %s3936_s27  }
  0x2f   : > { %s2597_s6 = sadd.s32 4294967294, %s3931_s17   ;;  %p78_p10 = scmp.ne.s32.totalorder %s3915_s13, %s3911_s12 }
  0x30   : > { %p5239_p0 = scmp.eq.s32.totalorder %s4051_s30, 0  ;;  %p130_p2 = scmp.eq.s32.totalorder %s4051_s30, 7 }
  0x31   : > { %p136_p3 = scmp.eq.s32.totalorder %s2597_s6, 7  ;;  %p2598_p5 = scmp.ge.s32.totalorder %s3931_s17, 1 }
  0x32   : > { %p4060_p4 = por %p5239_p0, %p78_p10  ;;  %p4068_p7 = por %p130_p2, %p72_p1 }
  0x33   : > { %p4072_p9 = por %p136_p3, %p78_p10  ;;  %p143_p11 = scmp.lt.s32.totalorder %s3931_s17, 9 }
  0x34   : > { %s5247_s7 = scalar_select %p4060_p4, 1, 0 }
  0x35   : > { %s5248_s28 = scalar_select %p4068_p7, 1, 0 }
  0x36   : > { %s5249_s4 = scalar_select %p4072_p9, 1, 0 }
  0x37   : > { %s2604_s8 = sshll.u32 %s172_s22, 2  ;;  %p4079_p12 = pnand %p2598_p5, %p143_p11 }
  0x38   : > { %s3937_s10 = smov [#allocation2]   ;;  %s2618_s19 = sshll.u32 %s3927_s16, 6 }
  0x39   : > { %s5250_s9 = scalar_select %p4079_p12, 1, 0 }
  0x3a   : > { %s159_s11 = sshll.u32 %s3937_s10, 4  ;;  %p3686_p1 = pneg %p4079_p12  ;;  %s4083_s11 = int_to_ptr.vmem [resolvable:$true] %s159_s11 }
  0x3b   : > { %s4091_s23 = scalar_lea.hbm %s5237_s2, %s2618_s19  ;;  %s195_s22 = scalar_lea.vmem [#allocation7], %s2604_s8 }
  0x3c   : > { %s203_s25 = sshll.u32 %s195_s22, 4  ;;  %p4095_p13 = pnand %p3686_p1, %p5239_p0  ;;  %s204_s25 = int_to_ptr.vmem [resolvable:$true] %s203_s25 }
  0x3d   : > { %s3787_s27 = scalar_lea.hbm %s4091_s23, 64  ;;  %s3792_s19 = scalar_lea.hbm %s5237_s2, 512 }
  0x3e   : > { %s5251_s26 = scalar_select %p4095_p13, 1, 0 }
  0x3f   : > { %p3788_p10 = scmp.ne.s32.totalorder %s4091_s23, %s3787_s27  ;;  %p3793_p5 = scmp.lt.u32.totalorder %s4091_s23, %s5237_s2 }
  0x40   : > { %p3794_p11 = scmp.lt.u32.totalorder %s3792_s19, %s3787_s27  ;;  %p3796_p0 = scmp.lt.u32.totalorder %s3787_s27, %s4091_s23 }
  0x41   : > { %p3790_p2 = pnand %p3788_p10, %p3759_p8 }
  0x42   : > { %p3795_p1 = por %p3794_p11, %p3793_p5 }
  0x43   : > { %p3791_p3 = pneg %p3790_p2 }
  0x44   : > { %p3797_p9 = por %p3796_p0, %p3795_p1 }
  0x46   : > { %p3798_p7 = pnand %p3797_p9, %p3791_p3 }
  0x48   : > { %3801 = shalt.err (!%p3798_p7)
}
  0x49   : > { %s3802_s8 = scalar_lea.vmem %s204_s25, 64  ;;  %s3938_s22 = smov [#allocation7]  }
  0x4a   : > { %p3803_p4 = scmp.ne.s32.totalorder %s204_s25, %s3802_s8  ;;  %s3807_s6 = sshll.u32 %s3938_s22, 4  ;;  %s3808_s6 = int_to_ptr.vmem [resolvable:$false] %s3807_s6 }
  0x4b   : > { %s3809_s10 = scalar_lea.vmem %s3808_s6, 128  ;;  %p3810_p12 = scmp.lt.s32.totalorder %s204_s25, %s3808_s6 }
  0x4c   : > { %p3805_p10 = pnand %p3803_p4, %p3759_p8  ;;  %p3811_p13 = scmp.lt.s32.totalorder %s3809_s10, %s3802_s8 }
  0x4e   : > { %p3806_p2 = pneg %p3805_p10  ;;  %p3812_p5 = por %p3811_p13, %p3810_p12 }
  0x50   : > { %p3813_p11 = pnand %p3812_p5, %p3806_p2 }
  0x52   : > { %3816 = shalt.err (!%p3813_p11)
}
  0x53   : > { %3696 = dma.hbm_to_vmem [thread:$0]  (!%p4016_p6), %s4091_s23, 64, %s204_s25, %s4022_s5  }
  0x54   : > { %s3817_s20 = scalar_lea.hbm %s5235_s0, 2048  ;;  %p5252_p0 = scmp.ne.s32.totalorder %s5251_s26, 0 }
  0x55   : > { %p3818_p8 = scmp.ne.s32.totalorder %s5235_s0, %s3817_s20  ;;  %p3824_p12 = scmp.lt.u32.totalorder %s3817_s20, %s5235_s0 }
  0x56   : > { %p3819_p4 = pneg %p5252_p0 }
  0x58   : > { %p3820_p7 = pnand %p3819_p4, %p3818_p8 }
  0x5a   : > { %p3821_p9 = pneg %p3820_p7 }
  0x5c   : > { %p3826_p13 = pnand %p3824_p12, %p3821_p9 }
  0x5e   : > { %3829 = shalt.err (!%p3826_p13)
}
  0x5f   : > { %s3830_s29 = scalar_lea.vmem %s4083_s11, 2048  ;;  %p3838_p10 = scmp.lt.s32.totalorder %s4083_s11, %s4083_s11 }
  0x60   : > { %p3831_p6 = scmp.ne.s32.totalorder %s4083_s11, %s3830_s29  ;;  %p3839_p2 = scmp.lt.s32.totalorder %s3830_s29, %s3830_s29 }
  0x62   : > { %p3833_p3 = pnand %p3831_p6, %p3819_p4  ;;  %p3840_p5 = por %p3839_p2, %p3838_p10 }
  0x64   : > { %p3834_p1 = pneg %p3833_p3 }
  0x66   : > { %p3841_p11 = pnand %p3840_p5, %p3834_p1 }
  0x68   : > { %3844 = shalt.err (!%p3841_p11)
}
  0x69   : > { %3689 = dma.hbm_to_vmem [thread:$0]  (!%p5252_p0), %s5235_s0, 2048, %s4083_s11, [#allocation3]  }
  0x6a   : > { %p5253_p8 = scmp.ne.s32.totalorder %s5250_s9, 0 }
  0x6b   : > { %p5254_p7 = scmp.eq.s32.totalorder (!%p5253_p8), %s4051_s30, 0 }
  0x6c   : > { %212 = sbr.rel (%p5253_p8) target bundleno = 867 (0x363), region = 32 }
  0x73   : > { %3898 = dma.done.wait (%p5254_p7), [#allocation3], 2048   ;;  %p5255_p4 = pmov %p5254_p7 }
  0x74   : > { %s218_s23 = sand.u32 1, %s4051_s30   ;;  %s4148_s25 = sand.u32 1, %s3915_s13  }
  0x75   : > { %3900 = vsyncadd (%p5255_p4), [#allocation3], 4294965248  ;;  %s2609_s26 = sshll.u32 %s4148_s25, 13  ;;  %s219_s6 = scalar_lea.sflag [#allocation6], %s218_s23 }
  0x76   : > { %s4151_s10 = scalar_lea.vmem [#allocation5], %s2609_s26  ;;  %p5256_p0 = scmp.ne.s32.totalorder %s5247_s7, 0 }
  0x78   : > { %3902 = dma.done.wait (%p5256_p0), %s219_s6, 131136  }
  0x79   : > { %3904 = vsyncadd (%p5256_p0), %s219_s6, 4294836160  ;;  %v279_v0 = vld [vmem:[%s4151_s10 + $0x8] sm:$0xff]  ;;  %v281_v2 = vld [vmem:[%s4151_s10 + $0x18] sm:$0xff]  ;;  %s2610_s30 = sshll.u32 %s4148_s25, 2  ;;  %s2611_s7 = sshll.u32 %s4148_s25, 5 }
  0x7a   : > { %v283_v1 = vld [vmem:[%s4151_s10 + $0x28] sm:$0xff]  ;;  %v285_v4 = vld [vmem:[%s4151_s10 + $0x38] sm:$0xff]  ;;  %v278_v5 = vld [vmem:[%s4151_s10] sm:$0xff]  ;;  %s231_s9 = scalar_lea.vmem [#allocation7], %s2610_s30  ;;  %s2619_s11 = sshll.u32 %s3923_s15, 9 }
  0x7b   : > { %v2620_v3 = vpack.c.bf16 %v283_v1, %v279_v0  ;;  %v282_v6 = vld [vmem:[%s4151_s10 + $0x20] sm:$0xff]  ;;  %v3132_v7 = vpack.c.bf16 %v285_v4, %v281_v2  ;;  %v280_v9 = vld [vmem:[%s4151_s10 + $0x10] sm:$0xff]  ;;  %v287_v11 = vld [vmem:[%s4151_s10 + $0x48] sm:$0xff]  ;;  %s258_s27 = scalar_lea.vmem [#allocation8], %s2611_s7  ;;  %s5187_s8 = scalar_lea.hbm %s5238_s3, %s2619_s11 }
  0x7c   : > { %v2622_v8 = vpack.c.bf16 %v282_v6, %v278_v5  ;;  %v284_v10 = vld [vmem:[%s4151_s10 + $0x30] sm:$0xff]  ;;  %v291_v13 = vld [vmem:[%s4151_s10 + $0x68] sm:$0xff]  ;;  %v289_v14 = vld [vmem:[%s4151_s10 + $0x58] sm:$0xff]  ;;  %s2481_s19 = sshll.u32 %s258_s27, 4  ;;  %s2465_s15 = scalar_lea.sflag [#allocation4], %s4148_s25  ;;  %s5189_s19 = int_to_ptr.vmem [resolvable:$true] %s2481_s19 }
  0x7d   : > { %2621 = vmatprep.subr.bf16.mxu0 %v2620_v3  ;;  %v3134_v12 = vpack.c.bf16 %v284_v10, %v280_v9  ;;  %v293_v15 = vld [vmem:[%s4151_s10 + $0x78] sm:$0xff]  ;;  %3133 = vmatprep.subr.bf16.mxu1 %v3132_v7  ;;  %v2624_v16 = vpack.c.bf16 %v291_v13, %v287_v11  ;;  %v286_v18 = vld [vmem:[%s4151_s10 + $0x40] sm:$0xff]  ;;  %v288_v20 = vld [vmem:[%s4151_s10 + $0x50] sm:$0xff]  ;;  %s3845_s22 = scalar_lea.vmem %s5189_s19, 512  ;;  %p5257_p12 = scmp.ne.s32.totalorder %s5248_s28, 0 }
  0x7e   : > { %2623 = vmatpush1.bf16.msra.mxu0 %v2622_v8  ;;  %v3136_v17 = vpack.c.bf16 %v293_v15, %v289_v14  ;;  %v290_v19 = vld [vmem:[%s4151_s10 + $0x60] sm:$0xff]  ;;  %v292_v22 = vld [vmem:[%s4151_s10 + $0x70] sm:$0xff]  ;;  %v295_v23 = vld [vmem:[%s4151_s10 + $0x88] sm:$0xff]  ;;  %p3846_p9 = scmp.ne.s32.totalorder %s5189_s19, %s3845_s22  ;;  %s3939_s29 = smov [#allocation8]  }
  0x7f   : > { %3135 = vmatpush1.bf16.msra.mxu1 %v3134_v12  ;;  %v2626_v21 = vpack.c.bf16 %v290_v19, %v286_v18  ;;  %v299_v24 = vld [vmem:[%s4151_s10 + $0xa8] sm:$0xff]  ;;  %2625 = vmatprep.subr.bf16.mxu0 %v2624_v16  ;;  %v3138_v25 = vpack.c.bf16 %v292_v22, %v288_v20  ;;  %v297_v27 = vld [vmem:[%s4151_s10 + $0x98] sm:$0xff]  ;;  %v294_v29 = vld [vmem:[%s4151_s10 + $0x80] sm:$0xff]  ;;  %s3849_s1 = sshll.u32 %s3939_s29, 4  ;;  %s3850_s1 = int_to_ptr.vmem [resolvable:$false] %s3849_s1 }
  0x80   : > { %3137 = vmatprep.subr.bf16.mxu1 %v3136_v17  ;;  %v2628_v26 = vpack.c.bf16 %v299_v24, %v295_v23  ;;  %v301_v28 = vld [vmem:[%s4151_s10 + $0xb8] sm:$0xff]  ;;  %v298_v31 = vld [vmem:[%s4151_s10 + $0xa0] sm:$0xff]  ;;  %v296_v32 = vld [vmem:[%s4151_s10 + $0x90] sm:$0xff]  ;;  %p3847_p13 = pnand %p3846_p9, %p5257_p12  ;;  %s3851_s5 = scalar_lea.vmem %s3850_s1, 1024 }
  0x81   : > { %v3140_v30 = vpack.c.bf16 %v301_v28, %v297_v27  ;;  %v300_v33 = vld [vmem:[%s4151_s10 + $0xb0] sm:$0xff]  ;;  %v2630_v34 = vpack.c.bf16 %v298_v31, %v294_v29  ;;  %v303_v35 = vld [vmem:[%s4151_s10 + $0xc8] sm:$0xff]  ;;  %v305_v37 = vld [vmem:[%s4151_s10 + $0xd8] sm:$0xff]  ;;  %p3852_p3 = scmp.lt.s32.totalorder %s5189_s19, %s3850_s1  ;;  %p3853_p1 = scmp.lt.s32.totalorder %s3851_s5, %s3845_s22 }
  0x82   : > { %2627 = vmatpush1.bf16.msra.mxu0 %v2626_v21  ;;  %v307_v36 = vld [vmem:[%s4151_s10 + $0xe8] sm:$0xff]  ;;  %v3142_v38 = vpack.c.bf16 %v300_v33, %v296_v32  ;;  %v309_v40 = vld [vmem:[%s4151_s10 + $0xf8] sm:$0xff]  ;;  %v302_v41 = vld [vmem:[%s4151_s10 + $0xc0] sm:$0xff]  ;;  %p3848_p6 = pneg %p3847_p13 }
  0x83   : > { %3139 = vmatpush1.bf16.msra.mxu1 %v3138_v25  ;;  %2629 = vmatprep.subr.bf16.mxu0 %v2628_v26  ;;  %v2632_v39 = vpack.c.bf16 %v307_v36, %v303_v35  ;;  %v306_v42 = vld [vmem:[%s4151_s10 + $0xe0] sm:$0xff]  ;;  %v3144_v43 = vpack.c.bf16 %v309_v40, %v305_v37  ;;  %v304_v44 = vld [vmem:[%s4151_s10 + $0xd0] sm:$0xff]  ;;  %v311_v46 = vld [vmem:[%s4151_s10 + $0x108] sm:$0xff]  ;;  %p3854_p10 = por %p3853_p1, %p3852_p3 }
  0x84   : > { %3141 = vmatprep.subr.bf16.mxu1 %v3140_v30  ;;  %v308_v45 = vld [vmem:[%s4151_s10 + $0xf0] sm:$0xff]  ;;  %v315_v47 = vld [vmem:[%s4151_s10 + $0x128] sm:$0xff]  ;;  %v313_v48 = vld [vmem:[%s4151_s10 + $0x118] sm:$0xff]  ;;  %v2634_v50 = vpack.c.bf16 %v306_v42, %v302_v41 }
  0x85   : > { %v317_v49 = vld [vmem:[%s4151_s10 + $0x138] sm:$0xff]  ;;  %v3146_v51 = vpack.c.bf16 %v308_v45, %v304_v44  ;;  %v2636_v52 = vpack.c.bf16 %v315_v47, %v311_v46  ;;  %v310_v53 = vld [vmem:[%s4151_s10 + $0x100] sm:$0xff]  ;;  %v312_v55 = vld [vmem:[%s4151_s10 + $0x110] sm:$0xff]  ;;  %p3855_p2 = pnand %p3854_p10, %p3848_p6 }
  0x86   : > { %2631 = vmatpush1.bf16.msra.mxu0 %v2630_v34  ;;  %v314_v54 = vld [vmem:[%s4151_s10 + $0x120] sm:$0xff]  ;;  %v3148_v56 = vpack.c.bf16 %v317_v49, %v313_v48  ;;  %v316_v57 = vld [vmem:[%s4151_s10 + $0x130] sm:$0xff]  ;;  %v319_v58 = vld [vmem:[%s4151_s10 + $0x148] sm:$0xff] }
  0x87   : > { %3143 = vmatpush1.bf16.msra.mxu1 %v3142_v38  ;;  %2633 = vmatprep.subr.bf16.mxu0 %v2632_v39  ;;  %v323_v59 = vld [vmem:[%s4151_s10 + $0x168] sm:$0xff]  ;;  %v321_v60 = vld [vmem:[%s4151_s10 + $0x158] sm:$0xff]  ;;  %v2638_v62 = vpack.c.bf16 %v314_v54, %v310_v53  ;;  %v3150_v63 = vpack.c.bf16 %v316_v57, %v312_v55  ;;  %v318_v1 = vld [vmem:[%s4151_s10 + $0x140] sm:$0xff] }
  0x88   : > { %3145 = vmatprep.subr.bf16.mxu1 %v3144_v43  ;;  %v325_v61 = vld [vmem:[%s4151_s10 + $0x178] sm:$0xff]  ;;  %v2640_v0 = vpack.c.bf16 %v323_v59, %v319_v58  ;;  %v322_v2 = vld [vmem:[%s4151_s10 + $0x160] sm:$0xff]  ;;  %v320_v3 = vld [vmem:[%s4151_s10 + $0x150] sm:$0xff] }
  0x89   : > { %v3152_v4 = vpack.c.bf16 %v325_v61, %v321_v60  ;;  %v324_v5 = vld [vmem:[%s4151_s10 + $0x170] sm:$0xff]  ;;  %v327_v6 = vld [vmem:[%s4151_s10 + $0x188] sm:$0xff]  ;;  %v329_v8 = vld [vmem:[%s4151_s10 + $0x198] sm:$0xff]  ;;  %v2642_v10 = vpack.c.bf16 %v322_v2, %v318_v1 }
  0x8a   : > { %2635 = vmatpush1.bf16.msra.mxu0 %v2634_v50  ;;  %v331_v7 = vld [vmem:[%s4151_s10 + $0x1a8] sm:$0xff]  ;;  %v333_v9 = vld [vmem:[%s4151_s10 + $0x1b8] sm:$0xff]  ;;  %v3154_v11 = vpack.c.bf16 %v324_v5, %v320_v3  ;;  %v326_v13 = vld [vmem:[%s4151_s10 + $0x180] sm:$0xff] }
  0x8b   : > { %3147 = vmatpush1.bf16.msra.mxu1 %v3146_v51  ;;  %2637 = vmatprep.subr.bf16.mxu0 %v2636_v52  ;;  %v2644_v12 = vpack.c.bf16 %v331_v7, %v327_v6  ;;  %v330_v14 = vld [vmem:[%s4151_s10 + $0x1a0] sm:$0xff]  ;;  %v328_v15 = vld [vmem:[%s4151_s10 + $0x190] sm:$0xff]  ;;  %v3156_v16 = vpack.c.bf16 %v333_v9, %v329_v8  ;;  %v335_v18 = vld [vmem:[%s4151_s10 + $0x1c8] sm:$0xff] }
  0x8c   : > { %3149 = vmatprep.subr.bf16.mxu1 %v3148_v56  ;;  %v332_v17 = vld [vmem:[%s4151_s10 + $0x1b0] sm:$0xff]  ;;  %v339_v19 = vld [vmem:[%s4151_s10 + $0x1e8] sm:$0xff]  ;;  %v337_v20 = vld [vmem:[%s4151_s10 + $0x1d8] sm:$0xff]  ;;  %v2646_v22 = vpack.c.bf16 %v330_v14, %v326_v13 }
  0x8d   : > { %v341_v21 = vld [vmem:[%s4151_s10 + $0x1f8] sm:$0xff]  ;;  %v3158_v23 = vpack.c.bf16 %v332_v17, %v328_v15  ;;  %v2648_v24 = vpack.c.bf16 %v339_v19, %v335_v18  ;;  %v334_v25 = vld [vmem:[%s4151_s10 + $0x1c0] sm:$0xff]  ;;  %v336_v27 = vld [vmem:[%s4151_s10 + $0x1d0] sm:$0xff] }
  0x8e   : > { %2639 = vmatpush1.bf16.msra.mxu0 %v2638_v62  ;;  %v338_v26 = vld [vmem:[%s4151_s10 + $0x1e0] sm:$0xff]  ;;  %v3160_v28 = vpack.c.bf16 %v341_v21, %v337_v20  ;;  %v340_v29 = vld [vmem:[%s4151_s10 + $0x1f0] sm:$0xff]  ;;  %v343_v30 = vld [vmem:[%s4151_s10 + $0x208] sm:$0xff] }
  0x8f   : > { %3151 = vmatpush1.bf16.msra.mxu1 %v3150_v63  ;;  %2641 = vmatprep.subr.bf16.mxu0 %v2640_v0  ;;  %v347_v31 = vld [vmem:[%s4151_s10 + $0x228] sm:$0xff]  ;;  %v345_v32 = vld [vmem:[%s4151_s10 + $0x218] sm:$0xff]  ;;  %v2650_v34 = vpack.c.bf16 %v338_v26, %v334_v25  ;;  %v3162_v35 = vpack.c.bf16 %v340_v29, %v336_v27  ;;  %v342_v37 = vld [vmem:[%s4151_s10 + $0x200] sm:$0xff] }
  0x90   : > { %3153 = vmatprep.subr.bf16.mxu1 %v3152_v4  ;;  %v349_v33 = vld [vmem:[%s4151_s10 + $0x238] sm:$0xff]  ;;  %v2652_v36 = vpack.c.bf16 %v347_v31, %v343_v30  ;;  %v346_v38 = vld [vmem:[%s4151_s10 + $0x220] sm:$0xff]  ;;  %v344_v39 = vld [vmem:[%s4151_s10 + $0x210] sm:$0xff] }
  0x91   : > { %v3164_v40 = vpack.c.bf16 %v349_v33, %v345_v32  ;;  %v348_v41 = vld [vmem:[%s4151_s10 + $0x230] sm:$0xff]  ;;  %v351_v42 = vld [vmem:[%s4151_s10 + $0x248] sm:$0xff]  ;;  %v353_v44 = vld [vmem:[%s4151_s10 + $0x258] sm:$0xff]  ;;  %v2654_v46 = vpack.c.bf16 %v346_v38, %v342_v37 }
  0x92   : > { %2643 = vmatpush1.bf16.msra.mxu0 %v2642_v10  ;;  %v355_v43 = vld [vmem:[%s4151_s10 + $0x268] sm:$0xff]  ;;  %v357_v45 = vld [vmem:[%s4151_s10 + $0x278] sm:$0xff]  ;;  %v3166_v47 = vpack.c.bf16 %v348_v41, %v344_v39  ;;  %v350_v49 = vld [vmem:[%s4151_s10 + $0x240] sm:$0xff] }
  0x93   : > { %3155 = vmatpush1.bf16.msra.mxu1 %v3154_v11  ;;  %2645 = vmatprep.subr.bf16.mxu0 %v2644_v12  ;;  %v2656_v48 = vpack.c.bf16 %v355_v43, %v351_v42  ;;  %v354_v50 = vld [vmem:[%s4151_s10 + $0x260] sm:$0xff]  ;;  %v352_v51 = vld [vmem:[%s4151_s10 + $0x250] sm:$0xff]  ;;  %v3168_v52 = vpack.c.bf16 %v357_v45, %v353_v44  ;;  %v359_v54 = vld [vmem:[%s4151_s10 + $0x288] sm:$0xff] }
  0x94   : > { %3157 = vmatprep.subr.bf16.mxu1 %v3156_v16  ;;  %v356_v53 = vld [vmem:[%s4151_s10 + $0x270] sm:$0xff]  ;;  %v363_v55 = vld [vmem:[%s4151_s10 + $0x2a8] sm:$0xff]  ;;  %v361_v56 = vld [vmem:[%s4151_s10 + $0x298] sm:$0xff]  ;;  %v2658_v58 = vpack.c.bf16 %v354_v50, %v350_v49 }
  0x95   : > { %v365_v57 = vld [vmem:[%s4151_s10 + $0x2b8] sm:$0xff]  ;;  %v3170_v59 = vpack.c.bf16 %v356_v53, %v352_v51  ;;  %v2660_v60 = vpack.c.bf16 %v363_v55, %v359_v54  ;;  %v358_v61 = vld [vmem:[%s4151_s10 + $0x280] sm:$0xff]  ;;  %v360_v63 = vld [vmem:[%s4151_s10 + $0x290] sm:$0xff] }
  0x96   : > { %2647 = vmatpush1.bf16.msra.mxu0 %v2646_v22  ;;  %v362_v62 = vld [vmem:[%s4151_s10 + $0x2a0] sm:$0xff]  ;;  %v3172_v0 = vpack.c.bf16 %v365_v57, %v361_v56  ;;  %v364_v1 = vld [vmem:[%s4151_s10 + $0x2b0] sm:$0xff]  ;;  %v367_v2 = vld [vmem:[%s4151_s10 + $0x2c8] sm:$0xff] }
  0x97   : > { %3159 = vmatpush1.bf16.msra.mxu1 %v3158_v23  ;;  %2649 = vmatprep.subr.bf16.mxu0 %v2648_v24  ;;  %v371_v3 = vld [vmem:[%s4151_s10 + $0x2e8] sm:$0xff]  ;;  %v369_v4 = vld [vmem:[%s4151_s10 + $0x2d8] sm:$0xff]  ;;  %v2662_v6 = vpack.c.bf16 %v362_v62, %v358_v61  ;;  %v366_v7 = vld [vmem:[%s4151_s10 + $0x2c0] sm:$0xff]  ;;  %v3174_v8 = vpack.c.bf16 %v364_v1, %v360_v63 }
  0x98   : > { %3161 = vmatprep.subr.bf16.mxu1 %v3160_v28  ;;  %v373_v5 = vld [vmem:[%s4151_s10 + $0x2f8] sm:$0xff]  ;;  %v2664_v9 = vpack.c.bf16 %v371_v3, %v367_v2  ;;  %v370_v10 = vld [vmem:[%s4151_s10 + $0x2e0] sm:$0xff]  ;;  %v368_v11 = vld [vmem:[%s4151_s10 + $0x2d0] sm:$0xff] }
  0x99   : > { %v372_v12 = vld [vmem:[%s4151_s10 + $0x2f0] sm:$0xff]  ;;  %v3176_v13 = vpack.c.bf16 %v373_v5, %v369_v4  ;;  %v375_v14 = vld [vmem:[%s4151_s10 + $0x308] sm:$0xff]  ;;  %v377_v17 = vld [vmem:[%s4151_s10 + $0x318] sm:$0xff]  ;;  %v2666_v19 = vpack.c.bf16 %v370_v10, %v366_v7 }
  0x9a   : > { %2651 = vmatpush1.bf16.msra.mxu0 %v2650_v34  ;;  %v379_v15 = vld [vmem:[%s4151_s10 + $0x328] sm:$0xff]  ;;  %v381_v18 = vld [vmem:[%s4151_s10 + $0x338] sm:$0xff]  ;;  %v3178_v20 = vpack.c.bf16 %v372_v12, %v368_v11  ;;  %v374_v22 = vld [vmem:[%s4151_s10 + $0x300] sm:$0xff] }
  0x9b   : > { %3163 = vmatpush1.bf16.msra.mxu1 %v3162_v35  ;;  %2653 = vmatprep.subr.bf16.mxu0 %v2652_v36  ;;  %v263_v16 = vld [vmem:[#allocation2 + $0x8] sm:$0xff]  ;;  %v2668_v21 = vpack.c.bf16 %v379_v15, %v375_v14  ;;  %v378_v23 = vld [vmem:[%s4151_s10 + $0x320] sm:$0xff]  ;;  %v376_v24 = vld [vmem:[%s4151_s10 + $0x310] sm:$0xff]  ;;  %v3180_v25 = vpack.c.bf16 %v381_v18, %v377_v17 }
  0x9c   : > { %3165 = vmatprep.subr.bf16.mxu1 %v3164_v40  ;;  %1388 = vmatprep.mubr.f32.mxu0 %v263_v16  ;;  %v380_v26 = vld [vmem:[%s4151_s10 + $0x330] sm:$0xff]  ;;  %v383_v27 = vld [vmem:[%s4151_s10 + $0x348] sm:$0xff]  ;;  %v385_v29 = vld [vmem:[%s4151_s10 + $0x358] sm:$0xff]  ;;  %v2670_v31 = vpack.c.bf16 %v378_v23, %v374_v22 }
  0x9d   : > { %1956 = vmatprep.mubr.f32.mxu1 %v263_v16  ;;  %v387_v28 = vld [vmem:[%s4151_s10 + $0x368] sm:$0xff]  ;;  %v389_v30 = vld [vmem:[%s4151_s10 + $0x378] sm:$0xff]  ;;  %v3182_v32 = vpack.c.bf16 %v380_v26, %v376_v24  ;;  %v382_v34 = vld [vmem:[%s4151_s10 + $0x340] sm:$0xff] }
  0x9e   : > { %2655 = vmatpush1.bf16.msra.mxu0 %v2654_v46  ;;  %v2672_v33 = vpack.c.bf16 %v387_v28, %v383_v27  ;;  %v386_v35 = vld [vmem:[%s4151_s10 + $0x360] sm:$0xff]  ;;  %v384_v36 = vld [vmem:[%s4151_s10 + $0x350] sm:$0xff]  ;;  %v3184_v37 = vpack.c.bf16 %v389_v30, %v385_v29  ;;  %v391_v39 = vld [vmem:[%s4151_s10 + $0x388] sm:$0xff] }
  0x9f   : > { %3167 = vmatpush1.bf16.msra.mxu1 %v3166_v47  ;;  %2657 = vmatprep.subr.bf16.mxu0 %v2656_v48  ;;  %v388_v38 = vld [vmem:[%s4151_s10 + $0x370] sm:$0xff]  ;;  %v395_v40 = vld [vmem:[%s4151_s10 + $0x3a8] sm:$0xff]  ;;  %v393_v41 = vld [vmem:[%s4151_s10 + $0x398] sm:$0xff]  ;;  %v2674_v43 = vpack.c.bf16 %v386_v35, %v382_v34 }
  0xa0   : > { %3169 = vmatprep.subr.bf16.mxu1 %v3168_v52  ;;  %v397_v42 = vld [vmem:[%s4151_s10 + $0x3b8] sm:$0xff]  ;;  %v3186_v44 = vpack.c.bf16 %v388_v38, %v384_v36  ;;  %v2676_v45 = vpack.c.bf16 %v395_v40, %v391_v39  ;;  %v390_v46 = vld [vmem:[%s4151_s10 + $0x380] sm:$0xff]  ;;  %v392_v48 = vld [vmem:[%s4151_s10 + $0x390] sm:$0xff] }
  0xa1   : > { %v394_v47 = vld [vmem:[%s4151_s10 + $0x3a0] sm:$0xff]  ;;  %v3188_v49 = vpack.c.bf16 %v397_v42, %v393_v41  ;;  %v396_v50 = vld [vmem:[%s4151_s10 + $0x3b0] sm:$0xff]  ;;  %v399_v51 = vld [vmem:[%s4151_s10 + $0x3c8] sm:$0xff] }
  0xa2   : > { %2659 = vmatpush1.bf16.msra.mxu0 %v2658_v58  ;;  %v403_v52 = vld [vmem:[%s4151_s10 + $0x3e8] sm:$0xff]  ;;  %v401_v53 = vld [vmem:[%s4151_s10 + $0x3d8] sm:$0xff]  ;;  %v2678_v55 = vpack.c.bf16 %v394_v47, %v390_v46  ;;  %v3190_v56 = vpack.c.bf16 %v396_v50, %v392_v48  ;;  %v398_v58 = vld [vmem:[%s4151_s10 + $0x3c0] sm:$0xff] }
  0xa3   : > { %3171 = vmatpush1.bf16.msra.mxu1 %v3170_v59  ;;  %2661 = vmatprep.subr.bf16.mxu0 %v2660_v60  ;;  %v405_v54 = vld [vmem:[%s4151_s10 + $0x3f8] sm:$0xff]  ;;  %v2680_v57 = vpack.c.bf16 %v403_v52, %v399_v51  ;;  %v402_v59 = vld [vmem:[%s4151_s10 + $0x3e0] sm:$0xff]  ;;  %v400_v60 = vld [vmem:[%s4151_s10 + $0x3d0] sm:$0xff] }
  0xa4   : > { %3173 = vmatprep.subr.bf16.mxu1 %v3172_v0  ;;  %v3192_v61 = vpack.c.bf16 %v405_v54, %v401_v53  ;;  %v404_v62 = vld [vmem:[%s4151_s10 + $0x3f0] sm:$0xff]  ;;  %v407_v63 = vld [vmem:[%s4151_s10 + $0x408] sm:$0xff]  ;;  %v409_v1 = vld [vmem:[%s4151_s10 + $0x418] sm:$0xff]  ;;  %v2682_v3 = vpack.c.bf16 %v402_v59, %v398_v58 }
  0xa5   : > { %v411_v0 = vld [vmem:[%s4151_s10 + $0x428] sm:$0xff]  ;;  %v413_v2 = vld [vmem:[%s4151_s10 + $0x438] sm:$0xff]  ;;  %v3194_v4 = vpack.c.bf16 %v404_v62, %v400_v60  ;;  %v410_v7 = vld [vmem:[%s4151_s10 + $0x420] sm:$0xff] }
  0xa6   : > { %2663 = vmatpush1.bf16.msra.mxu0 %v2662_v6  ;;  %v2684_v5 = vpack.c.bf16 %v411_v0, %v407_v63  ;;  %v406_v6 = vld [vmem:[%s4151_s10 + $0x400] sm:$0xff]  ;;  %v412_v10 = vld [vmem:[%s4151_s10 + $0x430] sm:$0xff]  ;;  %v415_v11 = vld [vmem:[%s4151_s10 + $0x448] sm:$0xff] }
  0xa7   : > { %3175 = vmatpush1.bf16.msra.mxu1 %v3174_v8  ;;  %2665 = vmatprep.subr.bf16.mxu0 %v2664_v9  ;;  %v408_v8 = vld [vmem:[%s4151_s10 + $0x410] sm:$0xff]  ;;  %v3196_v9 = vpack.c.bf16 %v413_v2, %v409_v1  ;;  %v419_v12 = vld [vmem:[%s4151_s10 + $0x468] sm:$0xff]  ;;  %v421_v14 = vld [vmem:[%s4151_s10 + $0x478] sm:$0xff]  ;;  %v2686_v16 = vpack.c.bf16 %v410_v7, %v406_v6 }
  0xa8   : > { %3177 = vmatprep.subr.bf16.mxu1 %v3176_v13  ;;  %v417_v13 = vld [vmem:[%s4151_s10 + $0x458] sm:$0xff]  ;;  %v262_v15 = vld [vmem:[#allocation2] sm:$0xff]  ;;  %v3198_v17 = vpack.c.bf16 %v412_v10, %v408_v8  ;;  %v2688_v18 = vpack.c.bf16 %v419_v12, %v415_v11  ;;  %v420_v23 = vld [vmem:[%s4151_s10 + $0x470] sm:$0xff] }
  0xa9   : > { %v3200_v22 = vpack.c.bf16 %v421_v14, %v417_v13  ;;  %v423_v24 = vld [vmem:[%s4151_s10 + $0x488] sm:$0xff]  ;;  %v425_v26 = vld [vmem:[%s4151_s10 + $0x498] sm:$0xff]  ;;  %v428_v35 = vld [vmem:[%s4151_s10 + $0x4b0] sm:$0xff] }
  0xaa   : > { %2667 = vmatpush1.bf16.msra.mxu0 %v2666_v19  ;;  %v414_v19 = vld [vmem:[%s4151_s10 + $0x440] sm:$0xff]  ;;  %v429_v27 = vld [vmem:[%s4151_s10 + $0x4b8] sm:$0xff]  ;;  %v431_v36 = vld [vmem:[%s4151_s10 + $0x4c8] sm:$0xff] }
  0xab   : > { %3179 = vmatpush1.bf16.msra.mxu1 %v3178_v20  ;;  %2669 = vmatprep.subr.bf16.mxu0 %v2668_v21  ;;  %v418_v20 = vld [vmem:[%s4151_s10 + $0x460] sm:$0xff]  ;;  %v416_v21 = vld [vmem:[%s4151_s10 + $0x450] sm:$0xff]  ;;  %v3204_v34 = vpack.c.bf16 %v429_v27, %v425_v26  ;;  %v433_v38 = vld [vmem:[%s4151_s10 + $0x4d8] sm:$0xff] }
  0xac   : > { %3181 = vmatprep.subr.bf16.mxu1 %v3180_v25  ;;  %v427_v25 = vld [vmem:[%s4151_s10 + $0x4a8] sm:$0xff]  ;;  %v2690_v28 = vpack.c.bf16 %v418_v20, %v414_v19  ;;  %v3202_v29 = vpack.c.bf16 %v420_v23, %v416_v21  ;;  %v437_v39 = vld [vmem:[%s4151_s10 + $0x4f8] sm:$0xff]  ;;  %v436_v47 = vld [vmem:[%s4151_s10 + $0x4f0] sm:$0xff] }
  0xad   : > { %v2692_v30 = vpack.c.bf16 %v427_v25, %v423_v24  ;;  %v3208_v46 = vpack.c.bf16 %v437_v39, %v433_v38  ;;  %v439_v48 = vld [vmem:[%s4151_s10 + $0x508] sm:$0xff]  ;;  %v441_v50 = vld [vmem:[%s4151_s10 + $0x518] sm:$0xff]  ;;  %v444_v59 = vld [vmem:[%s4151_s10 + $0x530] sm:$0xff] }
  0xae   : > { %2671 = vmatpush1.bf16.msra.mxu0 %v2670_v31  ;;  %v422_v31 = vld [vmem:[%s4151_s10 + $0x480] sm:$0xff]  ;;  %v445_v51 = vld [vmem:[%s4151_s10 + $0x538] sm:$0xff]  ;;  %v447_v60 = vld [vmem:[%s4151_s10 + $0x548] sm:$0xff] }
  0xaf   : > { %3183 = vmatpush1.bf16.msra.mxu1 %v3182_v32  ;;  %2673 = vmatprep.subr.bf16.mxu0 %v2672_v33  ;;  %v426_v32 = vld [vmem:[%s4151_s10 + $0x4a0] sm:$0xff]  ;;  %v424_v33 = vld [vmem:[%s4151_s10 + $0x490] sm:$0xff]  ;;  %v3212_v58 = vpack.c.bf16 %v445_v51, %v441_v50  ;;  %v449_v62 = vld [vmem:[%s4151_s10 + $0x558] sm:$0xff] }
  0xb0   : > { %3185 = vmatprep.subr.bf16.mxu1 %v3184_v37  ;;  %v435_v37 = vld [vmem:[%s4151_s10 + $0x4e8] sm:$0xff]  ;;  %v2694_v40 = vpack.c.bf16 %v426_v32, %v422_v31  ;;  %v3206_v41 = vpack.c.bf16 %v428_v35, %v424_v33  ;;  %v453_v63 = vld [vmem:[%s4151_s10 + $0x578] sm:$0xff]  ;;  %v452_v7 = vld [vmem:[%s4151_s10 + $0x570] sm:$0xff] }
  0xb1   : > { %v2696_v42 = vpack.c.bf16 %v435_v37, %v431_v36  ;;  %v3216_v6 = vpack.c.bf16 %v453_v63, %v449_v62  ;;  %v455_v8 = vld [vmem:[%s4151_s10 + $0x588] sm:$0xff]  ;;  %v457_v10 = vld [vmem:[%s4151_s10 + $0x598] sm:$0xff]  ;;  %v454_v13 = vld [vmem:[%s4151_s10 + $0x580] sm:$0xff] }
  0xb2   : > { %2675 = vmatpush1.bf16.msra.mxu0 %v2674_v43  ;;  %v430_v43 = vld [vmem:[%s4151_s10 + $0x4c0] sm:$0xff]  ;;  %v461_v11 = vld [vmem:[%s4151_s10 + $0x5b8] sm:$0xff]  ;;  %v463_v20 = vld [vmem:[%s4151_s10 + $0x5c8] sm:$0xff] }
  0xb3   : > { %3187 = vmatpush1.bf16.msra.mxu1 %v3186_v44  ;;  %2677 = vmatprep.subr.bf16.mxu0 %v2676_v45  ;;  %v434_v44 = vld [vmem:[%s4151_s10 + $0x4e0] sm:$0xff]  ;;  %v432_v45 = vld [vmem:[%s4151_s10 + $0x4d0] sm:$0xff]  ;;  %v3220_v19 = vpack.c.bf16 %v461_v11, %v457_v10  ;;  %v467_v21 = vld [vmem:[%s4151_s10 + $0x5e8] sm:$0xff] }
  0xb4   : > { %3189 = vmatprep.subr.bf16.mxu1 %v3188_v49  ;;  %v443_v49 = vld [vmem:[%s4151_s10 + $0x528] sm:$0xff]  ;;  %v2698_v52 = vpack.c.bf16 %v434_v44, %v430_v43  ;;  %v3210_v53 = vpack.c.bf16 %v436_v47, %v432_v45  ;;  %v465_v23 = vld [vmem:[%s4151_s10 + $0x5d8] sm:$0xff]  ;;  %v2712_v27 = vpack.c.bf16 %v467_v21, %v463_v20  ;;  %v468_v32 = vld [vmem:[%s4151_s10 + $0x5f0] sm:$0xff] }
  0xb5   : > { %v2700_v54 = vpack.c.bf16 %v443_v49, %v439_v48  ;;  %v469_v24 = vld [vmem:[%s4151_s10 + $0x5f8] sm:$0xff]  ;;  %v471_v33 = vld [vmem:[%s4151_s10 + $0x608] sm:$0xff]  ;;  %v476_v44 = vld [vmem:[%s4151_s10 + $0x630] sm:$0xff] }
  0xb6   : > { %2679 = vmatpush1.bf16.msra.mxu0 %v2678_v55  ;;  %v438_v55 = vld [vmem:[%s4151_s10 + $0x500] sm:$0xff]  ;;  %v3224_v31 = vpack.c.bf16 %v469_v24, %v465_v23  ;;  %v473_v35 = vld [vmem:[%s4151_s10 + $0x618] sm:$0xff]  ;;  %v479_v45 = vld [vmem:[%s4151_s10 + $0x648] sm:$0xff] }
  0xb7   : > { %3191 = vmatpush1.bf16.msra.mxu1 %v3190_v56  ;;  %2681 = vmatprep.subr.bf16.mxu0 %v2680_v57  ;;  %v442_v56 = vld [vmem:[%s4151_s10 + $0x520] sm:$0xff]  ;;  %v440_v57 = vld [vmem:[%s4151_s10 + $0x510] sm:$0xff]  ;;  %v477_v36 = vld [vmem:[%s4151_s10 + $0x638] sm:$0xff] }
  0xb8   : > { %3193 = vmatprep.subr.bf16.mxu1 %v3192_v61  ;;  %v451_v61 = vld [vmem:[%s4151_s10 + $0x568] sm:$0xff]  ;;  %v2702_v0 = vpack.c.bf16 %v442_v56, %v438_v55  ;;  %v3214_v1 = vpack.c.bf16 %v444_v59, %v440_v57  ;;  %v3228_v43 = vpack.c.bf16 %v477_v36, %v473_v35  ;;  %v481_v47 = vld [vmem:[%s4151_s10 + $0x658] sm:$0xff]  ;;  %v484_v56 = vld [vmem:[%s4151_s10 + $0x670] sm:$0xff] }
  0xb9   : > { %v2704_v2 = vpack.c.bf16 %v451_v61, %v447_v60  ;;  %v485_v48 = vld [vmem:[%s4151_s10 + $0x678] sm:$0xff]  ;;  %v487_v57 = vld [vmem:[%s4151_s10 + $0x688] sm:$0xff]  ;;  %v502_v24 = vld [vmem:[%s4151_s10 + $0x700] sm:$0xff] }
  0xba   : > { %2683 = vmatpush1.bf16.msra.mxu0 %v2682_v3  ;;  %v446_v3 = vld [vmem:[%s4151_s10 + $0x540] sm:$0xff]  ;;  %v3232_v55 = vpack.c.bf16 %v485_v48, %v481_v47  ;;  %v489_v59 = vld [vmem:[%s4151_s10 + $0x698] sm:$0xff] }
  0xbb   : > { %3195 = vmatpush1.bf16.msra.mxu1 %v3194_v4  ;;  %2685 = vmatprep.subr.bf16.mxu0 %v2684_v5  ;;  %v450_v4 = vld [vmem:[%s4151_s10 + $0x560] sm:$0xff]  ;;  %v448_v5 = vld [vmem:[%s4151_s10 + $0x550] sm:$0xff]  ;;  %v493_v60 = vld [vmem:[%s4151_s10 + $0x6b8] sm:$0xff] }
  0xbc   : > { %3197 = vmatprep.subr.bf16.mxu1 %v3196_v9  ;;  %v459_v9 = vld [vmem:[%s4151_s10 + $0x5a8] sm:$0xff]  ;;  %v2706_v12 = vpack.c.bf16 %v450_v4, %v446_v3  ;;  %v3218_v14 = vpack.c.bf16 %v452_v7, %v448_v5  ;;  %v3236_v3 = vpack.c.bf16 %v493_v60, %v489_v59  ;;  %v492_v4 = vld [vmem:[%s4151_s10 + $0x6b0] sm:$0xff]  ;;  %v497_v7 = vld [vmem:[%s4151_s10 + $0x6d8] sm:$0xff] }
  0xbd   : > { %1389 = vmatmul.mubr.f32.vlgmr.msra.gmra.mrb[0].mxu0 %v262_v15  ;;  %v495_v5 = vld [vmem:[%s4151_s10 + $0x6c8] sm:$0xff]  ;;  %v509_v20 = vld [vmem:[%s4151_s10 + $0x738] sm:$0xff]  ;;  %v510_v36 = vld [vmem:[%s4151_s10 + $0x740] sm:$0xff] }
  0xbe   : > { %2687 = vmatpush1.bf16.msra.mxu0 %v2686_v16  ;;  %1957 = vmatmul.mubr.f32.vlgmr.msra.gmra.mrb[0].mxu1 %v262_v15  ;;  %v2708_v15 = vpack.c.bf16 %v459_v9, %v455_v8  ;;  %v458_v16 = vld [vmem:[%s4151_s10 + $0x5a0] sm:$0xff]  ;;  %v501_v8 = vld [vmem:[%s4151_s10 + $0x6f8] sm:$0xff] }
  0xbf   : > { %3199 = vmatpush1.bf16.msra.mxu1 %v3198_v17  ;;  %2689 = vmatprep.subr.bf16.mxu0 %v2688_v18  ;;  %v456_v17 = vld [vmem:[%s4151_s10 + $0x590] sm:$0xff]  ;;  %v2710_v25 = vpack.c.bf16 %v458_v16, %v454_v13  ;;  %v498_v13 = vld [vmem:[%s4151_s10 + $0x6e0] sm:$0xff] }
  0xc0   : > { %3201 = vmatprep.subr.bf16.mxu1 %v3200_v22  ;;  %v460_v18 = vld [vmem:[%s4151_s10 + $0x5b0] sm:$0xff]  ;;  %v265_v22 = vld [vmem:[#allocation2 + $0x18] sm:$0xff]  ;;  %v518_v48 = vld [vmem:[%s4151_s10 + $0x780] sm:$0xff] }
  0xc1   : > { %1459 = vmatprep.mubr.f32.mxu0 %v265_v22  ;;  %2027 = vmatprep.mubr.f32.mxu1 %v265_v22  ;;  %v3222_v26 = vpack.c.bf16 %v460_v18, %v456_v17  ;;  %v500_v16 = vld [vmem:[%s4151_s10 + $0x6f0] sm:$0xff]  ;;  %v503_v17 = vld [vmem:[%s4151_s10 + $0x708] sm:$0xff]  ;;  %v526_v60 = vld [vmem:[%s4151_s10 + $0x7c0] sm:$0xff] }
  0xc2   : > { %2691 = vmatpush1.bf16.msra.mxu0 %v2690_v28  ;;  %v462_v28 = vld [vmem:[%s4151_s10 + $0x5c0] sm:$0xff]  ;;  %v507_v18 = vld [vmem:[%s4151_s10 + $0x728] sm:$0xff] }
  0xc3   : > { %3203 = vmatpush1.bf16.msra.mxu1 %v3202_v29  ;;  %2693 = vmatprep.subr.bf16.mxu0 %v2692_v30  ;;  %v466_v29 = vld [vmem:[%s4151_s10 + $0x5e0] sm:$0xff]  ;;  %v464_v30 = vld [vmem:[%s4151_s10 + $0x5d0] sm:$0xff]  ;;  %v2732_v23 = vpack.c.bf16 %v507_v18, %v503_v17 }
  0xc4   : > { %3205 = vmatprep.subr.bf16.mxu1 %v3204_v34  ;;  %v475_v34 = vld [vmem:[%s4151_s10 + $0x628] sm:$0xff]  ;;  %v2714_v37 = vpack.c.bf16 %v466_v29, %v462_v28  ;;  %v3226_v38 = vpack.c.bf16 %v468_v32, %v464_v30  ;;  %v508_v28 = vld [vmem:[%s4151_s10 + $0x730] sm:$0xff]  ;;  %v517_v32 = vld [vmem:[%s4151_s10 + $0x778] sm:$0xff] }
  0xc5   : > { %v2716_v39 = vpack.c.bf16 %v475_v34, %v471_v33  ;;  %v511_v29 = vld [vmem:[%s4151_s10 + $0x748] sm:$0xff]  ;;  %v264_v17 = vld [vmem:[#allocation2 + $0x10] sm:$0xff] }
  0xc6   : > { %2695 = vmatpush1.bf16.msra.mxu0 %v2694_v40  ;;  %v470_v40 = vld [vmem:[%s4151_s10 + $0x600] sm:$0xff]  ;;  %v515_v30 = vld [vmem:[%s4151_s10 + $0x768] sm:$0xff] }
  0xc7   : > { %3207 = vmatpush1.bf16.msra.mxu1 %v3206_v41  ;;  %2697 = vmatprep.subr.bf16.mxu0 %v2696_v42  ;;  %v474_v41 = vld [vmem:[%s4151_s10 + $0x620] sm:$0xff]  ;;  %v472_v42 = vld [vmem:[%s4151_s10 + $0x610] sm:$0xff]  ;;  %v2736_v35 = vpack.c.bf16 %v515_v30, %v511_v29  ;;  %v557_v29 = vld [vmem:[%s4151_s10 + $0x8b8] sm:$0xff] }
  0xc8   : > { %3209 = vmatprep.subr.bf16.mxu1 %v3208_v46  ;;  %v483_v46 = vld [vmem:[%s4151_s10 + $0x668] sm:$0xff]  ;;  %v2718_v49 = vpack.c.bf16 %v474_v41, %v470_v40  ;;  %v3230_v50 = vpack.c.bf16 %v476_v44, %v472_v42  ;;  %v516_v40 = vld [vmem:[%s4151_s10 + $0x770] sm:$0xff]  ;;  %v525_v44 = vld [vmem:[%s4151_s10 + $0x7b8] sm:$0xff] }
  0xc9   : > { %v2720_v51 = vpack.c.bf16 %v483_v46, %v479_v45  ;;  %v519_v41 = vld [vmem:[%s4151_s10 + $0x788] sm:$0xff] }
  0xca   : > { %2699 = vmatpush1.bf16.msra.mxu0 %v2698_v52  ;;  %v478_v52 = vld [vmem:[%s4151_s10 + $0x640] sm:$0xff]  ;;  %v523_v42 = vld [vmem:[%s4151_s10 + $0x7a8] sm:$0xff] }
  0xcb   : > { %3211 = vmatpush1.bf16.msra.mxu1 %v3210_v53  ;;  %2701 = vmatprep.subr.bf16.mxu0 %v2700_v54  ;;  %v482_v53 = vld [vmem:[%s4151_s10 + $0x660] sm:$0xff]  ;;  %v480_v54 = vld [vmem:[%s4151_s10 + $0x650] sm:$0xff]  ;;  %v2740_v47 = vpack.c.bf16 %v523_v42, %v519_v41  ;;  %v267_v30 = vld [vmem:[#allocation2 + $0x28] sm:$0xff] }
  0xcc   : > { %3213 = vmatprep.subr.bf16.mxu1 %v3212_v58  ;;  %v491_v58 = vld [vmem:[%s4151_s10 + $0x6a8] sm:$0xff]  ;;  %v2722_v61 = vpack.c.bf16 %v482_v53, %v478_v52  ;;  %v3234_v62 = vpack.c.bf16 %v484_v56, %v480_v54  ;;  %v524_v52 = vld [vmem:[%s4151_s10 + $0x7b0] sm:$0xff]  ;;  %v533_v56 = vld [vmem:[%s4151_s10 + $0x7f8] sm:$0xff] }
  0xcd   : > { %v2724_v63 = vpack.c.bf16 %v491_v58, %v487_v57  ;;  %v527_v53 = vld [vmem:[%s4151_s10 + $0x7c8] sm:$0xff]  ;;  %v561_v41 = vld [vmem:[%s4151_s10 + $0x8d8] sm:$0xff] }
  0xce   : > { %2703 = vmatpush1.bf16.msra.mxu0 %v2702_v0  ;;  %v486_v0 = vld [vmem:[%s4151_s10 + $0x680] sm:$0xff]  ;;  %v531_v54 = vld [vmem:[%s4151_s10 + $0x7e8] sm:$0xff]  ;;  %v565_v42 = vld [vmem:[%s4151_s10 + $0x8f8] sm:$0xff] }
  0xcf   : > { %3215 = vmatpush1.bf16.msra.mxu1 %v3214_v1  ;;  %2705 = vmatprep.subr.bf16.mxu0 %v2704_v2  ;;  %v490_v1 = vld [vmem:[%s4151_s10 + $0x6a0] sm:$0xff]  ;;  %v488_v2 = vld [vmem:[%s4151_s10 + $0x690] sm:$0xff]  ;;  %v2744_v59 = vpack.c.bf16 %v531_v54, %v527_v53  ;;  %v569_v53 = vld [vmem:[%s4151_s10 + $0x918] sm:$0xff] }
  0xd0   : > { %3217 = vmatprep.subr.bf16.mxu1 %v3216_v6  ;;  %v499_v6 = vld [vmem:[%s4151_s10 + $0x6e8] sm:$0xff]  ;;  %v2726_v9 = vpack.c.bf16 %v490_v1, %v486_v0  ;;  %v3238_v10 = vpack.c.bf16 %v492_v4, %v488_v2  ;;  %v532_v0 = vld [vmem:[%s4151_s10 + $0x7f0] sm:$0xff]  ;;  %v541_v4 = vld [vmem:[%s4151_s10 + $0x838] sm:$0xff] }
  0xd1   : > { %v2728_v11 = vpack.c.bf16 %v499_v6, %v495_v5  ;;  %v535_v1 = vld [vmem:[%s4151_s10 + $0x808] sm:$0xff]  ;;  %v573_v54 = vld [vmem:[%s4151_s10 + $0x938] sm:$0xff] }
  0xd2   : > { %2707 = vmatpush1.bf16.msra.mxu0 %v2706_v12  ;;  %v494_v12 = vld [vmem:[%s4151_s10 + $0x6c0] sm:$0xff]  ;;  %v539_v2 = vld [vmem:[%s4151_s10 + $0x828] sm:$0xff] }
  0xd3   : > { %3219 = vmatpush1.bf16.msra.mxu1 %v3218_v14  ;;  %2709 = vmatprep.subr.bf16.mxu0 %v2708_v15  ;;  %v496_v14 = vld [vmem:[%s4151_s10 + $0x6d0] sm:$0xff]  ;;  %v3240_v15 = vpack.c.bf16 %v501_v8, %v497_v7  ;;  %v2730_v21 = vpack.c.bf16 %v498_v13, %v494_v12  ;;  %v2748_v7 = vpack.c.bf16 %v539_v2, %v535_v1  ;;  %v534_v8 = vld [vmem:[%s4151_s10 + $0x800] sm:$0xff]  ;;  %v543_v13 = vld [vmem:[%s4151_s10 + $0x848] sm:$0xff] }
  0xd4   : > { %3221 = vmatprep.subr.bf16.mxu1 %v3220_v19  ;;  %v505_v19 = vld [vmem:[%s4151_s10 + $0x718] sm:$0xff]  ;;  %v3242_v22 = vpack.c.bf16 %v500_v16, %v496_v14  ;;  %v540_v12 = vld [vmem:[%s4151_s10 + $0x830] sm:$0xff]  ;;  %v547_v14 = vld [vmem:[%s4151_s10 + $0x868] sm:$0xff] }
  0xd5   : > { %v549_v16 = vld [vmem:[%s4151_s10 + $0x878] sm:$0xff] }
  0xd6   : > { %2711 = vmatpush1.bf16.msra.mxu0 %v2710_v25  ;;  %v506_v25 = vld [vmem:[%s4151_s10 + $0x720] sm:$0xff]  ;;  %v577_v1 = vld [vmem:[%s4151_s10 + $0x958] sm:$0xff] }
  0xd7   : > { %3223 = vmatpush1.bf16.msra.mxu1 %v3222_v26  ;;  %2713 = vmatprep.subr.bf16.mxu0 %v2712_v27  ;;  %v504_v26 = vld [vmem:[%s4151_s10 + $0x710] sm:$0xff]  ;;  %v3244_v27 = vpack.c.bf16 %v509_v20, %v505_v19  ;;  %v2734_v33 = vpack.c.bf16 %v506_v25, %v502_v24  ;;  %v2752_v20 = vpack.c.bf16 %v547_v14, %v543_v13  ;;  %v581_v2 = vld [vmem:[%s4151_s10 + $0x978] sm:$0xff] }
  0xd8   : > { %3225 = vmatprep.subr.bf16.mxu1 %v3224_v31  ;;  %v513_v31 = vld [vmem:[%s4151_s10 + $0x758] sm:$0xff]  ;;  %v3246_v34 = vpack.c.bf16 %v508_v28, %v504_v26  ;;  %v548_v25 = vld [vmem:[%s4151_s10 + $0x870] sm:$0xff]  ;;  %v551_v26 = vld [vmem:[%s4151_s10 + $0x888] sm:$0xff] }
  0xd9   : > { %v553_v28 = vld [vmem:[%s4151_s10 + $0x898] sm:$0xff] }
  0xda   : > { %2715 = vmatpush1.bf16.msra.mxu0 %v2714_v37  ;;  %v514_v37 = vld [vmem:[%s4151_s10 + $0x760] sm:$0xff]  ;;  %v585_v13 = vld [vmem:[%s4151_s10 + $0x998] sm:$0xff] }
  0xdb   : > { %3227 = vmatpush1.bf16.msra.mxu1 %v3226_v38  ;;  %2717 = vmatprep.subr.bf16.mxu0 %v2716_v39  ;;  %v512_v38 = vld [vmem:[%s4151_s10 + $0x750] sm:$0xff]  ;;  %v3248_v39 = vpack.c.bf16 %v517_v32, %v513_v31  ;;  %v2738_v45 = vpack.c.bf16 %v514_v37, %v510_v36  ;;  %v3268_v37 = vpack.c.bf16 %v557_v29, %v553_v28  ;;  %v589_v14 = vld [vmem:[%s4151_s10 + $0x9b8] sm:$0xff] }
  0xdc   : > { %3229 = vmatprep.subr.bf16.mxu1 %v3228_v43  ;;  %v521_v43 = vld [vmem:[%s4151_s10 + $0x798] sm:$0xff]  ;;  %v3250_v46 = vpack.c.bf16 %v516_v40, %v512_v38  ;;  %v552_v36 = vld [vmem:[%s4151_s10 + $0x890] sm:$0xff]  ;;  %v563_v40 = vld [vmem:[%s4151_s10 + $0x8e8] sm:$0xff] }
  0xdd   : > { %v556_v38 = vld [vmem:[%s4151_s10 + $0x8b0] sm:$0xff] }
  0xde   : > { %2719 = vmatpush1.bf16.msra.mxu0 %v2718_v49  ;;  %v522_v49 = vld [vmem:[%s4151_s10 + $0x7a0] sm:$0xff] }
  0xdf   : > { %3231 = vmatpush1.bf16.msra.mxu1 %v3230_v50  ;;  %2721 = vmatprep.subr.bf16.mxu0 %v2720_v51  ;;  %v520_v50 = vld [vmem:[%s4151_s10 + $0x790] sm:$0xff]  ;;  %v3252_v51 = vpack.c.bf16 %v525_v44, %v521_v43  ;;  %v2742_v57 = vpack.c.bf16 %v522_v49, %v518_v48  ;;  %v3270_v44 = vpack.c.bf16 %v556_v38, %v552_v36  ;;  %v603_v36 = vld [vmem:[%s4151_s10 + $0xa28] sm:$0xff]  ;;  %v605_v38 = vld [vmem:[%s4151_s10 + $0xa38] sm:$0xff] }
  0xe0   : > { %3233 = vmatprep.subr.bf16.mxu1 %v3232_v55  ;;  %v529_v55 = vld [vmem:[%s4151_s10 + $0x7d8] sm:$0xff]  ;;  %v3254_v58 = vpack.c.bf16 %v524_v52, %v520_v50  ;;  %v560_v48 = vld [vmem:[%s4151_s10 + $0x8d0] sm:$0xff]  ;;  %v3272_v49 = vpack.c.bf16 %v565_v42, %v561_v41  ;;  %v571_v52 = vld [vmem:[%s4151_s10 + $0x928] sm:$0xff] }
  0xe1   : > { %v564_v50 = vld [vmem:[%s4151_s10 + $0x8f0] sm:$0xff]  ;;  %v598_v42 = vld [vmem:[%s4151_s10 + $0xa00] sm:$0xff] }
  0xe2   : > { %2723 = vmatpush1.bf16.msra.mxu0 %v2722_v61  ;;  %v530_v61 = vld [vmem:[%s4151_s10 + $0x7e0] sm:$0xff] }
  0xe3   : > { %3235 = vmatpush1.bf16.msra.mxu1 %v3234_v62  ;;  %2725 = vmatprep.subr.bf16.mxu0 %v2724_v63  ;;  %v528_v62 = vld [vmem:[%s4151_s10 + $0x7d0] sm:$0xff]  ;;  %v3256_v63 = vpack.c.bf16 %v533_v56, %v529_v55  ;;  %v2746_v5 = vpack.c.bf16 %v530_v61, %v526_v60  ;;  %v3274_v56 = vpack.c.bf16 %v564_v50, %v560_v48  ;;  %v611_v48 = vld [vmem:[%s4151_s10 + $0xa68] sm:$0xff]  ;;  %v613_v50 = vld [vmem:[%s4151_s10 + $0xa78] sm:$0xff] }
  0xe4   : > { %3237 = vmatprep.subr.bf16.mxu1 %v3236_v3  ;;  %v537_v3 = vld [vmem:[%s4151_s10 + $0x818] sm:$0xff]  ;;  %v3258_v6 = vpack.c.bf16 %v532_v0, %v528_v62  ;;  %v568_v60 = vld [vmem:[%s4151_s10 + $0x910] sm:$0xff]  ;;  %v3276_v61 = vpack.c.bf16 %v573_v54, %v569_v53  ;;  %v579_v0 = vld [vmem:[%s4151_s10 + $0x968] sm:$0xff] }
  0xe5   : > { %v572_v62 = vld [vmem:[%s4151_s10 + $0x930] sm:$0xff]  ;;  %v606_v54 = vld [vmem:[%s4151_s10 + $0xa40] sm:$0xff] }
  0xe6   : > { %2727 = vmatpush1.bf16.msra.mxu0 %v2726_v9  ;;  %v538_v9 = vld [vmem:[%s4151_s10 + $0x820] sm:$0xff] }
  0xe7   : > { %3239 = vmatpush1.bf16.msra.mxu1 %v3238_v10  ;;  %2729 = vmatprep.subr.bf16.mxu0 %v2728_v11  ;;  %v536_v10 = vld [vmem:[%s4151_s10 + $0x810] sm:$0xff]  ;;  %v3260_v11 = vpack.c.bf16 %v541_v4, %v537_v3  ;;  %v2750_v18 = vpack.c.bf16 %v538_v9, %v534_v8  ;;  %v3278_v4 = vpack.c.bf16 %v572_v62, %v568_v60  ;;  %v619_v60 = vld [vmem:[%s4151_s10 + $0xaa8] sm:$0xff]  ;;  %v621_v62 = vld [vmem:[%s4151_s10 + $0xab8] sm:$0xff] }
  0xe8   : > { %3241 = vmatprep.subr.bf16.mxu1 %v3240_v15  ;;  %v545_v15 = vld [vmem:[%s4151_s10 + $0x858] sm:$0xff]  ;;  %v3262_v19 = vpack.c.bf16 %v540_v12, %v536_v10  ;;  %v576_v8 = vld [vmem:[%s4151_s10 + $0x950] sm:$0xff]  ;;  %v3280_v9 = vpack.c.bf16 %v581_v2, %v577_v1  ;;  %v587_v12 = vld [vmem:[%s4151_s10 + $0x9a8] sm:$0xff] }
  0xe9   : > { %v3264_v24 = vpack.c.bf16 %v549_v16, %v545_v15  ;;  %v580_v10 = vld [vmem:[%s4151_s10 + $0x970] sm:$0xff]  ;;  %v614_v2 = vld [vmem:[%s4151_s10 + $0xa80] sm:$0xff] }
  0xea   : > { %2731 = vmatpush1.bf16.msra.mxu0 %v2730_v21  ;;  %v542_v21 = vld [vmem:[%s4151_s10 + $0x840] sm:$0xff]  ;;  %v3282_v16 = vpack.c.bf16 %v580_v10, %v576_v8  ;;  %v627_v8 = vld [vmem:[%s4151_s10 + $0xae8] sm:$0xff]  ;;  %v629_v10 = vld [vmem:[%s4151_s10 + $0xaf8] sm:$0xff] }
  0xeb   : > { %3243 = vmatpush1.bf16.msra.mxu1 %v3242_v22  ;;  %2733 = vmatprep.subr.bf16.mxu0 %v2732_v23  ;;  %v546_v22 = vld [vmem:[%s4151_s10 + $0x860] sm:$0xff]  ;;  %v544_v23 = vld [vmem:[%s4151_s10 + $0x850] sm:$0xff] }
  0xec   : > { %3245 = vmatprep.subr.bf16.mxu1 %v3244_v27  ;;  %v555_v27 = vld [vmem:[%s4151_s10 + $0x8a8] sm:$0xff]  ;;  %v2754_v31 = vpack.c.bf16 %v546_v22, %v542_v21  ;;  %v3266_v32 = vpack.c.bf16 %v548_v25, %v544_v23  ;;  %v3284_v21 = vpack.c.bf16 %v589_v14, %v585_v13  ;;  %v588_v22 = vld [vmem:[%s4151_s10 + $0x9b0] sm:$0xff]  ;;  %v593_v25 = vld [vmem:[%s4151_s10 + $0x9d8] sm:$0xff] }
  0xed   : > { %v591_v23 = vld [vmem:[%s4151_s10 + $0x9c8] sm:$0xff]  ;;  %v622_v14 = vld [vmem:[%s4151_s10 + $0xac0] sm:$0xff] }
  0xee   : > { %2735 = vmatpush1.bf16.msra.mxu0 %v2734_v33  ;;  %v2756_v33 = vpack.c.bf16 %v555_v27, %v551_v26  ;;  %v597_v26 = vld [vmem:[%s4151_s10 + $0x9f8] sm:$0xff] }
  0xef   : > { %3247 = vmatpush1.bf16.msra.mxu1 %v3246_v34  ;;  %2737 = vmatprep.subr.bf16.mxu0 %v2736_v35  ;;  %v550_v34 = vld [vmem:[%s4151_s10 + $0x880] sm:$0xff] }
  0xf0   : > { %3249 = vmatprep.subr.bf16.mxu1 %v3248_v39  ;;  %v554_v35 = vld [vmem:[%s4151_s10 + $0x8a0] sm:$0xff]  ;;  %v559_v39 = vld [vmem:[%s4151_s10 + $0x8c8] sm:$0xff] }
  0xf1   : > { %v2758_v43 = vpack.c.bf16 %v554_v35, %v550_v34  ;;  %v596_v34 = vld [vmem:[%s4151_s10 + $0x9f0] sm:$0xff]  ;;  %v599_v35 = vld [vmem:[%s4151_s10 + $0xa08] sm:$0xff] }
  0xf2   : > { %2739 = vmatpush1.bf16.msra.mxu0 %v2738_v45  ;;  %v2760_v45 = vpack.c.bf16 %v563_v40, %v559_v39  ;;  %v2780_v41 = vpack.c.bf16 %v603_v36, %v599_v35 }
  0xf3   : > { %3251 = vmatpush1.bf16.msra.mxu1 %v3250_v46  ;;  %2741 = vmatprep.subr.bf16.mxu0 %v2740_v47  ;;  %v558_v46 = vld [vmem:[%s4151_s10 + $0x8c0] sm:$0xff] }
  0xf4   : > { %3253 = vmatprep.subr.bf16.mxu1 %v3252_v51  ;;  %v562_v47 = vld [vmem:[%s4151_s10 + $0x8e0] sm:$0xff]  ;;  %v567_v51 = vld [vmem:[%s4151_s10 + $0x908] sm:$0xff] }
  0xf5   : > { %v2762_v55 = vpack.c.bf16 %v562_v47, %v558_v46  ;;  %v604_v46 = vld [vmem:[%s4151_s10 + $0xa30] sm:$0xff]  ;;  %v607_v47 = vld [vmem:[%s4151_s10 + $0xa48] sm:$0xff] }
  0xf6   : > { %2743 = vmatpush1.bf16.msra.mxu0 %v2742_v57  ;;  %v2764_v57 = vpack.c.bf16 %v571_v52, %v567_v51  ;;  %v2784_v53 = vpack.c.bf16 %v611_v48, %v607_v47 }
  0xf7   : > { %3255 = vmatpush1.bf16.msra.mxu1 %v3254_v58  ;;  %2745 = vmatprep.subr.bf16.mxu0 %v2744_v59  ;;  %v566_v58 = vld [vmem:[%s4151_s10 + $0x900] sm:$0xff] }
  0xf8   : > { %3257 = vmatprep.subr.bf16.mxu1 %v3256_v63  ;;  %v570_v59 = vld [vmem:[%s4151_s10 + $0x920] sm:$0xff]  ;;  %v575_v63 = vld [vmem:[%s4151_s10 + $0x948] sm:$0xff] }
  0xf9   : > { %v2766_v3 = vpack.c.bf16 %v570_v59, %v566_v58  ;;  %v612_v58 = vld [vmem:[%s4151_s10 + $0xa70] sm:$0xff]  ;;  %v615_v59 = vld [vmem:[%s4151_s10 + $0xa88] sm:$0xff] }
  0xfa   : > { %2747 = vmatpush1.bf16.msra.mxu0 %v2746_v5  ;;  %v2768_v5 = vpack.c.bf16 %v579_v0, %v575_v63  ;;  %v2788_v1 = vpack.c.bf16 %v619_v60, %v615_v59 }
  0xfb   : > { %3259 = vmatpush1.bf16.msra.mxu1 %v3258_v6  ;;  %2749 = vmatprep.subr.bf16.mxu0 %v2748_v7  ;;  %v574_v6 = vld [vmem:[%s4151_s10 + $0x940] sm:$0xff] }
  0xfc   : > { %3261 = vmatprep.subr.bf16.mxu1 %v3260_v11  ;;  %v578_v7 = vld [vmem:[%s4151_s10 + $0x960] sm:$0xff]  ;;  %v583_v11 = vld [vmem:[%s4151_s10 + $0x988] sm:$0xff] }
  0xfd   : > { %1460 = vmatmul.mubr.f32.vlgmr.msra.gmra.mrb[0].mxu0 %v264_v17  ;;  %v2770_v15 = vpack.c.bf16 %v578_v7, %v574_v6  ;;  %v620_v6 = vld [vmem:[%s4151_s10 + $0xab0] sm:$0xff]  ;;  %v623_v7 = vld [vmem:[%s4151_s10 + $0xac8] sm:$0xff] }
  0xfe   : > { %2751 = vmatpush1.bf16.msra.mxu0 %v2750_v18  ;;  %2028 = vmatmul.mubr.f32.vlgmr.msra.gmra.mrb[0].mxu1 %v264_v17  ;;  %v2772_v17 = vpack.c.bf16 %v587_v12, %v583_v11  ;;  %v582_v18 = vld [vmem:[%s4151_s10 + $0x980] sm:$0xff]  ;;  %v2792_v13 = vpack.c.bf16 %v627_v8, %v623_v7 }
  0xff   : > { %3263 = vmatpush1.bf16.msra.mxu1 %v3262_v19  ;;  %2753 = vmatprep.subr.bf16.mxu0 %v2752_v20  ;;  %v586_v19 = vld [vmem:[%s4151_s10 + $0x9a0] sm:$0xff]  ;;  %v584_v20 = vld [vmem:[%s4151_s10 + $0x990] sm:$0xff] }
 0x100   : > { %3265 = vmatprep.subr.bf16.mxu1 %v3264_v24  ;;  %1530 = vmatprep.mubr.f32.mxu0 %v267_v30  ;;  %v595_v24 = vld [vmem:[%s4151_s10 + $0x9e8] sm:$0xff]  ;;  %v2774_v27 = vpack.c.bf16 %v586_v19, %v582_v18  ;;  %v3286_v28 = vpack.c.bf16 %v588_v22, %v584_v20  ;;  %v628_v18 = vld [vmem:[%s4151_s10 + $0xaf0] sm:$0xff]  ;;  %v637_v22 = vld [vmem:[%s4151_s10 + $0xb38] sm:$0xff] }
 0x101   : > { %2098 = vmatprep.mubr.f32.mxu1 %v267_v30  ;;  %v2776_v29 = vpack.c.bf16 %v595_v24, %v591_v23  ;;  %v590_v30 = vld [vmem:[%s4151_s10 + $0x9c0] sm:$0xff]  ;;  %v631_v19 = vld [vmem:[%s4151_s10 + $0xb08] sm:$0xff] }
 0x102   : > { %2755 = vmatpush1.bf16.msra.mxu0 %v2754_v31  ;;  %v594_v31 = vld [vmem:[%s4151_s10 + $0x9e0] sm:$0xff]  ;;  %v635_v20 = vld [vmem:[%s4151_s10 + $0xb28] sm:$0xff] }
 0x103   : > { %3267 = vmatpush1.bf16.msra.mxu1 %v3266_v32  ;;  %2757 = vmatprep.subr.bf16.mxu0 %v2756_v33  ;;  %v592_v32 = vld [vmem:[%s4151_s10 + $0x9d0] sm:$0xff]  ;;  %v3288_v33 = vpack.c.bf16 %v597_v26, %v593_v25  ;;  %v2778_v39 = vpack.c.bf16 %v594_v31, %v590_v30  ;;  %v2796_v25 = vpack.c.bf16 %v635_v20, %v631_v19  ;;  %v630_v26 = vld [vmem:[%s4151_s10 + $0xb00] sm:$0xff]  ;;  %v639_v31 = vld [vmem:[%s4151_s10 + $0xb48] sm:$0xff] }
 0x104   : > { %3269 = vmatprep.subr.bf16.mxu1 %v3268_v37  ;;  %v601_v37 = vld [vmem:[%s4151_s10 + $0xa18] sm:$0xff]  ;;  %v3290_v40 = vpack.c.bf16 %v596_v34, %v592_v32  ;;  %v636_v30 = vld [vmem:[%s4151_s10 + $0xb30] sm:$0xff]  ;;  %v643_v32 = vld [vmem:[%s4151_s10 + $0xb68] sm:$0xff] }
 0x105   : > { %v645_v34 = vld [vmem:[%s4151_s10 + $0xb78] sm:$0xff]  ;;  %v266_v19 = vld [vmem:[#allocation2 + $0x20] sm:$0xff] }
 0x106   : > { %2759 = vmatpush1.bf16.msra.mxu0 %v2758_v43  ;;  %v602_v43 = vld [vmem:[%s4151_s10 + $0xa20] sm:$0xff] }
 0x107   : > { %3271 = vmatpush1.bf16.msra.mxu1 %v3270_v44  ;;  %2761 = vmatprep.subr.bf16.mxu0 %v2760_v45  ;;  %v600_v44 = vld [vmem:[%s4151_s10 + $0xa10] sm:$0xff]  ;;  %v3292_v45 = vpack.c.bf16 %v605_v38, %v601_v37  ;;  %v2782_v51 = vpack.c.bf16 %v602_v43, %v598_v42  ;;  %v2800_v37 = vpack.c.bf16 %v643_v32, %v639_v31  ;;  %v638_v38 = vld [vmem:[%s4151_s10 + $0xb40] sm:$0xff]  ;;  %v647_v43 = vld [vmem:[%s4151_s10 + $0xb88] sm:$0xff] }
 0x108   : > { %3273 = vmatprep.subr.bf16.mxu1 %v3272_v49  ;;  %v609_v49 = vld [vmem:[%s4151_s10 + $0xa58] sm:$0xff]  ;;  %v3294_v52 = vpack.c.bf16 %v604_v46, %v600_v44  ;;  %v644_v42 = vld [vmem:[%s4151_s10 + $0xb70] sm:$0xff]  ;;  %v651_v44 = vld [vmem:[%s4151_s10 + $0xba8] sm:$0xff] }
 0x109   : > { %v653_v46 = vld [vmem:[%s4151_s10 + $0xbb8] sm:$0xff] }
 0x10a   : > { %2763 = vmatpush1.bf16.msra.mxu0 %v2762_v55  ;;  %v610_v55 = vld [vmem:[%s4151_s10 + $0xa60] sm:$0xff]  ;;  %v685_v31 = vld [vmem:[%s4151_s10 + $0xcb8] sm:$0xff] }
 0x10b   : > { %3275 = vmatpush1.bf16.msra.mxu1 %v3274_v56  ;;  %2765 = vmatprep.subr.bf16.mxu0 %v2764_v57  ;;  %v608_v56 = vld [vmem:[%s4151_s10 + $0xa50] sm:$0xff]  ;;  %v3296_v57 = vpack.c.bf16 %v613_v50, %v609_v49  ;;  %v2786_v63 = vpack.c.bf16 %v610_v55, %v606_v54  ;;  %v2804_v49 = vpack.c.bf16 %v651_v44, %v647_v43  ;;  %v646_v50 = vld [vmem:[%s4151_s10 + $0xb80] sm:$0xff]  ;;  %v655_v55 = vld [vmem:[%s4151_s10 + $0xbc8] sm:$0xff] }
 0x10c   : > { %3277 = vmatprep.subr.bf16.mxu1 %v3276_v61  ;;  %v617_v61 = vld [vmem:[%s4151_s10 + $0xa98] sm:$0xff]  ;;  %v3298_v0 = vpack.c.bf16 %v612_v58, %v608_v56  ;;  %v652_v54 = vld [vmem:[%s4151_s10 + $0xbb0] sm:$0xff]  ;;  %v659_v56 = vld [vmem:[%s4151_s10 + $0xbe8] sm:$0xff] }
 0x10d   : > { %v661_v58 = vld [vmem:[%s4151_s10 + $0xbf8] sm:$0xff] }
 0x10e   : > { %2767 = vmatpush1.bf16.msra.mxu0 %v2766_v3  ;;  %v618_v3 = vld [vmem:[%s4151_s10 + $0xaa0] sm:$0xff]  ;;  %v269_v32 = vld [vmem:[#allocation2 + $0x38] sm:$0xff] }
 0x10f   : > { %3279 = vmatpush1.bf16.msra.mxu1 %v3278_v4  ;;  %2769 = vmatprep.subr.bf16.mxu0 %v2768_v5  ;;  %v616_v4 = vld [vmem:[%s4151_s10 + $0xa90] sm:$0xff]  ;;  %v3300_v5 = vpack.c.bf16 %v621_v62, %v617_v61  ;;  %v2790_v11 = vpack.c.bf16 %v618_v3, %v614_v2  ;;  %v2808_v61 = vpack.c.bf16 %v659_v56, %v655_v55  ;;  %v654_v62 = vld [vmem:[%s4151_s10 + $0xbc0] sm:$0xff]  ;;  %v663_v3 = vld [vmem:[%s4151_s10 + $0xc08] sm:$0xff] }
 0x110   : > { %3281 = vmatprep.subr.bf16.mxu1 %v3280_v9  ;;  %v625_v9 = vld [vmem:[%s4151_s10 + $0xad8] sm:$0xff]  ;;  %v3302_v12 = vpack.c.bf16 %v620_v6, %v616_v4  ;;  %v660_v2 = vld [vmem:[%s4151_s10 + $0xbf0] sm:$0xff]  ;;  %v667_v4 = vld [vmem:[%s4151_s10 + $0xc28] sm:$0xff] }
 0x111   : > { %v669_v6 = vld [vmem:[%s4151_s10 + $0xc38] sm:$0xff] }
 0x112   : > { %2771 = vmatpush1.bf16.msra.mxu0 %v2770_v15  ;;  %v626_v15 = vld [vmem:[%s4151_s10 + $0xae0] sm:$0xff]  ;;  %v689_v43 = vld [vmem:[%s4151_s10 + $0xcd8] sm:$0xff] }
 0x113   : > { %3283 = vmatpush1.bf16.msra.mxu1 %v3282_v16  ;;  %2773 = vmatprep.subr.bf16.mxu0 %v2772_v17  ;;  %v624_v16 = vld [vmem:[%s4151_s10 + $0xad0] sm:$0xff]  ;;  %v3304_v17 = vpack.c.bf16 %v629_v10, %v625_v9  ;;  %v2794_v23 = vpack.c.bf16 %v626_v15, %v622_v14  ;;  %v2812_v9 = vpack.c.bf16 %v667_v4, %v663_v3  ;;  %v662_v10 = vld [vmem:[%s4151_s10 + $0xc00] sm:$0xff]  ;;  %v671_v15 = vld [vmem:[%s4151_s10 + $0xc48] sm:$0xff] }
 0x114   : > { %3285 = vmatprep.subr.bf16.mxu1 %v3284_v21  ;;  %v633_v21 = vld [vmem:[%s4151_s10 + $0xb18] sm:$0xff]  ;;  %v3306_v24 = vpack.c.bf16 %v628_v18, %v624_v16  ;;  %v668_v14 = vld [vmem:[%s4151_s10 + $0xc30] sm:$0xff]  ;;  %v675_v16 = vld [vmem:[%s4151_s10 + $0xc68] sm:$0xff] }
 0x115   : > { %v677_v18 = vld [vmem:[%s4151_s10 + $0xc78] sm:$0xff] }
 0x116   : > { %2775 = vmatpush1.bf16.msra.mxu0 %v2774_v27  ;;  %v634_v27 = vld [vmem:[%s4151_s10 + $0xb20] sm:$0xff]  ;;  %v693_v44 = vld [vmem:[%s4151_s10 + $0xcf8] sm:$0xff] }
 0x117   : > { %3287 = vmatpush1.bf16.msra.mxu1 %v3286_v28  ;;  %2777 = vmatprep.subr.bf16.mxu0 %v2776_v29  ;;  %v632_v28 = vld [vmem:[%s4151_s10 + $0xb10] sm:$0xff]  ;;  %v3308_v29 = vpack.c.bf16 %v637_v22, %v633_v21  ;;  %v2798_v35 = vpack.c.bf16 %v634_v27, %v630_v26  ;;  %v2816_v22 = vpack.c.bf16 %v675_v16, %v671_v15  ;;  %v697_v55 = vld [vmem:[%s4151_s10 + $0xd18] sm:$0xff] }
 0x118   : > { %3289 = vmatprep.subr.bf16.mxu1 %v3288_v33  ;;  %v641_v33 = vld [vmem:[%s4151_s10 + $0xb58] sm:$0xff]  ;;  %v3310_v36 = vpack.c.bf16 %v636_v30, %v632_v28  ;;  %v676_v27 = vld [vmem:[%s4151_s10 + $0xc70] sm:$0xff]  ;;  %v679_v28 = vld [vmem:[%s4151_s10 + $0xc88] sm:$0xff] }
 0x119   : > { %v681_v30 = vld [vmem:[%s4151_s10 + $0xc98] sm:$0xff] }
 0x11a   : > { %2779 = vmatpush1.bf16.msra.mxu0 %v2778_v39  ;;  %v642_v39 = vld [vmem:[%s4151_s10 + $0xb60] sm:$0xff]  ;;  %v701_v56 = vld [vmem:[%s4151_s10 + $0xd38] sm:$0xff] }
 0x11b   : > { %3291 = vmatpush1.bf16.msra.mxu1 %v3290_v40  ;;  %2781 = vmatprep.subr.bf16.mxu0 %v2780_v41  ;;  %v640_v40 = vld [vmem:[%s4151_s10 + $0xb50] sm:$0xff]  ;;  %v3312_v41 = vpack.c.bf16 %v645_v34, %v641_v33  ;;  %v2802_v47 = vpack.c.bf16 %v642_v39, %v638_v38  ;;  %v3332_v39 = vpack.c.bf16 %v685_v31, %v681_v30  ;;  %v705_v3 = vld [vmem:[%s4151_s10 + $0xd58] sm:$0xff] }
 0x11c   : > { %3293 = vmatprep.subr.bf16.mxu1 %v3292_v45  ;;  %v649_v45 = vld [vmem:[%s4151_s10 + $0xb98] sm:$0xff]  ;;  %v3314_v48 = vpack.c.bf16 %v644_v42, %v640_v40  ;;  %v680_v38 = vld [vmem:[%s4151_s10 + $0xc90] sm:$0xff]  ;;  %v691_v42 = vld [vmem:[%s4151_s10 + $0xce8] sm:$0xff] }
 0x11d   : > { %v684_v40 = vld [vmem:[%s4151_s10 + $0xcb0] sm:$0xff]  ;;  %v709_v4 = vld [vmem:[%s4151_s10 + $0xd78] sm:$0xff] }
 0x11e   : > { %2783 = vmatpush1.bf16.msra.mxu0 %v2782_v51  ;;  %v650_v51 = vld [vmem:[%s4151_s10 + $0xba0] sm:$0xff]  ;;  %v713_v15 = vld [vmem:[%s4151_s10 + $0xd98] sm:$0xff] }
 0x11f   : > { %3295 = vmatpush1.bf16.msra.mxu1 %v3294_v52  ;;  %2785 = vmatprep.subr.bf16.mxu0 %v2784_v53  ;;  %v648_v52 = vld [vmem:[%s4151_s10 + $0xb90] sm:$0xff]  ;;  %v3316_v53 = vpack.c.bf16 %v653_v46, %v649_v45  ;;  %v2806_v59 = vpack.c.bf16 %v650_v51, %v646_v50  ;;  %v3334_v46 = vpack.c.bf16 %v684_v40, %v680_v38  ;;  %v717_v16 = vld [vmem:[%s4151_s10 + $0xdb8] sm:$0xff]  ;;  %v731_v38 = vld [vmem:[%s4151_s10 + $0xe28] sm:$0xff] }
 0x120   : > { %3297 = vmatprep.subr.bf16.mxu1 %v3296_v57  ;;  %v657_v57 = vld [vmem:[%s4151_s10 + $0xbd8] sm:$0xff]  ;;  %v3318_v60 = vpack.c.bf16 %v652_v54, %v648_v52  ;;  %v688_v50 = vld [vmem:[%s4151_s10 + $0xcd0] sm:$0xff]  ;;  %v3336_v51 = vpack.c.bf16 %v693_v44, %v689_v43  ;;  %v699_v54 = vld [vmem:[%s4151_s10 + $0xd28] sm:$0xff] }
 0x121   : > { %v692_v52 = vld [vmem:[%s4151_s10 + $0xcf0] sm:$0xff]  ;;  %v733_v40 = vld [vmem:[%s4151_s10 + $0xe38] sm:$0xff]  ;;  %v726_v44 = vld [vmem:[%s4151_s10 + $0xe00] sm:$0xff] }
 0x122   : > { %2787 = vmatpush1.bf16.msra.mxu0 %v2786_v63  ;;  %v658_v63 = vld [vmem:[%s4151_s10 + $0xbe0] sm:$0xff] }
 0x123   : > { %3299 = vmatpush1.bf16.msra.mxu1 %v3298_v0  ;;  %2789 = vmatprep.subr.bf16.mxu0 %v2788_v1  ;;  %v656_v0 = vld [vmem:[%s4151_s10 + $0xbd0] sm:$0xff]  ;;  %v3320_v1 = vpack.c.bf16 %v661_v58, %v657_v57  ;;  %v2810_v7 = vpack.c.bf16 %v658_v63, %v654_v62  ;;  %v3338_v58 = vpack.c.bf16 %v692_v52, %v688_v50  ;;  %v739_v50 = vld [vmem:[%s4151_s10 + $0xe68] sm:$0xff]  ;;  %v741_v52 = vld [vmem:[%s4151_s10 + $0xe78] sm:$0xff] }
 0x124   : > { %3301 = vmatprep.subr.bf16.mxu1 %v3300_v5  ;;  %v665_v5 = vld [vmem:[%s4151_s10 + $0xc18] sm:$0xff]  ;;  %v3322_v8 = vpack.c.bf16 %v660_v2, %v656_v0  ;;  %v696_v62 = vld [vmem:[%s4151_s10 + $0xd10] sm:$0xff]  ;;  %v3340_v63 = vpack.c.bf16 %v701_v56, %v697_v55  ;;  %v707_v2 = vld [vmem:[%s4151_s10 + $0xd68] sm:$0xff] }
 0x125   : > { %v700_v0 = vld [vmem:[%s4151_s10 + $0xd30] sm:$0xff]  ;;  %v734_v56 = vld [vmem:[%s4151_s10 + $0xe40] sm:$0xff] }
 0x126   : > { %2791 = vmatpush1.bf16.msra.mxu0 %v2790_v11  ;;  %v666_v11 = vld [vmem:[%s4151_s10 + $0xc20] sm:$0xff] }
 0x127   : > { %3303 = vmatpush1.bf16.msra.mxu1 %v3302_v12  ;;  %2793 = vmatprep.subr.bf16.mxu0 %v2792_v13  ;;  %v664_v12 = vld [vmem:[%s4151_s10 + $0xc10] sm:$0xff]  ;;  %v3324_v13 = vpack.c.bf16 %v669_v6, %v665_v5  ;;  %v2814_v20 = vpack.c.bf16 %v666_v11, %v662_v10  ;;  %v3342_v6 = vpack.c.bf16 %v700_v0, %v696_v62  ;;  %v747_v62 = vld [vmem:[%s4151_s10 + $0xea8] sm:$0xff]  ;;  %v749_v0 = vld [vmem:[%s4151_s10 + $0xeb8] sm:$0xff] }
 0x128   : > { %3305 = vmatprep.subr.bf16.mxu1 %v3304_v17  ;;  %v673_v17 = vld [vmem:[%s4151_s10 + $0xc58] sm:$0xff]  ;;  %v3326_v21 = vpack.c.bf16 %v668_v14, %v664_v12  ;;  %v704_v10 = vld [vmem:[%s4151_s10 + $0xd50] sm:$0xff]  ;;  %v3344_v11 = vpack.c.bf16 %v709_v4, %v705_v3  ;;  %v715_v14 = vld [vmem:[%s4151_s10 + $0xda8] sm:$0xff] }
 0x129   : > { %v3328_v26 = vpack.c.bf16 %v677_v18, %v673_v17  ;;  %v708_v12 = vld [vmem:[%s4151_s10 + $0xd70] sm:$0xff]  ;;  %v742_v4 = vld [vmem:[%s4151_s10 + $0xe80] sm:$0xff] }
 0x12a   : > { %2795 = vmatpush1.bf16.msra.mxu0 %v2794_v23  ;;  %v670_v23 = vld [vmem:[%s4151_s10 + $0xc40] sm:$0xff]  ;;  %v3346_v18 = vpack.c.bf16 %v708_v12, %v704_v10  ;;  %v755_v10 = vld [vmem:[%s4151_s10 + $0xee8] sm:$0xff]  ;;  %v757_v12 = vld [vmem:[%s4151_s10 + $0xef8] sm:$0xff] }
 0x12b   : > { %3307 = vmatpush1.bf16.msra.mxu1 %v3306_v24  ;;  %2797 = vmatprep.subr.bf16.mxu0 %v2796_v25  ;;  %v674_v24 = vld [vmem:[%s4151_s10 + $0xc60] sm:$0xff]  ;;  %v672_v25 = vld [vmem:[%s4151_s10 + $0xc50] sm:$0xff] }
 0x12c   : > { %3309 = vmatprep.subr.bf16.mxu1 %v3308_v29  ;;  %v683_v29 = vld [vmem:[%s4151_s10 + $0xca8] sm:$0xff]  ;;  %v2818_v33 = vpack.c.bf16 %v674_v24, %v670_v23  ;;  %v3330_v34 = vpack.c.bf16 %v676_v27, %v672_v25  ;;  %v3348_v23 = vpack.c.bf16 %v717_v16, %v713_v15  ;;  %v716_v24 = vld [vmem:[%s4151_s10 + $0xdb0] sm:$0xff]  ;;  %v721_v27 = vld [vmem:[%s4151_s10 + $0xdd8] sm:$0xff] }
 0x12d   : > { %v719_v25 = vld [vmem:[%s4151_s10 + $0xdc8] sm:$0xff]  ;;  %v750_v16 = vld [vmem:[%s4151_s10 + $0xec0] sm:$0xff] }
 0x12e   : > { %2799 = vmatpush1.bf16.msra.mxu0 %v2798_v35  ;;  %v2820_v35 = vpack.c.bf16 %v683_v29, %v679_v28  ;;  %v725_v28 = vld [vmem:[%s4151_s10 + $0xdf8] sm:$0xff] }
 0x12f   : > { %3311 = vmatpush1.bf16.msra.mxu1 %v3310_v36  ;;  %2801 = vmatprep.subr.bf16.mxu0 %v2800_v37  ;;  %v678_v36 = vld [vmem:[%s4151_s10 + $0xc80] sm:$0xff] }
 0x130   : > { %3313 = vmatprep.subr.bf16.mxu1 %v3312_v41  ;;  %v682_v37 = vld [vmem:[%s4151_s10 + $0xca0] sm:$0xff]  ;;  %v687_v41 = vld [vmem:[%s4151_s10 + $0xcc8] sm:$0xff] }
 0x131   : > { %v2822_v45 = vpack.c.bf16 %v682_v37, %v678_v36  ;;  %v724_v36 = vld [vmem:[%s4151_s10 + $0xdf0] sm:$0xff]  ;;  %v727_v37 = vld [vmem:[%s4151_s10 + $0xe08] sm:$0xff] }
 0x132   : > { %2803 = vmatpush1.bf16.msra.mxu0 %v2802_v47  ;;  %v2824_v47 = vpack.c.bf16 %v691_v42, %v687_v41  ;;  %v2844_v43 = vpack.c.bf16 %v731_v38, %v727_v37 }
 0x133   : > { %3315 = vmatpush1.bf16.msra.mxu1 %v3314_v48  ;;  %2805 = vmatprep.subr.bf16.mxu0 %v2804_v49  ;;  %v686_v48 = vld [vmem:[%s4151_s10 + $0xcc0] sm:$0xff] }
 0x134   : > { %3317 = vmatprep.subr.bf16.mxu1 %v3316_v53  ;;  %v690_v49 = vld [vmem:[%s4151_s10 + $0xce0] sm:$0xff]  ;;  %v695_v53 = vld [vmem:[%s4151_s10 + $0xd08] sm:$0xff] }
 0x135   : > { %v2826_v57 = vpack.c.bf16 %v690_v49, %v686_v48  ;;  %v732_v48 = vld [vmem:[%s4151_s10 + $0xe30] sm:$0xff]  ;;  %v735_v49 = vld [vmem:[%s4151_s10 + $0xe48] sm:$0xff] }
 0x136   : > { %2807 = vmatpush1.bf16.msra.mxu0 %v2806_v59  ;;  %v2828_v59 = vpack.c.bf16 %v699_v54, %v695_v53  ;;  %v2848_v55 = vpack.c.bf16 %v739_v50, %v735_v49 }
 0x137   : > { %3319 = vmatpush1.bf16.msra.mxu1 %v3318_v60  ;;  %2809 = vmatprep.subr.bf16.mxu0 %v2808_v61  ;;  %v694_v60 = vld [vmem:[%s4151_s10 + $0xd00] sm:$0xff] }
 0x138   : > { %3321 = vmatprep.subr.bf16.mxu1 %v3320_v1  ;;  %v698_v61 = vld [vmem:[%s4151_s10 + $0xd20] sm:$0xff]  ;;  %v703_v1 = vld [vmem:[%s4151_s10 + $0xd48] sm:$0xff] }
 0x139   : > { %v2830_v5 = vpack.c.bf16 %v698_v61, %v694_v60  ;;  %v740_v60 = vld [vmem:[%s4151_s10 + $0xe70] sm:$0xff]  ;;  %v743_v61 = vld [vmem:[%s4151_s10 + $0xe88] sm:$0xff] }
 0x13a   : > { %2811 = vmatpush1.bf16.msra.mxu0 %v2810_v7  ;;  %v2832_v7 = vpack.c.bf16 %v707_v2, %v703_v1  ;;  %v2852_v3 = vpack.c.bf16 %v747_v62, %v743_v61 }
 0x13b   : > { %3323 = vmatpush1.bf16.msra.mxu1 %v3322_v8  ;;  %2813 = vmatprep.subr.bf16.mxu0 %v2812_v9  ;;  %v702_v8 = vld [vmem:[%s4151_s10 + $0xd40] sm:$0xff] }
 0x13c   : > { %3325 = vmatprep.subr.bf16.mxu1 %v3324_v13  ;;  %v706_v9 = vld [vmem:[%s4151_s10 + $0xd60] sm:$0xff]  ;;  %v711_v13 = vld [vmem:[%s4151_s10 + $0xd88] sm:$0xff] }
 0x13d   : > { %1531 = vmatmul.mubr.f32.vlgmr.msra.gmra.mrb[0].mxu0 %v266_v19  ;;  %v2834_v17 = vpack.c.bf16 %v706_v9, %v702_v8  ;;  %v748_v8 = vld [vmem:[%s4151_s10 + $0xeb0] sm:$0xff]  ;;  %v751_v9 = vld [vmem:[%s4151_s10 + $0xec8] sm:$0xff] }
 0x13e   : > { %2815 = vmatpush1.bf16.msra.mxu0 %v2814_v20  ;;  %2099 = vmatmul.mubr.f32.vlgmr.msra.gmra.mrb[0].mxu1 %v266_v19  ;;  %v2836_v19 = vpack.c.bf16 %v715_v14, %v711_v13  ;;  %v710_v20 = vld [vmem:[%s4151_s10 + $0xd80] sm:$0xff]  ;;  %v2856_v15 = vpack.c.bf16 %v755_v10, %v751_v9 }
 0x13f   : > { %3327 = vmatpush1.bf16.msra.mxu1 %v3326_v21  ;;  %2817 = vmatprep.subr.bf16.mxu0 %v2816_v22  ;;  %v714_v21 = vld [vmem:[%s4151_s10 + $0xda0] sm:$0xff]  ;;  %v712_v22 = vld [vmem:[%s4151_s10 + $0xd90] sm:$0xff] }
 0x140   : > { %3329 = vmatprep.subr.bf16.mxu1 %v3328_v26  ;;  %1601 = vmatprep.mubr.f32.mxu0 %v269_v32  ;;  %v723_v26 = vld [vmem:[%s4151_s10 + $0xde8] sm:$0xff]  ;;  %v2838_v29 = vpack.c.bf16 %v714_v21, %v710_v20  ;;  %v3350_v30 = vpack.c.bf16 %v716_v24, %v712_v22  ;;  %v756_v20 = vld [vmem:[%s4151_s10 + $0xef0] sm:$0xff]  ;;  %v765_v24 = vld [vmem:[%s4151_s10 + $0xf38] sm:$0xff] }
 0x141   : > { %2169 = vmatprep.mubr.f32.mxu1 %v269_v32  ;;  %v2840_v31 = vpack.c.bf16 %v723_v26, %v719_v25  ;;  %v718_v32 = vld [vmem:[%s4151_s10 + $0xdc0] sm:$0xff]  ;;  %v759_v21 = vld [vmem:[%s4151_s10 + $0xf08] sm:$0xff] }
 0x142   : > { %2819 = vmatpush1.bf16.msra.mxu0 %v2818_v33  ;;  %v722_v33 = vld [vmem:[%s4151_s10 + $0xde0] sm:$0xff]  ;;  %v763_v22 = vld [vmem:[%s4151_s10 + $0xf28] sm:$0xff] }
 0x143   : > { %3331 = vmatpush1.bf16.msra.mxu1 %v3330_v34  ;;  %2821 = vmatprep.subr.bf16.mxu0 %v2820_v35  ;;  %v720_v34 = vld [vmem:[%s4151_s10 + $0xdd0] sm:$0xff]  ;;  %v3352_v35 = vpack.c.bf16 %v725_v28, %v721_v27  ;;  %v2842_v41 = vpack.c.bf16 %v722_v33, %v718_v32  ;;  %v2860_v27 = vpack.c.bf16 %v763_v22, %v759_v21  ;;  %v758_v28 = vld [vmem:[%s4151_s10 + $0xf00] sm:$0xff]  ;;  %v767_v33 = vld [vmem:[%s4151_s10 + $0xf48] sm:$0xff] }
 0x144   : > { %3333 = vmatprep.subr.bf16.mxu1 %v3332_v39  ;;  %v729_v39 = vld [vmem:[%s4151_s10 + $0xe18] sm:$0xff]  ;;  %v3354_v42 = vpack.c.bf16 %v724_v36, %v720_v34  ;;  %v764_v32 = vld [vmem:[%s4151_s10 + $0xf30] sm:$0xff]  ;;  %v771_v34 = vld [vmem:[%s4151_s10 + $0xf68] sm:$0xff] }
 0x145   : > { %v773_v36 = vld [vmem:[%s4151_s10 + $0xf78] sm:$0xff]  ;;  %v268_v21 = vld [vmem:[#allocation2 + $0x30] sm:$0xff] }
 0x146   : > { %2823 = vmatpush1.bf16.msra.mxu0 %v2822_v45  ;;  %v730_v45 = vld [vmem:[%s4151_s10 + $0xe20] sm:$0xff] }
 0x147   : > { %3335 = vmatpush1.bf16.msra.mxu1 %v3334_v46  ;;  %2825 = vmatprep.subr.bf16.mxu0 %v2824_v47  ;;  %v728_v46 = vld [vmem:[%s4151_s10 + $0xe10] sm:$0xff]  ;;  %v3356_v47 = vpack.c.bf16 %v733_v40, %v729_v39  ;;  %v2846_v53 = vpack.c.bf16 %v730_v45, %v726_v44  ;;  %v2864_v39 = vpack.c.bf16 %v771_v34, %v767_v33  ;;  %v766_v40 = vld [vmem:[%s4151_s10 + $0xf40] sm:$0xff]  ;;  %v775_v45 = vld [vmem:[%s4151_s10 + $0xf88] sm:$0xff] }
 0x148   : > { %3337 = vmatprep.subr.bf16.mxu1 %v3336_v51  ;;  %v737_v51 = vld [vmem:[%s4151_s10 + $0xe58] sm:$0xff]  ;;  %v3358_v54 = vpack.c.bf16 %v732_v48, %v728_v46  ;;  %v772_v44 = vld [vmem:[%s4151_s10 + $0xf70] sm:$0xff]  ;;  %v779_v46 = vld [vmem:[%s4151_s10 + $0xfa8] sm:$0xff] }
 0x149   : > { %v781_v48 = vld [vmem:[%s4151_s10 + $0xfb8] sm:$0xff]  ;;  %v271_v34 = vld [vmem:[#allocation2 + $0x48] sm:$0xff] }
 0x14a   : > { %2827 = vmatpush1.bf16.msra.mxu0 %v2826_v57  ;;  %v738_v57 = vld [vmem:[%s4151_s10 + $0xe60] sm:$0xff]  ;;  %v813_v33 = vld [vmem:[%s4151_s10 + $0x10b8] sm:$0xff] }
 0x14b   : > { %3339 = vmatpush1.bf16.msra.mxu1 %v3338_v58  ;;  %2829 = vmatprep.subr.bf16.mxu0 %v2828_v59  ;;  %v736_v58 = vld [vmem:[%s4151_s10 + $0xe50] sm:$0xff]  ;;  %v3360_v59 = vpack.c.bf16 %v741_v52, %v737_v51  ;;  %v2850_v1 = vpack.c.bf16 %v738_v57, %v734_v56  ;;  %v2868_v51 = vpack.c.bf16 %v779_v46, %v775_v45  ;;  %v774_v52 = vld [vmem:[%s4151_s10 + $0xf80] sm:$0xff]  ;;  %v783_v57 = vld [vmem:[%s4151_s10 + $0xfc8] sm:$0xff] }
 0x14c   : > { %3341 = vmatprep.subr.bf16.mxu1 %v3340_v63  ;;  %v745_v63 = vld [vmem:[%s4151_s10 + $0xe98] sm:$0xff]  ;;  %v3362_v2 = vpack.c.bf16 %v740_v60, %v736_v58  ;;  %v780_v56 = vld [vmem:[%s4151_s10 + $0xfb0] sm:$0xff]  ;;  %v787_v58 = vld [vmem:[%s4151_s10 + $0xfe8] sm:$0xff] }
 0x14d   : > { %v789_v60 = vld [vmem:[%s4151_s10 + $0xff8] sm:$0xff] }
 0x14e   : > { %2831 = vmatpush1.bf16.msra.mxu0 %v2830_v5  ;;  %v746_v5 = vld [vmem:[%s4151_s10 + $0xea0] sm:$0xff]  ;;  %v817_v45 = vld [vmem:[%s4151_s10 + $0x10d8] sm:$0xff] }
 0x14f   : > { %3343 = vmatpush1.bf16.msra.mxu1 %v3342_v6  ;;  %2833 = vmatprep.subr.bf16.mxu0 %v2832_v7  ;;  %v744_v6 = vld [vmem:[%s4151_s10 + $0xe90] sm:$0xff]  ;;  %v3364_v7 = vpack.c.bf16 %v749_v0, %v745_v63  ;;  %v2854_v13 = vpack.c.bf16 %v746_v5, %v742_v4  ;;  %v2872_v63 = vpack.c.bf16 %v787_v58, %v783_v57  ;;  %v782_v0 = vld [vmem:[%s4151_s10 + $0xfc0] sm:$0xff]  ;;  %v791_v5 = vld [vmem:[%s4151_s10 + $0x1008] sm:$0xff] }
 0x150   : > { %3345 = vmatprep.subr.bf16.mxu1 %v3344_v11  ;;  %v753_v11 = vld [vmem:[%s4151_s10 + $0xed8] sm:$0xff]  ;;  %v3366_v14 = vpack.c.bf16 %v748_v8, %v744_v6  ;;  %v788_v4 = vld [vmem:[%s4151_s10 + $0xff0] sm:$0xff]  ;;  %v795_v6 = vld [vmem:[%s4151_s10 + $0x1028] sm:$0xff] }
 0x151   : > { %v797_v8 = vld [vmem:[%s4151_s10 + $0x1038] sm:$0xff] }
 0x152   : > { %2835 = vmatpush1.bf16.msra.mxu0 %v2834_v17  ;;  %v754_v17 = vld [vmem:[%s4151_s10 + $0xee0] sm:$0xff]  ;;  %v821_v46 = vld [vmem:[%s4151_s10 + $0x10f8] sm:$0xff] }
 0x153   : > { %3347 = vmatpush1.bf16.msra.mxu1 %v3346_v18  ;;  %2837 = vmatprep.subr.bf16.mxu0 %v2836_v19  ;;  %v752_v18 = vld [vmem:[%s4151_s10 + $0xed0] sm:$0xff]  ;;  %v3368_v19 = vpack.c.bf16 %v757_v12, %v753_v11  ;;  %v2858_v25 = vpack.c.bf16 %v754_v17, %v750_v16  ;;  %v2876_v11 = vpack.c.bf16 %v795_v6, %v791_v5  ;;  %v790_v12 = vld [vmem:[%s4151_s10 + $0x1000] sm:$0xff]  ;;  %v799_v17 = vld [vmem:[%s4151_s10 + $0x1048] sm:$0xff] }
 0x154   : > { %3349 = vmatprep.subr.bf16.mxu1 %v3348_v23  ;;  %v761_v23 = vld [vmem:[%s4151_s10 + $0xf18] sm:$0xff]  ;;  %v3370_v26 = vpack.c.bf16 %v756_v20, %v752_v18  ;;  %v796_v16 = vld [vmem:[%s4151_s10 + $0x1030] sm:$0xff]  ;;  %v803_v18 = vld [vmem:[%s4151_s10 + $0x1068] sm:$0xff] }
 0x155   : > { %v805_v20 = vld [vmem:[%s4151_s10 + $0x1078] sm:$0xff] }
 0x156   : > { %2839 = vmatpush1.bf16.msra.mxu0 %v2838_v29  ;;  %v762_v29 = vld [vmem:[%s4151_s10 + $0xf20] sm:$0xff]  ;;  %v825_v57 = vld [vmem:[%s4151_s10 + $0x1118] sm:$0xff] }
 0x157   : > { %3351 = vmatpush1.bf16.msra.mxu1 %v3350_v30  ;;  %2841 = vmatprep.subr.bf16.mxu0 %v2840_v31  ;;  %v760_v30 = vld [vmem:[%s4151_s10 + $0xf10] sm:$0xff]  ;;  %v3372_v31 = vpack.c.bf16 %v765_v24, %v761_v23  ;;  %v2862_v37 = vpack.c.bf16 %v762_v29, %v758_v28  ;;  %v2880_v24 = vpack.c.bf16 %v803_v18, %v799_v17  ;;  %v829_v58 = vld [vmem:[%s4151_s10 + $0x1138] sm:$0xff] }
 0x158   : > { %3353 = vmatprep.subr.bf16.mxu1 %v3352_v35  ;;  %v769_v35 = vld [vmem:[%s4151_s10 + $0xf58] sm:$0xff]  ;;  %v3374_v38 = vpack.c.bf16 %v764_v32, %v760_v30  ;;  %v804_v29 = vld [vmem:[%s4151_s10 + $0x1070] sm:$0xff]  ;;  %v807_v30 = vld [vmem:[%s4151_s10 + $0x1088] sm:$0xff] }
 0x159   : > { %v809_v32 = vld [vmem:[%s4151_s10 + $0x1098] sm:$0xff] }
 0x15a   : > { %2843 = vmatpush1.bf16.msra.mxu0 %v2842_v41  ;;  %v770_v41 = vld [vmem:[%s4151_s10 + $0xf60] sm:$0xff]  ;;  %v833_v5 = vld [vmem:[%s4151_s10 + $0x1158] sm:$0xff] }
 0x15b   : > { %3355 = vmatpush1.bf16.msra.mxu1 %v3354_v42  ;;  %2845 = vmatprep.subr.bf16.mxu0 %v2844_v43  ;;  %v768_v42 = vld [vmem:[%s4151_s10 + $0xf50] sm:$0xff]  ;;  %v3376_v43 = vpack.c.bf16 %v773_v36, %v769_v35  ;;  %v2866_v49 = vpack.c.bf16 %v770_v41, %v766_v40  ;;  %v3396_v41 = vpack.c.bf16 %v813_v33, %v809_v32  ;;  %v837_v6 = vld [vmem:[%s4151_s10 + $0x1178] sm:$0xff] }
 0x15c   : > { %3357 = vmatprep.subr.bf16.mxu1 %v3356_v47  ;;  %v777_v47 = vld [vmem:[%s4151_s10 + $0xf98] sm:$0xff]  ;;  %v3378_v50 = vpack.c.bf16 %v772_v44, %v768_v42  ;;  %v808_v40 = vld [vmem:[%s4151_s10 + $0x1090] sm:$0xff]  ;;  %v819_v44 = vld [vmem:[%s4151_s10 + $0x10e8] sm:$0xff] }
 0x15d   : > { %v812_v42 = vld [vmem:[%s4151_s10 + $0x10b0] sm:$0xff]  ;;  %v841_v17 = vld [vmem:[%s4151_s10 + $0x1198] sm:$0xff] }
 0x15e   : > { %2847 = vmatpush1.bf16.msra.mxu0 %v2846_v53  ;;  %v778_v53 = vld [vmem:[%s4151_s10 + $0xfa0] sm:$0xff]  ;;  %v845_v18 = vld [vmem:[%s4151_s10 + $0x11b8] sm:$0xff] }
 0x15f   : > { %3359 = vmatpush1.bf16.msra.mxu1 %v3358_v54  ;;  %2849 = vmatprep.subr.bf16.mxu0 %v2848_v55  ;;  %v776_v54 = vld [vmem:[%s4151_s10 + $0xf90] sm:$0xff]  ;;  %v3380_v55 = vpack.c.bf16 %v781_v48, %v777_v47  ;;  %v2870_v61 = vpack.c.bf16 %v778_v53, %v774_v52  ;;  %v3398_v48 = vpack.c.bf16 %v812_v42, %v808_v40  ;;  %v859_v40 = vld [vmem:[%s4151_s10 + $0x1228] sm:$0xff]  ;;  %v861_v42 = vld [vmem:[%s4151_s10 + $0x1238] sm:$0xff] }
 0x160   : > { %3361 = vmatprep.subr.bf16.mxu1 %v3360_v59  ;;  %v785_v59 = vld [vmem:[%s4151_s10 + $0xfd8] sm:$0xff]  ;;  %v3382_v62 = vpack.c.bf16 %v780_v56, %v776_v54  ;;  %v816_v52 = vld [vmem:[%s4151_s10 + $0x10d0] sm:$0xff]  ;;  %v3400_v53 = vpack.c.bf16 %v821_v46, %v817_v45  ;;  %v827_v56 = vld [vmem:[%s4151_s10 + $0x1128] sm:$0xff] }
 0x161   : > { %v820_v54 = vld [vmem:[%s4151_s10 + $0x10f0] sm:$0xff]  ;;  %v854_v46 = vld [vmem:[%s4151_s10 + $0x1200] sm:$0xff] }
 0x162   : > { %2851 = vmatpush1.bf16.msra.mxu0 %v2850_v1  ;;  %v786_v1 = vld [vmem:[%s4151_s10 + $0xfe0] sm:$0xff] }
 0x163   : > { %3363 = vmatpush1.bf16.msra.mxu1 %v3362_v2  ;;  %2853 = vmatprep.subr.bf16.mxu0 %v2852_v3  ;;  %v784_v2 = vld [vmem:[%s4151_s10 + $0xfd0] sm:$0xff]  ;;  %v3384_v3 = vpack.c.bf16 %v789_v60, %v785_v59  ;;  %v2874_v9 = vpack.c.bf16 %v786_v1, %v782_v0  ;;  %v3402_v60 = vpack.c.bf16 %v820_v54, %v816_v52  ;;  %v867_v52 = vld [vmem:[%s4151_s10 + $0x1268] sm:$0xff]  ;;  %v869_v54 = vld [vmem:[%s4151_s10 + $0x1278] sm:$0xff] }
 0x164   : > { %3365 = vmatprep.subr.bf16.mxu1 %v3364_v7  ;;  %v793_v7 = vld [vmem:[%s4151_s10 + $0x1018] sm:$0xff]  ;;  %v3386_v10 = vpack.c.bf16 %v788_v4, %v784_v2  ;;  %v824_v0 = vld [vmem:[%s4151_s10 + $0x1110] sm:$0xff]  ;;  %v3404_v1 = vpack.c.bf16 %v829_v58, %v825_v57  ;;  %v835_v4 = vld [vmem:[%s4151_s10 + $0x1168] sm:$0xff] }
 0x165   : > { %v828_v2 = vld [vmem:[%s4151_s10 + $0x1130] sm:$0xff]  ;;  %v862_v58 = vld [vmem:[%s4151_s10 + $0x1240] sm:$0xff] }
 0x166   : > { %2855 = vmatpush1.bf16.msra.mxu0 %v2854_v13  ;;  %v794_v13 = vld [vmem:[%s4151_s10 + $0x1020] sm:$0xff] }
 0x167   : > { %3367 = vmatpush1.bf16.msra.mxu1 %v3366_v14  ;;  %2857 = vmatprep.subr.bf16.mxu0 %v2856_v15  ;;  %v792_v14 = vld [vmem:[%s4151_s10 + $0x1010] sm:$0xff]  ;;  %v3388_v15 = vpack.c.bf16 %v797_v8, %v793_v7  ;;  %v2878_v22 = vpack.c.bf16 %v794_v13, %v790_v12  ;;  %v3406_v8 = vpack.c.bf16 %v828_v2, %v824_v0  ;;  %v875_v0 = vld [vmem:[%s4151_s10 + $0x12a8] sm:$0xff]  ;;  %v877_v2 = vld [vmem:[%s4151_s10 + $0x12b8] sm:$0xff] }
 0x168   : > { %3369 = vmatprep.subr.bf16.mxu1 %v3368_v19  ;;  %v801_v19 = vld [vmem:[%s4151_s10 + $0x1058] sm:$0xff]  ;;  %v3390_v23 = vpack.c.bf16 %v796_v16, %v792_v14  ;;  %v832_v12 = vld [vmem:[%s4151_s10 + $0x1150] sm:$0xff]  ;;  %v3408_v13 = vpack.c.bf16 %v837_v6, %v833_v5  ;;  %v843_v16 = vld [vmem:[%s4151_s10 + $0x11a8] sm:$0xff] }
 0x169   : > { %v3392_v28 = vpack.c.bf16 %v805_v20, %v801_v19  ;;  %v836_v14 = vld [vmem:[%s4151_s10 + $0x1170] sm:$0xff]  ;;  %v870_v6 = vld [vmem:[%s4151_s10 + $0x1280] sm:$0xff] }
 0x16a   : > { %2859 = vmatpush1.bf16.msra.mxu0 %v2858_v25  ;;  %v798_v25 = vld [vmem:[%s4151_s10 + $0x1040] sm:$0xff]  ;;  %v3410_v20 = vpack.c.bf16 %v836_v14, %v832_v12  ;;  %v883_v12 = vld [vmem:[%s4151_s10 + $0x12e8] sm:$0xff]  ;;  %v885_v14 = vld [vmem:[%s4151_s10 + $0x12f8] sm:$0xff] }
 0x16b   : > { %3371 = vmatpush1.bf16.msra.mxu1 %v3370_v26  ;;  %2861 = vmatprep.subr.bf16.mxu0 %v2860_v27  ;;  %v802_v26 = vld [vmem:[%s4151_s10 + $0x1060] sm:$0xff]  ;;  %v800_v27 = vld [vmem:[%s4151_s10 + $0x1050] sm:$0xff] }
 0x16c   : > { %3373 = vmatprep.subr.bf16.mxu1 %v3372_v31  ;;  %v811_v31 = vld [vmem:[%s4151_s10 + $0x10a8] sm:$0xff]  ;;  %v2882_v35 = vpack.c.bf16 %v802_v26, %v798_v25  ;;  %v3394_v36 = vpack.c.bf16 %v804_v29, %v800_v27  ;;  %v3412_v25 = vpack.c.bf16 %v845_v18, %v841_v17  ;;  %v844_v26 = vld [vmem:[%s4151_s10 + $0x11b0] sm:$0xff]  ;;  %v849_v29 = vld [vmem:[%s4151_s10 + $0x11d8] sm:$0xff] }
 0x16d   : > { %v847_v27 = vld [vmem:[%s4151_s10 + $0x11c8] sm:$0xff]  ;;  %v878_v18 = vld [vmem:[%s4151_s10 + $0x12c0] sm:$0xff] }
 0x16e   : > { %2863 = vmatpush1.bf16.msra.mxu0 %v2862_v37  ;;  %v2884_v37 = vpack.c.bf16 %v811_v31, %v807_v30  ;;  %v853_v30 = vld [vmem:[%s4151_s10 + $0x11f8] sm:$0xff] }
 0x16f   : > { %3375 = vmatpush1.bf16.msra.mxu1 %v3374_v38  ;;  %2865 = vmatprep.subr.bf16.mxu0 %v2864_v39  ;;  %v806_v38 = vld [vmem:[%s4151_s10 + $0x1080] sm:$0xff] }
 0x170   : > { %3377 = vmatprep.subr.bf16.mxu1 %v3376_v43  ;;  %v810_v39 = vld [vmem:[%s4151_s10 + $0x10a0] sm:$0xff]  ;;  %v815_v43 = vld [vmem:[%s4151_s10 + $0x10c8] sm:$0xff] }
 0x171   : > { %v2886_v47 = vpack.c.bf16 %v810_v39, %v806_v38  ;;  %v852_v38 = vld [vmem:[%s4151_s10 + $0x11f0] sm:$0xff]  ;;  %v855_v39 = vld [vmem:[%s4151_s10 + $0x1208] sm:$0xff] }
 0x172   : > { %2867 = vmatpush1.bf16.msra.mxu0 %v2866_v49  ;;  %v2888_v49 = vpack.c.bf16 %v819_v44, %v815_v43  ;;  %v2908_v45 = vpack.c.bf16 %v859_v40, %v855_v39 }
 0x173   : > { %3379 = vmatpush1.bf16.msra.mxu1 %v3378_v50  ;;  %2869 = vmatprep.subr.bf16.mxu0 %v2868_v51  ;;  %v814_v50 = vld [vmem:[%s4151_s10 + $0x10c0] sm:$0xff] }
 0x174   : > { %3381 = vmatprep.subr.bf16.mxu1 %v3380_v55  ;;  %v818_v51 = vld [vmem:[%s4151_s10 + $0x10e0] sm:$0xff]  ;;  %v823_v55 = vld [vmem:[%s4151_s10 + $0x1108] sm:$0xff] }
 0x175   : > { %v2890_v59 = vpack.c.bf16 %v818_v51, %v814_v50  ;;  %v860_v50 = vld [vmem:[%s4151_s10 + $0x1230] sm:$0xff]  ;;  %v863_v51 = vld [vmem:[%s4151_s10 + $0x1248] sm:$0xff] }
 0x176   : > { %2871 = vmatpush1.bf16.msra.mxu0 %v2870_v61  ;;  %v2892_v61 = vpack.c.bf16 %v827_v56, %v823_v55  ;;  %v2912_v57 = vpack.c.bf16 %v867_v52, %v863_v51 }
 0x177   : > { %3383 = vmatpush1.bf16.msra.mxu1 %v3382_v62  ;;  %2873 = vmatprep.subr.bf16.mxu0 %v2872_v63  ;;  %v822_v62 = vld [vmem:[%s4151_s10 + $0x1100] sm:$0xff] }
 0x178   : > { %3385 = vmatprep.subr.bf16.mxu1 %v3384_v3  ;;  %v826_v63 = vld [vmem:[%s4151_s10 + $0x1120] sm:$0xff]  ;;  %v831_v3 = vld [vmem:[%s4151_s10 + $0x1148] sm:$0xff] }
 0x179   : > { %v2894_v7 = vpack.c.bf16 %v826_v63, %v822_v62  ;;  %v868_v62 = vld [vmem:[%s4151_s10 + $0x1270] sm:$0xff]  ;;  %v871_v63 = vld [vmem:[%s4151_s10 + $0x1288] sm:$0xff] }
 0x17a   : > { %2875 = vmatpush1.bf16.msra.mxu0 %v2874_v9  ;;  %v2896_v9 = vpack.c.bf16 %v835_v4, %v831_v3  ;;  %v2916_v5 = vpack.c.bf16 %v875_v0, %v871_v63 }
 0x17b   : > { %3387 = vmatpush1.bf16.msra.mxu1 %v3386_v10  ;;  %2877 = vmatprep.subr.bf16.mxu0 %v2876_v11  ;;  %v830_v10 = vld [vmem:[%s4151_s10 + $0x1140] sm:$0xff] }
 0x17c   : > { %3389 = vmatprep.subr.bf16.mxu1 %v3388_v15  ;;  %v834_v11 = vld [vmem:[%s4151_s10 + $0x1160] sm:$0xff]  ;;  %v839_v15 = vld [vmem:[%s4151_s10 + $0x1188] sm:$0xff] }
 0x17d   : > { %1602 = vmatmul.mubr.f32.vlgmr.msra.gmra.mrb[0].mxu0 %v268_v21  ;;  %v2898_v19 = vpack.c.bf16 %v834_v11, %v830_v10  ;;  %v876_v10 = vld [vmem:[%s4151_s10 + $0x12b0] sm:$0xff]  ;;  %v879_v11 = vld [vmem:[%s4151_s10 + $0x12c8] sm:$0xff] }
 0x17e   : > { %2879 = vmatpush1.bf16.msra.mxu0 %v2878_v22  ;;  %2170 = vmatmul.mubr.f32.vlgmr.msra.gmra.mrb[0].mxu1 %v268_v21  ;;  %v2900_v21 = vpack.c.bf16 %v843_v16, %v839_v15  ;;  %v838_v22 = vld [vmem:[%s4151_s10 + $0x1180] sm:$0xff]  ;;  %v2920_v17 = vpack.c.bf16 %v883_v12, %v879_v11 }
 0x17f   : > { %3391 = vmatpush1.bf16.msra.mxu1 %v3390_v23  ;;  %2881 = vmatprep.subr.bf16.mxu0 %v2880_v24  ;;  %v842_v23 = vld [vmem:[%s4151_s10 + $0x11a0] sm:$0xff]  ;;  %v840_v24 = vld [vmem:[%s4151_s10 + $0x1190] sm:$0xff] }
 0x180   : > { %3393 = vmatprep.subr.bf16.mxu1 %v3392_v28  ;;  %1672 = vmatprep.mubr.f32.mxu0 %v271_v34  ;;  %v851_v28 = vld [vmem:[%s4151_s10 + $0x11e8] sm:$0xff]  ;;  %v2902_v31 = vpack.c.bf16 %v842_v23, %v838_v22  ;;  %v3414_v32 = vpack.c.bf16 %v844_v26, %v840_v24  ;;  %v884_v22 = vld [vmem:[%s4151_s10 + $0x12f0] sm:$0xff]  ;;  %v893_v26 = vld [vmem:[%s4151_s10 + $0x1338] sm:$0xff] }
 0x181   : > { %2240 = vmatprep.mubr.f32.mxu1 %v271_v34  ;;  %v2904_v33 = vpack.c.bf16 %v851_v28, %v847_v27  ;;  %v846_v34 = vld [vmem:[%s4151_s10 + $0x11c0] sm:$0xff]  ;;  %v887_v23 = vld [vmem:[%s4151_s10 + $0x1308] sm:$0xff] }
 0x182   : > { %2883 = vmatpush1.bf16.msra.mxu0 %v2882_v35  ;;  %v850_v35 = vld [vmem:[%s4151_s10 + $0x11e0] sm:$0xff]  ;;  %v891_v24 = vld [vmem:[%s4151_s10 + $0x1328] sm:$0xff] }
 0x183   : > { %3395 = vmatpush1.bf16.msra.mxu1 %v3394_v36  ;;  %2885 = vmatprep.subr.bf16.mxu0 %v2884_v37  ;;  %v848_v36 = vld [vmem:[%s4151_s10 + $0x11d0] sm:$0xff]  ;;  %v3416_v37 = vpack.c.bf16 %v853_v30, %v849_v29  ;;  %v2906_v43 = vpack.c.bf16 %v850_v35, %v846_v34  ;;  %v2924_v29 = vpack.c.bf16 %v891_v24, %v887_v23  ;;  %v886_v30 = vld [vmem:[%s4151_s10 + $0x1300] sm:$0xff]  ;;  %v895_v35 = vld [vmem:[%s4151_s10 + $0x1348] sm:$0xff] }
 0x184   : > { %3397 = vmatprep.subr.bf16.mxu1 %v3396_v41  ;;  %v857_v41 = vld [vmem:[%s4151_s10 + $0x1218] sm:$0xff]  ;;  %v3418_v44 = vpack.c.bf16 %v852_v38, %v848_v36  ;;  %v892_v34 = vld [vmem:[%s4151_s10 + $0x1330] sm:$0xff]  ;;  %v899_v36 = vld [vmem:[%s4151_s10 + $0x1368] sm:$0xff] }
 0x185   : > { %v901_v38 = vld [vmem:[%s4151_s10 + $0x1378] sm:$0xff]  ;;  %v270_v23 = vld [vmem:[#allocation2 + $0x40] sm:$0xff] }
 0x186   : > { %2887 = vmatpush1.bf16.msra.mxu0 %v2886_v47  ;;  %v858_v47 = vld [vmem:[%s4151_s10 + $0x1220] sm:$0xff] }
 0x187   : > { %3399 = vmatpush1.bf16.msra.mxu1 %v3398_v48  ;;  %2889 = vmatprep.subr.bf16.mxu0 %v2888_v49  ;;  %v856_v48 = vld [vmem:[%s4151_s10 + $0x1210] sm:$0xff]  ;;  %v3420_v49 = vpack.c.bf16 %v861_v42, %v857_v41  ;;  %v2910_v55 = vpack.c.bf16 %v858_v47, %v854_v46  ;;  %v2928_v41 = vpack.c.bf16 %v899_v36, %v895_v35  ;;  %v894_v42 = vld [vmem:[%s4151_s10 + $0x1340] sm:$0xff]  ;;  %v903_v47 = vld [vmem:[%s4151_s10 + $0x1388] sm:$0xff] }
 0x188   : > { %3401 = vmatprep.subr.bf16.mxu1 %v3400_v53  ;;  %v865_v53 = vld [vmem:[%s4151_s10 + $0x1258] sm:$0xff]  ;;  %v3422_v56 = vpack.c.bf16 %v860_v50, %v856_v48  ;;  %v900_v46 = vld [vmem:[%s4151_s10 + $0x1370] sm:$0xff]  ;;  %v907_v48 = vld [vmem:[%s4151_s10 + $0x13a8] sm:$0xff] }
 0x189   : > { %v909_v50 = vld [vmem:[%s4151_s10 + $0x13b8] sm:$0xff] }
 0x18a   : > { %2891 = vmatpush1.bf16.msra.mxu0 %v2890_v59  ;;  %v866_v59 = vld [vmem:[%s4151_s10 + $0x1260] sm:$0xff]  ;;  %v941_v35 = vld [vmem:[%s4151_s10 + $0x14b8] sm:$0xff] }
 0x18b   : > { %3403 = vmatpush1.bf16.msra.mxu1 %v3402_v60  ;;  %2893 = vmatprep.subr.bf16.mxu0 %v2892_v61  ;;  %v864_v60 = vld [vmem:[%s4151_s10 + $0x1250] sm:$0xff]  ;;  %v3424_v61 = vpack.c.bf16 %v869_v54, %v865_v53  ;;  %v2914_v3 = vpack.c.bf16 %v866_v59, %v862_v58  ;;  %v2932_v53 = vpack.c.bf16 %v907_v48, %v903_v47  ;;  %v902_v54 = vld [vmem:[%s4151_s10 + $0x1380] sm:$0xff]  ;;  %v911_v59 = vld [vmem:[%s4151_s10 + $0x13c8] sm:$0xff] }
 0x18c   : > { %3405 = vmatprep.subr.bf16.mxu1 %v3404_v1  ;;  %v873_v1 = vld [vmem:[%s4151_s10 + $0x1298] sm:$0xff]  ;;  %v3426_v4 = vpack.c.bf16 %v868_v62, %v864_v60  ;;  %v908_v58 = vld [vmem:[%s4151_s10 + $0x13b0] sm:$0xff]  ;;  %v915_v60 = vld [vmem:[%s4151_s10 + $0x13e8] sm:$0xff] }
 0x18d   : > { %v917_v62 = vld [vmem:[%s4151_s10 + $0x13f8] sm:$0xff] }
 0x18e   : > { %2895 = vmatpush1.bf16.msra.mxu0 %v2894_v7  ;;  %v874_v7 = vld [vmem:[%s4151_s10 + $0x12a0] sm:$0xff]  ;;  %v273_v36 = vld [vmem:[#allocation2 + $0x58] sm:$0xff] }
 0x18f   : > { %3407 = vmatpush1.bf16.msra.mxu1 %v3406_v8  ;;  %2897 = vmatprep.subr.bf16.mxu0 %v2896_v9  ;;  %v872_v8 = vld [vmem:[%s4151_s10 + $0x1290] sm:$0xff]  ;;  %v3428_v9 = vpack.c.bf16 %v877_v2, %v873_v1  ;;  %v2918_v15 = vpack.c.bf16 %v874_v7, %v870_v6  ;;  %v2936_v1 = vpack.c.bf16 %v915_v60, %v911_v59  ;;  %v910_v2 = vld [vmem:[%s4151_s10 + $0x13c0] sm:$0xff]  ;;  %v919_v7 = vld [vmem:[%s4151_s10 + $0x1408] sm:$0xff] }
 0x190   : > { %3409 = vmatprep.subr.bf16.mxu1 %v3408_v13  ;;  %v881_v13 = vld [vmem:[%s4151_s10 + $0x12d8] sm:$0xff]  ;;  %v3430_v16 = vpack.c.bf16 %v876_v10, %v872_v8  ;;  %v916_v6 = vld [vmem:[%s4151_s10 + $0x13f0] sm:$0xff]  ;;  %v923_v8 = vld [vmem:[%s4151_s10 + $0x1428] sm:$0xff] }
 0x191   : > { %v925_v10 = vld [vmem:[%s4151_s10 + $0x1438] sm:$0xff] }
 0x192   : > { %2899 = vmatpush1.bf16.msra.mxu0 %v2898_v19  ;;  %v882_v19 = vld [vmem:[%s4151_s10 + $0x12e0] sm:$0xff]  ;;  %v945_v47 = vld [vmem:[%s4151_s10 + $0x14d8] sm:$0xff] }
 0x193   : > { %3411 = vmatpush1.bf16.msra.mxu1 %v3410_v20  ;;  %2901 = vmatprep.subr.bf16.mxu0 %v2900_v21  ;;  %v880_v20 = vld [vmem:[%s4151_s10 + $0x12d0] sm:$0xff]  ;;  %v3432_v21 = vpack.c.bf16 %v885_v14, %v881_v13  ;;  %v2922_v27 = vpack.c.bf16 %v882_v19, %v878_v18  ;;  %v2940_v13 = vpack.c.bf16 %v923_v8, %v919_v7  ;;  %v918_v14 = vld [vmem:[%s4151_s10 + $0x1400] sm:$0xff]  ;;  %v927_v19 = vld [vmem:[%s4151_s10 + $0x1448] sm:$0xff] }
 0x194   : > { %3413 = vmatprep.subr.bf16.mxu1 %v3412_v25  ;;  %v889_v25 = vld [vmem:[%s4151_s10 + $0x1318] sm:$0xff]  ;;  %v3434_v28 = vpack.c.bf16 %v884_v22, %v880_v20  ;;  %v924_v18 = vld [vmem:[%s4151_s10 + $0x1430] sm:$0xff]  ;;  %v931_v20 = vld [vmem:[%s4151_s10 + $0x1468] sm:$0xff] }
 0x195   : > { %v933_v22 = vld [vmem:[%s4151_s10 + $0x1478] sm:$0xff] }
 0x196   : > { %2903 = vmatpush1.bf16.msra.mxu0 %v2902_v31  ;;  %v890_v31 = vld [vmem:[%s4151_s10 + $0x1320] sm:$0xff]  ;;  %v949_v48 = vld [vmem:[%s4151_s10 + $0x14f8] sm:$0xff] }
 0x197   : > { %3415 = vmatpush1.bf16.msra.mxu1 %v3414_v32  ;;  %2905 = vmatprep.subr.bf16.mxu0 %v2904_v33  ;;  %v888_v32 = vld [vmem:[%s4151_s10 + $0x1310] sm:$0xff]  ;;  %v3436_v33 = vpack.c.bf16 %v893_v26, %v889_v25  ;;  %v2926_v39 = vpack.c.bf16 %v890_v31, %v886_v30  ;;  %v2944_v26 = vpack.c.bf16 %v931_v20, %v927_v19  ;;  %v953_v59 = vld [vmem:[%s4151_s10 + $0x1518] sm:$0xff] }
 0x198   : > { %3417 = vmatprep.subr.bf16.mxu1 %v3416_v37  ;;  %v897_v37 = vld [vmem:[%s4151_s10 + $0x1358] sm:$0xff]  ;;  %v3438_v40 = vpack.c.bf16 %v892_v34, %v888_v32  ;;  %v932_v31 = vld [vmem:[%s4151_s10 + $0x1470] sm:$0xff]  ;;  %v935_v32 = vld [vmem:[%s4151_s10 + $0x1488] sm:$0xff] }
 0x199   : > { %v937_v34 = vld [vmem:[%s4151_s10 + $0x1498] sm:$0xff] }
 0x19a   : > { %2907 = vmatpush1.bf16.msra.mxu0 %v2906_v43  ;;  %v898_v43 = vld [vmem:[%s4151_s10 + $0x1360] sm:$0xff]  ;;  %v957_v60 = vld [vmem:[%s4151_s10 + $0x1538] sm:$0xff] }
 0x19b   : > { %3419 = vmatpush1.bf16.msra.mxu1 %v3418_v44  ;;  %2909 = vmatprep.subr.bf16.mxu0 %v2908_v45  ;;  %v896_v44 = vld [vmem:[%s4151_s10 + $0x1350] sm:$0xff]  ;;  %v3440_v45 = vpack.c.bf16 %v901_v38, %v897_v37  ;;  %v2930_v51 = vpack.c.bf16 %v898_v43, %v894_v42  ;;  %v3460_v43 = vpack.c.bf16 %v941_v35, %v937_v34  ;;  %v961_v7 = vld [vmem:[%s4151_s10 + $0x1558] sm:$0xff] }
 0x19c   : > { %3421 = vmatprep.subr.bf16.mxu1 %v3420_v49  ;;  %v905_v49 = vld [vmem:[%s4151_s10 + $0x1398] sm:$0xff]  ;;  %v3442_v52 = vpack.c.bf16 %v900_v46, %v896_v44  ;;  %v936_v42 = vld [vmem:[%s4151_s10 + $0x1490] sm:$0xff]  ;;  %v947_v46 = vld [vmem:[%s4151_s10 + $0x14e8] sm:$0xff] }
 0x19d   : > { %v940_v44 = vld [vmem:[%s4151_s10 + $0x14b0] sm:$0xff]  ;;  %v965_v8 = vld [vmem:[%s4151_s10 + $0x1578] sm:$0xff] }
 0x19e   : > { %2911 = vmatpush1.bf16.msra.mxu0 %v2910_v55  ;;  %v906_v55 = vld [vmem:[%s4151_s10 + $0x13a0] sm:$0xff]  ;;  %v969_v19 = vld [vmem:[%s4151_s10 + $0x1598] sm:$0xff] }
 0x19f   : > { %3423 = vmatpush1.bf16.msra.mxu1 %v3422_v56  ;;  %2913 = vmatprep.subr.bf16.mxu0 %v2912_v57  ;;  %v904_v56 = vld [vmem:[%s4151_s10 + $0x1390] sm:$0xff]  ;;  %v3444_v57 = vpack.c.bf16 %v909_v50, %v905_v49  ;;  %v2934_v63 = vpack.c.bf16 %v906_v55, %v902_v54  ;;  %v3462_v50 = vpack.c.bf16 %v940_v44, %v936_v42  ;;  %v973_v20 = vld [vmem:[%s4151_s10 + $0x15b8] sm:$0xff]  ;;  %v987_v42 = vld [vmem:[%s4151_s10 + $0x1628] sm:$0xff] }
 0x1a0   : > { %3425 = vmatprep.subr.bf16.mxu1 %v3424_v61  ;;  %v913_v61 = vld [vmem:[%s4151_s10 + $0x13d8] sm:$0xff]  ;;  %v3446_v0 = vpack.c.bf16 %v908_v58, %v904_v56  ;;  %v944_v54 = vld [vmem:[%s4151_s10 + $0x14d0] sm:$0xff]  ;;  %v3464_v55 = vpack.c.bf16 %v949_v48, %v945_v47  ;;  %v955_v58 = vld [vmem:[%s4151_s10 + $0x1528] sm:$0xff] }
 0x1a1   : > { %v948_v56 = vld [vmem:[%s4151_s10 + $0x14f0] sm:$0xff]  ;;  %v989_v44 = vld [vmem:[%s4151_s10 + $0x1638] sm:$0xff]  ;;  %v982_v48 = vld [vmem:[%s4151_s10 + $0x1600] sm:$0xff] }
 0x1a2   : > { %2915 = vmatpush1.bf16.msra.mxu0 %v2914_v3  ;;  %v914_v3 = vld [vmem:[%s4151_s10 + $0x13e0] sm:$0xff] }
 0x1a3   : > { %3427 = vmatpush1.bf16.msra.mxu1 %v3426_v4  ;;  %2917 = vmatprep.subr.bf16.mxu0 %v2916_v5  ;;  %v912_v4 = vld [vmem:[%s4151_s10 + $0x13d0] sm:$0xff]  ;;  %v3448_v5 = vpack.c.bf16 %v917_v62, %v913_v61  ;;  %v2938_v11 = vpack.c.bf16 %v914_v3, %v910_v2  ;;  %v3466_v62 = vpack.c.bf16 %v948_v56, %v944_v54  ;;  %v995_v54 = vld [vmem:[%s4151_s10 + $0x1668] sm:$0xff]  ;;  %v997_v56 = vld [vmem:[%s4151_s10 + $0x1678] sm:$0xff] }
 0x1a4   : > { %3429 = vmatprep.subr.bf16.mxu1 %v3428_v9  ;;  %v921_v9 = vld [vmem:[%s4151_s10 + $0x1418] sm:$0xff]  ;;  %v3450_v12 = vpack.c.bf16 %v916_v6, %v912_v4  ;;  %v952_v2 = vld [vmem:[%s4151_s10 + $0x1510] sm:$0xff]  ;;  %v3468_v3 = vpack.c.bf16 %v957_v60, %v953_v59  ;;  %v963_v6 = vld [vmem:[%s4151_s10 + $0x1568] sm:$0xff] }
 0x1a5   : > { %v956_v4 = vld [vmem:[%s4151_s10 + $0x1530] sm:$0xff]  ;;  %v990_v60 = vld [vmem:[%s4151_s10 + $0x1640] sm:$0xff] }
 0x1a6   : > { %2919 = vmatpush1.bf16.msra.mxu0 %v2918_v15  ;;  %v922_v15 = vld [vmem:[%s4151_s10 + $0x1420] sm:$0xff] }
 0x1a7   : > { %3431 = vmatpush1.bf16.msra.mxu1 %v3430_v16  ;;  %2921 = vmatprep.subr.bf16.mxu0 %v2920_v17  ;;  %v920_v16 = vld [vmem:[%s4151_s10 + $0x1410] sm:$0xff]  ;;  %v3452_v17 = vpack.c.bf16 %v925_v10, %v921_v9  ;;  %v2942_v24 = vpack.c.bf16 %v922_v15, %v918_v14  ;;  %v3470_v10 = vpack.c.bf16 %v956_v4, %v952_v2  ;;  %v1003_v2 = vld [vmem:[%s4151_s10 + $0x16a8] sm:$0xff]  ;;  %v1005_v4 = vld [vmem:[%s4151_s10 + $0x16b8] sm:$0xff] }
 0x1a8   : > { %3433 = vmatprep.subr.bf16.mxu1 %v3432_v21  ;;  %v929_v21 = vld [vmem:[%s4151_s10 + $0x1458] sm:$0xff]  ;;  %v3454_v25 = vpack.c.bf16 %v924_v18, %v920_v16  ;;  %v960_v14 = vld [vmem:[%s4151_s10 + $0x1550] sm:$0xff]  ;;  %v3472_v15 = vpack.c.bf16 %v965_v8, %v961_v7  ;;  %v971_v18 = vld [vmem:[%s4151_s10 + $0x15a8] sm:$0xff] }
 0x1a9   : > { %v3456_v30 = vpack.c.bf16 %v933_v22, %v929_v21  ;;  %v964_v16 = vld [vmem:[%s4151_s10 + $0x1570] sm:$0xff]  ;;  %v998_v8 = vld [vmem:[%s4151_s10 + $0x1680] sm:$0xff] }
 0x1aa   : > { %2923 = vmatpush1.bf16.msra.mxu0 %v2922_v27  ;;  %v926_v27 = vld [vmem:[%s4151_s10 + $0x1440] sm:$0xff]  ;;  %v3474_v22 = vpack.c.bf16 %v964_v16, %v960_v14  ;;  %v1011_v14 = vld [vmem:[%s4151_s10 + $0x16e8] sm:$0xff]  ;;  %v1013_v16 = vld [vmem:[%s4151_s10 + $0x16f8] sm:$0xff] }
 0x1ab   : > { %3435 = vmatpush1.bf16.msra.mxu1 %v3434_v28  ;;  %2925 = vmatprep.subr.bf16.mxu0 %v2924_v29  ;;  %v930_v28 = vld [vmem:[%s4151_s10 + $0x1460] sm:$0xff]  ;;  %v928_v29 = vld [vmem:[%s4151_s10 + $0x1450] sm:$0xff] }
 0x1ac   : > { %3437 = vmatprep.subr.bf16.mxu1 %v3436_v33  ;;  %v939_v33 = vld [vmem:[%s4151_s10 + $0x14a8] sm:$0xff]  ;;  %v2946_v37 = vpack.c.bf16 %v930_v28, %v926_v27  ;;  %v3458_v38 = vpack.c.bf16 %v932_v31, %v928_v29  ;;  %v3476_v27 = vpack.c.bf16 %v973_v20, %v969_v19  ;;  %v972_v28 = vld [vmem:[%s4151_s10 + $0x15b0] sm:$0xff]  ;;  %v977_v31 = vld [vmem:[%s4151_s10 + $0x15d8] sm:$0xff] }
 0x1ad   : > { %v975_v29 = vld [vmem:[%s4151_s10 + $0x15c8] sm:$0xff]  ;;  %v1006_v20 = vld [vmem:[%s4151_s10 + $0x16c0] sm:$0xff] }
 0x1ae   : > { %2927 = vmatpush1.bf16.msra.mxu0 %v2926_v39  ;;  %v2948_v39 = vpack.c.bf16 %v939_v33, %v935_v32  ;;  %v981_v32 = vld [vmem:[%s4151_s10 + $0x15f8] sm:$0xff] }
 0x1af   : > { %3439 = vmatpush1.bf16.msra.mxu1 %v3438_v40  ;;  %2929 = vmatprep.subr.bf16.mxu0 %v2928_v41  ;;  %v934_v40 = vld [vmem:[%s4151_s10 + $0x1480] sm:$0xff] }
 0x1b0   : > { %3441 = vmatprep.subr.bf16.mxu1 %v3440_v45  ;;  %v938_v41 = vld [vmem:[%s4151_s10 + $0x14a0] sm:$0xff]  ;;  %v943_v45 = vld [vmem:[%s4151_s10 + $0x14c8] sm:$0xff] }
 0x1b1   : > { %v2950_v49 = vpack.c.bf16 %v938_v41, %v934_v40  ;;  %v980_v40 = vld [vmem:[%s4151_s10 + $0x15f0] sm:$0xff]  ;;  %v983_v41 = vld [vmem:[%s4151_s10 + $0x1608] sm:$0xff] }
 0x1b2   : > { %2931 = vmatpush1.bf16.msra.mxu0 %v2930_v51  ;;  %v2952_v51 = vpack.c.bf16 %v947_v46, %v943_v45  ;;  %v2972_v47 = vpack.c.bf16 %v987_v42, %v983_v41 }
 0x1b3   : > { %3443 = vmatpush1.bf16.msra.mxu1 %v3442_v52  ;;  %2933 = vmatprep.subr.bf16.mxu0 %v2932_v53  ;;  %v942_v52 = vld [vmem:[%s4151_s10 + $0x14c0] sm:$0xff] }
 0x1b4   : > { %3445 = vmatprep.subr.bf16.mxu1 %v3444_v57  ;;  %v946_v53 = vld [vmem:[%s4151_s10 + $0x14e0] sm:$0xff]  ;;  %v951_v57 = vld [vmem:[%s4151_s10 + $0x1508] sm:$0xff] }
 0x1b5   : > { %v2954_v61 = vpack.c.bf16 %v946_v53, %v942_v52  ;;  %v988_v52 = vld [vmem:[%s4151_s10 + $0x1630] sm:$0xff]  ;;  %v991_v53 = vld [vmem:[%s4151_s10 + $0x1648] sm:$0xff] }
 0x1b6   : > { %2935 = vmatpush1.bf16.msra.mxu0 %v2934_v63  ;;  %v2956_v63 = vpack.c.bf16 %v955_v58, %v951_v57  ;;  %v2976_v59 = vpack.c.bf16 %v995_v54, %v991_v53 }
 0x1b7   : > { %3447 = vmatpush1.bf16.msra.mxu1 %v3446_v0  ;;  %2937 = vmatprep.subr.bf16.mxu0 %v2936_v1  ;;  %v950_v0 = vld [vmem:[%s4151_s10 + $0x1500] sm:$0xff] }
 0x1b8   : > { %3449 = vmatprep.subr.bf16.mxu1 %v3448_v5  ;;  %v954_v1 = vld [vmem:[%s4151_s10 + $0x1520] sm:$0xff]  ;;  %v959_v5 = vld [vmem:[%s4151_s10 + $0x1548] sm:$0xff] }
 0x1b9   : > { %v2958_v9 = vpack.c.bf16 %v954_v1, %v950_v0  ;;  %v996_v0 = vld [vmem:[%s4151_s10 + $0x1670] sm:$0xff]  ;;  %v999_v1 = vld [vmem:[%s4151_s10 + $0x1688] sm:$0xff] }
 0x1ba   : > { %2939 = vmatpush1.bf16.msra.mxu0 %v2938_v11  ;;  %v2960_v11 = vpack.c.bf16 %v963_v6, %v959_v5  ;;  %v2980_v7 = vpack.c.bf16 %v1003_v2, %v999_v1 }
 0x1bb   : > { %3451 = vmatpush1.bf16.msra.mxu1 %v3450_v12  ;;  %2941 = vmatprep.subr.bf16.mxu0 %v2940_v13  ;;  %v958_v12 = vld [vmem:[%s4151_s10 + $0x1540] sm:$0xff] }
 0x1bc   : > { %3453 = vmatprep.subr.bf16.mxu1 %v3452_v17  ;;  %v962_v13 = vld [vmem:[%s4151_s10 + $0x1560] sm:$0xff]  ;;  %v967_v17 = vld [vmem:[%s4151_s10 + $0x1588] sm:$0xff] }
 0x1bd   : > { %1673 = vmatmul.mubr.f32.vlgmr.msra.gmra.mrb[0].mxu0 %v270_v23  ;;  %v2962_v21 = vpack.c.bf16 %v962_v13, %v958_v12  ;;  %v1004_v12 = vld [vmem:[%s4151_s10 + $0x16b0] sm:$0xff]  ;;  %v1007_v13 = vld [vmem:[%s4151_s10 + $0x16c8] sm:$0xff] }
 0x1be   : > { %2943 = vmatpush1.bf16.msra.mxu0 %v2942_v24  ;;  %2241 = vmatmul.mubr.f32.vlgmr.msra.gmra.mrb[0].mxu1 %v270_v23  ;;  %v2964_v23 = vpack.c.bf16 %v971_v18, %v967_v17  ;;  %v966_v24 = vld [vmem:[%s4151_s10 + $0x1580] sm:$0xff]  ;;  %v2984_v19 = vpack.c.bf16 %v1011_v14, %v1007_v13 }
 0x1bf   : > { %3455 = vmatpush1.bf16.msra.mxu1 %v3454_v25  ;;  %2945 = vmatprep.subr.bf16.mxu0 %v2944_v26  ;;  %v970_v25 = vld [vmem:[%s4151_s10 + $0x15a0] sm:$0xff]  ;;  %v968_v26 = vld [vmem:[%s4151_s10 + $0x1590] sm:$0xff] }
 0x1c0   : > { %3457 = vmatprep.subr.bf16.mxu1 %v3456_v30  ;;  %1743 = vmatprep.mubr.f32.mxu0 %v273_v36  ;;  %v979_v30 = vld [vmem:[%s4151_s10 + $0x15e8] sm:$0xff]  ;;  %v2966_v33 = vpack.c.bf16 %v970_v25, %v966_v24  ;;  %v3478_v34 = vpack.c.bf16 %v972_v28, %v968_v26  ;;  %v1012_v24 = vld [vmem:[%s4151_s10 + $0x16f0] sm:$0xff]  ;;  %v1021_v28 = vld [vmem:[%s4151_s10 + $0x1738] sm:$0xff] }
 0x1c1   : > { %2311 = vmatprep.mubr.f32.mxu1 %v273_v36  ;;  %v2968_v35 = vpack.c.bf16 %v979_v30, %v975_v29  ;;  %v974_v36 = vld [vmem:[%s4151_s10 + $0x15c0] sm:$0xff]  ;;  %v1015_v25 = vld [vmem:[%s4151_s10 + $0x1708] sm:$0xff] }
 0x1c2   : > { %2947 = vmatpush1.bf16.msra.mxu0 %v2946_v37  ;;  %v978_v37 = vld [vmem:[%s4151_s10 + $0x15e0] sm:$0xff]  ;;  %v1019_v26 = vld [vmem:[%s4151_s10 + $0x1728] sm:$0xff] }
 0x1c3   : > { %3459 = vmatpush1.bf16.msra.mxu1 %v3458_v38  ;;  %2949 = vmatprep.subr.bf16.mxu0 %v2948_v39  ;;  %v976_v38 = vld [vmem:[%s4151_s10 + $0x15d0] sm:$0xff]  ;;  %v3480_v39 = vpack.c.bf16 %v981_v32, %v977_v31  ;;  %v2970_v45 = vpack.c.bf16 %v978_v37, %v974_v36  ;;  %v2988_v31 = vpack.c.bf16 %v1019_v26, %v1015_v25  ;;  %v1014_v32 = vld [vmem:[%s4151_s10 + $0x1700] sm:$0xff]  ;;  %v1023_v37 = vld [vmem:[%s4151_s10 + $0x1748] sm:$0xff] }
 0x1c4   : > { %3461 = vmatprep.subr.bf16.mxu1 %v3460_v43  ;;  %v985_v43 = vld [vmem:[%s4151_s10 + $0x1618] sm:$0xff]  ;;  %v3482_v46 = vpack.c.bf16 %v980_v40, %v976_v38  ;;  %v1020_v36 = vld [vmem:[%s4151_s10 + $0x1730] sm:$0xff]  ;;  %v1027_v38 = vld [vmem:[%s4151_s10 + $0x1768] sm:$0xff] }
 0x1c5   : > { %v1029_v40 = vld [vmem:[%s4151_s10 + $0x1778] sm:$0xff]  ;;  %v272_v25 = vld [vmem:[#allocation2 + $0x50] sm:$0xff] }
 0x1c6   : > { %2951 = vmatpush1.bf16.msra.mxu0 %v2950_v49  ;;  %v986_v49 = vld [vmem:[%s4151_s10 + $0x1620] sm:$0xff] }
 0x1c7   : > { %3463 = vmatpush1.bf16.msra.mxu1 %v3462_v50  ;;  %2953 = vmatprep.subr.bf16.mxu0 %v2952_v51  ;;  %v984_v50 = vld [vmem:[%s4151_s10 + $0x1610] sm:$0xff]  ;;  %v3484_v51 = vpack.c.bf16 %v989_v44, %v985_v43  ;;  %v2974_v57 = vpack.c.bf16 %v986_v49, %v982_v48  ;;  %v2992_v43 = vpack.c.bf16 %v1027_v38, %v1023_v37  ;;  %v1022_v44 = vld [vmem:[%s4151_s10 + $0x1740] sm:$0xff]  ;;  %v1031_v49 = vld [vmem:[%s4151_s10 + $0x1788] sm:$0xff] }
 0x1c8   : > { %3465 = vmatprep.subr.bf16.mxu1 %v3464_v55  ;;  %v993_v55 = vld [vmem:[%s4151_s10 + $0x1658] sm:$0xff]  ;;  %v3486_v58 = vpack.c.bf16 %v988_v52, %v984_v50  ;;  %v1028_v48 = vld [vmem:[%s4151_s10 + $0x1770] sm:$0xff]  ;;  %v1035_v50 = vld [vmem:[%s4151_s10 + $0x17a8] sm:$0xff] }
 0x1c9   : > { %v1037_v52 = vld [vmem:[%s4151_s10 + $0x17b8] sm:$0xff]  ;;  %v275_v38 = vld [vmem:[#allocation2 + $0x68] sm:$0xff] }
 0x1ca   : > { %2955 = vmatpush1.bf16.msra.mxu0 %v2954_v61  ;;  %v994_v61 = vld [vmem:[%s4151_s10 + $0x1660] sm:$0xff]  ;;  %v1069_v37 = vld [vmem:[%s4151_s10 + $0x18b8] sm:$0xff] }
 0x1cb   : > { %3467 = vmatpush1.bf16.msra.mxu1 %v3466_v62  ;;  %2957 = vmatprep.subr.bf16.mxu0 %v2956_v63  ;;  %v992_v62 = vld [vmem:[%s4151_s10 + $0x1650] sm:$0xff]  ;;  %v3488_v63 = vpack.c.bf16 %v997_v56, %v993_v55  ;;  %v2978_v5 = vpack.c.bf16 %v994_v61, %v990_v60  ;;  %v2996_v55 = vpack.c.bf16 %v1035_v50, %v1031_v49  ;;  %v1030_v56 = vld [vmem:[%s4151_s10 + $0x1780] sm:$0xff]  ;;  %v1039_v61 = vld [vmem:[%s4151_s10 + $0x17c8] sm:$0xff] }
 0x1cc   : > { %3469 = vmatprep.subr.bf16.mxu1 %v3468_v3  ;;  %v1001_v3 = vld [vmem:[%s4151_s10 + $0x1698] sm:$0xff]  ;;  %v3490_v6 = vpack.c.bf16 %v996_v0, %v992_v62  ;;  %v1036_v60 = vld [vmem:[%s4151_s10 + $0x17b0] sm:$0xff]  ;;  %v1043_v62 = vld [vmem:[%s4151_s10 + $0x17e8] sm:$0xff] }
 0x1cd   : > { %v1045_v0 = vld [vmem:[%s4151_s10 + $0x17f8] sm:$0xff] }
 0x1ce   : > { %2959 = vmatpush1.bf16.msra.mxu0 %v2958_v9  ;;  %v1002_v9 = vld [vmem:[%s4151_s10 + $0x16a0] sm:$0xff]  ;;  %v1073_v49 = vld [vmem:[%s4151_s10 + $0x18d8] sm:$0xff] }
 0x1cf   : > { %3471 = vmatpush1.bf16.msra.mxu1 %v3470_v10  ;;  %2961 = vmatprep.subr.bf16.mxu0 %v2960_v11  ;;  %v1000_v10 = vld [vmem:[%s4151_s10 + $0x1690] sm:$0xff]  ;;  %v3492_v11 = vpack.c.bf16 %v1005_v4, %v1001_v3  ;;  %v2982_v17 = vpack.c.bf16 %v1002_v9, %v998_v8  ;;  %v3000_v3 = vpack.c.bf16 %v1043_v62, %v1039_v61  ;;  %v1038_v4 = vld [vmem:[%s4151_s10 + $0x17c0] sm:$0xff]  ;;  %v1047_v9 = vld [vmem:[%s4151_s10 + $0x1808] sm:$0xff] }
 0x1d0   : > { %3473 = vmatprep.subr.bf16.mxu1 %v3472_v15  ;;  %v1009_v15 = vld [vmem:[%s4151_s10 + $0x16d8] sm:$0xff]  ;;  %v3494_v18 = vpack.c.bf16 %v1004_v12, %v1000_v10  ;;  %v1044_v8 = vld [vmem:[%s4151_s10 + $0x17f0] sm:$0xff]  ;;  %v1051_v10 = vld [vmem:[%s4151_s10 + $0x1828] sm:$0xff] }
 0x1d1   : > { %v1053_v12 = vld [vmem:[%s4151_s10 + $0x1838] sm:$0xff] }
 0x1d2   : > { %2963 = vmatpush1.bf16.msra.mxu0 %v2962_v21  ;;  %v1010_v21 = vld [vmem:[%s4151_s10 + $0x16e0] sm:$0xff]  ;;  %v1077_v50 = vld [vmem:[%s4151_s10 + $0x18f8] sm:$0xff] }
 0x1d3   : > { %3475 = vmatpush1.bf16.msra.mxu1 %v3474_v22  ;;  %2965 = vmatprep.subr.bf16.mxu0 %v2964_v23  ;;  %v1008_v22 = vld [vmem:[%s4151_s10 + $0x16d0] sm:$0xff]  ;;  %v3496_v23 = vpack.c.bf16 %v1013_v16, %v1009_v15  ;;  %v2986_v29 = vpack.c.bf16 %v1010_v21, %v1006_v20  ;;  %v3004_v15 = vpack.c.bf16 %v1051_v10, %v1047_v9  ;;  %v1046_v16 = vld [vmem:[%s4151_s10 + $0x1800] sm:$0xff]  ;;  %v1055_v21 = vld [vmem:[%s4151_s10 + $0x1848] sm:$0xff] }
 0x1d4   : > { %3477 = vmatprep.subr.bf16.mxu1 %v3476_v27  ;;  %v1017_v27 = vld [vmem:[%s4151_s10 + $0x1718] sm:$0xff]  ;;  %v3498_v30 = vpack.c.bf16 %v1012_v24, %v1008_v22  ;;  %v1052_v20 = vld [vmem:[%s4151_s10 + $0x1830] sm:$0xff]  ;;  %v1059_v22 = vld [vmem:[%s4151_s10 + $0x1868] sm:$0xff] }
 0x1d5   : > { %v1061_v24 = vld [vmem:[%s4151_s10 + $0x1878] sm:$0xff] }
 0x1d6   : > { %2967 = vmatpush1.bf16.msra.mxu0 %v2966_v33  ;;  %v1018_v33 = vld [vmem:[%s4151_s10 + $0x1720] sm:$0xff]  ;;  %v1081_v61 = vld [vmem:[%s4151_s10 + $0x1918] sm:$0xff] }
 0x1d7   : > { %3479 = vmatpush1.bf16.msra.mxu1 %v3478_v34  ;;  %2969 = vmatprep.subr.bf16.mxu0 %v2968_v35  ;;  %v1016_v34 = vld [vmem:[%s4151_s10 + $0x1710] sm:$0xff]  ;;  %v3500_v35 = vpack.c.bf16 %v1021_v28, %v1017_v27  ;;  %v2990_v41 = vpack.c.bf16 %v1018_v33, %v1014_v32  ;;  %v3008_v28 = vpack.c.bf16 %v1059_v22, %v1055_v21  ;;  %v1085_v62 = vld [vmem:[%s4151_s10 + $0x1938] sm:$0xff] }
 0x1d8   : > { %3481 = vmatprep.subr.bf16.mxu1 %v3480_v39  ;;  %v1025_v39 = vld [vmem:[%s4151_s10 + $0x1758] sm:$0xff]  ;;  %v3502_v42 = vpack.c.bf16 %v1020_v36, %v1016_v34  ;;  %v1060_v33 = vld [vmem:[%s4151_s10 + $0x1870] sm:$0xff]  ;;  %v1063_v34 = vld [vmem:[%s4151_s10 + $0x1888] sm:$0xff] }
 0x1d9   : > { %v1065_v36 = vld [vmem:[%s4151_s10 + $0x1898] sm:$0xff] }
 0x1da   : > { %2971 = vmatpush1.bf16.msra.mxu0 %v2970_v45  ;;  %v1026_v45 = vld [vmem:[%s4151_s10 + $0x1760] sm:$0xff]  ;;  %v1089_v9 = vld [vmem:[%s4151_s10 + $0x1958] sm:$0xff] }
 0x1db   : > { %3483 = vmatpush1.bf16.msra.mxu1 %v3482_v46  ;;  %2973 = vmatprep.subr.bf16.mxu0 %v2972_v47  ;;  %v1024_v46 = vld [vmem:[%s4151_s10 + $0x1750] sm:$0xff]  ;;  %v3504_v47 = vpack.c.bf16 %v1029_v40, %v1025_v39  ;;  %v2994_v53 = vpack.c.bf16 %v1026_v45, %v1022_v44  ;;  %v3524_v45 = vpack.c.bf16 %v1069_v37, %v1065_v36  ;;  %v1093_v10 = vld [vmem:[%s4151_s10 + $0x1978] sm:$0xff] }
 0x1dc   : > { %3485 = vmatprep.subr.bf16.mxu1 %v3484_v51  ;;  %v1033_v51 = vld [vmem:[%s4151_s10 + $0x1798] sm:$0xff]  ;;  %v3506_v54 = vpack.c.bf16 %v1028_v48, %v1024_v46  ;;  %v1064_v44 = vld [vmem:[%s4151_s10 + $0x1890] sm:$0xff]  ;;  %v1075_v48 = vld [vmem:[%s4151_s10 + $0x18e8] sm:$0xff] }
 0x1dd   : > { %v1068_v46 = vld [vmem:[%s4151_s10 + $0x18b0] sm:$0xff]  ;;  %v1097_v21 = vld [vmem:[%s4151_s10 + $0x1998] sm:$0xff] }
 0x1de   : > { %2975 = vmatpush1.bf16.msra.mxu0 %v2974_v57  ;;  %v1034_v57 = vld [vmem:[%s4151_s10 + $0x17a0] sm:$0xff]  ;;  %v1101_v22 = vld [vmem:[%s4151_s10 + $0x19b8] sm:$0xff] }
 0x1df   : > { %3487 = vmatpush1.bf16.msra.mxu1 %v3486_v58  ;;  %2977 = vmatprep.subr.bf16.mxu0 %v2976_v59  ;;  %v1032_v58 = vld [vmem:[%s4151_s10 + $0x1790] sm:$0xff]  ;;  %v3508_v59 = vpack.c.bf16 %v1037_v52, %v1033_v51  ;;  %v2998_v1 = vpack.c.bf16 %v1034_v57, %v1030_v56  ;;  %v3526_v52 = vpack.c.bf16 %v1068_v46, %v1064_v44  ;;  %v1115_v44 = vld [vmem:[%s4151_s10 + $0x1a28] sm:$0xff]  ;;  %v1117_v46 = vld [vmem:[%s4151_s10 + $0x1a38] sm:$0xff] }
 0x1e0   : > { %3489 = vmatprep.subr.bf16.mxu1 %v3488_v63  ;;  %v1041_v63 = vld [vmem:[%s4151_s10 + $0x17d8] sm:$0xff]  ;;  %v3510_v2 = vpack.c.bf16 %v1036_v60, %v1032_v58  ;;  %v1072_v56 = vld [vmem:[%s4151_s10 + $0x18d0] sm:$0xff]  ;;  %v3528_v57 = vpack.c.bf16 %v1077_v50, %v1073_v49  ;;  %v1083_v60 = vld [vmem:[%s4151_s10 + $0x1928] sm:$0xff] }
 0x1e1   : > { %v1076_v58 = vld [vmem:[%s4151_s10 + $0x18f0] sm:$0xff]  ;;  %v1110_v50 = vld [vmem:[%s4151_s10 + $0x1a00] sm:$0xff] }
 0x1e2   : > { %2979 = vmatpush1.bf16.msra.mxu0 %v2978_v5  ;;  %v1042_v5 = vld [vmem:[%s4151_s10 + $0x17e0] sm:$0xff] }
 0x1e3   : > { %3491 = vmatpush1.bf16.msra.mxu1 %v3490_v6  ;;  %2981 = vmatprep.subr.bf16.mxu0 %v2980_v7  ;;  %v1040_v6 = vld [vmem:[%s4151_s10 + $0x17d0] sm:$0xff]  ;;  %v3512_v7 = vpack.c.bf16 %v1045_v0, %v1041_v63  ;;  %v3002_v13 = vpack.c.bf16 %v1042_v5, %v1038_v4  ;;  %v3530_v0 = vpack.c.bf16 %v1076_v58, %v1072_v56  ;;  %v1123_v56 = vld [vmem:[%s4151_s10 + $0x1a68] sm:$0xff]  ;;  %v1125_v58 = vld [vmem:[%s4151_s10 + $0x1a78] sm:$0xff] }
 0x1e4   : > { %3493 = vmatprep.subr.bf16.mxu1 %v3492_v11  ;;  %v1049_v11 = vld [vmem:[%s4151_s10 + $0x1818] sm:$0xff]  ;;  %v3514_v14 = vpack.c.bf16 %v1044_v8, %v1040_v6  ;;  %v1080_v4 = vld [vmem:[%s4151_s10 + $0x1910] sm:$0xff]  ;;  %v3532_v5 = vpack.c.bf16 %v1085_v62, %v1081_v61  ;;  %v1091_v8 = vld [vmem:[%s4151_s10 + $0x1968] sm:$0xff] }
 0x1e5   : > { %v1084_v6 = vld [vmem:[%s4151_s10 + $0x1930] sm:$0xff]  ;;  %v1118_v62 = vld [vmem:[%s4151_s10 + $0x1a40] sm:$0xff] }
 0x1e6   : > { %2983 = vmatpush1.bf16.msra.mxu0 %v2982_v17  ;;  %v1050_v17 = vld [vmem:[%s4151_s10 + $0x1820] sm:$0xff] }
 0x1e7   : > { %3495 = vmatpush1.bf16.msra.mxu1 %v3494_v18  ;;  %2985 = vmatprep.subr.bf16.mxu0 %v2984_v19  ;;  %v1048_v18 = vld [vmem:[%s4151_s10 + $0x1810] sm:$0xff]  ;;  %v3516_v19 = vpack.c.bf16 %v1053_v12, %v1049_v11  ;;  %v3006_v26 = vpack.c.bf16 %v1050_v17, %v1046_v16  ;;  %v3534_v12 = vpack.c.bf16 %v1084_v6, %v1080_v4  ;;  %v1131_v4 = vld [vmem:[%s4151_s10 + $0x1aa8] sm:$0xff]  ;;  %v1133_v6 = vld [vmem:[%s4151_s10 + $0x1ab8] sm:$0xff] }
 0x1e8   : > { %3497 = vmatprep.subr.bf16.mxu1 %v3496_v23  ;;  %v1057_v23 = vld [vmem:[%s4151_s10 + $0x1858] sm:$0xff]  ;;  %v3518_v27 = vpack.c.bf16 %v1052_v20, %v1048_v18  ;;  %v1088_v16 = vld [vmem:[%s4151_s10 + $0x1950] sm:$0xff]  ;;  %v3536_v17 = vpack.c.bf16 %v1093_v10, %v1089_v9  ;;  %v1099_v20 = vld [vmem:[%s4151_s10 + $0x19a8] sm:$0xff] }
 0x1e9   : > { %v3520_v32 = vpack.c.bf16 %v1061_v24, %v1057_v23  ;;  %v1092_v18 = vld [vmem:[%s4151_s10 + $0x1970] sm:$0xff]  ;;  %v1126_v10 = vld [vmem:[%s4151_s10 + $0x1a80] sm:$0xff] }
 0x1ea   : > { %2987 = vmatpush1.bf16.msra.mxu0 %v2986_v29  ;;  %v1054_v29 = vld [vmem:[%s4151_s10 + $0x1840] sm:$0xff]  ;;  %v3538_v24 = vpack.c.bf16 %v1092_v18, %v1088_v16  ;;  %v1139_v16 = vld [vmem:[%s4151_s10 + $0x1ae8] sm:$0xff]  ;;  %v1141_v18 = vld [vmem:[%s4151_s10 + $0x1af8] sm:$0xff] }
 0x1eb   : > { %3499 = vmatpush1.bf16.msra.mxu1 %v3498_v30  ;;  %2989 = vmatprep.subr.bf16.mxu0 %v2988_v31  ;;  %v1058_v30 = vld [vmem:[%s4151_s10 + $0x1860] sm:$0xff]  ;;  %v1056_v31 = vld [vmem:[%s4151_s10 + $0x1850] sm:$0xff] }
 0x1ec   : > { %3501 = vmatprep.subr.bf16.mxu1 %v3500_v35  ;;  %v1067_v35 = vld [vmem:[%s4151_s10 + $0x18a8] sm:$0xff]  ;;  %v3010_v39 = vpack.c.bf16 %v1058_v30, %v1054_v29  ;;  %v3522_v40 = vpack.c.bf16 %v1060_v33, %v1056_v31  ;;  %v3540_v29 = vpack.c.bf16 %v1101_v22, %v1097_v21  ;;  %v1100_v30 = vld [vmem:[%s4151_s10 + $0x19b0] sm:$0xff]  ;;  %v1105_v33 = vld [vmem:[%s4151_s10 + $0x19d8] sm:$0xff] }
 0x1ed   : > { %v1103_v31 = vld [vmem:[%s4151_s10 + $0x19c8] sm:$0xff]  ;;  %v1134_v22 = vld [vmem:[%s4151_s10 + $0x1ac0] sm:$0xff] }
 0x1ee   : > { %2991 = vmatpush1.bf16.msra.mxu0 %v2990_v41  ;;  %v3012_v41 = vpack.c.bf16 %v1067_v35, %v1063_v34  ;;  %v1109_v34 = vld [vmem:[%s4151_s10 + $0x19f8] sm:$0xff] }
 0x1ef   : > { %3503 = vmatpush1.bf16.msra.mxu1 %v3502_v42  ;;  %2993 = vmatprep.subr.bf16.mxu0 %v2992_v43  ;;  %v1062_v42 = vld [vmem:[%s4151_s10 + $0x1880] sm:$0xff] }
 0x1f0   : > { %3505 = vmatprep.subr.bf16.mxu1 %v3504_v47  ;;  %v1066_v43 = vld [vmem:[%s4151_s10 + $0x18a0] sm:$0xff]  ;;  %v1071_v47 = vld [vmem:[%s4151_s10 + $0x18c8] sm:$0xff] }
 0x1f1   : > { %v3014_v51 = vpack.c.bf16 %v1066_v43, %v1062_v42  ;;  %v1108_v42 = vld [vmem:[%s4151_s10 + $0x19f0] sm:$0xff]  ;;  %v1111_v43 = vld [vmem:[%s4151_s10 + $0x1a08] sm:$0xff] }
 0x1f2   : > { %2995 = vmatpush1.bf16.msra.mxu0 %v2994_v53  ;;  %v3016_v53 = vpack.c.bf16 %v1075_v48, %v1071_v47  ;;  %v3036_v49 = vpack.c.bf16 %v1115_v44, %v1111_v43 }
 0x1f3   : > { %3507 = vmatpush1.bf16.msra.mxu1 %v3506_v54  ;;  %2997 = vmatprep.subr.bf16.mxu0 %v2996_v55  ;;  %v1070_v54 = vld [vmem:[%s4151_s10 + $0x18c0] sm:$0xff] }
 0x1f4   : > { %3509 = vmatprep.subr.bf16.mxu1 %v3508_v59  ;;  %v1074_v55 = vld [vmem:[%s4151_s10 + $0x18e0] sm:$0xff]  ;;  %v1079_v59 = vld [vmem:[%s4151_s10 + $0x1908] sm:$0xff] }
 0x1f5   : > { %v3018_v63 = vpack.c.bf16 %v1074_v55, %v1070_v54  ;;  %v1116_v54 = vld [vmem:[%s4151_s10 + $0x1a30] sm:$0xff]  ;;  %v1119_v55 = vld [vmem:[%s4151_s10 + $0x1a48] sm:$0xff] }
 0x1f6   : > { %2999 = vmatpush1.bf16.msra.mxu0 %v2998_v1  ;;  %v3020_v1 = vpack.c.bf16 %v1083_v60, %v1079_v59  ;;  %v3040_v61 = vpack.c.bf16 %v1123_v56, %v1119_v55 }
 0x1f7   : > { %3511 = vmatpush1.bf16.msra.mxu1 %v3510_v2  ;;  %3001 = vmatprep.subr.bf16.mxu0 %v3000_v3  ;;  %v1078_v2 = vld [vmem:[%s4151_s10 + $0x1900] sm:$0xff] }
 0x1f8   : > { %3513 = vmatprep.subr.bf16.mxu1 %v3512_v7  ;;  %v1082_v3 = vld [vmem:[%s4151_s10 + $0x1920] sm:$0xff]  ;;  %v1087_v7 = vld [vmem:[%s4151_s10 + $0x1948] sm:$0xff] }
 0x1f9   : > { %v3022_v11 = vpack.c.bf16 %v1082_v3, %v1078_v2  ;;  %v1124_v2 = vld [vmem:[%s4151_s10 + $0x1a70] sm:$0xff]  ;;  %v1127_v3 = vld [vmem:[%s4151_s10 + $0x1a88] sm:$0xff] }
 0x1fa   : > { %3003 = vmatpush1.bf16.msra.mxu0 %v3002_v13  ;;  %v3024_v13 = vpack.c.bf16 %v1091_v8, %v1087_v7  ;;  %v3044_v9 = vpack.c.bf16 %v1131_v4, %v1127_v3 }
 0x1fb   : > { %3515 = vmatpush1.bf16.msra.mxu1 %v3514_v14  ;;  %3005 = vmatprep.subr.bf16.mxu0 %v3004_v15  ;;  %v1086_v14 = vld [vmem:[%s4151_s10 + $0x1940] sm:$0xff] }
 0x1fc   : > { %3517 = vmatprep.subr.bf16.mxu1 %v3516_v19  ;;  %v1090_v15 = vld [vmem:[%s4151_s10 + $0x1960] sm:$0xff]  ;;  %v1095_v19 = vld [vmem:[%s4151_s10 + $0x1988] sm:$0xff] }
 0x1fd   : > { %1744 = vmatmul.mubr.f32.vlgmr.msra.gmra.mrb[0].mxu0 %v272_v25  ;;  %v3026_v23 = vpack.c.bf16 %v1090_v15, %v1086_v14  ;;  %v1132_v14 = vld [vmem:[%s4151_s10 + $0x1ab0] sm:$0xff]  ;;  %v1135_v15 = vld [vmem:[%s4151_s10 + $0x1ac8] sm:$0xff] }
 0x1fe   : > { %3007 = vmatpush1.bf16.msra.mxu0 %v3006_v26  ;;  %2312 = vmatmul.mubr.f32.vlgmr.msra.gmra.mrb[0].mxu1 %v272_v25  ;;  %v3028_v25 = vpack.c.bf16 %v1099_v20, %v1095_v19  ;;  %v1094_v26 = vld [vmem:[%s4151_s10 + $0x1980] sm:$0xff]  ;;  %v3048_v21 = vpack.c.bf16 %v1139_v16, %v1135_v15 }
 0x1ff   : > { %3519 = vmatpush1.bf16.msra.mxu1 %v3518_v27  ;;  %3009 = vmatprep.subr.bf16.mxu0 %v3008_v28  ;;  %v1098_v27 = vld [vmem:[%s4151_s10 + $0x19a0] sm:$0xff]  ;;  %v1096_v28 = vld [vmem:[%s4151_s10 + $0x1990] sm:$0xff] }
 0x200   : > { %3521 = vmatprep.subr.bf16.mxu1 %v3520_v32  ;;  %1814 = vmatprep.mubr.f32.mxu0 %v275_v38  ;;  %v1107_v32 = vld [vmem:[%s4151_s10 + $0x19e8] sm:$0xff]  ;;  %v3030_v35 = vpack.c.bf16 %v1098_v27, %v1094_v26  ;;  %v3542_v36 = vpack.c.bf16 %v1100_v30, %v1096_v28  ;;  %v1140_v26 = vld [vmem:[%s4151_s10 + $0x1af0] sm:$0xff]  ;;  %v1149_v30 = vld [vmem:[%s4151_s10 + $0x1b38] sm:$0xff] }
 0x201   : > { %2382 = vmatprep.mubr.f32.mxu1 %v275_v38  ;;  %v3032_v37 = vpack.c.bf16 %v1107_v32, %v1103_v31  ;;  %v1102_v38 = vld [vmem:[%s4151_s10 + $0x19c0] sm:$0xff]  ;;  %v1143_v27 = vld [vmem:[%s4151_s10 + $0x1b08] sm:$0xff] }
 0x202   : > { %3011 = vmatpush1.bf16.msra.mxu0 %v3010_v39  ;;  %v1106_v39 = vld [vmem:[%s4151_s10 + $0x19e0] sm:$0xff]  ;;  %v1147_v28 = vld [vmem:[%s4151_s10 + $0x1b28] sm:$0xff] }
 0x203   : > { %3523 = vmatpush1.bf16.msra.mxu1 %v3522_v40  ;;  %3013 = vmatprep.subr.bf16.mxu0 %v3012_v41  ;;  %v1104_v40 = vld [vmem:[%s4151_s10 + $0x19d0] sm:$0xff]  ;;  %v3544_v41 = vpack.c.bf16 %v1109_v34, %v1105_v33  ;;  %v3034_v47 = vpack.c.bf16 %v1106_v39, %v1102_v38  ;;  %v3052_v33 = vpack.c.bf16 %v1147_v28, %v1143_v27  ;;  %v1142_v34 = vld [vmem:[%s4151_s10 + $0x1b00] sm:$0xff]  ;;  %v1151_v39 = vld [vmem:[%s4151_s10 + $0x1b48] sm:$0xff] }
 0x204   : > { %3525 = vmatprep.subr.bf16.mxu1 %v3524_v45  ;;  %v1113_v45 = vld [vmem:[%s4151_s10 + $0x1a18] sm:$0xff]  ;;  %v3546_v48 = vpack.c.bf16 %v1108_v42, %v1104_v40  ;;  %v1148_v38 = vld [vmem:[%s4151_s10 + $0x1b30] sm:$0xff]  ;;  %v1155_v40 = vld [vmem:[%s4151_s10 + $0x1b68] sm:$0xff] }
 0x205   : > { %v1157_v42 = vld [vmem:[%s4151_s10 + $0x1b78] sm:$0xff]  ;;  %v274_v27 = vld [vmem:[#allocation2 + $0x60] sm:$0xff] }
 0x206   : > { %3015 = vmatpush1.bf16.msra.mxu0 %v3014_v51  ;;  %v1114_v51 = vld [vmem:[%s4151_s10 + $0x1a20] sm:$0xff] }
 0x207   : > { %3527 = vmatpush1.bf16.msra.mxu1 %v3526_v52  ;;  %3017 = vmatprep.subr.bf16.mxu0 %v3016_v53  ;;  %v1112_v52 = vld [vmem:[%s4151_s10 + $0x1a10] sm:$0xff]  ;;  %v3548_v53 = vpack.c.bf16 %v1117_v46, %v1113_v45  ;;  %v3038_v59 = vpack.c.bf16 %v1114_v51, %v1110_v50  ;;  %v3056_v45 = vpack.c.bf16 %v1155_v40, %v1151_v39  ;;  %v1150_v46 = vld [vmem:[%s4151_s10 + $0x1b40] sm:$0xff]  ;;  %v1159_v51 = vld [vmem:[%s4151_s10 + $0x1b88] sm:$0xff] }
 0x208   : > { %3529 = vmatprep.subr.bf16.mxu1 %v3528_v57  ;;  %v1121_v57 = vld [vmem:[%s4151_s10 + $0x1a58] sm:$0xff]  ;;  %v3550_v60 = vpack.c.bf16 %v1116_v54, %v1112_v52  ;;  %v1156_v50 = vld [vmem:[%s4151_s10 + $0x1b70] sm:$0xff]  ;;  %v1163_v52 = vld [vmem:[%s4151_s10 + $0x1ba8] sm:$0xff] }
 0x209   : > { %v1165_v54 = vld [vmem:[%s4151_s10 + $0x1bb8] sm:$0xff] }
 0x20a   : > { %3019 = vmatpush1.bf16.msra.mxu0 %v3018_v63  ;;  %v1122_v63 = vld [vmem:[%s4151_s10 + $0x1a60] sm:$0xff]  ;;  %v1197_v39 = vld [vmem:[%s4151_s10 + $0x1cb8] sm:$0xff] }
 0x20b   : > { %3531 = vmatpush1.bf16.msra.mxu1 %v3530_v0  ;;  %3021 = vmatprep.subr.bf16.mxu0 %v3020_v1  ;;  %v1120_v0 = vld [vmem:[%s4151_s10 + $0x1a50] sm:$0xff]  ;;  %v3552_v1 = vpack.c.bf16 %v1125_v58, %v1121_v57  ;;  %v3042_v7 = vpack.c.bf16 %v1122_v63, %v1118_v62  ;;  %v3060_v57 = vpack.c.bf16 %v1163_v52, %v1159_v51  ;;  %v1158_v58 = vld [vmem:[%s4151_s10 + $0x1b80] sm:$0xff]  ;;  %v1167_v63 = vld [vmem:[%s4151_s10 + $0x1bc8] sm:$0xff] }
 0x20c   : > { %3533 = vmatprep.subr.bf16.mxu1 %v3532_v5  ;;  %v1129_v5 = vld [vmem:[%s4151_s10 + $0x1a98] sm:$0xff]  ;;  %v3554_v8 = vpack.c.bf16 %v1124_v2, %v1120_v0  ;;  %v1164_v62 = vld [vmem:[%s4151_s10 + $0x1bb0] sm:$0xff]  ;;  %v1171_v0 = vld [vmem:[%s4151_s10 + $0x1be8] sm:$0xff] }
 0x20d   : > { %v1173_v2 = vld [vmem:[%s4151_s10 + $0x1bf8] sm:$0xff] }
 0x20e   : > { %3023 = vmatpush1.bf16.msra.mxu0 %v3022_v11  ;;  %v1130_v11 = vld [vmem:[%s4151_s10 + $0x1aa0] sm:$0xff]  ;;  %v277_v40 = vld [vmem:[#allocation2 + $0x78] sm:$0xff] }
 0x20f   : > { %3535 = vmatpush1.bf16.msra.mxu1 %v3534_v12  ;;  %3025 = vmatprep.subr.bf16.mxu0 %v3024_v13  ;;  %v1128_v12 = vld [vmem:[%s4151_s10 + $0x1a90] sm:$0xff]  ;;  %v3556_v13 = vpack.c.bf16 %v1133_v6, %v1129_v5  ;;  %v3046_v19 = vpack.c.bf16 %v1130_v11, %v1126_v10  ;;  %v3064_v5 = vpack.c.bf16 %v1171_v0, %v1167_v63  ;;  %v1166_v6 = vld [vmem:[%s4151_s10 + $0x1bc0] sm:$0xff]  ;;  %v1175_v11 = vld [vmem:[%s4151_s10 + $0x1c08] sm:$0xff] }
 0x210   : > { %3537 = vmatprep.subr.bf16.mxu1 %v3536_v17  ;;  %v1137_v17 = vld [vmem:[%s4151_s10 + $0x1ad8] sm:$0xff]  ;;  %v3558_v20 = vpack.c.bf16 %v1132_v14, %v1128_v12  ;;  %v1172_v10 = vld [vmem:[%s4151_s10 + $0x1bf0] sm:$0xff]  ;;  %v1179_v12 = vld [vmem:[%s4151_s10 + $0x1c28] sm:$0xff] }
 0x211   : > { %v1181_v14 = vld [vmem:[%s4151_s10 + $0x1c38] sm:$0xff] }
 0x212   : > { %3027 = vmatpush1.bf16.msra.mxu0 %v3026_v23  ;;  %v1138_v23 = vld [vmem:[%s4151_s10 + $0x1ae0] sm:$0xff]  ;;  %v1201_v51 = vld [vmem:[%s4151_s10 + $0x1cd8] sm:$0xff] }
 0x213   : > { %3539 = vmatpush1.bf16.msra.mxu1 %v3538_v24  ;;  %3029 = vmatprep.subr.bf16.mxu0 %v3028_v25  ;;  %v1136_v24 = vld [vmem:[%s4151_s10 + $0x1ad0] sm:$0xff]  ;;  %v3560_v25 = vpack.c.bf16 %v1141_v18, %v1137_v17  ;;  %v3050_v31 = vpack.c.bf16 %v1138_v23, %v1134_v22  ;;  %v3068_v17 = vpack.c.bf16 %v1179_v12, %v1175_v11  ;;  %v1174_v18 = vld [vmem:[%s4151_s10 + $0x1c00] sm:$0xff]  ;;  %v1183_v23 = vld [vmem:[%s4151_s10 + $0x1c48] sm:$0xff] }
 0x214   : > { %3541 = vmatprep.subr.bf16.mxu1 %v3540_v29  ;;  %v1145_v29 = vld [vmem:[%s4151_s10 + $0x1b18] sm:$0xff]  ;;  %v3562_v32 = vpack.c.bf16 %v1140_v26, %v1136_v24  ;;  %v1180_v22 = vld [vmem:[%s4151_s10 + $0x1c30] sm:$0xff]  ;;  %v1187_v24 = vld [vmem:[%s4151_s10 + $0x1c68] sm:$0xff] }
 0x215   : > { %v1189_v26 = vld [vmem:[%s4151_s10 + $0x1c78] sm:$0xff] }
 0x216   : > { %3031 = vmatpush1.bf16.msra.mxu0 %v3030_v35  ;;  %v1146_v35 = vld [vmem:[%s4151_s10 + $0x1b20] sm:$0xff]  ;;  %v1205_v52 = vld [vmem:[%s4151_s10 + $0x1cf8] sm:$0xff] }
 0x217   : > { %3543 = vmatpush1.bf16.msra.mxu1 %v3542_v36  ;;  %3033 = vmatprep.subr.bf16.mxu0 %v3032_v37  ;;  %v1144_v36 = vld [vmem:[%s4151_s10 + $0x1b10] sm:$0xff]  ;;  %v3564_v37 = vpack.c.bf16 %v1149_v30, %v1145_v29  ;;  %v3054_v43 = vpack.c.bf16 %v1146_v35, %v1142_v34  ;;  %v3072_v30 = vpack.c.bf16 %v1187_v24, %v1183_v23  ;;  %v1209_v63 = vld [vmem:[%s4151_s10 + $0x1d18] sm:$0xff] }
 0x218   : > { %3545 = vmatprep.subr.bf16.mxu1 %v3544_v41  ;;  %v1153_v41 = vld [vmem:[%s4151_s10 + $0x1b58] sm:$0xff]  ;;  %v3566_v44 = vpack.c.bf16 %v1148_v38, %v1144_v36  ;;  %v1188_v35 = vld [vmem:[%s4151_s10 + $0x1c70] sm:$0xff]  ;;  %v1191_v36 = vld [vmem:[%s4151_s10 + $0x1c88] sm:$0xff] }
 0x219   : > { %v1193_v38 = vld [vmem:[%s4151_s10 + $0x1c98] sm:$0xff] }
 0x21a   : > { %3035 = vmatpush1.bf16.msra.mxu0 %v3034_v47  ;;  %v1154_v47 = vld [vmem:[%s4151_s10 + $0x1b60] sm:$0xff]  ;;  %v1213_v0 = vld [vmem:[%s4151_s10 + $0x1d38] sm:$0xff] }
 0x21b   : > { %3547 = vmatpush1.bf16.msra.mxu1 %v3546_v48  ;;  %3037 = vmatprep.subr.bf16.mxu0 %v3036_v49  ;;  %v1152_v48 = vld [vmem:[%s4151_s10 + $0x1b50] sm:$0xff]  ;;  %v3568_v49 = vpack.c.bf16 %v1157_v42, %v1153_v41  ;;  %v3058_v55 = vpack.c.bf16 %v1154_v47, %v1150_v46  ;;  %v3588_v47 = vpack.c.bf16 %v1197_v39, %v1193_v38  ;;  %v1217_v11 = vld [vmem:[%s4151_s10 + $0x1d58] sm:$0xff] }
 0x21c   : > { %3549 = vmatprep.subr.bf16.mxu1 %v3548_v53  ;;  %v1161_v53 = vld [vmem:[%s4151_s10 + $0x1b98] sm:$0xff]  ;;  %v3570_v56 = vpack.c.bf16 %v1156_v50, %v1152_v48  ;;  %v1192_v46 = vld [vmem:[%s4151_s10 + $0x1c90] sm:$0xff]  ;;  %v1203_v50 = vld [vmem:[%s4151_s10 + $0x1ce8] sm:$0xff] }
 0x21d   : > { %v1196_v48 = vld [vmem:[%s4151_s10 + $0x1cb0] sm:$0xff]  ;;  %v1221_v12 = vld [vmem:[%s4151_s10 + $0x1d78] sm:$0xff] }
 0x21e   : > { %3039 = vmatpush1.bf16.msra.mxu0 %v3038_v59  ;;  %v1162_v59 = vld [vmem:[%s4151_s10 + $0x1ba0] sm:$0xff]  ;;  %v1225_v23 = vld [vmem:[%s4151_s10 + $0x1d98] sm:$0xff] }
 0x21f   : > { %3551 = vmatpush1.bf16.msra.mxu1 %v3550_v60  ;;  %3041 = vmatprep.subr.bf16.mxu0 %v3040_v61  ;;  %v1160_v60 = vld [vmem:[%s4151_s10 + $0x1b90] sm:$0xff]  ;;  %v3572_v61 = vpack.c.bf16 %v1165_v54, %v1161_v53  ;;  %v3062_v3 = vpack.c.bf16 %v1162_v59, %v1158_v58  ;;  %v3590_v54 = vpack.c.bf16 %v1196_v48, %v1192_v46  ;;  %v1229_v24 = vld [vmem:[%s4151_s10 + $0x1db8] sm:$0xff]  ;;  %v1243_v46 = vld [vmem:[%s4151_s10 + $0x1e28] sm:$0xff] }
 0x220   : > { %3553 = vmatprep.subr.bf16.mxu1 %v3552_v1  ;;  %v1169_v1 = vld [vmem:[%s4151_s10 + $0x1bd8] sm:$0xff]  ;;  %v3574_v4 = vpack.c.bf16 %v1164_v62, %v1160_v60  ;;  %v1200_v58 = vld [vmem:[%s4151_s10 + $0x1cd0] sm:$0xff]  ;;  %v3592_v59 = vpack.c.bf16 %v1205_v52, %v1201_v51  ;;  %v1211_v62 = vld [vmem:[%s4151_s10 + $0x1d28] sm:$0xff] }
 0x221   : > { %v1204_v60 = vld [vmem:[%s4151_s10 + $0x1cf0] sm:$0xff]  ;;  %v1245_v48 = vld [vmem:[%s4151_s10 + $0x1e38] sm:$0xff]  ;;  %v1238_v52 = vld [vmem:[%s4151_s10 + $0x1e00] sm:$0xff] }
 0x222   : > { %3043 = vmatpush1.bf16.msra.mxu0 %v3042_v7  ;;  %v1170_v7 = vld [vmem:[%s4151_s10 + $0x1be0] sm:$0xff] }
 0x223   : > { %3555 = vmatpush1.bf16.msra.mxu1 %v3554_v8  ;;  %3045 = vmatprep.subr.bf16.mxu0 %v3044_v9  ;;  %v1168_v8 = vld [vmem:[%s4151_s10 + $0x1bd0] sm:$0xff]  ;;  %v3576_v9 = vpack.c.bf16 %v1173_v2, %v1169_v1  ;;  %v3066_v15 = vpack.c.bf16 %v1170_v7, %v1166_v6  ;;  %v3594_v2 = vpack.c.bf16 %v1204_v60, %v1200_v58  ;;  %v1251_v58 = vld [vmem:[%s4151_s10 + $0x1e68] sm:$0xff]  ;;  %v1253_v60 = vld [vmem:[%s4151_s10 + $0x1e78] sm:$0xff] }
 0x224   : > { %3557 = vmatprep.subr.bf16.mxu1 %v3556_v13  ;;  %v1177_v13 = vld [vmem:[%s4151_s10 + $0x1c18] sm:$0xff]  ;;  %v3578_v16 = vpack.c.bf16 %v1172_v10, %v1168_v8  ;;  %v1208_v6 = vld [vmem:[%s4151_s10 + $0x1d10] sm:$0xff]  ;;  %v3596_v7 = vpack.c.bf16 %v1213_v0, %v1209_v63  ;;  %v1219_v10 = vld [vmem:[%s4151_s10 + $0x1d68] sm:$0xff] }
 0x225   : > { %v1212_v8 = vld [vmem:[%s4151_s10 + $0x1d30] sm:$0xff]  ;;  %v1246_v0 = vld [vmem:[%s4151_s10 + $0x1e40] sm:$0xff] }
 0x226   : > { %3047 = vmatpush1.bf16.msra.mxu0 %v3046_v19  ;;  %v1178_v19 = vld [vmem:[%s4151_s10 + $0x1c20] sm:$0xff] }
 0x227   : > { %3559 = vmatpush1.bf16.msra.mxu1 %v3558_v20  ;;  %3049 = vmatprep.subr.bf16.mxu0 %v3048_v21  ;;  %v1176_v20 = vld [vmem:[%s4151_s10 + $0x1c10] sm:$0xff]  ;;  %v3580_v21 = vpack.c.bf16 %v1181_v14, %v1177_v13  ;;  %v3070_v28 = vpack.c.bf16 %v1178_v19, %v1174_v18  ;;  %v3598_v14 = vpack.c.bf16 %v1212_v8, %v1208_v6  ;;  %v1259_v6 = vld [vmem:[%s4151_s10 + $0x1ea8] sm:$0xff]  ;;  %v1261_v8 = vld [vmem:[%s4151_s10 + $0x1eb8] sm:$0xff] }
 0x228   : > { %3561 = vmatprep.subr.bf16.mxu1 %v3560_v25  ;;  %v1185_v25 = vld [vmem:[%s4151_s10 + $0x1c58] sm:$0xff]  ;;  %v3582_v29 = vpack.c.bf16 %v1180_v22, %v1176_v20  ;;  %v1216_v18 = vld [vmem:[%s4151_s10 + $0x1d50] sm:$0xff]  ;;  %v3600_v19 = vpack.c.bf16 %v1221_v12, %v1217_v11  ;;  %v1227_v22 = vld [vmem:[%s4151_s10 + $0x1da8] sm:$0xff] }
 0x229   : > { %v3584_v34 = vpack.c.bf16 %v1189_v26, %v1185_v25  ;;  %v1220_v20 = vld [vmem:[%s4151_s10 + $0x1d70] sm:$0xff]  ;;  %v1254_v12 = vld [vmem:[%s4151_s10 + $0x1e80] sm:$0xff] }
 0x22a   : > { %3051 = vmatpush1.bf16.msra.mxu0 %v3050_v31  ;;  %v1182_v31 = vld [vmem:[%s4151_s10 + $0x1c40] sm:$0xff]  ;;  %v3602_v26 = vpack.c.bf16 %v1220_v20, %v1216_v18  ;;  %v1267_v18 = vld [vmem:[%s4151_s10 + $0x1ee8] sm:$0xff]  ;;  %v1269_v20 = vld [vmem:[%s4151_s10 + $0x1ef8] sm:$0xff] }
 0x22b   : > { %3563 = vmatpush1.bf16.msra.mxu1 %v3562_v32  ;;  %3053 = vmatprep.subr.bf16.mxu0 %v3052_v33  ;;  %v1186_v32 = vld [vmem:[%s4151_s10 + $0x1c60] sm:$0xff]  ;;  %v1184_v33 = vld [vmem:[%s4151_s10 + $0x1c50] sm:$0xff] }
 0x22c   : > { %3565 = vmatprep.subr.bf16.mxu1 %v3564_v37  ;;  %v1195_v37 = vld [vmem:[%s4151_s10 + $0x1ca8] sm:$0xff]  ;;  %v3074_v41 = vpack.c.bf16 %v1186_v32, %v1182_v31  ;;  %v3586_v42 = vpack.c.bf16 %v1188_v35, %v1184_v33  ;;  %v3604_v31 = vpack.c.bf16 %v1229_v24, %v1225_v23  ;;  %v1228_v32 = vld [vmem:[%s4151_s10 + $0x1db0] sm:$0xff]  ;;  %v1233_v35 = vld [vmem:[%s4151_s10 + $0x1dd8] sm:$0xff] }
 0x22d   : > { %v1231_v33 = vld [vmem:[%s4151_s10 + $0x1dc8] sm:$0xff]  ;;  %v1262_v24 = vld [vmem:[%s4151_s10 + $0x1ec0] sm:$0xff] }
 0x22e   : > { %3055 = vmatpush1.bf16.msra.mxu0 %v3054_v43  ;;  %v3076_v43 = vpack.c.bf16 %v1195_v37, %v1191_v36  ;;  %v1237_v36 = vld [vmem:[%s4151_s10 + $0x1df8] sm:$0xff] }
 0x22f   : > { %3567 = vmatpush1.bf16.msra.mxu1 %v3566_v44  ;;  %3057 = vmatprep.subr.bf16.mxu0 %v3056_v45  ;;  %v1190_v44 = vld [vmem:[%s4151_s10 + $0x1c80] sm:$0xff] }
 0x230   : > { %3569 = vmatprep.subr.bf16.mxu1 %v3568_v49  ;;  %v1194_v45 = vld [vmem:[%s4151_s10 + $0x1ca0] sm:$0xff]  ;;  %v1199_v49 = vld [vmem:[%s4151_s10 + $0x1cc8] sm:$0xff] }
 0x231   : > { %v3078_v53 = vpack.c.bf16 %v1194_v45, %v1190_v44  ;;  %v1236_v44 = vld [vmem:[%s4151_s10 + $0x1df0] sm:$0xff]  ;;  %v1239_v45 = vld [vmem:[%s4151_s10 + $0x1e08] sm:$0xff] }
 0x232   : > { %3059 = vmatpush1.bf16.msra.mxu0 %v3058_v55  ;;  %v3080_v55 = vpack.c.bf16 %v1203_v50, %v1199_v49  ;;  %v3100_v51 = vpack.c.bf16 %v1243_v46, %v1239_v45 }
 0x233   : > { %3571 = vmatpush1.bf16.msra.mxu1 %v3570_v56  ;;  %3061 = vmatprep.subr.bf16.mxu0 %v3060_v57  ;;  %v1198_v56 = vld [vmem:[%s4151_s10 + $0x1cc0] sm:$0xff] }
 0x234   : > { %3573 = vmatprep.subr.bf16.mxu1 %v3572_v61  ;;  %v1202_v57 = vld [vmem:[%s4151_s10 + $0x1ce0] sm:$0xff]  ;;  %v1207_v61 = vld [vmem:[%s4151_s10 + $0x1d08] sm:$0xff] }
 0x235   : > { %v3082_v1 = vpack.c.bf16 %v1202_v57, %v1198_v56  ;;  %v1244_v56 = vld [vmem:[%s4151_s10 + $0x1e30] sm:$0xff]  ;;  %v1247_v57 = vld [vmem:[%s4151_s10 + $0x1e48] sm:$0xff] }
 0x236   : > { %3063 = vmatpush1.bf16.msra.mxu0 %v3062_v3  ;;  %v3084_v3 = vpack.c.bf16 %v1211_v62, %v1207_v61  ;;  %v3104_v63 = vpack.c.bf16 %v1251_v58, %v1247_v57 }
 0x237   : > { %3575 = vmatpush1.bf16.msra.mxu1 %v3574_v4  ;;  %3065 = vmatprep.subr.bf16.mxu0 %v3064_v5  ;;  %v1206_v4 = vld [vmem:[%s4151_s10 + $0x1d00] sm:$0xff] }
 0x238   : > { %3577 = vmatprep.subr.bf16.mxu1 %v3576_v9  ;;  %v1210_v5 = vld [vmem:[%s4151_s10 + $0x1d20] sm:$0xff]  ;;  %v1215_v9 = vld [vmem:[%s4151_s10 + $0x1d48] sm:$0xff] }
 0x239   : > { %v3086_v13 = vpack.c.bf16 %v1210_v5, %v1206_v4  ;;  %v1252_v4 = vld [vmem:[%s4151_s10 + $0x1e70] sm:$0xff]  ;;  %v1255_v5 = vld [vmem:[%s4151_s10 + $0x1e88] sm:$0xff] }
 0x23a   : > { %3067 = vmatpush1.bf16.msra.mxu0 %v3066_v15  ;;  %v3088_v15 = vpack.c.bf16 %v1219_v10, %v1215_v9  ;;  %v3108_v11 = vpack.c.bf16 %v1259_v6, %v1255_v5 }
 0x23b   : > { %3579 = vmatpush1.bf16.msra.mxu1 %v3578_v16  ;;  %3069 = vmatprep.subr.bf16.mxu0 %v3068_v17  ;;  %v1214_v16 = vld [vmem:[%s4151_s10 + $0x1d40] sm:$0xff] }
 0x23c   : > { %3581 = vmatprep.subr.bf16.mxu1 %v3580_v21  ;;  %v1218_v17 = vld [vmem:[%s4151_s10 + $0x1d60] sm:$0xff]  ;;  %v1223_v21 = vld [vmem:[%s4151_s10 + $0x1d88] sm:$0xff] }
 0x23d   : > { %1815 = vmatmul.mubr.f32.vlgmr.msra.gmra.mrb[0].mxu0 %v274_v27  ;;  %v3090_v25 = vpack.c.bf16 %v1218_v17, %v1214_v16  ;;  %v1260_v16 = vld [vmem:[%s4151_s10 + $0x1eb0] sm:$0xff]  ;;  %v1263_v17 = vld [vmem:[%s4151_s10 + $0x1ec8] sm:$0xff] }
 0x23e   : > { %3071 = vmatpush1.bf16.msra.mxu0 %v3070_v28  ;;  %2383 = vmatmul.mubr.f32.vlgmr.msra.gmra.mrb[0].mxu1 %v274_v27  ;;  %v3092_v27 = vpack.c.bf16 %v1227_v22, %v1223_v21  ;;  %v1222_v28 = vld [vmem:[%s4151_s10 + $0x1d80] sm:$0xff]  ;;  %v3112_v23 = vpack.c.bf16 %v1267_v18, %v1263_v17 }
 0x23f   : > { %3583 = vmatpush1.bf16.msra.mxu1 %v3582_v29  ;;  %3073 = vmatprep.subr.bf16.mxu0 %v3072_v30  ;;  %v1226_v29 = vld [vmem:[%s4151_s10 + $0x1da0] sm:$0xff]  ;;  %v1224_v30 = vld [vmem:[%s4151_s10 + $0x1d90] sm:$0xff] }
 0x240   : > { %3585 = vmatprep.subr.bf16.mxu1 %v3584_v34  ;;  %1885 = vmatprep.mubr.f32.mxu0 %v277_v40  ;;  %v1235_v34 = vld [vmem:[%s4151_s10 + $0x1de8] sm:$0xff]  ;;  %v3094_v37 = vpack.c.bf16 %v1226_v29, %v1222_v28  ;;  %v3606_v38 = vpack.c.bf16 %v1228_v32, %v1224_v30  ;;  %v1268_v28 = vld [vmem:[%s4151_s10 + $0x1ef0] sm:$0xff]  ;;  %v1277_v32 = vld [vmem:[%s4151_s10 + $0x1f38] sm:$0xff] }
 0x241   : > { %2453 = vmatprep.mubr.f32.mxu1 %v277_v40  ;;  %v3096_v39 = vpack.c.bf16 %v1235_v34, %v1231_v33  ;;  %v1230_v40 = vld [vmem:[%s4151_s10 + $0x1dc0] sm:$0xff]  ;;  %v1271_v29 = vld [vmem:[%s4151_s10 + $0x1f08] sm:$0xff] }
 0x242   : > { %3075 = vmatpush1.bf16.msra.mxu0 %v3074_v41  ;;  %v1234_v41 = vld [vmem:[%s4151_s10 + $0x1de0] sm:$0xff]  ;;  %v1275_v30 = vld [vmem:[%s4151_s10 + $0x1f28] sm:$0xff] }
 0x243   : > { %3587 = vmatpush1.bf16.msra.mxu1 %v3586_v42  ;;  %3077 = vmatprep.subr.bf16.mxu0 %v3076_v43  ;;  %v1232_v42 = vld [vmem:[%s4151_s10 + $0x1dd0] sm:$0xff]  ;;  %v3608_v43 = vpack.c.bf16 %v1237_v36, %v1233_v35  ;;  %v3098_v49 = vpack.c.bf16 %v1234_v41, %v1230_v40  ;;  %v3116_v35 = vpack.c.bf16 %v1275_v30, %v1271_v29  ;;  %v1270_v36 = vld [vmem:[%s4151_s10 + $0x1f00] sm:$0xff]  ;;  %v1279_v41 = vld [vmem:[%s4151_s10 + $0x1f48] sm:$0xff] }
 0x244   : > { %3589 = vmatprep.subr.bf16.mxu1 %v3588_v47  ;;  %v1241_v47 = vld [vmem:[%s4151_s10 + $0x1e18] sm:$0xff]  ;;  %v3610_v50 = vpack.c.bf16 %v1236_v44, %v1232_v42  ;;  %v1276_v40 = vld [vmem:[%s4151_s10 + $0x1f30] sm:$0xff]  ;;  %v1283_v42 = vld [vmem:[%s4151_s10 + $0x1f68] sm:$0xff] }
 0x245   : > { %v1285_v44 = vld [vmem:[%s4151_s10 + $0x1f78] sm:$0xff] }
 0x246   : > { %3079 = vmatpush1.bf16.msra.mxu0 %v3078_v53  ;;  %v1242_v53 = vld [vmem:[%s4151_s10 + $0x1e20] sm:$0xff] }
 0x247   : > { %3591 = vmatpush1.bf16.msra.mxu1 %v3590_v54  ;;  %3081 = vmatprep.subr.bf16.mxu0 %v3080_v55  ;;  %v1240_v54 = vld [vmem:[%s4151_s10 + $0x1e10] sm:$0xff]  ;;  %v3612_v55 = vpack.c.bf16 %v1245_v48, %v1241_v47  ;;  %v3102_v61 = vpack.c.bf16 %v1242_v53, %v1238_v52  ;;  %v3120_v47 = vpack.c.bf16 %v1283_v42, %v1279_v41  ;;  %v1278_v48 = vld [vmem:[%s4151_s10 + $0x1f40] sm:$0xff]  ;;  %v1287_v53 = vld [vmem:[%s4151_s10 + $0x1f88] sm:$0xff] }
 0x248   : > { %3593 = vmatprep.subr.bf16.mxu1 %v3592_v59  ;;  %v1249_v59 = vld [vmem:[%s4151_s10 + $0x1e58] sm:$0xff]  ;;  %v3614_v62 = vpack.c.bf16 %v1244_v56, %v1240_v54  ;;  %v1284_v52 = vld [vmem:[%s4151_s10 + $0x1f70] sm:$0xff]  ;;  %v1291_v54 = vld [vmem:[%s4151_s10 + $0x1fa8] sm:$0xff] }
 0x249   : > { %v1293_v56 = vld [vmem:[%s4151_s10 + $0x1fb8] sm:$0xff] }
 0x24a   : > { %3083 = vmatpush1.bf16.msra.mxu0 %v3082_v1  ;;  %v1250_v1 = vld [vmem:[%s4151_s10 + $0x1e60] sm:$0xff] }
 0x24b   : > { %3595 = vmatpush1.bf16.msra.mxu1 %v3594_v2  ;;  %3085 = vmatprep.subr.bf16.mxu0 %v3084_v3  ;;  %v1248_v2 = vld [vmem:[%s4151_s10 + $0x1e50] sm:$0xff]  ;;  %v3616_v3 = vpack.c.bf16 %v1253_v60, %v1249_v59  ;;  %v3106_v9 = vpack.c.bf16 %v1250_v1, %v1246_v0  ;;  %v3124_v59 = vpack.c.bf16 %v1291_v54, %v1287_v53  ;;  %v1286_v60 = vld [vmem:[%s4151_s10 + $0x1f80] sm:$0xff]  ;;  %v1295_v1 = vld [vmem:[%s4151_s10 + $0x1fc8] sm:$0xff] }
 0x24c   : > { %3597 = vmatprep.subr.bf16.mxu1 %v3596_v7  ;;  %v1257_v7 = vld [vmem:[%s4151_s10 + $0x1e98] sm:$0xff]  ;;  %v3618_v10 = vpack.c.bf16 %v1252_v4, %v1248_v2  ;;  %v1292_v0 = vld [vmem:[%s4151_s10 + $0x1fb0] sm:$0xff]  ;;  %v1299_v2 = vld [vmem:[%s4151_s10 + $0x1fe8] sm:$0xff] }
 0x24d   : > { %v1301_v4 = vld [vmem:[%s4151_s10 + $0x1ff8] sm:$0xff] }
 0x24e   : > { %3087 = vmatpush1.bf16.msra.mxu0 %v3086_v13  ;;  %v1258_v13 = vld [vmem:[%s4151_s10 + $0x1ea0] sm:$0xff] }
 0x24f   : > { %3599 = vmatpush1.bf16.msra.mxu1 %v3598_v14  ;;  %3089 = vmatprep.subr.bf16.mxu0 %v3088_v15  ;;  %v1256_v14 = vld [vmem:[%s4151_s10 + $0x1e90] sm:$0xff]  ;;  %v3620_v15 = vpack.c.bf16 %v1261_v8, %v1257_v7  ;;  %v3110_v21 = vpack.c.bf16 %v1258_v13, %v1254_v12  ;;  %v3128_v7 = vpack.c.bf16 %v1299_v2, %v1295_v1  ;;  %v1294_v8 = vld [vmem:[%s4151_s10 + $0x1fc0] sm:$0xff] }
 0x250   : > { %3601 = vmatprep.subr.bf16.mxu1 %v3600_v19  ;;  %v1265_v19 = vld [vmem:[%s4151_s10 + $0x1ed8] sm:$0xff]  ;;  %v3622_v22 = vpack.c.bf16 %v1260_v16, %v1256_v14  ;;  %v1300_v12 = vld [vmem:[%s4151_s10 + $0x1ff0] sm:$0xff]  ;;  %v1304_v16 = vlaneseq }
 0x252   : > { %3091 = vmatpush1.bf16.msra.mxu0 %v3090_v25  ;;  %v1266_v25 = vld [vmem:[%s4151_s10 + $0x1ee0] sm:$0xff]  ;;  %v1305_v17 = vshrl.u32 %v1304_v16, 7 }
 0x253   : > { %3603 = vmatpush1.bf16.msra.mxu1 %v3602_v26  ;;  %3093 = vmatprep.subr.bf16.mxu0 %v3092_v27  ;;  %v1264_v26 = vld [vmem:[%s4151_s10 + $0x1ed0] sm:$0xff]  ;;  %v3624_v27 = vpack.c.bf16 %v1269_v20, %v1265_v19  ;;  %v3114_v33 = vpack.c.bf16 %v1266_v25, %v1262_v24  ;;  %v1302_v19 = vld [vmem:[%s231_s9] sm:$0xf] }
 0x254   : > { %3605 = vmatprep.subr.bf16.mxu1 %v3604_v31  ;;  %v1273_v31 = vld [vmem:[%s4151_s10 + $0x1f18] sm:$0xff]  ;;  %v3626_v34 = vpack.c.bf16 %v1268_v28, %v1264_v26  ;;  %v1306_v18 = vsub.s32 0, %v1305_v17  ;;  %v1314_v20 = vsub.s32 2, %v1305_v17 }
 0x256   : > { %3095 = vmatpush1.bf16.msra.mxu0 %v3094_v37  ;;  %v1274_v37 = vld [vmem:[%s4151_s10 + $0x1f20] sm:$0xff]  ;;  %v1315_v24 = vrot.slane %v1302_v19, %v1314_v20 }
 0x257   : > { %3607 = vmatpush1.bf16.msra.mxu1 %v3606_v38  ;;  %3097 = vmatprep.subr.bf16.mxu0 %v3096_v39  ;;  %v1272_v38 = vld [vmem:[%s4151_s10 + $0x1f10] sm:$0xff]  ;;  %v3628_v39 = vpack.c.bf16 %v1277_v32, %v1273_v31  ;;  %v3118_v45 = vpack.c.bf16 %v1274_v37, %v1270_v36 }
 0x258   : > { %3609 = vmatprep.subr.bf16.mxu1 %v3608_v43  ;;  %v1281_v43 = vld [vmem:[%s4151_s10 + $0x1f58] sm:$0xff]  ;;  %v3630_v46 = vpack.c.bf16 %v1276_v40, %v1272_v38 }
 0x25a   : > { %3099 = vmatpush1.bf16.msra.mxu0 %v3098_v49  ;;  %v1282_v49 = vld [vmem:[%s4151_s10 + $0x1f60] sm:$0xff] }
 0x25b   : > { %3611 = vmatpush1.bf16.msra.mxu1 %v3610_v50  ;;  %3101 = vmatprep.subr.bf16.mxu0 %v3100_v51  ;;  %v1280_v50 = vld [vmem:[%s4151_s10 + $0x1f50] sm:$0xff]  ;;  %v3632_v51 = vpack.c.bf16 %v1285_v44, %v1281_v43  ;;  %v3122_v57 = vpack.c.bf16 %v1282_v49, %v1278_v48 }
 0x25c   : > { %3613 = vmatprep.subr.bf16.mxu1 %v3612_v55  ;;  %v1289_v55 = vld [vmem:[%s4151_s10 + $0x1f98] sm:$0xff]  ;;  %v3634_v58 = vpack.c.bf16 %v1284_v52, %v1280_v50 }
 0x25e   : > { %3103 = vmatpush1.bf16.msra.mxu0 %v3102_v61  ;;  %v1290_v61 = vld [vmem:[%s4151_s10 + $0x1fa0] sm:$0xff] }
 0x25f   : > { %3615 = vmatpush1.bf16.msra.mxu1 %v3614_v62  ;;  %3105 = vmatprep.subr.bf16.mxu0 %v3104_v63  ;;  %v1288_v62 = vld [vmem:[%s4151_s10 + $0x1f90] sm:$0xff]  ;;  %v3636_v63 = vpack.c.bf16 %v1293_v56, %v1289_v55  ;;  %v3126_v5 = vpack.c.bf16 %v1290_v61, %v1286_v60 }
 0x260   : > { %3617 = vmatprep.subr.bf16.mxu1 %v3616_v3  ;;  %v1297_v3 = vld [vmem:[%s4151_s10 + $0x1fd8] sm:$0xff]  ;;  %v3638_v6 = vpack.c.bf16 %v1292_v0, %v1288_v62 }
 0x262   : > { %3107 = vmatpush1.bf16.msra.mxu0 %v3106_v9  ;;  %v1298_v9 = vld [vmem:[%s4151_s10 + $0x1fe0] sm:$0xff] }
 0x263   : > { %3619 = vmatpush1.bf16.msra.mxu1 %v3618_v10  ;;  %3109 = vmatprep.subr.bf16.mxu0 %v3108_v11  ;;  %v3640_v10 = vpack.c.bf16 %v1301_v4, %v1297_v3  ;;  %v1296_v11 = vld [vmem:[%s4151_s10 + $0x1fd0] sm:$0xff]  ;;  %v3130_v13 = vpack.c.bf16 %v1298_v9, %v1294_v8 }
 0x264   : > { %3621 = vmatprep.subr.bf16.mxu1 %v3620_v15  ;;  %v3642_v14 = vpack.c.bf16 %v1300_v12, %v1296_v11  ;;  %v276_v15 = vld [vmem:[#allocation2 + $0x70] sm:$0xff] }
 0x266   : > { %3111 = vmatpush1.bf16.msra.mxu0 %v3110_v21  ;;  %v1310_v21 = vsub.s32 1, %v1305_v17 }
 0x267   : > { %3623 = vmatpush1.bf16.msra.mxu1 %v3622_v22  ;;  %3113 = vmatprep.subr.bf16.mxu0 %v3112_v23  ;;  %v1318_v22 = vsub.s32 3, %v1305_v17  ;;  %v1307_v23 = vrot.slane %v1302_v19, %v1306_v18 }
 0x268   : > { %3625 = vmatprep.subr.bf16.mxu1 %v3624_v27  ;;  %v1311_v25 = vrot.slane %v1302_v19, %v1310_v21 }
 0x269   : > { %v1319_v26 = vrot.slane %v1302_v19, %v1318_v22 }
 0x26a   : > { %3115 = vmatpush1.bf16.msra.mxu0 %v3114_v33 }
 0x26b   : > { %3627 = vmatpush1.bf16.msra.mxu1 %v3626_v34  ;;  %3117 = vmatprep.subr.bf16.mxu0 %v3116_v35 }
 0x26c   : > { %3629 = vmatprep.subr.bf16.mxu1 %v3628_v39 }
 0x26e   : > { %3119 = vmatpush1.bf16.msra.mxu0 %v3118_v45 }
 0x26f   : > { %3631 = vmatpush1.bf16.msra.mxu1 %v3630_v46  ;;  %3121 = vmatprep.subr.bf16.mxu0 %v3120_v47 }
 0x270   : > { %3633 = vmatprep.subr.bf16.mxu1 %v3632_v51 }
 0x272   : > { %3123 = vmatpush1.bf16.msra.mxu0 %v3122_v57 }
 0x273   : > { %3635 = vmatpush1.bf16.msra.mxu1 %v3634_v58  ;;  %3125 = vmatprep.subr.bf16.mxu0 %v3124_v59 }
 0x274   : > { %3637 = vmatprep.subr.bf16.mxu1 %v3636_v63 }
 0x276   : > { %3127 = vmatpush1.bf16.msra.mxu0 %v3126_v5 }
 0x277   : > { %3639 = vmatpush1.bf16.msra.mxu1 %v3638_v6  ;;  %3129 = vmatprep.subr.bf16.mxu0 %v3128_v7 }
 0x278   : > { %3641 = vmatprep.subr.bf16.mxu1 %v3640_v10 }
 0x27a   : > { %3131 = vmatpush1.bf16.msra.mxu0 %v3130_v13 }
 0x27b   : > { %3643 = vmatpush1.bf16.msra.mxu1 %v3642_v14 }
 0x27d   : > { %1886 = vmatmul.mubr.f32.vlgmr.msra.gmra.mrb[0].mxu0 %v276_v15 }
 0x27e   : > { %2454 = vmatmul.mubr.f32.vlgmr.msra.gmra.mrb[0].mxu1 %v276_v15 }
 0x350   : > { %v1887_v27 = vpop.f32.mrb[0].mxu0 }
 0x351   : > { %v3644_v28 = vadd.f32 %v1887_v27, %v1307_v23  ;;  %v2455_v29 = vpop.f32.mrb[0].mxu1  ;;  %v1889_v30 = vpop.f32.mrb[1].mxu0 }
 0x352   : > { %v3646_v31 = vadd.f32 %v2455_v29, %v1315_v24  ;;  %v3645_v32 = vadd.f32 %v1889_v30, %v1311_v25  ;;  %v2457_v33 = vpop.f32.mrb[1].mxu1 }
 0x353   : > { %2460 = vst [vmem:[%s258_s27] sm:$0xff] %v3644_v28  ;;  %v3647_v34 = vadd.f32 %v2457_v33, %v1319_v26 }
 0x354   : > { %2462 = vst [vmem:[%s258_s27 + $0x10] sm:$0xff] %v3646_v31  ;;  %2461 = vst [vmem:[%s258_s27 + $0x8] sm:$0xff] %v3645_v32 }
 0x355   : > { %2463 = vst [vmem:[%s258_s27 + $0x18] sm:$0xff] %v3647_v34 }
 0x356   : > { %3858 = shalt.err (!%p3855_p2)
}
 0x357   : > { %s3859_s23 = scalar_lea.hbm %s5187_s8, 512  ;;  %s3863_s6 = scalar_lea.hbm %s5238_s3, 4096 }
 0x358   : > { %p3860_p5 = scmp.ne.s32.totalorder %s5187_s8, %s3859_s23  ;;  %p3864_p7 = scmp.lt.u32.totalorder %s5187_s8, %s5238_s3 }
 0x359   : > { %p3865_p4 = scmp.lt.u32.totalorder %s3863_s6, %s3859_s23  ;;  %p3867_p9 = scmp.lt.u32.totalorder %s3859_s23, %s5187_s8 }
 0x35a   : > { %p3861_p11 = pnand %p3860_p5, %p5257_p12 }
 0x35b   : > { %p3866_p0 = por %p3865_p4, %p3864_p7 }
 0x35c   : > { %p3862_p8 = pneg %p3861_p11 }
 0x35d   : > { %p3868_p13 = por %p3867_p9, %p3866_p0 }
 0x35f   : > { %p3869_p6 = pnand %p3868_p13, %p3862_p8 }
 0x361   : > { %3872 = shalt.err (!%p3869_p6)
}
 0x362   : > { %3684 = dma.vmem_to_hbm [thread:$0]  (%p5257_p12), %s5189_s19, 512, %s5187_s8, %s2465_s15  }
 0x363 PF: > { %p3704_p3 = scmp.ge.s32.totalorder %s3931_s17, 2  ;;  %s2493_s7 = sand.u32 1, %s3911_s12  }
 0x364   : > { %p5258_p1 = scmp.ne.s32.totalorder %s5249_s4, 0  ;;  %s2494_s9 = scalar_lea.sflag [#allocation4], %s2493_s7 }
 0x366   : > { %p3698_p10 = pnand %p3704_p3, %p5258_p1 }
 0x368   : > { %3906 = dma.done.wait (!%p3698_p10), %s2494_s9, 512  }
 0x369   : > { %3908 = vsyncadd (!%p3698_p10), %s2494_s9, 4294966784  ;;  %s20_s17 = sadd.s32 1, %s3931_s17   ;;  %s5259_s12 = smov %s3915_s13 }
 0x36a   : > { %p17_p2 = scmp.ge.s32.totalorder %s20_s17, 10   ;;  %s5260_s13 = smov %s3919_s14 }
 0x36b   : > { %s5261_s14 = smov %s4007_s24  ;;  %s5262_s15 = smov %s3927_s16 }
 0x36c   : > { %s5263_s16 = smov %s5265_s18  ;;  %19 = sbr.rel (!%p17_p2) target bundleno = 9 (0x9), region = 94 }
 0x373   :  { %2499 = vsyncpa [#allocation3], 1 }
 0x374   :  { %2501 = vsyncpa [#allocation3 + $0x1], 1 }
 0x375   :  { %2502 = vsyncpa [#allocation6], 1 }
 0x376   :  { %2504 = vsyncpa [#allocation6 + $0x1], 1 }
 0x377   :  { %2505 = vsyncpa [#allocation4], 1 }
 0x378   :  { %2507 = vsyncpa [#allocation4 + $0x1], 1 }

</bundles_post_ra>
